<compile_context>
chip_gen: v7x
topology: tpu7x:2x2x1
jax: 0.10.0
libtpu: 0.0.40
codegen_flags: <defaults>
</compile_context>

<pallas_src>
import functools

import jax
import jax.numpy as jnp
from jax.experimental import pallas as pl
from jax.experimental.pallas import tpu as pltpu

LANE = 128                      # feature dims padded to multiples of this
DEF_TM = 512                    # row tile (output rows / A rows)
DEF_TK = 2048                   # reduction tile along the node axis (A cols)
RESIDENT_ZL_BYTES = 8 * 1024 * 1024   # keep zl VMEM-resident up to this size


def _round_up(x, m):
    return (x + m - 1) // m * m


def _pad_to(arr, shape):
    return jnp.pad(arr, [(0, s - d) for d, s in zip(arr.shape, shape)])


# ---------------------------------------------------------------------------
# Kernel 1: per-row-tile feature transform (two MXU dots, no wide f32 temp)
#   zl = x @ W_l          (feeds the aggregation matmul A @ zl)
#   zr = x @ W_r + b      (root/self term; bias folded in exactly once)
# ---------------------------------------------------------------------------
def transform_kernel(x_ref, wl_ref, wr_ref, b_ref, zl_ref, zr_ref):
    x = x_ref[...]
    zl_ref[...] = jnp.dot(x, wl_ref[...],
                          preferred_element_type=jnp.float32).astype(zl_ref.dtype)
    zr_ref[...] = (jnp.dot(x, wr_ref[...],
                           preferred_element_type=jnp.float32)
                   + b_ref[...]).astype(zr_ref.dtype)


# ---------------------------------------------------------------------------
# Kernel 2: tiled mean-aggregation + root add (+ optional fused ReLU)
#   out[i] = (sum_k A_cnt[i, k] @ zl[k]) * deg_inv[i]  +  zr[i]
# A_cnt is int8 edge counts (cast to bf16 in-register, exact); deg_inv is the
# exact f32 per-row 1/deg applied once at writeback.
# grid = (row tiles "parallel", reduction tiles "arbitrary")
# ---------------------------------------------------------------------------
def aggregate_kernel(a_ref, zl_ref, zr_ref, dinv_ref, o_ref, acc_ref,
                     *, relu, tk, zl_resident):
    k = pl.program_id(1)

    @pl.when(k == 0)
    def _():
        acc_ref[...] = jnp.zeros_like(acc_ref)

    if zl_resident:
        # zl lives fully in VMEM; slice the current reduction window.
        zl = zl_ref[pl.ds(pl.multiple_of(k * tk, tk), tk), :]
    else:
        zl = zl_ref[...]

    a = a_ref[...].astype(jnp.bfloat16)   # small int counts: exact in bf16
    acc_ref[...] += jnp.dot(a, zl, preferred_element_type=jnp.float32)

    @pl.when(k == pl.num_programs(1) - 1)
    def _():
        out = acc_ref[...] * dinv_ref[...] + zr_ref[...].astype(jnp.float32)
        if relu:
            out = jnp.maximum(out, 0.0)
        o_ref[...] = out.astype(o_ref.dtype)


def _transform_call(x, w_l, w_r, b, *, tm):
    n_p, f_in_p = x.shape
    f_out_p = w_l.shape[1]
    return pl.pallas_call(
        transform_kernel,
        out_shape=(jax.ShapeDtypeStruct((n_p, f_out_p), jnp.bfloat16),
                   jax.ShapeDtypeStruct((n_p, f_out_p), jnp.bfloat16)),
        grid_spec=pltpu.PrefetchScalarGridSpec(
            num_scalar_prefetch=0,
            grid=(n_p // tm,),
            in_specs=[
                pl.BlockSpec((tm, f_in_p), lambda i: (i, 0)),
                pl.BlockSpec((f_in_p, f_out_p), lambda i: (0, 0)),
                pl.BlockSpec((f_in_p, f_out_p), lambda i: (0, 0)),
                pl.BlockSpec((1, f_out_p), lambda i: (0, 0)),
            ],
            out_specs=(
                pl.BlockSpec((tm, f_out_p), lambda i: (i, 0)),
                pl.BlockSpec((tm, f_out_p), lambda i: (i, 0)),
            ),
        ),
        compiler_params=pltpu.CompilerParams(
            dimension_semantics=("parallel",)),
    )(x, w_l, w_r, b)


def _aggregate_call(a, zl, zr, deg_inv, *, relu, out_dtype, tm, tk):
    n_p = a.shape[0]
    f_p = zl.shape[1]

    zl_resident = (n_p * f_p * zl.dtype.itemsize) <= RESIDENT_ZL_BYTES
    if zl_resident:
        zl_spec = pl.BlockSpec((n_p, f_p), lambda i, k: (0, 0))
    else:
        zl_spec = pl.BlockSpec((tk, f_p), lambda i, k: (k, 0))

    # Explicit VMEM budget (double-buffered inputs/outputs + f32 accumulator),
    # with headroom, capped below v7x's 64 MiB physical VMEM.
    out_bytes = jnp.dtype(out_dtype).itemsize
    vmem_bytes = (2 * tm * tk * a.dtype.itemsize
                  + 2 * (n_p if zl_resident else tk) * f_p * 2
                  + 2 * tm * f_p * 2
                  + 2 * tm * 4
                  + 2 * tm * f_p * out_bytes
                  + tm * f_p * 4)
    vmem_limit = int(min(max(2 * vmem_bytes, 32 << 20), 48 << 20))

    kernel = functools.partial(aggregate_kernel, relu=relu, tk=tk,
                               zl_resident=zl_resident)
    return pl.pallas_call(
        kernel,
        out_shape=jax.ShapeDtypeStruct((n_p, f_p), out_dtype),
        grid_spec=pltpu.PrefetchScalarGridSpec(
            num_scalar_prefetch=0,
            grid=(n_p // tm, n_p // tk),
            in_specs=[
                pl.BlockSpec((tm, tk), lambda i, k: (i, k)),
                zl_spec,
                pl.BlockSpec((tm, f_p), lambda i, k: (i, 0)),
                pl.BlockSpec((tm, 1), lambda i, k: (i, 0)),
            ],
            out_specs=pl.BlockSpec((tm, f_p), lambda i, k: (i, 0)),
            scratch_shapes=[pltpu.VMEM((tm, f_p), jnp.float32)],
        ),
        compiler_params=pltpu.CompilerParams(
            dimension_semantics=("parallel", "arbitrary"),
            vmem_limit_bytes=vmem_limit),
    )(a, zl, zr, deg_inv)


def sage_layer(a, deg_inv, x, w_l, w_r, b, *, relu, out_dtype, tm, tk):
    zl, zr = _transform_call(x, w_l, w_r, b, tm=tm)
    return _aggregate_call(a, zl, zr, deg_inv, relu=relu, out_dtype=out_dtype,
                           tm=tm, tk=tk)


def build_adjacency_padded(edge_index, n_p):
    """Padded int8 edge-count adjacency (one O(E) scatter) + exact f32 1/deg."""
    src, dst = edge_index[0], edge_index[1]
    a = jnp.zeros((n_p, n_p), jnp.int8).at[dst, src].add(
        jnp.ones(src.shape, jnp.int8))
    deg = jnp.zeros((n_p,), jnp.float32).at[dst].add(1.0)
    deg_inv = jnp.where(deg > 0, 1.0 / jnp.maximum(deg, 1.0), 0.0)[:, None]
    return a, deg_inv


def gnn_encoder(x, edge_index, params, *, tm=DEF_TM, tk=DEF_TK):
    # tk a multiple of tm (single padded N) and tk >= 2*tm so the row-tile
    # ("parallel") grid axis is always >= 2 -> both v7x TensorCores get work.
    assert tk % tm == 0 and tk >= 2 * tm
    n, f_in = x.shape
    hidden = params["w1l"].shape[1]
    out_ch = params["w2l"].shape[1]

    n_p = _round_up(max(n, tk), tk)         # divisible by both tm and tk
    f_in_p = _round_up(f_in, LANE)
    h_p = _round_up(hidden, LANE)
    o_p = _round_up(out_ch, LANE)

    # --- plain-JAX glue: padded 0/1 int8 adjacency + exact per-row scale ---
    # TODO(synk): replace the dense N x N adjacency with a CSR/edge-list gather
    # kernel (PrefetchScalarGridSpec + scalar-prefetched neighbor offsets) so
    # the dominant traffic scales with E instead of N^2 on real sparse graphs.
    a, deg_inv = build_adjacency_padded(edge_index, n_p)

    xp = _pad_to(x, (n_p, f_in_p)).astype(jnp.bfloat16)
    w1l = _pad_to(params["w1l"], (f_in_p, h_p)).astype(jnp.bfloat16)
    w1r = _pad_to(params["w1r"], (f_in_p, h_p)).astype(jnp.bfloat16)
    b1 = _pad_to(params["b1"], (1, h_p)).astype(jnp.float32)
    w2l = _pad_to(params["w2l"], (h_p, o_p)).astype(jnp.bfloat16)
    w2r = _pad_to(params["w2r"], (h_p, o_p)).astype(jnp.bfloat16)
    b2 = _pad_to(params["b2"], (1, o_p)).astype(jnp.float32)

    # Layer 1: SAGEConv + ReLU; keep h in bf16 (feeds the next MXU matmuls).
    h = sage_layer(a, deg_inv, xp, w1l, w1r, b1, relu=True,
                   out_dtype=jnp.bfloat16, tm=tm, tk=tk)
    # Layer 2: SAGEConv; f32 output.
    out = sage_layer(a, deg_inv, h, w2l, w2r, b2, relu=False,
                     out_dtype=jnp.float32, tm=tm, tk=tk)
    return out[:n, :out_ch]


def init_params(key, in_channels, hidden_channels, out_channels):
    ks = jax.random.split(key, 4)

    def lin(k, fan_in, fan_out):
        bound = 1.0 / jnp.sqrt(jnp.float32(fan_in))
        return jax.random.uniform(k, (fan_in, fan_out), jnp.float32,
                                  -bound, bound)

    return {
        # lin_l (aggregated neighbors, has bias) and lin_r (root, no bias)
        "w1l": lin(ks[0], in_channels, hidden_channels),
        "w1r": lin(ks[1], in_channels, hidden_channels),
        "b1":  jnp.zeros((1, hidden_channels), jnp.float32),
        "w2l": lin(ks[2], hidden_channels, out_channels),
        "w2r": lin(ks[3], hidden_channels, out_channels),
        "b2":  jnp.zeros((1, out_channels), jnp.float32),
    }


def reference_forward(x, edge_index, params):
    """Pure-JAX f32 reference of the same semantics (dense normalized A)."""
    n = x.shape[0]
    src, dst = edge_index[0], edge_index[1]
    a = jnp.zeros((n, n), jnp.float32).at[dst, src].add(1.0)
    deg = a.sum(axis=1, keepdims=True)
    a = jnp.where(deg > 0, a / jnp.maximum(deg, 1.0), 0.0)
    h = a @ x @ params["w1l"] + x @ params["w1r"] + params["b1"]
    h = jnp.maximum(h, 0.0)
    return a @ h @ params["w2l"] + h @ params["w2r"] + params["b2"]


if __name__ == "__main__":
    key = jax.random.PRNGKey(0)
    k_x, k_e, k_p = jax.random.split(key, 3)

    num_nodes, in_channels = 32, 16
    hidden_channels, out_channels = 32, 16
    num_edges = 64

    x = jax.random.normal(k_x, (num_nodes, in_channels), jnp.float32)
    edge_index = jax.random.randint(k_e, (2, num_edges), 0, num_nodes,
                                    jnp.int32)
    params = init_params(k_p, in_channels, hidden_channels, out_channels)

    out = jax.jit(gnn_encoder)(x, edge_index, params)
    out = jax.block_until_ready(out)

    ref = reference_forward(x, edge_index, params)
    assert out.shape == (num_nodes, out_channels)
    # bf16 operands (f32 accumulation, exact 0/1 A + f32 1/deg) vs f32 ref.
    assert jnp.allclose(out, ref, atol=5e-2, rtol=5e-2), (
        float(jnp.max(jnp.abs(out - ref))))

    print("KERNEL_OK")
</pallas_src>

<mosaic_0001>
module attributes {stable_mosaic.version = 11 : i64} {
  func.func private @main(%arg0: i32) attributes {dimension_semantics = [#tpu.dimension_semantics<core_parallel>], iteration_bounds = array<i64: 2>, tpu.core_type = #tpu.core_type<sc_scalar_subcore>, window_params = []} {
    return
  }
}

module attributes {stable_mosaic.version = 11 : i64} {
  func.func private @main(%arg0: i32) attributes {dimension_semantics = [#tpu.dimension_semantics<core_parallel>], iteration_bounds = array<i64: 2>, tpu.core_type = #tpu.core_type<sc_scalar_subcore>, window_params = []} {
    return
  }
}

module attributes {stable_mosaic.version = 11 : i64} {
  func.func @transform_kernel(%arg0: i32, %arg1: memref<512x128xbf16, #tpu.memory_space<vmem>>, %arg2: memref<128x128xbf16, #tpu.memory_space<vmem>>, %arg3: memref<128x128xbf16, #tpu.memory_space<vmem>>, %arg4: memref<1x128xf32, #tpu.memory_space<vmem>>, %arg5: memref<512x128xbf16, #tpu.memory_space<vmem>>, %arg6: memref<512x128xbf16, #tpu.memory_space<vmem>>) attributes {dimension_semantics = [#tpu.dimension_semantics<parallel>], iteration_bounds = array<i64: 4>, scalar_prefetch = 0 : i64, scratch_operands = 0 : i64, tpu.core_type = #tpu.core_type<tc>, window_params = [{transform_indices = @transform_0, window_bounds = array<i64: 512, 128>}, {pipeline_mode = #tpu.pipeline_mode<synchronous>, transform_indices = @transform_1, window_bounds = array<i64: 128, 128>}, {pipeline_mode = #tpu.pipeline_mode<synchronous>, transform_indices = @transform_2, window_bounds = array<i64: 128, 128>}, {pipeline_mode = #tpu.pipeline_mode<synchronous>, transform_indices = @transform_3, window_bounds = array<i64: 1, 128>}, {transform_indices = @transform_4, window_bounds = array<i64: 512, 128>}, {transform_indices = @transform_5, window_bounds = array<i64: 512, 128>}]} {
    %c0 = arith.constant 0 : index
    %c0_0 = arith.constant 0 : index
    %0 = vector.load %arg1[%c0, %c0_0] : memref<512x128xbf16, #tpu.memory_space<vmem>>, vector<512x128xbf16>
    %c0_1 = arith.constant 0 : index
    %c0_2 = arith.constant 0 : index
    %1 = vector.load %arg2[%c0_1, %c0_2] : memref<128x128xbf16, #tpu.memory_space<vmem>>, vector<128x128xbf16>
    %cst = arith.constant dense<0.000000e+00> : vector<512x128xf32>
    %2 = tpu.matmul %0, %1, %cst {dimension_numbers = #tpu.dot_dimension_numbers<[1], [0], [0], [1], [0, 0, 1, 1], [], []>} : vector<512x128xbf16>, vector<128x128xbf16>, vector<512x128xf32> -> vector<512x128xf32>
    %3 = arith.truncf %2 : vector<512x128xf32> to vector<512x128xbf16>
    %c0_3 = arith.constant 0 : index
    %c0_4 = arith.constant 0 : index
    %4 = vector.load %arg5[%c0_3, %c0_4] : memref<512x128xbf16, #tpu.memory_space<vmem>>, vector<512x128xbf16>
    tpu.vector_store %arg5[%c0_3, %c0_4], %3 {strides = array<i32>} : memref<512x128xbf16, #tpu.memory_space<vmem>>, vector<512x128xbf16>,
    %c0_5 = arith.constant 0 : index
    %c0_6 = arith.constant 0 : index
    %5 = vector.load %arg3[%c0_5, %c0_6] : memref<128x128xbf16, #tpu.memory_space<vmem>>, vector<128x128xbf16>
    %cst_7 = arith.constant dense<0.000000e+00> : vector<512x128xf32>
    %6 = tpu.matmul %0, %5, %cst_7 {dimension_numbers = #tpu.dot_dimension_numbers<[1], [0], [0], [1], [0, 0, 1, 1], [], []>} : vector<512x128xbf16>, vector<128x128xbf16>, vector<512x128xf32> -> vector<512x128xf32>
    %c0_8 = arith.constant 0 : index
    %c0_9 = arith.constant 0 : index
    %7 = vector.load %arg4[%c0_8, %c0_9] : memref<1x128xf32, #tpu.memory_space<vmem>>, vector<1x128xf32>
    %8 = vector.broadcast %7 : vector<1x128xf32> to vector<512x128xf32>
    %9 = arith.addf %6, %8 : vector<512x128xf32>
    %10 = arith.truncf %9 : vector<512x128xf32> to vector<512x128xbf16>
    %c0_10 = arith.constant 0 : index
    %c0_11 = arith.constant 0 : index
    %11 = vector.load %arg6[%c0_10, %c0_11] : memref<512x128xbf16, #tpu.memory_space<vmem>>, vector<512x128xbf16>
    tpu.vector_store %arg6[%c0_10, %c0_11], %10 {strides = array<i32>} : memref<512x128xbf16, #tpu.memory_space<vmem>>, vector<512x128xbf16>,
    return
  }
  func.func @transform_0(%arg0: i32) -> (i32, i32) {
    %c0_i32 = arith.constant 0 : i32
    %c0_i32_0 = arith.constant 0 : i32
    return %arg0, %c0_i32 : i32, i32
  }
  func.func @transform_1(%arg0: i32) -> (i32, i32) {
    %c0_i32 = arith.constant 0 : i32
    %c0_i32_0 = arith.constant 0 : i32
    %c0_i32_1 = arith.constant 0 : i32
    return %c0_i32, %c0_i32_0 : i32, i32
  }
  func.func @transform_2(%arg0: i32) -> (i32, i32) {
    %c0_i32 = arith.constant 0 : i32
    %c0_i32_0 = arith.constant 0 : i32
    %c0_i32_1 = arith.constant 0 : i32
    return %c0_i32, %c0_i32_0 : i32, i32
  }
  func.func @transform_3(%arg0: i32) -> (i32, i32) {
    %c0_i32 = arith.constant 0 : i32
    %c0_i32_0 = arith.constant 0 : i32
    %c0_i32_1 = arith.constant 0 : i32
    return %c0_i32, %c0_i32_0 : i32, i32
  }
  func.func @transform_4(%arg0: i32) -> (i32, i32) {
    %c0_i32 = arith.constant 0 : i32
    %c0_i32_0 = arith.constant 0 : i32
    return %arg0, %c0_i32 : i32, i32
  }
  func.func @transform_5(%arg0: i32) -> (i32, i32) {
    %c0_i32 = arith.constant 0 : i32
    %c0_i32_0 = arith.constant 0 : i32
    return %arg0, %c0_i32 : i32, i32
  }
}

module attributes {stable_mosaic.version = 11 : i64} {
  func.func @aggregate_kernel(%arg0: i32, %arg1: i32, %arg2: memref<512x2048xi8, #tpu.memory_space<vmem>>, %arg3: memref<2048x128xbf16, #tpu.memory_space<vmem>>, %arg4: memref<512x128xbf16, #tpu.memory_space<vmem>>, %arg5: memref<512x1xf32, #tpu.memory_space<vmem>>, %arg6: memref<512x128xbf16, #tpu.memory_space<vmem>>, %arg7: memref<512x128xf32, #tpu.memory_space<vmem>>) attributes {dimension_semantics = [#tpu.dimension_semantics<parallel>, #tpu.dimension_semantics<arbitrary>], iteration_bounds = array<i64: 4, 1>, scalar_prefetch = 0 : i64, scratch_operands = 1 : i64, tpu.core_type = #tpu.core_type<tc>, window_params = [{transform_indices = @transform_0, window_bounds = array<i64: 512, 2048>}, {pipeline_mode = #tpu.pipeline_mode<synchronous>, transform_indices = @transform_1, window_bounds = array<i64: 2048, 128>}, {transform_indices = @transform_2, window_bounds = array<i64: 512, 128>}, {transform_indices = @transform_3, window_bounds = array<i64: 512, 1>}, {transform_indices = @transform_4, window_bounds = array<i64: 512, 128>}]} {
    %c0_i32 = arith.constant 0 : i32
    %0 = arith.cmpi eq, %arg1, %c0_i32 : i32
    %1 = arith.extui %0 : i1 to i32
    %c0_i32_0 = arith.constant 0 : i32
    %2 = arith.cmpi ne, %1, %c0_i32_0 : i32
    scf.if %2 {
      %cst_9 = arith.constant 0.000000e+00 : f32
      %16 = vector.broadcast %cst_9 : f32 to vector<512x128xf32>
      %c0_10 = arith.constant 0 : index
      %c0_11 = arith.constant 0 : index
      %17 = vector.load %arg7[%c0_10, %c0_11] : memref<512x128xf32, #tpu.memory_space<vmem>>, vector<512x128xf32>
      tpu.vector_store %arg7[%c0_10, %c0_11], %16 {strides = array<i32>} : memref<512x128xf32, #tpu.memory_space<vmem>>, vector<512x128xf32>,
    } else {
    }
    %c2048_i32 = arith.constant 2048 : i32
    %3 = arith.muli %arg1, %c2048_i32 : i32
    %4 = tpu.assume_multiple %3, 2048 : i32
    %5 = arith.index_cast %4 : i32 to index
    %c0 = arith.constant 0 : index
    %6 = vector.load %arg3[%5, %c0] : memref<2048x128xbf16, #tpu.memory_space<vmem>>, vector<2048x128xbf16>
    %c0_1 = arith.constant 0 : index
    %c0_2 = arith.constant 0 : index
    %7 = vector.load %arg2[%c0_1, %c0_2] : memref<512x2048xi8, #tpu.memory_space<vmem>>, vector<512x2048xi8>
    %8 = arith.sitofp %7 : vector<512x2048xi8> to vector<512x2048xbf16>
    %c0_3 = arith.constant 0 : index
    %c0_4 = arith.constant 0 : index
    %9 = vector.load %arg7[%c0_3, %c0_4] : memref<512x128xf32, #tpu.memory_space<vmem>>, vector<512x128xf32>
    %cst = arith.constant dense<0.000000e+00> : vector<512x128xf32>
    %10 = tpu.matmul %8, %6, %cst {dimension_numbers = #tpu.dot_dimension_numbers<[1], [0], [0], [1], [0, 0, 1, 1], [], []>} : vector<512x2048xbf16>, vector<2048x128xbf16>, vector<512x128xf32> -> vector<512x128xf32>
    %11 = arith.addf %9, %10 : vector<512x128xf32>
    %c0_5 = arith.constant 0 : index
    %c0_6 = arith.constant 0 : index
    %12 = vector.load %arg7[%c0_5, %c0_6] : memref<512x128xf32, #tpu.memory_space<vmem>>, vector<512x128xf32>
    tpu.vector_store %arg7[%c0_5, %c0_6], %11 {strides = array<i32>} : memref<512x128xf32, #tpu.memory_space<vmem>>, vector<512x128xf32>,
    %c0_i32_7 = arith.constant 0 : i32
    %13 = arith.cmpi eq, %arg1, %c0_i32_7 : i32
    %14 = arith.extui %13 : i1 to i32
    %c0_i32_8 = arith.constant 0 : i32
    %15 = arith.cmpi ne, %14, %c0_i32_8 : i32
    scf.if %15 {
      %c0_9 = arith.constant 0 : index
      %c0_10 = arith.constant 0 : index
      %16 = vector.load %arg7[%c0_9, %c0_10] : memref<512x128xf32, #tpu.memory_space<vmem>>, vector<512x128xf32>
      %c0_11 = arith.constant 0 : index
      %c0_12 = arith.constant 0 : index
      %17 = vector.load %arg5[%c0_11, %c0_12] : memref<512x1xf32, #tpu.memory_space<vmem>>, vector<512x1xf32>
      %18 = vector.broadcast %17 : vector<512x1xf32> to vector<512x128xf32>
      %19 = arith.mulf %16, %18 : vector<512x128xf32>
      %c0_13 = arith.constant 0 : index
      %c0_14 = arith.constant 0 : index
      %20 = vector.load %arg4[%c0_13, %c0_14] : memref<512x128xbf16, #tpu.memory_space<vmem>>, vector<512x128xbf16>
      %21 = arith.extf %20 : vector<512x128xbf16> to vector<512x128xf32>
      %22 = arith.addf %19, %21 : vector<512x128xf32>
      %cst_15 = arith.constant 0.000000e+00 : f32
      %23 = vector.broadcast %cst_15 : f32 to vector<512x128xf32>
      %24 = arith.maximumf %22, %23 : vector<512x128xf32>
      %25 = arith.truncf %24 : vector<512x128xf32> to vector<512x128xbf16>
      %c0_16 = arith.constant 0 : index
      %c0_17 = arith.constant 0 : index
      %26 = vector.load %arg6[%c0_16, %c0_17] : memref<512x128xbf16, #tpu.memory_space<vmem>>, vector<512x128xbf16>
      tpu.vector_store %arg6[%c0_16, %c0_17], %25 {strides = array<i32>} : memref<512x128xbf16, #tpu.memory_space<vmem>>, vector<512x128xbf16>,
    } else {
    }
    return
  }
  func.func @transform_0(%arg0: i32, %arg1: i32) -> (i32, i32) {
    %c0_i32 = arith.constant 0 : i32
    return %arg0, %arg1 : i32, i32
  }
  func.func @transform_1(%arg0: i32, %arg1: i32) -> (i32, i32) {
    %c0_i32 = arith.constant 0 : i32
    %c0_i32_0 = arith.constant 0 : i32
    %c0_i32_1 = arith.constant 0 : i32
    return %c0_i32, %c0_i32_0 : i32, i32
  }
  func.func @transform_2(%arg0: i32, %arg1: i32) -> (i32, i32) {
    %c0_i32 = arith.constant 0 : i32
    %c0_i32_0 = arith.constant 0 : i32
    return %arg0, %c0_i32 : i32, i32
  }
  func.func @transform_3(%arg0: i32, %arg1: i32) -> (i32, i32) {
    %c0_i32 = arith.constant 0 : i32
    %c0_i32_0 = arith.constant 0 : i32
    return %arg0, %c0_i32 : i32, i32
  }
  func.func @transform_4(%arg0: i32, %arg1: i32) -> (i32, i32) {
    %c0_i32 = arith.constant 0 : i32
    %c0_i32_0 = arith.constant 0 : i32
    return %arg0, %c0_i32 : i32, i32
  }
}

module attributes {stable_mosaic.version = 11 : i64} {
  func.func @aggregate_kernel(%arg0: i32, %arg1: i32, %arg2: memref<512x2048xi8, #tpu.memory_space<vmem>>, %arg3: memref<2048x128xbf16, #tpu.memory_space<vmem>>, %arg4: memref<512x128xbf16, #tpu.memory_space<vmem>>, %arg5: memref<512x1xf32, #tpu.memory_space<vmem>>, %arg6: memref<512x128xf32, #tpu.memory_space<vmem>>, %arg7: memref<512x128xf32, #tpu.memory_space<vmem>>) attributes {dimension_semantics = [#tpu.dimension_semantics<parallel>, #tpu.dimension_semantics<arbitrary>], iteration_bounds = array<i64: 4, 1>, scalar_prefetch = 0 : i64, scratch_operands = 1 : i64, tpu.core_type = #tpu.core_type<tc>, window_params = [{transform_indices = @transform_0, window_bounds = array<i64: 512, 2048>}, {pipeline_mode = #tpu.pipeline_mode<synchronous>, transform_indices = @transform_1, window_bounds = array<i64: 2048, 128>}, {transform_indices = @transform_2, window_bounds = array<i64: 512, 128>}, {transform_indices = @transform_3, window_bounds = array<i64: 512, 1>}, {transform_indices = @transform_4, window_bounds = array<i64: 512, 128>}]} {
    %c0_i32 = arith.constant 0 : i32
    %0 = arith.cmpi eq, %arg1, %c0_i32 : i32
    %1 = arith.extui %0 : i1 to i32
    %c0_i32_0 = arith.constant 0 : i32
    %2 = arith.cmpi ne, %1, %c0_i32_0 : i32
    scf.if %2 {
      %cst_9 = arith.constant 0.000000e+00 : f32
      %16 = vector.broadcast %cst_9 : f32 to vector<512x128xf32>
      %c0_10 = arith.constant 0 : index
      %c0_11 = arith.constant 0 : index
      %17 = vector.load %arg7[%c0_10, %c0_11] : memref<512x128xf32, #tpu.memory_space<vmem>>, vector<512x128xf32>
      tpu.vector_store %arg7[%c0_10, %c0_11], %16 {strides = array<i32>} : memref<512x128xf32, #tpu.memory_space<vmem>>, vector<512x128xf32>,
    } else {
    }
    %c2048_i32 = arith.constant 2048 : i32
    %3 = arith.muli %arg1, %c2048_i32 : i32
    %4 = tpu.assume_multiple %3, 2048 : i32
    %5 = arith.index_cast %4 : i32 to index
    %c0 = arith.constant 0 : index
    %6 = vector.load %arg3[%5, %c0] : memref<2048x128xbf16, #tpu.memory_space<vmem>>, vector<2048x128xbf16>
    %c0_1 = arith.constant 0 : index
    %c0_2 = arith.constant 0 : index
    %7 = vector.load %arg2[%c0_1, %c0_2] : memref<512x2048xi8, #tpu.memory_space<vmem>>, vector<512x2048xi8>
    %8 = arith.sitofp %7 : vector<512x2048xi8> to vector<512x2048xbf16>
    %c0_3 = arith.constant 0 : index
    %c0_4 = arith.constant 0 : index
    %9 = vector.load %arg7[%c0_3, %c0_4] : memref<512x128xf32, #tpu.memory_space<vmem>>, vector<512x128xf32>
    %cst = arith.constant dense<0.000000e+00> : vector<512x128xf32>
    %10 = tpu.matmul %8, %6, %cst {dimension_numbers = #tpu.dot_dimension_numbers<[1], [0], [0], [1], [0, 0, 1, 1], [], []>} : vector<512x2048xbf16>, vector<2048x128xbf16>, vector<512x128xf32> -> vector<512x128xf32>
    %11 = arith.addf %9, %10 : vector<512x128xf32>
    %c0_5 = arith.constant 0 : index
    %c0_6 = arith.constant 0 : index
    %12 = vector.load %arg7[%c0_5, %c0_6] : memref<512x128xf32, #tpu.memory_space<vmem>>, vector<512x128xf32>
    tpu.vector_store %arg7[%c0_5, %c0_6], %11 {strides = array<i32>} : memref<512x128xf32, #tpu.memory_space<vmem>>, vector<512x128xf32>,
    %c0_i32_7 = arith.constant 0 : i32
    %13 = arith.cmpi eq, %arg1, %c0_i32_7 : i32
    %14 = arith.extui %13 : i1 to i32
    %c0_i32_8 = arith.constant 0 : i32
    %15 = arith.cmpi ne, %14, %c0_i32_8 : i32
    scf.if %15 {
      %c0_9 = arith.constant 0 : index
      %c0_10 = arith.constant 0 : index
      %16 = vector.load %arg7[%c0_9, %c0_10] : memref<512x128xf32, #tpu.memory_space<vmem>>, vector<512x128xf32>
      %c0_11 = arith.constant 0 : index
      %c0_12 = arith.constant 0 : index
      %17 = vector.load %arg5[%c0_11, %c0_12] : memref<512x1xf32, #tpu.memory_space<vmem>>, vector<512x1xf32>
      %18 = vector.broadcast %17 : vector<512x1xf32> to vector<512x128xf32>
      %19 = arith.mulf %16, %18 : vector<512x128xf32>
      %c0_13 = arith.constant 0 : index
      %c0_14 = arith.constant 0 : index
      %20 = vector.load %arg4[%c0_13, %c0_14] : memref<512x128xbf16, #tpu.memory_space<vmem>>, vector<512x128xbf16>
      %21 = arith.extf %20 : vector<512x128xbf16> to vector<512x128xf32>
      %22 = arith.addf %19, %21 : vector<512x128xf32>
      %c0_15 = arith.constant 0 : index
      %c0_16 = arith.constant 0 : index
      %23 = vector.load %arg6[%c0_15, %c0_16] : memref<512x128xf32, #tpu.memory_space<vmem>>, vector<512x128xf32>
      tpu.vector_store %arg6[%c0_15, %c0_16], %22 {strides = array<i32>} : memref<512x128xf32, #tpu.memory_space<vmem>>, vector<512x128xf32>,
    } else {
    }
    return
  }
  func.func @transform_0(%arg0: i32, %arg1: i32) -> (i32, i32) {
    %c0_i32 = arith.constant 0 : i32
    return %arg0, %arg1 : i32, i32
  }
  func.func @transform_1(%arg0: i32, %arg1: i32) -> (i32, i32) {
    %c0_i32 = arith.constant 0 : i32
    %c0_i32_0 = arith.constant 0 : i32
    %c0_i32_1 = arith.constant 0 : i32
    return %c0_i32, %c0_i32_0 : i32, i32
  }
  func.func @transform_2(%arg0: i32, %arg1: i32) -> (i32, i32) {
    %c0_i32 = arith.constant 0 : i32
    %c0_i32_0 = arith.constant 0 : i32
    return %arg0, %c0_i32 : i32, i32
  }
  func.func @transform_3(%arg0: i32, %arg1: i32) -> (i32, i32) {
    %c0_i32 = arith.constant 0 : i32
    %c0_i32_0 = arith.constant 0 : i32
    return %arg0, %c0_i32 : i32, i32
  }
  func.func @transform_4(%arg0: i32, %arg1: i32) -> (i32, i32) {
    %c0_i32 = arith.constant 0 : i32
    %c0_i32_0 = arith.constant 0 : i32
    return %arg0, %c0_i32 : i32, i32
  }
}

</mosaic_0001>

<bundles_post_ra>
// kernel: gnn_encoder.4
= control target key start
LH: loop header
LB: loop body
LE: loop exit
PB: predicated region body
PF: predicated region fallthrough
CT: control target
= control target key end

     0   :  { %s2976_s18 = smov 0   ;;  %s3220_s0 = inlined_call_operand.vmem [shape: bf16[2048,128], index: 0, kind: input, shape index: {}]   ;;  %s3221_s1 = inlined_call_operand.vmem [shape: bf16[128,128], index: 1, kind: input, shape index: {}]   ;;  %s3222_s2 = inlined_call_operand.vmem [shape: bf16[128,128], index: 2, kind: input, shape index: {}]   ;;  %s3223_s3 = inlined_call_operand.vmem [shape: f32[1,128], index: 3, kind: input, shape index: {}]   ;;  %s3224_s4 = inlined_call_operand.vmem [shape: bf16[2048,128], index: 4, kind: output, shape index: {0}]   ;;  %s3225_s5 = inlined_call_operand.vmem [shape: bf16[2048,128], index: 5, kind: output, shape index: {1}]  }
   0x1 LB: > { %s1942_s19 = sadd.s32 4294967295, %s2944_s18   ;;  %p1946_p0 = scmp.ge.s32.totalorder %s2944_s18, 1  ;;  %s2944_s18 = sphi %s2976_s18, %s16_s18  }
   0x2   : > { %p191_p1 = scmp.lt.s32.totalorder %s2944_s18, 5 }
   0x4   : > { %p192_p2 = pnand %p1946_p0, %p191_p1 }
   0x5   : > { %v2890_v0 = vld [vmem:[%s3221_s1] sm:$0xff] (!%p192_p2)   ;;  %s1947_s22 = sshll.u32 (!%p192_p2), %s1942_s19, 6  ;;  %v2892_v2 = vld [vmem:[%s3221_s1 + $0x8] sm:$0xff] (!%p192_p2)   ;;  %v2894_v4 = vld [vmem:[%s3221_s1 + $0x10] sm:$0xff] (!%p192_p2)  }
   0x6   : > { %195 = sbr.rel (%p192_p2) target bundleno = 379 (0x17b), region = 36  ;;  %v2891_v1 = vld [vmem:[%s3222_s2] sm:$0xff] (!%p192_p2)   ;;  %2722 = vmatprep.subr.bf16.mxu0 (!%p192_p2), %v2890_v0  ;;  %p225_p3 = scmp.lt.s32.totalorder (!%p192_p2), %s1947_s22, 255  ;;  %v2893_v3 = vld [vmem:[%s3222_s2 + $0x8] sm:$0xff] (!%p192_p2)   ;;  %v2895_v5 = vld [vmem:[%s3222_s2 + $0x10] sm:$0xff] (!%p192_p2)  }
   0x7   : > { %2802 = vmatprep.subr.bf16.mxu1 (!%p192_p2), %v2891_v1  ;;  %2723 = vmatpush3.bf16.msra.mxu0 (!%p192_p2), %v2890_v0  ;;  %v2896_v6 = vld [vmem:[%s3221_s1 + $0x18] sm:$0xff] (!%p192_p2)   ;;  %v2898_v8 = vld [vmem:[%s3221_s1 + $0x20] sm:$0xff] (!%p192_p2)   ;;  %v2900_v10 = vld [vmem:[%s3221_s1 + $0x28] sm:$0xff] (!%p192_p2)  }
   0x8   : > { %2803 = vmatpush3.bf16.msra.mxu1 (!%p192_p2), %v2891_v1  ;;  %2724 = vmatprep.subr.bf16.mxu0 (!%p192_p2), %v2892_v2  ;;  %v2897_v7 = vld [vmem:[%s3222_s2 + $0x18] sm:$0xff] (!%p192_p2)   ;;  %v2899_v9 = vld [vmem:[%s3222_s2 + $0x20] sm:$0xff] (!%p192_p2)   ;;  %v2901_v12 = vld [vmem:[%s3222_s2 + $0x28] sm:$0xff] (!%p192_p2)  }
   0x9   : > { %2804 = vmatprep.subr.bf16.mxu1 (!%p192_p2), %v2893_v3  ;;  %v2902_v13 = vld [vmem:[%s3221_s1 + $0x30] sm:$0xff] (!%p192_p2)   ;;  %v2904_v15 = vld [vmem:[%s3221_s1 + $0x38] sm:$0xff] (!%p192_p2)   ;;  %v3075_v50 = vld [vmem:[%s3223_s3] ss:$0 sm:$0xff] (!%p192_p2) }
   0xa   : > { %v2903_v14 = vld [vmem:[%s3222_s2 + $0x30] sm:$0xff] (!%p192_p2)   ;;  %v2905_v16 = vld [vmem:[%s3222_s2 + $0x38] sm:$0xff] (!%p192_p2)  }
   0xb   : > { %2725 = vmatpush3.bf16.msra.mxu0 (!%p192_p2), %v2892_v2 }
   0xc   : > { %2805 = vmatpush3.bf16.msra.mxu1 (!%p192_p2), %v2893_v3  ;;  %2726 = vmatprep.subr.bf16.mxu0 (!%p192_p2), %v2894_v4 }
   0xd   : > { %s3227_s22 = smov (!%p225_p3, %s1947_s22), 255  ;;  %2806 = vmatprep.subr.bf16.mxu1 %v2895_v5 }
   0xe   : > { %s3008_s12 = sshll.u32 %s3227_s22, 2 }
   0xf   : > { %2727 = vmatpush3.bf16.msra.mxu0 %v2894_v4  ;;  %s3020_s20 = scalar_lea.vmem %s3220_s0, %s3008_s12  ;;  %s3081_s13 = scalar_lea.vmem %s3224_s4, %s3008_s12 }
  0x10   : > { %2807 = vmatpush3.bf16.msra.mxu1 %v2895_v5  ;;  %2728 = vmatprep.subr.bf16.mxu0 %v2896_v6  ;;  %v2906_v11 = vld [vmem:[%s3020_s20] sm:$0xff]   ;;  %v2907_v17 = vld [vmem:[%s3020_s20 + $0x8] sm:$0xff]   ;;  %v2908_v18 = vld [vmem:[%s3020_s20 + $0x10] sm:$0xff]   ;;  %s3091_s16 = scalar_lea.vmem %s3225_s5, %s3008_s12 }
  0x11   : > { %2808 = vmatprep.subr.bf16.mxu1 %v2897_v7  ;;  %2738 = vmatprep.mubr.bf16.mxu0 %v2906_v11  ;;  %v2909_v19 = vld [vmem:[%s3020_s20 + $0x18] sm:$0xff]   ;;  %v2910_v20 = vld [vmem:[%s3020_s20 + $0x20] sm:$0xff]   ;;  %v2911_v21 = vld [vmem:[%s3020_s20 + $0x28] sm:$0xff]  }
  0x12   : > { %2818 = vmatprep.mubr.bf16.mxu1 %v2906_v11  ;;  %v2912_v22 = vld [vmem:[%s3020_s20 + $0x30] sm:$0xff]   ;;  %v2913_v23 = vld [vmem:[%s3020_s20 + $0x38] sm:$0xff]   ;;  %v2914_v24 = vld [vmem:[%s3020_s20 + $0x40] sm:$0xff]  }
  0x13   : > { %2729 = vmatpush3.bf16.msra.mxu0 %v2896_v6  ;;  %v2915_v25 = vld [vmem:[%s3020_s20 + $0x48] sm:$0xff]   ;;  %v2916_v26 = vld [vmem:[%s3020_s20 + $0x50] sm:$0xff]   ;;  %v2917_v27 = vld [vmem:[%s3020_s20 + $0x58] sm:$0xff]  }
  0x14   : > { %2809 = vmatpush3.bf16.msra.mxu1 %v2897_v7  ;;  %2730 = vmatprep.subr.bf16.mxu0 %v2898_v8  ;;  %v2918_v28 = vld [vmem:[%s3020_s20 + $0x60] sm:$0xff]   ;;  %v2919_v29 = vld [vmem:[%s3020_s20 + $0x68] sm:$0xff]   ;;  %v2920_v30 = vld [vmem:[%s3020_s20 + $0x70] sm:$0xff]  }
  0x15   : > { %2810 = vmatprep.subr.bf16.mxu1 %v2899_v9  ;;  %v2921_v31 = vld [vmem:[%s3020_s20 + $0x78] sm:$0xff]   ;;  %v2922_v32 = vld [vmem:[%s3020_s20 + $0x80] sm:$0xff]   ;;  %v2923_v33 = vld [vmem:[%s3020_s20 + $0x88] sm:$0xff]  }
  0x16   : > { %v2924_v34 = vld [vmem:[%s3020_s20 + $0x90] sm:$0xff]   ;;  %v2925_v35 = vld [vmem:[%s3020_s20 + $0x98] sm:$0xff]   ;;  %v2926_v36 = vld [vmem:[%s3020_s20 + $0xa0] sm:$0xff]  }
  0x17   : > { %2731 = vmatpush3.bf16.msra.mxu0 %v2898_v8  ;;  %v2927_v37 = vld [vmem:[%s3020_s20 + $0xa8] sm:$0xff]   ;;  %v2928_v38 = vld [vmem:[%s3020_s20 + $0xb0] sm:$0xff]   ;;  %v2929_v39 = vld [vmem:[%s3020_s20 + $0xb8] sm:$0xff]  }
  0x18   : > { %2811 = vmatpush3.bf16.msra.mxu1 %v2899_v9  ;;  %2732 = vmatprep.subr.bf16.mxu0 %v2900_v10  ;;  %v2930_v40 = vld [vmem:[%s3020_s20 + $0xc0] sm:$0xff]   ;;  %v2931_v41 = vld [vmem:[%s3020_s20 + $0xc8] sm:$0xff]   ;;  %v2932_v42 = vld [vmem:[%s3020_s20 + $0xd0] sm:$0xff]  }
  0x19   : > { %2812 = vmatprep.subr.bf16.mxu1 %v2901_v12  ;;  %v2933_v43 = vld [vmem:[%s3020_s20 + $0xd8] sm:$0xff]   ;;  %v2934_v44 = vld [vmem:[%s3020_s20 + $0xe0] sm:$0xff]   ;;  %v2935_v45 = vld [vmem:[%s3020_s20 + $0xe8] sm:$0xff]  }
  0x1a   : > { %v2936_v46 = vld [vmem:[%s3020_s20 + $0xf0] sm:$0xff]   ;;  %v2937_v47 = vld [vmem:[%s3020_s20 + $0xf8] sm:$0xff]  }
  0x1b   : > { %2733 = vmatpush3.bf16.msra.mxu0 %v2900_v10 }
  0x1c   : > { %2813 = vmatpush3.bf16.msra.mxu1 %v2901_v12  ;;  %2734 = vmatprep.subr.bf16.mxu0 %v2902_v13 }
  0x1d   : > { %2814 = vmatprep.subr.bf16.mxu1 %v2903_v14 }
  0x1f   : > { %2735 = vmatpush3.bf16.msra.mxu0 %v2902_v13 }
  0x20   : > { %2815 = vmatpush3.bf16.msra.mxu1 %v2903_v14  ;;  %2736 = vmatprep.subr.bf16.mxu0 %v2904_v15 }
  0x21   : > { %2816 = vmatprep.subr.bf16.mxu1 %v2905_v16 }
  0x23   : > { %2737 = vmatpush3.bf16.msra.mxu0 %v2904_v15 }
  0x24   : > { %2817 = vmatpush3.bf16.msra.mxu1 %v2905_v16 }
  0x26   : > { %2739 = vmatmul.mubr.bf16.vlgmr.msra.gmra.mrb[0].mxu0 %v2907_v17 }
  0x27   : > { %2819 = vmatmul.mubr.bf16.vlgmr.msra.gmra.mrb[0].mxu1 %v2907_v17  ;;  %2742 = vmatprep.mubr.bf16.mxu0 %v2908_v18 }
  0x28   : > { %2822 = vmatprep.mubr.bf16.mxu1 %v2908_v18 }
  0x2e   : > { %2743 = vmatmul.mubr.bf16.gmra.mrb[4].mxu0 %v2909_v19 }
  0x2f   : > { %2823 = vmatmul.mubr.bf16.gmra.mrb[4].mxu1 %v2909_v19  ;;  %2746 = vmatprep.mubr.bf16.mxu0 %v2910_v20 }
  0x30   : > { %2826 = vmatprep.mubr.bf16.mxu1 %v2910_v20 }
  0x36   : > { %2747 = vmatmul.mubr.bf16.gmra.mrb[8].mxu0 %v2911_v21 }
  0x37   : > { %2827 = vmatmul.mubr.bf16.gmra.mrb[8].mxu1 %v2911_v21  ;;  %2750 = vmatprep.mubr.bf16.mxu0 %v2912_v22 }
  0x38   : > { %2830 = vmatprep.mubr.bf16.mxu1 %v2912_v22 }
  0x3e   : > { %2751 = vmatmul.mubr.bf16.gmra.mrb[12].mxu0 %v2913_v23 }
  0x3f   : > { %2831 = vmatmul.mubr.bf16.gmra.mrb[12].mxu1 %v2913_v23  ;;  %2754 = vmatprep.mubr.bf16.mxu0 %v2914_v24 }
  0x40   : > { %2834 = vmatprep.mubr.bf16.mxu1 %v2914_v24 }
  0x46   : > { %2755 = vmatmul.mubr.bf16.gmra.mrb[16].mxu0 %v2915_v25 }
  0x47   : > { %2835 = vmatmul.mubr.bf16.gmra.mrb[16].mxu1 %v2915_v25  ;;  %2758 = vmatprep.mubr.bf16.mxu0 %v2916_v26 }
  0x48   : > { %2838 = vmatprep.mubr.bf16.mxu1 %v2916_v26 }
  0x4e   : > { %2759 = vmatmul.mubr.bf16.gmra.mrb[20].mxu0 %v2917_v27 }
  0x4f   : > { %2839 = vmatmul.mubr.bf16.gmra.mrb[20].mxu1 %v2917_v27  ;;  %2762 = vmatprep.mubr.bf16.mxu0 %v2918_v28 }
  0x50   : > { %2842 = vmatprep.mubr.bf16.mxu1 %v2918_v28 }
  0x56   : > { %2763 = vmatmul.mubr.bf16.gmra.mrb[24].mxu0 %v2919_v29 }
  0x57   : > { %2843 = vmatmul.mubr.bf16.gmra.mrb[24].mxu1 %v2919_v29  ;;  %2766 = vmatprep.mubr.bf16.mxu0 %v2920_v30 }
  0x58   : > { %2846 = vmatprep.mubr.bf16.mxu1 %v2920_v30 }
  0x5e   : > { %2767 = vmatmul.mubr.bf16.gmra.mrb[28].mxu0 %v2921_v31 }
  0x5f   : > { %2847 = vmatmul.mubr.bf16.gmra.mrb[28].mxu1 %v2921_v31  ;;  %2770 = vmatprep.mubr.bf16.mxu0 %v2922_v32 }
  0x60   : > { %2850 = vmatprep.mubr.bf16.mxu1 %v2922_v32 }
  0x66   : > { %2771 = vmatmul.mubr.bf16.gmra.mrb[32].mxu0 %v2923_v33 }
  0x67   : > { %2851 = vmatmul.mubr.bf16.gmra.mrb[32].mxu1 %v2923_v33  ;;  %2774 = vmatprep.mubr.bf16.mxu0 %v2924_v34 }
  0x68   : > { %2854 = vmatprep.mubr.bf16.mxu1 %v2924_v34 }
  0x6e   : > { %2775 = vmatmul.mubr.bf16.gmra.mrb[36].mxu0 %v2925_v35 }
  0x6f   : > { %2855 = vmatmul.mubr.bf16.gmra.mrb[36].mxu1 %v2925_v35  ;;  %2778 = vmatprep.mubr.bf16.mxu0 %v2926_v36 }
  0x70   : > { %2858 = vmatprep.mubr.bf16.mxu1 %v2926_v36 }
  0x76   : > { %2779 = vmatmul.mubr.bf16.gmra.mrb[40].mxu0 %v2927_v37 }
  0x77   : > { %2859 = vmatmul.mubr.bf16.gmra.mrb[40].mxu1 %v2927_v37  ;;  %2782 = vmatprep.mubr.bf16.mxu0 %v2928_v38 }
  0x78   : > { %2862 = vmatprep.mubr.bf16.mxu1 %v2928_v38 }
  0x7e   : > { %2783 = vmatmul.mubr.bf16.gmra.mrb[44].mxu0 %v2929_v39 }
  0x7f   : > { %2863 = vmatmul.mubr.bf16.gmra.mrb[44].mxu1 %v2929_v39  ;;  %2786 = vmatprep.mubr.bf16.mxu0 %v2930_v40 }
  0x80   : > { %2866 = vmatprep.mubr.bf16.mxu1 %v2930_v40 }
  0x86   : > { %2787 = vmatmul.mubr.bf16.gmra.mrb[48].mxu0 %v2931_v41 }
  0x87   : > { %2867 = vmatmul.mubr.bf16.gmra.mrb[48].mxu1 %v2931_v41  ;;  %2790 = vmatprep.mubr.bf16.mxu0 %v2932_v42 }
  0x88   : > { %2870 = vmatprep.mubr.bf16.mxu1 %v2932_v42 }
  0x8e   : > { %2791 = vmatmul.mubr.bf16.gmra.mrb[52].mxu0 %v2933_v43 }
  0x8f   : > { %2871 = vmatmul.mubr.bf16.gmra.mrb[52].mxu1 %v2933_v43  ;;  %2794 = vmatprep.mubr.bf16.mxu0 %v2934_v44 }
  0x90   : > { %2874 = vmatprep.mubr.bf16.mxu1 %v2934_v44 }
  0x96   : > { %2795 = vmatmul.mubr.bf16.gmra.mrb[56].mxu0 %v2935_v45 }
  0x97   : > { %2875 = vmatmul.mubr.bf16.gmra.mrb[56].mxu1 %v2935_v45  ;;  %2798 = vmatprep.mubr.bf16.mxu0 %v2936_v46 }
  0x98   : > { %2878 = vmatprep.mubr.bf16.mxu1 %v2936_v46 }
  0x9e   : > { %2799 = vmatmul.mubr.bf16.gmra.mrb[60].mxu0 %v2937_v47 }
  0x9f   : > { %2879 = vmatmul.mubr.bf16.gmra.mrb[60].mxu1 %v2937_v47 }
  0xf9   : > { %v2740_v48 = vpop.f32.mrb[0].mxu0 }
  0xfa   : > { %v2820_v49 = vpop.f32.mrb[0].mxu1  ;;  %v597_v51 = vpop.f32.mrb[1].mxu0 }
  0xfb   : > { %v1277_v52 = vpop.f32.mrb[1].mxu1  ;;  %v2741_v53 = vpop.f32.mrb[2].mxu0  ;;  %v1286_v57 = vadd.f32 %v2820_v49, %v3075_v50 }
  0xfc   : > { %v2268_v54 = vpack.c.bf16 %v2741_v53, %v2740_v48  ;;  %v2821_v55 = vpop.f32.mrb[2].mxu1  ;;  %v600_v56 = vpop.f32.mrb[3].mxu0  ;;  %v1278_v61 = vadd.f32 %v3075_v50, %v1277_v52 }
  0xfd   : > { %v1289_v58 = vadd.f32 %v2821_v55, %v3075_v50  ;;  %v2263_v59 = vpack.c.bf16 %v600_v56, %v597_v51  ;;  %v1280_v60 = vpop.f32.mrb[3].mxu1 }
  0xfe   : > { %2580 = vst [vmem:[%s3081_s13 + $0x8] sm:$0xff] %v2268_v54   ;;  %v1281_v62 = vadd.f32 %v3075_v50, %v1280_v60 }
  0xff   : > { %v2428_v63 = vpack.c.bf16 %v1289_v58, %v1286_v57  ;;  %2264 = vst [vmem:[%s3081_s13] sm:$0xff] %v2263_v59  }
 0x100   : > { %v2423_v0 = vpack.c.bf16 %v1281_v62, %v1278_v61 }
 0x101   : > { %2611 = vst [vmem:[%s3091_s16 + $0x8] sm:$0xff] %v2428_v63   ;;  %v2744_v1 = vpop.f32.mrb[4].mxu0 }
 0x102   : > { %2424 = vst [vmem:[%s3091_s16] sm:$0xff] %v2423_v0   ;;  %v2824_v2 = vpop.f32.mrb[4].mxu1  ;;  %v613_v3 = vpop.f32.mrb[5].mxu0 }
 0x103   : > { %v1293_v4 = vpop.f32.mrb[5].mxu1  ;;  %v2745_v5 = vpop.f32.mrb[6].mxu0  ;;  %v1302_v9 = vadd.f32 %v2824_v2, %v3075_v50 }
 0x104   : > { %v2278_v6 = vpack.c.bf16 %v2745_v5, %v2744_v1  ;;  %v2825_v7 = vpop.f32.mrb[6].mxu1  ;;  %v616_v8 = vpop.f32.mrb[7].mxu0  ;;  %v1294_v13 = vadd.f32 %v3075_v50, %v1293_v4 }
 0x105   : > { %v1305_v10 = vadd.f32 %v2825_v7, %v3075_v50  ;;  %v2273_v11 = vpack.c.bf16 %v616_v8, %v613_v3  ;;  %v1296_v12 = vpop.f32.mrb[7].mxu1 }
 0x106   : > { %2582 = vst [vmem:[%s3081_s13 + $0x18] sm:$0xff] %v2278_v6   ;;  %v1297_v14 = vadd.f32 %v3075_v50, %v1296_v12 }
 0x107   : > { %v2438_v15 = vpack.c.bf16 %v1305_v10, %v1302_v9  ;;  %2581 = vst [vmem:[%s3081_s13 + $0x10] sm:$0xff] %v2273_v11  }
 0x108   : > { %v2433_v16 = vpack.c.bf16 %v1297_v14, %v1294_v13 }
 0x109   : > { %2613 = vst [vmem:[%s3091_s16 + $0x18] sm:$0xff] %v2438_v15   ;;  %v2748_v17 = vpop.f32.mrb[8].mxu0 }
 0x10a   : > { %2612 = vst [vmem:[%s3091_s16 + $0x10] sm:$0xff] %v2433_v16   ;;  %v2828_v18 = vpop.f32.mrb[8].mxu1  ;;  %v629_v19 = vpop.f32.mrb[9].mxu0 }
 0x10b   : > { %v1309_v20 = vpop.f32.mrb[9].mxu1  ;;  %v2749_v21 = vpop.f32.mrb[10].mxu0  ;;  %v1318_v25 = vadd.f32 %v2828_v18, %v3075_v50 }
 0x10c   : > { %v2288_v22 = vpack.c.bf16 %v2749_v21, %v2748_v17  ;;  %v2829_v23 = vpop.f32.mrb[10].mxu1  ;;  %v632_v24 = vpop.f32.mrb[11].mxu0  ;;  %v1310_v29 = vadd.f32 %v3075_v50, %v1309_v20 }
 0x10d   : > { %v1321_v26 = vadd.f32 %v2829_v23, %v3075_v50  ;;  %v2283_v27 = vpack.c.bf16 %v632_v24, %v629_v19  ;;  %v1312_v28 = vpop.f32.mrb[11].mxu1 }
 0x10e   : > { %2584 = vst [vmem:[%s3081_s13 + $0x28] sm:$0xff] %v2288_v22   ;;  %v1313_v30 = vadd.f32 %v3075_v50, %v1312_v28 }
 0x10f   : > { %v2448_v31 = vpack.c.bf16 %v1321_v26, %v1318_v25  ;;  %2583 = vst [vmem:[%s3081_s13 + $0x20] sm:$0xff] %v2283_v27  }
 0x110   : > { %v2443_v32 = vpack.c.bf16 %v1313_v30, %v1310_v29 }
 0x111   : > { %2615 = vst [vmem:[%s3091_s16 + $0x28] sm:$0xff] %v2448_v31   ;;  %v2752_v33 = vpop.f32.mrb[12].mxu0 }
 0x112   : > { %2614 = vst [vmem:[%s3091_s16 + $0x20] sm:$0xff] %v2443_v32   ;;  %v2832_v34 = vpop.f32.mrb[12].mxu1  ;;  %v645_v35 = vpop.f32.mrb[13].mxu0 }
 0x113   : > { %v1325_v36 = vpop.f32.mrb[13].mxu1  ;;  %v2753_v37 = vpop.f32.mrb[14].mxu0  ;;  %v1334_v41 = vadd.f32 %v2832_v34, %v3075_v50 }
 0x114   : > { %v2298_v38 = vpack.c.bf16 %v2753_v37, %v2752_v33  ;;  %v2833_v39 = vpop.f32.mrb[14].mxu1  ;;  %v648_v40 = vpop.f32.mrb[15].mxu0  ;;  %v1326_v45 = vadd.f32 %v3075_v50, %v1325_v36 }
 0x115   : > { %v1337_v42 = vadd.f32 %v2833_v39, %v3075_v50  ;;  %v2293_v43 = vpack.c.bf16 %v648_v40, %v645_v35  ;;  %v1328_v44 = vpop.f32.mrb[15].mxu1 }
 0x116   : > { %2586 = vst [vmem:[%s3081_s13 + $0x38] sm:$0xff] %v2298_v38   ;;  %v1329_v46 = vadd.f32 %v3075_v50, %v1328_v44 }
 0x117   : > { %v2458_v47 = vpack.c.bf16 %v1337_v42, %v1334_v41  ;;  %2585 = vst [vmem:[%s3081_s13 + $0x30] sm:$0xff] %v2293_v43  }
 0x118   : > { %v2453_v48 = vpack.c.bf16 %v1329_v46, %v1326_v45 }
 0x119   : > { %2617 = vst [vmem:[%s3091_s16 + $0x38] sm:$0xff] %v2458_v47   ;;  %v2756_v49 = vpop.f32.mrb[16].mxu0 }
 0x11a   : > { %2616 = vst [vmem:[%s3091_s16 + $0x30] sm:$0xff] %v2453_v48   ;;  %v2836_v51 = vpop.f32.mrb[16].mxu1  ;;  %v661_v52 = vpop.f32.mrb[17].mxu0 }
 0x11b   : > { %v1341_v53 = vpop.f32.mrb[17].mxu1  ;;  %v2757_v54 = vpop.f32.mrb[18].mxu0  ;;  %v1350_v58 = vadd.f32 %v2836_v51, %v3075_v50 }
 0x11c   : > { %v2308_v55 = vpack.c.bf16 %v2757_v54, %v2756_v49  ;;  %v2837_v56 = vpop.f32.mrb[18].mxu1  ;;  %v664_v57 = vpop.f32.mrb[19].mxu0  ;;  %v1342_v62 = vadd.f32 %v3075_v50, %v1341_v53 }
 0x11d   : > { %v1353_v59 = vadd.f32 %v2837_v56, %v3075_v50  ;;  %v2303_v60 = vpack.c.bf16 %v664_v57, %v661_v52  ;;  %v1344_v61 = vpop.f32.mrb[19].mxu1 }
 0x11e   : > { %2588 = vst [vmem:[%s3081_s13 + $0x48] sm:$0xff] %v2308_v55   ;;  %v1345_v63 = vadd.f32 %v3075_v50, %v1344_v61 }
 0x11f   : > { %v2468_v0 = vpack.c.bf16 %v1353_v59, %v1350_v58  ;;  %2587 = vst [vmem:[%s3081_s13 + $0x40] sm:$0xff] %v2303_v60  }
 0x120   : > { %v2463_v1 = vpack.c.bf16 %v1345_v63, %v1342_v62 }
 0x121   : > { %2619 = vst [vmem:[%s3091_s16 + $0x48] sm:$0xff] %v2468_v0   ;;  %v2760_v2 = vpop.f32.mrb[20].mxu0 }
 0x122   : > { %2618 = vst [vmem:[%s3091_s16 + $0x40] sm:$0xff] %v2463_v1   ;;  %v2840_v3 = vpop.f32.mrb[20].mxu1  ;;  %v677_v4 = vpop.f32.mrb[21].mxu0 }
 0x123   : > { %v1357_v5 = vpop.f32.mrb[21].mxu1  ;;  %v2761_v6 = vpop.f32.mrb[22].mxu0  ;;  %v1366_v10 = vadd.f32 %v2840_v3, %v3075_v50 }
 0x124   : > { %v2318_v7 = vpack.c.bf16 %v2761_v6, %v2760_v2  ;;  %v2841_v8 = vpop.f32.mrb[22].mxu1  ;;  %v680_v9 = vpop.f32.mrb[23].mxu0  ;;  %v1358_v14 = vadd.f32 %v3075_v50, %v1357_v5 }
 0x125   : > { %v1369_v11 = vadd.f32 %v2841_v8, %v3075_v50  ;;  %v2313_v12 = vpack.c.bf16 %v680_v9, %v677_v4  ;;  %v1360_v13 = vpop.f32.mrb[23].mxu1 }
 0x126   : > { %2590 = vst [vmem:[%s3081_s13 + $0x58] sm:$0xff] %v2318_v7   ;;  %v1361_v15 = vadd.f32 %v3075_v50, %v1360_v13 }
 0x127   : > { %v2478_v16 = vpack.c.bf16 %v1369_v11, %v1366_v10  ;;  %2589 = vst [vmem:[%s3081_s13 + $0x50] sm:$0xff] %v2313_v12  }
 0x128   : > { %v2473_v17 = vpack.c.bf16 %v1361_v15, %v1358_v14 }
 0x129   : > { %2621 = vst [vmem:[%s3091_s16 + $0x58] sm:$0xff] %v2478_v16   ;;  %v2764_v18 = vpop.f32.mrb[24].mxu0 }
 0x12a   : > { %2620 = vst [vmem:[%s3091_s16 + $0x50] sm:$0xff] %v2473_v17   ;;  %v2844_v19 = vpop.f32.mrb[24].mxu1  ;;  %v693_v20 = vpop.f32.mrb[25].mxu0 }
 0x12b   : > { %v1373_v21 = vpop.f32.mrb[25].mxu1  ;;  %v2765_v22 = vpop.f32.mrb[26].mxu0  ;;  %v1382_v26 = vadd.f32 %v2844_v19, %v3075_v50 }
 0x12c   : > { %v2328_v23 = vpack.c.bf16 %v2765_v22, %v2764_v18  ;;  %v2845_v24 = vpop.f32.mrb[26].mxu1  ;;  %v696_v25 = vpop.f32.mrb[27].mxu0  ;;  %v1374_v30 = vadd.f32 %v3075_v50, %v1373_v21 }
 0x12d   : > { %v1385_v27 = vadd.f32 %v2845_v24, %v3075_v50  ;;  %v2323_v28 = vpack.c.bf16 %v696_v25, %v693_v20  ;;  %v1376_v29 = vpop.f32.mrb[27].mxu1 }
 0x12e   : > { %2592 = vst [vmem:[%s3081_s13 + $0x68] sm:$0xff] %v2328_v23   ;;  %v1377_v31 = vadd.f32 %v3075_v50, %v1376_v29 }
 0x12f   : > { %v2488_v32 = vpack.c.bf16 %v1385_v27, %v1382_v26  ;;  %2591 = vst [vmem:[%s3081_s13 + $0x60] sm:$0xff] %v2323_v28  }
 0x130   : > { %v2483_v33 = vpack.c.bf16 %v1377_v31, %v1374_v30 }
 0x131   : > { %2623 = vst [vmem:[%s3091_s16 + $0x68] sm:$0xff] %v2488_v32   ;;  %v2768_v34 = vpop.f32.mrb[28].mxu0 }
 0x132   : > { %2622 = vst [vmem:[%s3091_s16 + $0x60] sm:$0xff] %v2483_v33   ;;  %v2848_v35 = vpop.f32.mrb[28].mxu1  ;;  %v709_v36 = vpop.f32.mrb[29].mxu0 }
 0x133   : > { %v1389_v37 = vpop.f32.mrb[29].mxu1  ;;  %v2769_v38 = vpop.f32.mrb[30].mxu0  ;;  %v1398_v42 = vadd.f32 %v2848_v35, %v3075_v50 }
 0x134   : > { %v2338_v39 = vpack.c.bf16 %v2769_v38, %v2768_v34  ;;  %v2849_v40 = vpop.f32.mrb[30].mxu1  ;;  %v712_v41 = vpop.f32.mrb[31].mxu0  ;;  %v1390_v46 = vadd.f32 %v3075_v50, %v1389_v37 }
 0x135   : > { %v1401_v43 = vadd.f32 %v2849_v40, %v3075_v50  ;;  %v2333_v44 = vpack.c.bf16 %v712_v41, %v709_v36  ;;  %v1392_v45 = vpop.f32.mrb[31].mxu1 }
 0x136   : > { %2594 = vst [vmem:[%s3081_s13 + $0x78] sm:$0xff] %v2338_v39   ;;  %v1393_v47 = vadd.f32 %v3075_v50, %v1392_v45 }
 0x137   : > { %v2498_v48 = vpack.c.bf16 %v1401_v43, %v1398_v42  ;;  %2593 = vst [vmem:[%s3081_s13 + $0x70] sm:$0xff] %v2333_v44  }
 0x138   : > { %v2493_v49 = vpack.c.bf16 %v1393_v47, %v1390_v46 }
 0x139   : > { %2625 = vst [vmem:[%s3091_s16 + $0x78] sm:$0xff] %v2498_v48   ;;  %v2772_v51 = vpop.f32.mrb[32].mxu0 }
 0x13a   : > { %2624 = vst [vmem:[%s3091_s16 + $0x70] sm:$0xff] %v2493_v49   ;;  %v2852_v52 = vpop.f32.mrb[32].mxu1  ;;  %v725_v53 = vpop.f32.mrb[33].mxu0 }
 0x13b   : > { %v1405_v54 = vpop.f32.mrb[33].mxu1  ;;  %v2773_v55 = vpop.f32.mrb[34].mxu0  ;;  %v1414_v59 = vadd.f32 %v2852_v52, %v3075_v50 }
 0x13c   : > { %v2348_v56 = vpack.c.bf16 %v2773_v55, %v2772_v51  ;;  %v2853_v57 = vpop.f32.mrb[34].mxu1  ;;  %v728_v58 = vpop.f32.mrb[35].mxu0  ;;  %v1406_v63 = vadd.f32 %v3075_v50, %v1405_v54 }
 0x13d   : > { %v1417_v60 = vadd.f32 %v2853_v57, %v3075_v50  ;;  %v2343_v61 = vpack.c.bf16 %v728_v58, %v725_v53  ;;  %v1408_v62 = vpop.f32.mrb[35].mxu1 }
 0x13e   : > { %2596 = vst [vmem:[%s3081_s13 + $0x88] sm:$0xff] %v2348_v56   ;;  %v1409_v0 = vadd.f32 %v3075_v50, %v1408_v62 }
 0x13f   : > { %v2508_v1 = vpack.c.bf16 %v1417_v60, %v1414_v59  ;;  %2595 = vst [vmem:[%s3081_s13 + $0x80] sm:$0xff] %v2343_v61  }
 0x140   : > { %v2503_v2 = vpack.c.bf16 %v1409_v0, %v1406_v63 }
 0x141   : > { %2627 = vst [vmem:[%s3091_s16 + $0x88] sm:$0xff] %v2508_v1   ;;  %v2776_v3 = vpop.f32.mrb[36].mxu0 }
 0x142   : > { %2626 = vst [vmem:[%s3091_s16 + $0x80] sm:$0xff] %v2503_v2   ;;  %v2856_v4 = vpop.f32.mrb[36].mxu1  ;;  %v741_v5 = vpop.f32.mrb[37].mxu0 }
 0x143   : > { %v1421_v6 = vpop.f32.mrb[37].mxu1  ;;  %v2777_v7 = vpop.f32.mrb[38].mxu0  ;;  %v1430_v11 = vadd.f32 %v2856_v4, %v3075_v50 }
 0x144   : > { %v2358_v8 = vpack.c.bf16 %v2777_v7, %v2776_v3  ;;  %v2857_v9 = vpop.f32.mrb[38].mxu1  ;;  %v744_v10 = vpop.f32.mrb[39].mxu0  ;;  %v1422_v15 = vadd.f32 %v3075_v50, %v1421_v6 }
 0x145   : > { %v1433_v12 = vadd.f32 %v2857_v9, %v3075_v50  ;;  %v2353_v13 = vpack.c.bf16 %v744_v10, %v741_v5  ;;  %v1424_v14 = vpop.f32.mrb[39].mxu1 }
 0x146   : > { %2598 = vst [vmem:[%s3081_s13 + $0x98] sm:$0xff] %v2358_v8   ;;  %v1425_v16 = vadd.f32 %v3075_v50, %v1424_v14 }
 0x147   : > { %v2518_v17 = vpack.c.bf16 %v1433_v12, %v1430_v11  ;;  %2597 = vst [vmem:[%s3081_s13 + $0x90] sm:$0xff] %v2353_v13  }
 0x148   : > { %v2513_v18 = vpack.c.bf16 %v1425_v16, %v1422_v15 }
 0x149   : > { %2629 = vst [vmem:[%s3091_s16 + $0x98] sm:$0xff] %v2518_v17   ;;  %v2780_v19 = vpop.f32.mrb[40].mxu0 }
 0x14a   : > { %2628 = vst [vmem:[%s3091_s16 + $0x90] sm:$0xff] %v2513_v18   ;;  %v2860_v20 = vpop.f32.mrb[40].mxu1  ;;  %v757_v21 = vpop.f32.mrb[41].mxu0 }
 0x14b   : > { %v1437_v22 = vpop.f32.mrb[41].mxu1  ;;  %v2781_v23 = vpop.f32.mrb[42].mxu0  ;;  %v1446_v27 = vadd.f32 %v2860_v20, %v3075_v50 }
 0x14c   : > { %v2368_v24 = vpack.c.bf16 %v2781_v23, %v2780_v19  ;;  %v2861_v25 = vpop.f32.mrb[42].mxu1  ;;  %v760_v26 = vpop.f32.mrb[43].mxu0  ;;  %v1438_v31 = vadd.f32 %v3075_v50, %v1437_v22 }
 0x14d   : > { %v1449_v28 = vadd.f32 %v2861_v25, %v3075_v50  ;;  %v2363_v29 = vpack.c.bf16 %v760_v26, %v757_v21  ;;  %v1440_v30 = vpop.f32.mrb[43].mxu1 }
 0x14e   : > { %2600 = vst [vmem:[%s3081_s13 + $0xa8] sm:$0xff] %v2368_v24   ;;  %v1441_v32 = vadd.f32 %v3075_v50, %v1440_v30 }
 0x14f   : > { %v2528_v33 = vpack.c.bf16 %v1449_v28, %v1446_v27  ;;  %2599 = vst [vmem:[%s3081_s13 + $0xa0] sm:$0xff] %v2363_v29  }
 0x150   : > { %v2523_v34 = vpack.c.bf16 %v1441_v32, %v1438_v31 }
 0x151   : > { %2631 = vst [vmem:[%s3091_s16 + $0xa8] sm:$0xff] %v2528_v33   ;;  %v2784_v35 = vpop.f32.mrb[44].mxu0 }
 0x152   : > { %2630 = vst [vmem:[%s3091_s16 + $0xa0] sm:$0xff] %v2523_v34   ;;  %v2864_v36 = vpop.f32.mrb[44].mxu1  ;;  %v773_v37 = vpop.f32.mrb[45].mxu0 }
 0x153   : > { %v1453_v38 = vpop.f32.mrb[45].mxu1  ;;  %v2785_v39 = vpop.f32.mrb[46].mxu0  ;;  %v1462_v43 = vadd.f32 %v2864_v36, %v3075_v50 }
 0x154   : > { %v2378_v40 = vpack.c.bf16 %v2785_v39, %v2784_v35  ;;  %v2865_v41 = vpop.f32.mrb[46].mxu1  ;;  %v776_v42 = vpop.f32.mrb[47].mxu0  ;;  %v1454_v47 = vadd.f32 %v3075_v50, %v1453_v38 }
 0x155   : > { %v1465_v44 = vadd.f32 %v2865_v41, %v3075_v50  ;;  %v2373_v45 = vpack.c.bf16 %v776_v42, %v773_v37  ;;  %v1456_v46 = vpop.f32.mrb[47].mxu1 }
 0x156   : > { %2602 = vst [vmem:[%s3081_s13 + $0xb8] sm:$0xff] %v2378_v40   ;;  %v1457_v48 = vadd.f32 %v3075_v50, %v1456_v46 }
 0x157   : > { %v2538_v49 = vpack.c.bf16 %v1465_v44, %v1462_v43  ;;  %2601 = vst [vmem:[%s3081_s13 + $0xb0] sm:$0xff] %v2373_v45  }
 0x158   : > { %v2533_v51 = vpack.c.bf16 %v1457_v48, %v1454_v47 }
 0x159   : > { %2633 = vst [vmem:[%s3091_s16 + $0xb8] sm:$0xff] %v2538_v49   ;;  %v2788_v52 = vpop.f32.mrb[48].mxu0 }
 0x15a   : > { %2632 = vst [vmem:[%s3091_s16 + $0xb0] sm:$0xff] %v2533_v51   ;;  %v2868_v53 = vpop.f32.mrb[48].mxu1  ;;  %v789_v54 = vpop.f32.mrb[49].mxu0 }
 0x15b   : > { %v1469_v55 = vpop.f32.mrb[49].mxu1  ;;  %v2789_v56 = vpop.f32.mrb[50].mxu0  ;;  %v1478_v60 = vadd.f32 %v2868_v53, %v3075_v50 }
 0x15c   : > { %v2388_v57 = vpack.c.bf16 %v2789_v56, %v2788_v52  ;;  %v2869_v58 = vpop.f32.mrb[50].mxu1  ;;  %v792_v59 = vpop.f32.mrb[51].mxu0  ;;  %v1470_v0 = vadd.f32 %v3075_v50, %v1469_v55 }
 0x15d   : > { %v1481_v61 = vadd.f32 %v2869_v58, %v3075_v50  ;;  %v2383_v62 = vpack.c.bf16 %v792_v59, %v789_v54  ;;  %v1472_v63 = vpop.f32.mrb[51].mxu1 }
 0x15e   : > { %2604 = vst [vmem:[%s3081_s13 + $0xc8] sm:$0xff] %v2388_v57   ;;  %v1473_v1 = vadd.f32 %v3075_v50, %v1472_v63 }
 0x15f   : > { %v2548_v2 = vpack.c.bf16 %v1481_v61, %v1478_v60  ;;  %2603 = vst [vmem:[%s3081_s13 + $0xc0] sm:$0xff] %v2383_v62  }
 0x160   : > { %v2543_v3 = vpack.c.bf16 %v1473_v1, %v1470_v0 }
 0x161   : > { %2635 = vst [vmem:[%s3091_s16 + $0xc8] sm:$0xff] %v2548_v2   ;;  %v2792_v4 = vpop.f32.mrb[52].mxu0 }
 0x162   : > { %2634 = vst [vmem:[%s3091_s16 + $0xc0] sm:$0xff] %v2543_v3   ;;  %v2872_v5 = vpop.f32.mrb[52].mxu1  ;;  %v805_v6 = vpop.f32.mrb[53].mxu0 }
 0x163   : > { %v1485_v7 = vpop.f32.mrb[53].mxu1  ;;  %v2793_v8 = vpop.f32.mrb[54].mxu0  ;;  %v1494_v12 = vadd.f32 %v2872_v5, %v3075_v50 }
 0x164   : > { %v2398_v9 = vpack.c.bf16 %v2793_v8, %v2792_v4  ;;  %v2873_v10 = vpop.f32.mrb[54].mxu1  ;;  %v808_v11 = vpop.f32.mrb[55].mxu0  ;;  %v1486_v16 = vadd.f32 %v3075_v50, %v1485_v7 }
 0x165   : > { %v1497_v13 = vadd.f32 %v2873_v10, %v3075_v50  ;;  %v2393_v14 = vpack.c.bf16 %v808_v11, %v805_v6  ;;  %v1488_v15 = vpop.f32.mrb[55].mxu1 }
 0x166   : > { %2606 = vst [vmem:[%s3081_s13 + $0xd8] sm:$0xff] %v2398_v9   ;;  %v1489_v17 = vadd.f32 %v3075_v50, %v1488_v15 }
 0x167   : > { %v2558_v18 = vpack.c.bf16 %v1497_v13, %v1494_v12  ;;  %2605 = vst [vmem:[%s3081_s13 + $0xd0] sm:$0xff] %v2393_v14  }
 0x168   : > { %v2553_v19 = vpack.c.bf16 %v1489_v17, %v1486_v16 }
 0x169   : > { %2637 = vst [vmem:[%s3091_s16 + $0xd8] sm:$0xff] %v2558_v18   ;;  %v2796_v20 = vpop.f32.mrb[56].mxu0 }
 0x16a   : > { %2636 = vst [vmem:[%s3091_s16 + $0xd0] sm:$0xff] %v2553_v19   ;;  %v2876_v21 = vpop.f32.mrb[56].mxu1  ;;  %v821_v22 = vpop.f32.mrb[57].mxu0 }
 0x16b   : > { %v1501_v23 = vpop.f32.mrb[57].mxu1  ;;  %v2797_v24 = vpop.f32.mrb[58].mxu0  ;;  %v1510_v28 = vadd.f32 %v2876_v21, %v3075_v50 }
 0x16c   : > { %v2408_v25 = vpack.c.bf16 %v2797_v24, %v2796_v20  ;;  %v2877_v26 = vpop.f32.mrb[58].mxu1  ;;  %v824_v27 = vpop.f32.mrb[59].mxu0  ;;  %v1502_v32 = vadd.f32 %v3075_v50, %v1501_v23 }
 0x16d   : > { %v1513_v29 = vadd.f32 %v2877_v26, %v3075_v50  ;;  %v2403_v30 = vpack.c.bf16 %v824_v27, %v821_v22  ;;  %v1504_v31 = vpop.f32.mrb[59].mxu1 }
 0x16e   : > { %2608 = vst [vmem:[%s3081_s13 + $0xe8] sm:$0xff] %v2408_v25   ;;  %v1505_v33 = vadd.f32 %v3075_v50, %v1504_v31 }
 0x16f   : > { %v2568_v34 = vpack.c.bf16 %v1513_v29, %v1510_v28  ;;  %2607 = vst [vmem:[%s3081_s13 + $0xe0] sm:$0xff] %v2403_v30  }
 0x170   : > { %v2563_v35 = vpack.c.bf16 %v1505_v33, %v1502_v32 }
 0x171   : > { %2639 = vst [vmem:[%s3091_s16 + $0xe8] sm:$0xff] %v2568_v34   ;;  %v2800_v36 = vpop.f32.mrb[60].mxu0 }
 0x172   : > { %2638 = vst [vmem:[%s3091_s16 + $0xe0] sm:$0xff] %v2563_v35   ;;  %v2880_v37 = vpop.f32.mrb[60].mxu1  ;;  %v837_v38 = vpop.f32.mrb[61].mxu0 }
 0x173   : > { %v1517_v39 = vpop.f32.mrb[61].mxu1  ;;  %v2801_v40 = vpop.f32.mrb[62].mxu0  ;;  %v1526_v44 = vadd.f32 %v2880_v37, %v3075_v50 }
 0x174   : > { %v2418_v41 = vpack.c.bf16 %v2801_v40, %v2800_v36  ;;  %v2881_v42 = vpop.f32.mrb[62].mxu1  ;;  %v840_v43 = vpop.f32.mrb[63].mxu0  ;;  %v1518_v48 = vadd.f32 %v3075_v50, %v1517_v39 }
 0x175   : > { %v1529_v45 = vadd.f32 %v2881_v42, %v3075_v50  ;;  %v2413_v46 = vpack.c.bf16 %v840_v43, %v837_v38  ;;  %v1520_v47 = vpop.f32.mrb[63].mxu1 }
 0x176   : > { %2610 = vst [vmem:[%s3081_s13 + $0xf8] sm:$0xff] %v2418_v41   ;;  %v1521_v49 = vadd.f32 %v3075_v50, %v1520_v47 }
 0x177   : > { %v2578_v51 = vpack.c.bf16 %v1529_v45, %v1526_v44  ;;  %2609 = vst [vmem:[%s3081_s13 + $0xf0] sm:$0xff] %v2413_v46  }
 0x178   : > { %v2573_v52 = vpack.c.bf16 %v1521_v49, %v1518_v48 }
 0x179   : > { %2641 = vst [vmem:[%s3091_s16 + $0xf8] sm:$0xff] %v2578_v51  }
 0x17a   : > { %2640 = vst [vmem:[%s3091_s16 + $0xf0] sm:$0xff] %v2573_v52  }
 0x17b PF: > { %s16_s18 = sadd.s32 1, %s2944_s18  }
 0x17c   : > { %p13_p4 = scmp.ge.s32.totalorder %s16_s18, 6  }
 0x17e   :  { %15 = sbr.rel (!%p13_p4) target bundleno = 1 (0x1), region = 78 }

// kernel: gnn_encoder.5
= control target key start
LH: loop header
LB: loop body
LE: loop exit
PB: predicated region body
PF: predicated region fallthrough
CT: control target
= control target key end

     0   :  { %s10784_s15 = smov 0   ;;  %s10786_s16 = smov 0   ;;  %s12147_s0 = inlined_call_operand.vmem [shape: s8[2048,2048], index: 0, kind: input, shape index: {}]   ;;  %s12148_s1 = inlined_call_operand.vmem [shape: bf16[2048,128], index: 1, kind: input, shape index: {}]   ;;  %s12149_s2 = inlined_call_operand.vmem [shape: bf16[2048,128], index: 2, kind: input, shape index: {}]   ;;  %s12150_s3 = inlined_call_operand.vmem [shape: f32[2048,1], index: 3, kind: input, shape index: {}]   ;;  %s12151_s4 = inlined_call_operand.vmem [shape: bf16[2048,128], index: 4, kind: output, shape index: {}]  }
   0x1   :  { %s10788_s17 = smov 0  }
   0x2 LB: > { %s26_s18 = sadd.s32 1, %s10752_s16  ;;  %p8398_p0 = scmp.ge.s32.totalorder %s10756_s17, 1  ;;  %s10756_s17 = sphi %s10788_s17, %s14_s17   ;;  %s10752_s16 = sphi %s10786_s16, %s12153_s16   ;;  %s10748_s15 = sphi %s10784_s15, %s12152_s15  }
   0x3   : > { %p28_p1 = scmp.ge.s32.totalorder %s26_s18, 4  ;;  %p205_p2 = scmp.lt.s32.totalorder %s10756_s17, 5 }
   0x5   : > { %s12155_s18 = smov (%p28_p1, %s26_s18), 0  ;;  %p206_p3 = pnand %p8398_p0, %p205_p2 }
   0x6   : > { %v10388_v0 = vld [vmem:[%s12148_s1] sm:$0xff] (!%p206_p3)   ;;  %v10758_v1 = vmov (!%p206_p3), 0   ;;  %v10390_v3 = vld [vmem:[%s12148_s1 + $0x8] sm:$0xff] (!%p206_p3)   ;;  %v10392_v5 = vld [vmem:[%s12148_s1 + $0x10] sm:$0xff] (!%p206_p3)   ;;  %s8399_s13 = sshll.u32 (!%p206_p3), %s10748_s15, 6 }
   0x7   : > { %209 = sbr.rel (%p206_p3) target bundleno = 1313 (0x521), region = 36  ;;  %4766 = vmatprep.subr.bf16.mxu1 (!%p206_p3), %v10758_v1  ;;  %5922 = vmatprep.subr.bf16.mxu0 (!%p206_p3), %v10758_v1  ;;  %v10389_v2 = vld [vmem:[%s12148_s1 + $0x200] sm:$0xff] (!%p206_p3)   ;;  %v10391_v4 = vld [vmem:[%s12148_s1 + $0x208] sm:$0xff] (!%p206_p3)   ;;  %v10393_v6 = vld [vmem:[%s12148_s1 + $0x210] sm:$0xff] (!%p206_p3)   ;;  %p248_p4 = scmp.lt.s32.totalorder (!%p206_p3), %s8399_s13, 255 }
   0x8   : > { %4767 = vmatpush1.bf16.msra.mxu1 (!%p206_p3), %v10388_v0  ;;  %10386 = vset.pattern.permute.xlu0 (!%p206_p3), %v10758_v1  ;;  %v10394_v7 = vld [vmem:[%s12148_s1 + $0x18] sm:$0xff] (!%p206_p3)   ;;  %v10396_v9 = vld [vmem:[%s12148_s1 + $0x20] sm:$0xff] (!%p206_p3)   ;;  %v10398_v11 = vld [vmem:[%s12148_s1 + $0x28] sm:$0xff] (!%p206_p3)  }
   0x9   : > { %5923 = vmatpush1.bf16.msra.mxu0 (!%p206_p3), %v10389_v2  ;;  %4768 = vmatprep.subr.bf16.mxu1 (!%p206_p3), %v10758_v1  ;;  %v10395_v8 = vld [vmem:[%s12148_s1 + $0x218] sm:$0xff] (!%p206_p3)   ;;  %v10397_v10 = vld [vmem:[%s12148_s1 + $0x220] sm:$0xff] (!%p206_p3)   ;;  %v10399_v12 = vld [vmem:[%s12148_s1 + $0x228] sm:$0xff] (!%p206_p3)  }
   0xa   : > { %5924 = vmatprep.subr.bf16.mxu0 (!%p206_p3), %v10758_v1  ;;  %10387 = vset.pattern.permute.xlu1 (!%p206_p3), %v10758_v1  ;;  %v10400_v13 = vld [vmem:[%s12148_s1 + $0x30] sm:$0xff] (!%p206_p3)   ;;  %v10402_v15 = vld [vmem:[%s12148_s1 + $0x38] sm:$0xff] (!%p206_p3)   ;;  %v10404_v17 = vld [vmem:[%s12148_s1 + $0x40] sm:$0xff] (!%p206_p3)  }
   0xb   : > { %v10401_v14 = vld [vmem:[%s12148_s1 + $0x230] sm:$0xff] (!%p206_p3)   ;;  %v10403_v16 = vld [vmem:[%s12148_s1 + $0x238] sm:$0xff] (!%p206_p3)   ;;  %v10405_v18 = vld [vmem:[%s12148_s1 + $0x240] sm:$0xff] (!%p206_p3)  }
   0xc   : > { %4769 = vmatpush1.bf16.msra.mxu1 (!%p206_p3), %v10390_v3  ;;  %v10406_v27 = vld [vmem:[%s12148_s1 + $0x48] sm:$0xff] (!%p206_p3)   ;;  %v10408_v37 = vld [vmem:[%s12148_s1 + $0x50] sm:$0xff] (!%p206_p3)   ;;  %v10410_v39 = vld [vmem:[%s12148_s1 + $0x58] sm:$0xff] (!%p206_p3)  }
   0xd   : > { %5925 = vmatpush1.bf16.msra.mxu0 (!%p206_p3), %v10391_v4  ;;  %4770 = vmatprep.subr.bf16.mxu1 (!%p206_p3), %v10758_v1  ;;  %v10407_v32 = vld [vmem:[%s12148_s1 + $0x248] sm:$0xff] (!%p206_p3)   ;;  %v10409_v38 = vld [vmem:[%s12148_s1 + $0x250] sm:$0xff] (!%p206_p3)   ;;  %v10411_v40 = vld [vmem:[%s12148_s1 + $0x258] sm:$0xff] (!%p206_p3)  }
   0xe   : > { %5926 = vmatprep.subr.bf16.mxu0 %v10758_v1  ;;  %s12157_s13 = smov (!%p248_p4, %s8399_s13), 255  ;;  %v10412_v41 = vld [vmem:[%s12148_s1 + $0x60] sm:$0xff]   ;;  %v10414_v43 = vld [vmem:[%s12148_s1 + $0x68] sm:$0xff]   ;;  %v10416_v45 = vld [vmem:[%s12148_s1 + $0x70] sm:$0xff]  }
   0xf   : > { %s9114_s27 = sshll.u32 %s12157_s13, 5  ;;  %v10413_v42 = vld [vmem:[%s12148_s1 + $0x260] sm:$0xff]   ;;  %v10415_v44 = vld [vmem:[%s12148_s1 + $0x268] sm:$0xff]   ;;  %v10417_v46 = vld [vmem:[%s12148_s1 + $0x270] sm:$0xff]   ;;  %s8405_s25 = sshll.u32 %s12157_s13, 3 }
  0x10   : > { %4771 = vmatpush1.bf16.msra.mxu1 %v10392_v5  ;;  %s10877_s6 = scalar_lea.vmem %s12147_s0, %s9114_s27  ;;  %v10418_v51 = vld [vmem:[%s12148_s1 + $0x78] sm:$0xff]   ;;  %v10420_v59 = vld [vmem:[%s12148_s1 + $0x80] sm:$0xff]   ;;  %s11853_s28 = scalar_lea.vmem %s12150_s3, %s8405_s25 }
  0x11   : > { %5927 = vmatpush1.bf16.msra.mxu0 %v10393_v6  ;;  %4772 = vmatprep.subr.bf16.mxu1 %v10758_v1  ;;  %v10888_v19 = vld [vmem:[%s10877_s6] sm:$0xff]  ;;  %v10894_v21 = vld [vmem:[%s10877_s6 + $0x10] sm:$0xff]  ;;  %v10419_v52 = vld [vmem:[%s12148_s1 + $0x278] sm:$0xff]   ;;  %s8403_s29 = sshll.u32 %s12157_s13, 2 }
  0x12   : > { %5928 = vmatprep.subr.bf16.mxu0 %v10758_v1  ;;  %v10891_v20 = vld [vmem:[%s10877_s6 + $0x20] sm:$0xff]  ;;  %v862_v22 = vunpack.c.l.s8.bf16 %v10888_v19  ;;  %v863_v23 = vunpack.c.h.s8.bf16 %v10888_v19  ;;  %v10901_v26 = vld [vmem:[%s10877_s6 + $0x30] sm:$0xff]  ;;  %v866_v28 = vunpack.c.l.s8.bf16 %v10894_v21  ;;  %v867_v29 = vunpack.c.h.s8.bf16 %v10894_v21  ;;  %v10422_v6 = vld [vmem:[%s12148_s1 + $0x88] sm:$0xff]   ;;  %s12049_s7 = scalar_lea.vmem %s12149_s2, %s8403_s29  ;;  %s12066_s10 = scalar_lea.vmem %s12151_s4, %s8403_s29 }
  0x13   : > { %v870_v24 = vunpack.c.l.s8.bf16 %v10891_v20  ;;  %v871_v25 = vunpack.c.h.s8.bf16 %v10891_v20  ;;  %v874_v30 = vunpack.c.l.s8.bf16 %v10901_v26  ;;  %v875_v31 = vunpack.c.h.s8.bf16 %v10901_v26  ;;  %v614_v47 = vld [vmem:[%s10877_s6 + $0x40] sm:$0xff]  ;;  %v616_v49 = vld [vmem:[%s10877_s6 + $0x50] sm:$0xff] }
  0x14   : > { %4773 = vmatpush1.bf16.msra.mxu1 %v10394_v7  ;;  %v618_v48 = vld [vmem:[%s10877_s6 + $0x60] sm:$0xff]  ;;  %v620_v50 = vld [vmem:[%s10877_s6 + $0x70] sm:$0xff]  ;;  %v878_v53 = vunpack.c.l.s8.bf16 %v614_v47  ;;  %v882_v55 = vunpack.c.l.s8.bf16 %v616_v49 }
  0x15   : > { %5929 = vmatpush1.bf16.msra.mxu0 %v10395_v8  ;;  %4774 = vmatprep.subr.bf16.mxu1 %v10758_v1  ;;  %v8409_v33 = vcombine.high %v862_v22, %v870_v24  ;;  %v10922_v34 = vcombine.low %v863_v23, %v871_v25  ;;  %v8417_v35 = vcombine.high %v866_v28, %v874_v30  ;;  %v886_v54 = vunpack.c.l.s8.bf16 %v618_v48  ;;  %v10421_v60 = vld [vmem:[%s12148_s1 + $0x280] sm:$0xff]   ;;  %v624_v2 = vld [vmem:[%s10877_s6 + $0x90] sm:$0xff] }
  0x16   : > { %5930 = vmatprep.subr.bf16.mxu0 %v10758_v1  ;;  %v10929_v36 = vcombine.low %v867_v29, %v875_v31  ;;  %v890_v56 = vunpack.c.l.s8.bf16 %v620_v50  ;;  %v8408_v57 = vcombine.low %v862_v22, %v870_v24  ;;  %v8416_v58 = vcombine.low %v866_v28, %v874_v30  ;;  %v622_v62 = vld [vmem:[%s10877_s6 + $0x80] sm:$0xff]  ;;  %v628_v3 = vld [vmem:[%s10877_s6 + $0xb0] sm:$0xff]  ;;  %v10426_v28 = vld [vmem:[%s12148_s1 + $0x98] sm:$0xff]  }
  0x17   : > { %4798 = vmatprep.mubr.bf16.mxu1 %v8409_v33  ;;  %5954 = vmatprep.mubr.bf16.mxu0 %v8417_v35  ;;  %v8425_v61 = vcombine.high %v878_v53, %v886_v54  ;;  %v626_v63 = vld [vmem:[%s10877_s6 + $0xa0] sm:$0xff]  ;;  %v894_v4 = vunpack.c.l.s8.bf16 %v622_v62  ;;  %v898_v7 = vunpack.c.l.s8.bf16 %v624_v2  ;;  %v906_v8 = vunpack.c.l.s8.bf16 %v628_v3  ;;  %v10425_v22 = vld [vmem:[%s12148_s1 + $0x290] sm:$0xff]   ;;  %v10427_v33 = vld [vmem:[%s12148_s1 + $0x298] sm:$0xff]  }
  0x18   : > { %4775 = vmatpush1.bf16.msra.mxu1 %v10396_v9  ;;  %v8433_v0 = vcombine.high %v882_v55, %v890_v56  ;;  %v902_v5 = vunpack.c.l.s8.bf16 %v626_v63  ;;  %v10423_v9 = vld [vmem:[%s12148_s1 + $0x288] sm:$0xff]   ;;  %v754_v20 = vld [vmem:[%s10877_s6 + $0x4a0] sm:$0xff]  ;;  %v752_v19 = vld [vmem:[%s10877_s6 + $0x490] sm:$0xff] }
  0x19   : > { %5931 = vmatpush1.bf16.msra.mxu0 %v10397_v10  ;;  %4776 = vmatprep.subr.bf16.mxu1 %v10758_v1  ;;  %v8424_v10 = vcombine.low %v878_v53, %v886_v54  ;;  %v10430_v50 = vld [vmem:[%s12148_s1 + $0xa8] sm:$0xff]   ;;  %v646_v53 = vld [vmem:[%s10877_s6 + $0x140] sm:$0xff]  ;;  %v1154_v26 = vunpack.c.l.s8.bf16 %v752_v19 }
  0x1a   : > { %5932 = vmatprep.subr.bf16.mxu0 %v10758_v1  ;;  %v8440_v35 = vcombine.low %v894_v4, %v902_v5  ;;  %v650_v54 = vld [vmem:[%s10877_s6 + $0x160] sm:$0xff]  ;;  %v942_v62 = vunpack.c.l.s8.bf16 %v646_v53 }
  0x1b   : > { %v950_v63 = vunpack.c.l.s8.bf16 %v650_v54  ;;  %v11217_v19 = vld [vmem:[%s10877_s6 + $0x5e0] sm:$0xff] }
  0x1c   : > { %4777 = vmatpush1.bf16.msra.mxu1 %v10398_v11  ;;  %v630_v11 = vld [vmem:[%s10877_s6 + $0xc0] sm:$0xff] }
  0x1d   : > { %5933 = vmatpush1.bf16.msra.mxu0 %v10399_v12  ;;  %4778 = vmatprep.subr.bf16.mxu1 %v10758_v1  ;;  %v8432_v12 = vcombine.low %v882_v55, %v890_v56  ;;  %v910_v24 = vunpack.c.l.s8.bf16 %v630_v11  ;;  %v10432_v55 = vld [vmem:[%s12148_s1 + $0xb0] sm:$0xff]  }
  0x1e   : > { %5934 = vmatprep.subr.bf16.mxu0 %v10758_v1  ;;  %v656_v11 = vld [vmem:[%s10877_s6 + $0x190] sm:$0xff] }
  0x20   : > { %4779 = vmatpush1.bf16.msra.mxu1 %v10400_v13  ;;  %v8441_v13 = vcombine.high %v894_v4, %v902_v5  ;;  %v10435_v4 = vld [vmem:[%s12148_s1 + $0x2b8] sm:$0xff]  }
  0x21   : > { %5935 = vmatpush1.bf16.msra.mxu0 %v10401_v14  ;;  %4780 = vmatprep.subr.bf16.mxu1 %v10758_v1  ;;  %v634_v14 = vld [vmem:[%s10877_s6 + $0xe0] sm:$0xff] }
  0x22   : > { %5936 = vmatprep.subr.bf16.mxu0 %v10758_v1 }
  0x24   : > { %4781 = vmatpush1.bf16.msra.mxu1 %v10402_v15  ;;  %v632_v15 = vld [vmem:[%s10877_s6 + $0xd0] sm:$0xff] }
  0x25   : > { %5937 = vmatpush1.bf16.msra.mxu0 %v10403_v16  ;;  %4782 = vmatprep.subr.bf16.mxu1 %v10758_v1  ;;  %v8449_v16 = vcombine.high %v898_v7, %v906_v8  ;;  %v914_v30 = vunpack.c.l.s8.bf16 %v632_v15 }
  0x26   : > { %5938 = vmatprep.subr.bf16.mxu0 %v10758_v1 }
  0x28   : > { %4783 = vmatpush1.bf16.msra.mxu1 %v10404_v17  ;;  %v10424_v17 = vld [vmem:[%s12148_s1 + $0x90] sm:$0xff]  }
  0x29   : > { %5939 = vmatpush1.bf16.msra.mxu0 %v10405_v18  ;;  %4784 = vmatprep.subr.bf16.mxu1 %v10758_v1  ;;  %v636_v18 = vld [vmem:[%s10877_s6 + $0xf0] sm:$0xff] }
  0x2a   : > { %5940 = vmatprep.subr.bf16.mxu0 %v10758_v1 }
  0x2c   : > { %4785 = vmatpush1.bf16.msra.mxu1 %v10406_v27  ;;  %v918_v27 = vunpack.c.l.s8.bf16 %v634_v14 }
  0x2d   : > { %5941 = vmatpush1.bf16.msra.mxu0 %v10407_v32  ;;  %4786 = vmatprep.subr.bf16.mxu1 %v10758_v1  ;;  %v922_v32 = vunpack.c.l.s8.bf16 %v636_v18 }
  0x2e   : > { %5942 = vmatprep.subr.bf16.mxu0 %v10758_v1 }
  0x2f   : > { %v8464_v56 = vcombine.low %v914_v30, %v922_v32 }
  0x30   : > { %4787 = vmatpush1.bf16.msra.mxu1 %v10408_v37  ;;  %v638_v37 = vld [vmem:[%s10877_s6 + $0x100] sm:$0xff] }
  0x31   : > { %5943 = vmatpush1.bf16.msra.mxu0 %v10409_v38  ;;  %4788 = vmatprep.subr.bf16.mxu1 %v10758_v1  ;;  %v642_v38 = vld [vmem:[%s10877_s6 + $0x120] sm:$0xff] }
  0x32   : > { %5944 = vmatprep.subr.bf16.mxu0 %v10758_v1  ;;  %v934_v47 = vunpack.c.l.s8.bf16 %v642_v38  ;;  %v668_v38 = vld [vmem:[%s10877_s6 + $0x1f0] sm:$0xff] }
  0x34   : > { %4789 = vmatpush1.bf16.msra.mxu1 %v10410_v39  ;;  %v10428_v39 = vld [vmem:[%s12148_s1 + $0xa0] sm:$0xff]  }
  0x35   : > { %5945 = vmatpush1.bf16.msra.mxu0 %v10411_v40  ;;  %4790 = vmatprep.subr.bf16.mxu1 %v10758_v1  ;;  %v8448_v40 = vcombine.low %v898_v7, %v906_v8  ;;  %v658_v7 = vld [vmem:[%s10877_s6 + $0x1a0] sm:$0xff] }
  0x36   : > { %5946 = vmatprep.subr.bf16.mxu0 %v10758_v1  ;;  %v10436_v8 = vld [vmem:[%s12148_s1 + $0xc0] sm:$0xff]  }
  0x38   : > { %4791 = vmatpush1.bf16.msra.mxu1 %v10412_v41  ;;  %v8457_v41 = vcombine.high %v910_v24, %v918_v27 }
  0x39   : > { %5947 = vmatpush1.bf16.msra.mxu0 %v10413_v42  ;;  %4792 = vmatprep.subr.bf16.mxu1 %v10758_v1  ;;  %v640_v42 = vld [vmem:[%s10877_s6 + $0x110] sm:$0xff] }
  0x3a   : > { %5948 = vmatprep.subr.bf16.mxu0 %v10758_v1  ;;  %v930_v48 = vunpack.c.l.s8.bf16 %v640_v42 }
  0x3c   : > { %4793 = vmatpush1.bf16.msra.mxu1 %v10414_v43  ;;  %v644_v43 = vld [vmem:[%s10877_s6 + $0x130] sm:$0xff] }
  0x3d   : > { %5949 = vmatpush1.bf16.msra.mxu0 %v10415_v44  ;;  %4794 = vmatprep.subr.bf16.mxu1 %v10758_v1  ;;  %v10429_v44 = vld [vmem:[%s12148_s1 + $0x2a0] sm:$0xff]   ;;  %v938_v49 = vunpack.c.l.s8.bf16 %v644_v43 }
  0x3e   : > { %5950 = vmatprep.subr.bf16.mxu0 %v10758_v1 }
  0x40   : > { %4795 = vmatpush1.bf16.msra.mxu1 %v10416_v45  ;;  %v8465_v45 = vcombine.high %v914_v30, %v922_v32  ;;  %v666_v30 = vld [vmem:[%s10877_s6 + $0x1e0] sm:$0xff]  ;;  %v10440_v32 = vld [vmem:[%s12148_s1 + $0xd0] sm:$0xff]  }
  0x41   : > { %5951 = vmatpush1.bf16.msra.mxu0 %v10417_v46  ;;  %4796 = vmatprep.subr.bf16.mxu1 %v10758_v1  ;;  %v926_v46 = vunpack.c.l.s8.bf16 %v638_v37  ;;  %v664_v37 = vld [vmem:[%s10877_s6 + $0x1d0] sm:$0xff]  ;;  %v982_v42 = vunpack.c.l.s8.bf16 %v666_v30  ;;  %v694_v30 = vld [vmem:[%s10877_s6 + $0x2c0] sm:$0xff] }
  0x42   : > { %5952 = vmatprep.subr.bf16.mxu0 %v10758_v1  ;;  %v978_v43 = vunpack.c.l.s8.bf16 %v664_v37  ;;  %v696_v37 = vld [vmem:[%s10877_s6 + $0x2d0] sm:$0xff] }
  0x43   : > { %v8472_v5 = vcombine.low %v926_v46, %v934_v47 }
  0x44   : > { %4797 = vmatpush1.bf16.msra.mxu1 %v10418_v51  ;;  %v10431_v51 = vld [vmem:[%s12148_s1 + $0x2a8] sm:$0xff]  }
  0x45   : > { %5953 = vmatpush1.bf16.msra.mxu0 %v10419_v52  ;;  %5055 = vmatprep.subr.bf16.mxu1 %v10758_v1  ;;  %v8456_v52 = vcombine.low %v910_v24, %v918_v27  ;;  %v10439_v24 = vld [vmem:[%s12148_s1 + $0x2c8] sm:$0xff]   ;;  %v8488_v27 = vcombine.low %v942_v62, %v950_v63 }
  0x46   : > { %6211 = vmatprep.subr.bf16.mxu0 %v10758_v1 }
  0x47   : > { %4799 = vmatmul.mubr.bf16.vlgmr.msra.gmra.mrb[0].mxu1 %v8408_v57  ;;  %v8473_v57 = vcombine.high %v926_v46, %v934_v47  ;;  %v670_v46 = vld [vmem:[%s10877_s6 + $0x200] sm:$0xff] }
  0x48   : > { %5955 = vmatmul.mubr.bf16.vlgmr.msra.gmra.mrb[0].mxu0 %v8416_v58  ;;  %5056 = vmatpush1.bf16.msra.mxu1 %v10420_v59  ;;  %v648_v58 = vld [vmem:[%s10877_s6 + $0x150] sm:$0xff]  ;;  %v674_v47 = vld [vmem:[%s10877_s6 + $0x220] sm:$0xff]  ;;  %v990_v53 = vunpack.c.l.s8.bf16 %v670_v46 }
  0x49   : > { %6212 = vmatpush1.bf16.msra.mxu0 %v10421_v60  ;;  %4806 = vmatprep.mubr.bf16.mxu1 %v8425_v61  ;;  %v652_v59 = vld [vmem:[%s10877_s6 + $0x170] sm:$0xff]  ;;  %v8481_v61 = vcombine.high %v930_v48, %v938_v49  ;;  %v946_v2 = vunpack.c.l.s8.bf16 %v648_v58  ;;  %v998_v54 = vunpack.c.l.s8.bf16 %v674_v47 }
  0x4a   : > { %5962 = vmatprep.mubr.bf16.mxu0 %v8433_v0  ;;  %5057 = vmatprep.subr.bf16.mxu1 %v10758_v1  ;;  %v10433_v60 = vld [vmem:[%s12148_s1 + $0x2b0] sm:$0xff]   ;;  %v10434_v0 = vld [vmem:[%s12148_s1 + $0xb8] sm:$0xff]   ;;  %v954_v3 = vunpack.c.l.s8.bf16 %v652_v59 }
  0x4b   : > { %6213 = vmatprep.subr.bf16.mxu0 %v10758_v1 }
  0x4c   : > { %5058 = vmatpush1.bf16.msra.mxu1 %v10422_v6  ;;  %v654_v6 = vld [vmem:[%s10877_s6 + $0x180] sm:$0xff]  ;;  %v8497_v14 = vcombine.high %v946_v2, %v954_v3 }
  0x4d   : > { %6214 = vmatpush1.bf16.msra.mxu0 %v10423_v9  ;;  %5059 = vmatprep.subr.bf16.mxu1 %v10758_v1  ;;  %v8480_v9 = vcombine.low %v930_v48, %v938_v49  ;;  %v958_v15 = vunpack.c.l.s8.bf16 %v654_v6 }
  0x4e   : > { %6215 = vmatprep.subr.bf16.mxu0 %v10758_v1 }
  0x4f   : > { %4807 = vmatmul.mubr.bf16.gmra.mrb[4].mxu1 %v8424_v10  ;;  %v8489_v10 = vcombine.high %v942_v62, %v950_v63  ;;  %v8537_v63 = vcombine.high %v990_v53, %v998_v54 }
  0x50   : > { %5963 = vmatmul.mubr.bf16.gmra.mrb[4].mxu0 %v8432_v12  ;;  %4814 = vmatprep.mubr.bf16.mxu1 %v8441_v13  ;;  %v660_v12 = vld [vmem:[%s10877_s6 + $0x1b0] sm:$0xff]  ;;  %v10437_v13 = vld [vmem:[%s12148_s1 + $0x2c0] sm:$0xff]  }
  0x51   : > { %5970 = vmatprep.mubr.bf16.mxu0 %v8449_v16  ;;  %5060 = vmatpush1.bf16.msra.mxu1 %v10424_v17  ;;  %v966_v16 = vunpack.c.l.s8.bf16 %v658_v7  ;;  %v962_v17 = vunpack.c.l.s8.bf16 %v656_v11  ;;  %v970_v18 = vunpack.c.l.s8.bf16 %v660_v12 }
  0x52   : > { %6216 = vmatpush1.bf16.msra.mxu0 %v10425_v22  ;;  %5061 = vmatprep.subr.bf16.mxu1 %v10758_v1  ;;  %v10438_v22 = vld [vmem:[%s12148_s1 + $0xc8] sm:$0xff]  }
  0x53   : > { %6217 = vmatprep.subr.bf16.mxu0 %v10758_v1  ;;  %v8512_v48 = vcombine.low %v962_v17, %v970_v18 }
  0x55   : > { %5062 = vmatpush1.bf16.msra.mxu1 %v10426_v28  ;;  %v662_v28 = vld [vmem:[%s10877_s6 + $0x1c0] sm:$0xff] }
  0x56   : > { %6218 = vmatpush1.bf16.msra.mxu0 %v10427_v33  ;;  %5063 = vmatprep.subr.bf16.mxu1 %v10758_v1  ;;  %v8496_v33 = vcombine.low %v946_v2, %v954_v3  ;;  %v684_v2 = vld [vmem:[%s10877_s6 + $0x270] sm:$0xff] }
  0x57   : > { %4815 = vmatmul.mubr.bf16.gmra.mrb[8].mxu1 %v8440_v35  ;;  %6219 = vmatprep.subr.bf16.mxu0 %v10758_v1  ;;  %v8505_v35 = vcombine.high %v958_v15, %v966_v16  ;;  %v1018_v7 = vunpack.c.l.s8.bf16 %v684_v2  ;;  %v716_v2 = vld [vmem:[%s10877_s6 + $0x370] sm:$0xff] }
  0x58   : > { %5971 = vmatmul.mubr.bf16.gmra.mrb[8].mxu0 %v8448_v40  ;;  %4822 = vmatprep.mubr.bf16.mxu1 %v8457_v41  ;;  %v8513_v40 = vcombine.high %v962_v17, %v970_v18  ;;  %v974_v41 = vunpack.c.l.s8.bf16 %v662_v28  ;;  %v10444_v18 = vld [vmem:[%s12148_s1 + $0xe0] sm:$0xff]  }
  0x59   : > { %5978 = vmatprep.mubr.bf16.mxu0 %v8465_v45  ;;  %5064 = vmatpush1.bf16.msra.mxu1 %v10428_v39  ;;  %v10441_v39 = vld [vmem:[%s12148_s1 + $0x2d0] sm:$0xff]   ;;  %v8504_v45 = vcombine.low %v958_v15, %v966_v16 }
  0x5a   : > { %6220 = vmatpush1.bf16.msra.mxu0 %v10429_v44  ;;  %5065 = vmatprep.subr.bf16.mxu1 %v10758_v1  ;;  %v986_v44 = vunpack.c.l.s8.bf16 %v668_v38  ;;  %v8521_v49 = vcombine.high %v974_v41, %v982_v42  ;;  %v8520_v59 = vcombine.low %v974_v41, %v982_v42  ;;  %v700_v38 = vld [vmem:[%s10877_s6 + $0x2f0] sm:$0xff]  ;;  %v1042_v42 = vunpack.c.l.s8.bf16 %v696_v37 }
  0x5b   : > { %6221 = vmatprep.subr.bf16.mxu0 %v10758_v1  ;;  %v728_v37 = vld [vmem:[%s10877_s6 + $0x3d0] sm:$0xff] }
  0x5c   : > { %v8528_v62 = vcombine.low %v978_v43, %v986_v44 }
  0x5d   : > { %5066 = vmatpush1.bf16.msra.mxu1 %v10430_v50  ;;  %v672_v50 = vld [vmem:[%s10877_s6 + $0x210] sm:$0xff] }
  0x5e   : > { %6222 = vmatpush1.bf16.msra.mxu0 %v10431_v51  ;;  %5067 = vmatprep.subr.bf16.mxu1 %v10758_v1  ;;  %v676_v51 = vld [vmem:[%s10877_s6 + $0x230] sm:$0xff] }
  0x5f   : > { %4823 = vmatmul.mubr.bf16.gmra.mrb[12].mxu1 %v8456_v52  ;;  %6223 = vmatprep.subr.bf16.mxu0 %v10758_v1  ;;  %v8529_v52 = vcombine.high %v978_v43, %v986_v44  ;;  %v1002_v58 = vunpack.c.l.s8.bf16 %v676_v51  ;;  %v1050_v43 = vunpack.c.l.s8.bf16 %v700_v38  ;;  %v708_v51 = vld [vmem:[%s10877_s6 + $0x330] sm:$0xff] }
  0x60   : > { %5979 = vmatmul.mubr.bf16.gmra.mrb[12].mxu0 %v8464_v56  ;;  %4830 = vmatprep.mubr.bf16.mxu1 %v8473_v57  ;;  %v10443_v56 = vld [vmem:[%s12148_s1 + $0x2d8] sm:$0xff]   ;;  %v994_v57 = vunpack.c.l.s8.bf16 %v672_v50  ;;  %v704_v50 = vld [vmem:[%s10877_s6 + $0x310] sm:$0xff] }
  0x61   : > { %5986 = vmatprep.mubr.bf16.mxu0 %v8481_v61  ;;  %5068 = vmatpush1.bf16.msra.mxu1 %v10432_v55  ;;  %v10442_v55 = vld [vmem:[%s12148_s1 + $0xd8] sm:$0xff]   ;;  %v682_v61 = vld [vmem:[%s10877_s6 + $0x260] sm:$0xff]  ;;  %v8593_v47 = vcombine.high %v1042_v42, %v1050_v43  ;;  %v732_v38 = vld [vmem:[%s10877_s6 + $0x3f0] sm:$0xff] }
  0x62   : > { %6224 = vmatpush1.bf16.msra.mxu0 %v10433_v60  ;;  %5069 = vmatprep.subr.bf16.mxu1 %v10758_v1  ;;  %v678_v60 = vld [vmem:[%s10877_s6 + $0x240] sm:$0xff]  ;;  %v8545_v3 = vcombine.high %v994_v57, %v1002_v58  ;;  %v8544_v11 = vcombine.low %v994_v57, %v1002_v58  ;;  %v1066_v57 = vunpack.c.l.s8.bf16 %v708_v51 }
  0x63   : > { %6225 = vmatprep.subr.bf16.mxu0 %v10758_v1 }
  0x65   : > { %5070 = vmatpush1.bf16.msra.mxu1 %v10434_v0  ;;  %v680_v0 = vld [vmem:[%s10877_s6 + $0x250] sm:$0xff] }
  0x66   : > { %6226 = vmatpush1.bf16.msra.mxu0 %v10435_v4  ;;  %5071 = vmatprep.subr.bf16.mxu1 %v10758_v1  ;;  %v1006_v4 = vunpack.c.l.s8.bf16 %v678_v60  ;;  %v1010_v6 = vunpack.c.l.s8.bf16 %v680_v0  ;;  %v712_v0 = vld [vmem:[%s10877_s6 + $0x350] sm:$0xff] }
  0x67   : > { %4831 = vmatmul.mubr.bf16.gmra.mrb[16].mxu1 %v8472_v5  ;;  %6227 = vmatprep.subr.bf16.mxu0 %v10758_v1  ;;  %v1014_v5 = vunpack.c.l.s8.bf16 %v682_v61 }
  0x68   : > { %5987 = vmatmul.mubr.bf16.gmra.mrb[16].mxu0 %v8480_v9  ;;  %4838 = vmatprep.mubr.bf16.mxu1 %v8489_v10  ;;  %v686_v9 = vld [vmem:[%s10877_s6 + $0x280] sm:$0xff]  ;;  %v8561_v15 = vcombine.high %v1010_v6, %v1018_v7 }
  0x69   : > { %5994 = vmatprep.mubr.bf16.mxu0 %v8497_v14  ;;  %5072 = vmatpush1.bf16.msra.mxu1 %v10436_v8  ;;  %v8536_v8 = vcombine.low %v990_v53, %v998_v54  ;;  %v690_v10 = vld [vmem:[%s10877_s6 + $0x2a0] sm:$0xff]  ;;  %v8553_v12 = vcombine.high %v1006_v4, %v1014_v5  ;;  %v692_v14 = vld [vmem:[%s10877_s6 + $0x2b0] sm:$0xff]  ;;  %v1022_v16 = vunpack.c.l.s8.bf16 %v686_v9  ;;  %v8552_v28 = vcombine.low %v1006_v4, %v1014_v5  ;;  %v10446_v54 = vld [vmem:[%s12148_s1 + $0xe8] sm:$0xff]  }
  0x6a   : > { %6228 = vmatpush1.bf16.msra.mxu0 %v10437_v13  ;;  %5073 = vmatprep.subr.bf16.mxu1 %v10758_v1  ;;  %v688_v13 = vld [vmem:[%s10877_s6 + $0x290] sm:$0xff]  ;;  %v1030_v17 = vunpack.c.l.s8.bf16 %v690_v10  ;;  %v1074_v5 = vunpack.c.l.s8.bf16 %v712_v0 }
  0x6b   : > { %6229 = vmatprep.subr.bf16.mxu0 %v10758_v1  ;;  %v748_v0 = vld [vmem:[%s10877_s6 + $0x470] sm:$0xff] }
  0x6c   : > { %v8568_v44 = vcombine.low %v1022_v16, %v1030_v17 }
  0x6d   : > { %5074 = vmatpush1.bf16.msra.mxu1 %v10438_v22  ;;  %v10445_v22 = vld [vmem:[%s12148_s1 + $0x2e0] sm:$0xff]  }
  0x6e   : > { %6230 = vmatpush1.bf16.msra.mxu0 %v10439_v24  ;;  %5075 = vmatprep.subr.bf16.mxu1 %v10758_v1  ;;  %v1026_v24 = vunpack.c.l.s8.bf16 %v688_v13  ;;  %v720_v13 = vld [vmem:[%s10877_s6 + $0x390] sm:$0xff] }
  0x6f   : > { %4839 = vmatmul.mubr.bf16.gmra.mrb[20].mxu1 %v8488_v27  ;;  %6231 = vmatprep.subr.bf16.mxu0 %v10758_v1  ;;  %v1034_v27 = vunpack.c.l.s8.bf16 %v692_v14  ;;  %v724_v14 = vld [vmem:[%s10877_s6 + $0x3b0] sm:$0xff] }
  0x70   : > { %5995 = vmatmul.mubr.bf16.gmra.mrb[20].mxu0 %v8496_v33  ;;  %4846 = vmatprep.mubr.bf16.mxu1 %v8505_v35  ;;  %v8560_v33 = vcombine.low %v1010_v6, %v1018_v7  ;;  %v8569_v35 = vcombine.high %v1022_v16, %v1030_v17  ;;  %v1082_v6 = vunpack.c.l.s8.bf16 %v716_v2  ;;  %v10448_v17 = vld [vmem:[%s12148_s1 + $0xf0] sm:$0xff]  }
  0x71   : > { %6002 = vmatprep.mubr.bf16.mxu0 %v8513_v40  ;;  %5076 = vmatpush1.bf16.msra.mxu1 %v10440_v32  ;;  %v698_v32 = vld [vmem:[%s10877_s6 + $0x2e0] sm:$0xff]  ;;  %v1038_v40 = vunpack.c.l.s8.bf16 %v694_v30 }
  0x72   : > { %6232 = vmatpush1.bf16.msra.mxu0 %v10441_v39  ;;  %5077 = vmatprep.subr.bf16.mxu1 %v10758_v1  ;;  %v8577_v39 = vcombine.high %v1026_v24, %v1034_v27  ;;  %v1046_v41 = vunpack.c.l.s8.bf16 %v698_v32  ;;  %v8625_v10 = vcombine.high %v1074_v5, %v1082_v6 }
  0x73   : > { %6233 = vmatprep.subr.bf16.mxu0 %v10758_v1 }
  0x74   : > { %v8585_v46 = vcombine.high %v1038_v40, %v1046_v41  ;;  %v8584_v58 = vcombine.low %v1038_v40, %v1046_v41  ;;  %v1106_v41 = vunpack.c.l.s8.bf16 %v728_v37 }
  0x75   : > { %5078 = vmatpush1.bf16.msra.mxu1 %v10442_v55  ;;  %v10447_v55 = vld [vmem:[%s12148_s1 + $0x2e8] sm:$0xff]  }
  0x76   : > { %6234 = vmatpush1.bf16.msra.mxu0 %v10443_v56  ;;  %5079 = vmatprep.subr.bf16.mxu1 %v10758_v1  ;;  %v1058_v56 = vunpack.c.l.s8.bf16 %v704_v50  ;;  %v740_v50 = vld [vmem:[%s10877_s6 + $0x430] sm:$0xff] }
  0x77   : > { %4847 = vmatmul.mubr.bf16.gmra.mrb[24].mxu1 %v8504_v45  ;;  %6235 = vmatprep.subr.bf16.mxu0 %v10758_v1  ;;  %v8576_v45 = vcombine.low %v1026_v24, %v1034_v27  ;;  %v1098_v24 = vunpack.c.l.s8.bf16 %v724_v14 }
  0x78   : > { %6003 = vmatmul.mubr.bf16.gmra.mrb[24].mxu0 %v8512_v48  ;;  %4854 = vmatprep.mubr.bf16.mxu1 %v8521_v49  ;;  %v702_v48 = vld [vmem:[%s10877_s6 + $0x300] sm:$0xff]  ;;  %v8609_v61 = vcombine.high %v1058_v56, %v1066_v57 }
  0x79   : > { %6010 = vmatprep.mubr.bf16.mxu0 %v8529_v52  ;;  %5080 = vmatpush1.bf16.msra.mxu1 %v10444_v18  ;;  %v706_v49 = vld [vmem:[%s10877_s6 + $0x320] sm:$0xff]  ;;  %v1054_v52 = vunpack.c.l.s8.bf16 %v702_v48  ;;  %v10449_v18 = vld [vmem:[%s12148_s1 + $0x2f0] sm:$0xff]  }
  0x7a   : > { %6236 = vmatpush1.bf16.msra.mxu0 %v10445_v22  ;;  %5081 = vmatprep.subr.bf16.mxu1 %v10758_v1  ;;  %v1062_v53 = vunpack.c.l.s8.bf16 %v706_v49  ;;  %v1090_v22 = vunpack.c.l.s8.bf16 %v720_v13  ;;  %v738_v48 = vld [vmem:[%s10877_s6 + $0x420] sm:$0xff]  ;;  %v736_v49 = vld [vmem:[%s10877_s6 + $0x410] sm:$0xff] }
  0x7b   : > { %6237 = vmatprep.subr.bf16.mxu0 %v10758_v1 }
  0x7c   : > { %v8601_v60 = vcombine.high %v1054_v52, %v1062_v53  ;;  %v8600_v7 = vcombine.low %v1054_v52, %v1062_v53  ;;  %v8641_v32 = vcombine.high %v1090_v22, %v1098_v24  ;;  %v1126_v52 = vunpack.c.l.s8.bf16 %v738_v48  ;;  %v10450_v53 = vld [vmem:[%s12148_s1 + $0xf8] sm:$0xff]  }
  0x7d   : > { %5082 = vmatpush1.bf16.msra.mxu1 %v10446_v54  ;;  %v10451_v54 = vld [vmem:[%s12148_s1 + $0x2f8] sm:$0xff]  }
  0x7e   : > { %6238 = vmatpush1.bf16.msra.mxu0 %v10447_v55  ;;  %5083 = vmatprep.subr.bf16.mxu1 %v10758_v1  ;;  %v1122_v55 = vunpack.c.l.s8.bf16 %v736_v49 }
  0x7f   : > { %4855 = vmatmul.mubr.bf16.gmra.mrb[28].mxu1 %v8520_v59  ;;  %6239 = vmatprep.subr.bf16.mxu0 %v10758_v1  ;;  %v8592_v59 = vcombine.low %v1042_v42, %v1050_v43  ;;  %v1114_v42 = vunpack.c.l.s8.bf16 %v732_v38  ;;  %v766_v38 = vld [vmem:[%s10877_s6 + $0x500] sm:$0xff] }
  0x80   : > { %6011 = vmatmul.mubr.bf16.gmra.mrb[28].mxu0 %v8528_v62  ;;  %4862 = vmatprep.mubr.bf16.mxu1 %v8537_v63  ;;  %v710_v62 = vld [vmem:[%s10877_s6 + $0x340] sm:$0xff] }
  0x81   : > { %6018 = vmatprep.mubr.bf16.mxu0 %v8545_v3  ;;  %v714_v63 = vld [vmem:[%s10877_s6 + $0x360] sm:$0xff]  ;;  %v1070_v3 = vunpack.c.l.s8.bf16 %v710_v62  ;;  %5084 = vmatpush1.bf16.msra.mxu1 %v10448_v17 }
  0x82   : > { %v1078_v4 = vunpack.c.l.s8.bf16 %v714_v63  ;;  %6240 = vmatpush1.bf16.msra.mxu0 %v10449_v18  ;;  %5085 = vmatprep.subr.bf16.mxu1 %v10758_v1  ;;  %v746_v62 = vld [vmem:[%s10877_s6 + $0x460] sm:$0xff]  ;;  %v744_v63 = vld [vmem:[%s10877_s6 + $0x450] sm:$0xff] }
  0x83   : > { %6241 = vmatprep.subr.bf16.mxu0 %v10758_v1  ;;  %v762_v17 = vld [vmem:[%s10877_s6 + $0x4e0] sm:$0xff]  ;;  %v760_v18 = vld [vmem:[%s10877_s6 + $0x4d0] sm:$0xff] }
  0x84   : > { %v8617_v9 = vcombine.high %v1070_v3, %v1078_v4  ;;  %v8616_v27 = vcombine.low %v1070_v3, %v1078_v4  ;;  %v1142_v3 = vunpack.c.l.s8.bf16 %v746_v62  ;;  %v11185_v4 = vcombine.high %v863_v23, %v871_v25  ;;  %v756_v23 = vld [vmem:[%s10877_s6 + $0x4b0] sm:$0xff]  ;;  %v782_v62 = vld [vmem:[%s10877_s6 + $0x580] sm:$0xff] }
  0x85   : > { %5086 = vmatpush1.bf16.msra.mxu1 %v10450_v53  ;;  %v1158_v25 = vunpack.c.l.s8.bf16 %v754_v20  ;;  %v780_v53 = vld [vmem:[%s10877_s6 + $0x570] sm:$0xff]  ;;  %v11214_v20 = vld [vmem:[%s10877_s6 + $0x5c0] sm:$0xff] }
  0x86   : > { %6242 = vmatpush1.bf16.msra.mxu0 %v10451_v54  ;;  %5344 = vmatprep.subr.bf16.mxu1 %v10758_v1 }
  0x87   : > { %4863 = vmatmul.mubr.bf16.gmra.mrb[32].mxu1 %v8536_v8  ;;  %v8608_v8 = vcombine.low %v1058_v56, %v1066_v57  ;;  %v1130_v56 = vunpack.c.l.s8.bf16 %v740_v50  ;;  %6500 = vmatprep.subr.bf16.mxu0 %v10758_v1  ;;  %v774_v50 = vld [vmem:[%s10877_s6 + $0x540] sm:$0xff] }
  0x88   : > { %6019 = vmatmul.mubr.bf16.gmra.mrb[32].mxu0 %v8544_v11  ;;  %4870 = vmatprep.mubr.bf16.mxu1 %v8553_v12  ;;  %v718_v11 = vld [vmem:[%s10877_s6 + $0x380] sm:$0xff]  ;;  %v1198_v54 = vunpack.c.l.s8.bf16 %v774_v50 }
  0x89   : > { %6026 = vmatprep.mubr.bf16.mxu0 %v8561_v15  ;;  %v722_v12 = vld [vmem:[%s10877_s6 + $0x3a0] sm:$0xff]  ;;  %v1086_v15 = vunpack.c.l.s8.bf16 %v718_v11 }
  0x8a   : > { %v1094_v16 = vunpack.c.l.s8.bf16 %v722_v12  ;;  %v750_v12 = vld [vmem:[%s10877_s6 + $0x480] sm:$0xff] }
  0x8b   : > { %v1150_v21 = vunpack.c.l.s8.bf16 %v750_v12 }
  0x8c   : > { %v8633_v30 = vcombine.high %v1086_v15, %v1094_v16  ;;  %v8632_v43 = vcombine.low %v1086_v15, %v1094_v16  ;;  %v758_v16 = vld [vmem:[%s10877_s6 + $0x4c0] sm:$0xff] }
  0x8d   : > { %v8697_v14 = vcombine.high %v1150_v21, %v1158_v25 }
  0x8f   : > { %4871 = vmatmul.mubr.bf16.gmra.mrb[36].mxu1 %v8552_v28  ;;  %v8624_v28 = vcombine.low %v1074_v5, %v1082_v6  ;;  %v11191_v5 = vcombine.high %v867_v29, %v875_v31  ;;  %v1138_v6 = vunpack.c.l.s8.bf16 %v744_v63  ;;  %v1162_v29 = vunpack.c.l.s8.bf16 %v756_v23  ;;  %v786_v63 = vld [vmem:[%s10877_s6 + $0x5a0] sm:$0xff]  ;;  %v792_v23 = vld [vmem:[%s10877_s6 + $0x5d0] sm:$0xff] }
  0x90   : > { %6027 = vmatmul.mubr.bf16.gmra.mrb[36].mxu0 %v8560_v33  ;;  %4878 = vmatprep.mubr.bf16.mxu1 %v8569_v35  ;;  %v726_v33 = vld [vmem:[%s10877_s6 + $0x3c0] sm:$0xff] }
  0x91   : > { %6034 = vmatprep.mubr.bf16.mxu0 %v8577_v39  ;;  %v730_v35 = vld [vmem:[%s10877_s6 + $0x3e0] sm:$0xff]  ;;  %v1102_v39 = vunpack.c.l.s8.bf16 %v726_v33  ;;  %v8705_v15 = vcombine.high %v1154_v26, %v1162_v29  ;;  %v8704_v33 = vcombine.low %v1154_v26, %v1162_v29  ;;  %v1238_v26 = vunpack.c.l.s8.bf16 %v11217_v19 }
  0x92   : > { %v1110_v40 = vunpack.c.l.s8.bf16 %v730_v35  ;;  %v1234_v29 = vunpack.c.l.s8.bf16 %v792_v23 }
  0x94   : > { %v8648_v57 = vcombine.low %v1102_v39, %v1110_v40 }
  0x97   : > { %4879 = vmatmul.mubr.bf16.gmra.mrb[40].mxu1 %v8568_v44  ;;  %v8640_v44 = vcombine.low %v1090_v22, %v1098_v24  ;;  %v764_v22 = vld [vmem:[%s10877_s6 + $0x4f0] sm:$0xff]  ;;  %v1166_v24 = vunpack.c.l.s8.bf16 %v758_v16 }
  0x98   : > { %6035 = vmatmul.mubr.bf16.gmra.mrb[40].mxu0 %v8576_v45  ;;  %4886 = vmatprep.mubr.bf16.mxu1 %v8585_v46  ;;  %v8649_v45 = vcombine.high %v1102_v39, %v1110_v40  ;;  %v8657_v46 = vcombine.high %v1106_v41, %v1114_v42  ;;  %v770_v39 = vld [vmem:[%s10877_s6 + $0x520] sm:$0xff]  ;;  %v768_v40 = vld [vmem:[%s10877_s6 + $0x510] sm:$0xff] }
  0x99   : > { %6042 = vmatprep.mubr.bf16.mxu0 %v8593_v47  ;;  %v734_v47 = vld [vmem:[%s10877_s6 + $0x400] sm:$0xff] }
  0x9a   : > { %v1118_v51 = vunpack.c.l.s8.bf16 %v734_v47 }
  0x9f   : > { %4887 = vmatmul.mubr.bf16.gmra.mrb[44].mxu1 %v8584_v58  ;;  %v8656_v58 = vcombine.low %v1106_v41, %v1114_v42  ;;  %v772_v41 = vld [vmem:[%s10877_s6 + $0x530] sm:$0xff]  ;;  %v1182_v42 = vunpack.c.l.s8.bf16 %v766_v38 }
  0xa0   : > { %6043 = vmatmul.mubr.bf16.gmra.mrb[44].mxu0 %v8592_v59  ;;  %4894 = vmatprep.mubr.bf16.mxu1 %v8601_v60  ;;  %v8665_v59 = vcombine.high %v1118_v51, %v1126_v52  ;;  %v8673_v60 = vcombine.high %v1122_v55, %v1130_v56 }
  0xa1   : > { %6050 = vmatprep.mubr.bf16.mxu0 %v8609_v61  ;;  %v742_v61 = vld [vmem:[%s10877_s6 + $0x440] sm:$0xff] }
  0xa2   : > { %v1134_v2 = vunpack.c.l.s8.bf16 %v742_v61 }
  0xa4   : > { %v8680_v31 = vcombine.low %v1134_v2, %v1142_v3 }
  0xa7   : > { %4895 = vmatmul.mubr.bf16.gmra.mrb[48].mxu1 %v8600_v7  ;;  %v1146_v7 = vunpack.c.l.s8.bf16 %v748_v0  ;;  %v784_v0 = vld [vmem:[%s10877_s6 + $0x590] sm:$0xff] }
  0xa8   : > { %6051 = vmatmul.mubr.bf16.gmra.mrb[48].mxu0 %v8608_v8  ;;  %4902 = vmatprep.mubr.bf16.mxu1 %v8617_v9  ;;  %v8664_v8 = vcombine.low %v1118_v51, %v1126_v52  ;;  %v8672_v9 = vcombine.low %v1122_v55, %v1130_v56  ;;  %v778_v51 = vld [vmem:[%s10877_s6 + $0x560] sm:$0xff]  ;;  %v776_v52 = vld [vmem:[%s10877_s6 + $0x550] sm:$0xff] }
  0xa9   : > { %6058 = vmatprep.mubr.bf16.mxu0 %v8625_v10  ;;  %v8681_v10 = vcombine.high %v1134_v2, %v1142_v3  ;;  %v8689_v11 = vcombine.high %v1138_v6, %v1146_v7  ;;  %v8688_v13 = vcombine.low %v1138_v6, %v1146_v7  ;;  %v1206_v55 = vunpack.c.l.s8.bf16 %v778_v51  ;;  %v788_v2 = vld [vmem:[%s10877_s6 + $0x5b0] sm:$0xff]  ;;  %v11256_v51 = vld [vmem:[%s10877_s6 + $0x680] sm:$0xff] }
  0xaa   : > { %v1202_v56 = vunpack.c.l.s8.bf16 %v776_v52  ;;  %v1214_v3 = vunpack.c.l.s8.bf16 %v782_v62  ;;  %v1222_v6 = vunpack.c.l.s8.bf16 %v786_v63  ;;  %v1218_v7 = vunpack.c.l.s8.bf16 %v784_v0  ;;  %v11259_v52 = vld [vmem:[%s10877_s6 + $0x6a0] sm:$0xff] }
  0xab   : > { %v11272_v63 = vld [vmem:[%s10877_s6 + $0x6c0] sm:$0xff] }
  0xac   : > { %v11275_v0 = vld [vmem:[%s10877_s6 + $0x6e0] sm:$0xff] }
  0xaf   : > { %4903 = vmatmul.mubr.bf16.gmra.mrb[52].mxu1 %v8616_v27  ;;  %v1174_v27 = vunpack.c.l.s8.bf16 %v762_v17  ;;  %v11224_v17 = vld [vmem:[%s10877_s6 + $0x600] sm:$0xff] }
  0xb0   : > { %6059 = vmatmul.mubr.bf16.gmra.mrb[52].mxu0 %v8624_v28  ;;  %4910 = vmatprep.mubr.bf16.mxu1 %v8633_v30  ;;  %v1170_v28 = vunpack.c.l.s8.bf16 %v760_v18  ;;  %v1178_v30 = vunpack.c.l.s8.bf16 %v764_v22  ;;  %v11227_v18 = vld [vmem:[%s10877_s6 + $0x620] sm:$0xff]  ;;  %v11230_v22 = vld [vmem:[%s10877_s6 + $0x610] sm:$0xff] }
  0xb1   : > { %6066 = vmatprep.mubr.bf16.mxu0 %v8641_v32  ;;  %v8696_v32 = vcombine.low %v1150_v21, %v1158_v25  ;;  %v8713_v35 = vcombine.high %v1166_v24, %v1174_v27  ;;  %v796_v21 = vld [vmem:[%s10877_s6 + $0x5f0] sm:$0xff]  ;;  %v1230_v25 = vunpack.c.l.s8.bf16 %v11214_v20 }
  0xb2   : > { %v8721_v37 = vcombine.high %v1170_v28, %v1178_v30  ;;  %v8720_v47 = vcombine.low %v1170_v28, %v1178_v30  ;;  %v1254_v28 = vunpack.c.l.s8.bf16 %v11227_v18  ;;  %v1250_v30 = vunpack.c.l.s8.bf16 %v11230_v22 }
  0xb7   : > { %4911 = vmatmul.mubr.bf16.gmra.mrb[56].mxu1 %v8632_v43  ;;  %v1190_v43 = vunpack.c.l.s8.bf16 %v770_v39  ;;  %v11240_v39 = vld [vmem:[%s10877_s6 + $0x640] sm:$0xff] }
  0xb8   : > { %6067 = vmatmul.mubr.bf16.gmra.mrb[56].mxu0 %v8640_v44  ;;  %4918 = vmatprep.mubr.bf16.mxu1 %v8649_v45  ;;  %v1186_v44 = vunpack.c.l.s8.bf16 %v768_v40  ;;  %v1194_v45 = vunpack.c.l.s8.bf16 %v772_v41  ;;  %v11243_v40 = vld [vmem:[%s10877_s6 + $0x660] sm:$0xff]  ;;  %v11246_v41 = vld [vmem:[%s10877_s6 + $0x650] sm:$0xff] }
  0xb9   : > { %6074 = vmatprep.mubr.bf16.mxu0 %v8657_v46  ;;  %v8712_v46 = vcombine.low %v1166_v24, %v1174_v27  ;;  %v8729_v48 = vcombine.high %v1182_v42, %v1190_v43  ;;  %v11233_v24 = vld [vmem:[%s10877_s6 + $0x630] sm:$0xff]  ;;  %v1246_v27 = vunpack.c.l.s8.bf16 %v11224_v17 }
  0xba   : > { %v8737_v49 = vcombine.high %v1186_v44, %v1194_v45 }
  0xbf   : > { %4919 = vmatmul.mubr.bf16.gmra.mrb[60].mxu1 %v8648_v57  ;;  %v1210_v57 = vunpack.c.l.s8.bf16 %v780_v53  ;;  %v11262_v53 = vld [vmem:[%s10877_s6 + $0x690] sm:$0xff] }
  0xc0   : > { %6075 = vmatmul.mubr.bf16.gmra.mrb[60].mxu0 %v8656_v58  ;;  %4926 = vmatprep.mubr.bf16.mxu1 %v8665_v59  ;;  %v8728_v58 = vcombine.low %v1182_v42, %v1190_v43  ;;  %v8736_v59 = vcombine.low %v1186_v44, %v1194_v45  ;;  %v11249_v42 = vld [vmem:[%s10877_s6 + $0x670] sm:$0xff]  ;;  %v1262_v43 = vunpack.c.l.s8.bf16 %v11240_v39  ;;  %v1270_v44 = vunpack.c.l.s8.bf16 %v11243_v40 }
  0xc1   : > { %6082 = vmatprep.mubr.bf16.mxu0 %v8673_v60  ;;  %v8745_v60 = vcombine.high %v1198_v54, %v1206_v55  ;;  %v8753_v61 = vcombine.high %v1202_v56, %v1210_v57  ;;  %v1266_v45 = vunpack.c.l.s8.bf16 %v11246_v41 }
  0xc7   : > { %4927 = vmatmul.mubr.bf16.gmra.mrb[64].mxu1 %v8664_v8  ;;  %v1226_v8 = vunpack.c.l.s8.bf16 %v788_v2  ;;  %v11278_v2 = vld [vmem:[%s10877_s6 + $0x6d0] sm:$0xff] }
  0xc8   : > { %6083 = vmatmul.mubr.bf16.gmra.mrb[64].mxu0 %v8672_v9  ;;  %4934 = vmatprep.mubr.bf16.mxu1 %v8681_v10  ;;  %v8744_v9 = vcombine.low %v1198_v54, %v1206_v55  ;;  %v8752_v10 = vcombine.low %v1202_v56, %v1210_v57  ;;  %v11265_v54 = vld [vmem:[%s10877_s6 + $0x6b0] sm:$0xff]  ;;  %v1278_v55 = vunpack.c.l.s8.bf16 %v11256_v51  ;;  %v1286_v56 = vunpack.c.l.s8.bf16 %v11259_v52 }
  0xc9   : > { %6090 = vmatprep.mubr.bf16.mxu0 %v8689_v11  ;;  %v8761_v11 = vcombine.high %v1214_v3, %v1222_v6  ;;  %v8769_v12 = vcombine.high %v1218_v7, %v1226_v8  ;;  %v1282_v57 = vunpack.c.l.s8.bf16 %v11262_v53 }
  0xcf   : > { %4935 = vmatmul.mubr.bf16.gmra.mrb[68].mxu1 %v8680_v31  ;;  %v1242_v31 = vunpack.c.l.s8.bf16 %v796_v21  ;;  %v11288_v21 = vld [vmem:[%s10877_s6 + $0x700] sm:$0xff] }
  0xd0   : > { %6091 = vmatmul.mubr.bf16.gmra.mrb[68].mxu0 %v8688_v13  ;;  %4942 = vmatprep.mubr.bf16.mxu1 %v8697_v14  ;;  %v8760_v13 = vcombine.low %v1214_v3, %v1222_v6  ;;  %v8768_v14 = vcombine.low %v1218_v7, %v1226_v8  ;;  %v11281_v3 = vld [vmem:[%s10877_s6 + $0x6f0] sm:$0xff]  ;;  %v1294_v6 = vunpack.c.l.s8.bf16 %v11272_v63  ;;  %v1302_v7 = vunpack.c.l.s8.bf16 %v11275_v0 }
  0xd1   : > { %6098 = vmatprep.mubr.bf16.mxu0 %v8705_v15  ;;  %v8777_v15 = vcombine.high %v1230_v25, %v1238_v26  ;;  %v8785_v16 = vcombine.high %v1234_v29, %v1242_v31  ;;  %v1298_v8 = vunpack.c.l.s8.bf16 %v11278_v2 }
  0xd7   : > { %4943 = vmatmul.mubr.bf16.gmra.mrb[72].mxu1 %v8696_v32  ;;  %v1258_v32 = vunpack.c.l.s8.bf16 %v11233_v24 }
  0xd8   : > { %6099 = vmatmul.mubr.bf16.gmra.mrb[72].mxu0 %v8704_v33  ;;  %4950 = vmatprep.mubr.bf16.mxu1 %v8713_v35  ;;  %v8776_v33 = vcombine.low %v1230_v25, %v1238_v26  ;;  %v8784_v35 = vcombine.low %v1234_v29, %v1242_v31  ;;  %v11291_v25 = vld [vmem:[%s10877_s6 + $0x720] sm:$0xff]  ;;  %v11294_v26 = vld [vmem:[%s10877_s6 + $0x710] sm:$0xff]  ;;  %v1310_v31 = vunpack.c.l.s8.bf16 %v11288_v21 }
  0xd9   : > { %6106 = vmatprep.mubr.bf16.mxu0 %v8721_v37  ;;  %v8793_v37 = vcombine.high %v1246_v27, %v1254_v28  ;;  %v8801_v38 = vcombine.high %v1250_v30, %v1258_v32  ;;  %v11297_v29 = vld [vmem:[%s10877_s6 + $0x730] sm:$0xff] }
  0xdf   : > { %4951 = vmatmul.mubr.bf16.gmra.mrb[76].mxu1 %v8712_v46  ;;  %v1274_v46 = vunpack.c.l.s8.bf16 %v11249_v42 }
  0xe0   : > { %6107 = vmatmul.mubr.bf16.gmra.mrb[76].mxu0 %v8720_v47  ;;  %4958 = vmatprep.mubr.bf16.mxu1 %v8729_v48  ;;  %v8792_v47 = vcombine.low %v1246_v27, %v1254_v28  ;;  %v8800_v48 = vcombine.low %v1250_v30, %v1258_v32  ;;  %v11304_v32 = vld [vmem:[%s10877_s6 + $0x740] sm:$0xff] }
  0xe1   : > { %6114 = vmatprep.mubr.bf16.mxu0 %v8737_v49  ;;  %v8809_v49 = vcombine.high %v1262_v43, %v1270_v44  ;;  %v8817_v50 = vcombine.high %v1266_v45, %v1274_v46 }
  0xe7   : > { %4959 = vmatmul.mubr.bf16.gmra.mrb[80].mxu1 %v8728_v58  ;;  %v1290_v58 = vunpack.c.l.s8.bf16 %v11265_v54 }
  0xe8   : > { %6115 = vmatmul.mubr.bf16.gmra.mrb[80].mxu0 %v8736_v59  ;;  %4966 = vmatprep.mubr.bf16.mxu1 %v8745_v60  ;;  %v8808_v59 = vcombine.low %v1262_v43, %v1270_v44  ;;  %v8816_v60 = vcombine.low %v1266_v45, %v1274_v46 }
  0xe9   : > { %6122 = vmatprep.mubr.bf16.mxu0 %v8753_v61  ;;  %v8825_v61 = vcombine.high %v1278_v55, %v1286_v56  ;;  %v8833_v62 = vcombine.high %v1282_v57, %v1290_v58 }
  0xef   : > { %4967 = vmatmul.mubr.bf16.gmra.mrb[84].mxu1 %v8744_v9  ;;  %v1306_v9 = vunpack.c.l.s8.bf16 %v11281_v3 }
  0xf0   : > { %6123 = vmatmul.mubr.bf16.gmra.mrb[84].mxu0 %v8752_v10  ;;  %4974 = vmatprep.mubr.bf16.mxu1 %v8761_v11  ;;  %v8824_v10 = vcombine.low %v1278_v55, %v1286_v56  ;;  %v8832_v11 = vcombine.low %v1282_v57, %v1290_v58  ;;  %v11323_v55 = vld [vmem:[%s10877_s6 + $0x7a0] sm:$0xff]  ;;  %v11326_v56 = vld [vmem:[%s10877_s6 + $0x790] sm:$0xff] }
  0xf1   : > { %6130 = vmatprep.mubr.bf16.mxu0 %v8769_v12  ;;  %v8841_v12 = vcombine.high %v1294_v6, %v1302_v7  ;;  %v8849_v23 = vcombine.high %v1298_v8, %v1306_v9  ;;  %v8848_v27 = vcombine.low %v1298_v8, %v1306_v9  ;;  %v11329_v57 = vld [vmem:[%s10877_s6 + $0x7b0] sm:$0xff]  ;;  %v11336_v9 = vld [vmem:[%s10877_s6 + $0x7c0] sm:$0xff] }
  0xf7   : > { %4975 = vmatmul.mubr.bf16.gmra.mrb[88].mxu1 %v8760_v13  ;;  %v1318_v13 = vunpack.c.l.s8.bf16 %v11291_v25 }
  0xf8   : > { %6131 = vmatmul.mubr.bf16.gmra.mrb[88].mxu0 %v8768_v14  ;;  %4982 = vmatprep.mubr.bf16.mxu1 %v8777_v15  ;;  %v1314_v14 = vunpack.c.l.s8.bf16 %v11294_v26  ;;  %v1322_v15 = vunpack.c.l.s8.bf16 %v11297_v29 }
  0xf9   : > { %6138 = vmatprep.mubr.bf16.mxu0 %v8785_v16  ;;  %v8840_v16 = vcombine.low %v1294_v6, %v1302_v7  ;;  %v8857_v28 = vcombine.high %v1310_v31, %v1318_v13  ;;  %v8856_v46 = vcombine.low %v1310_v31, %v1318_v13 }
  0xfa   : > { %v8865_v30 = vcombine.high %v1314_v14, %v1322_v15 }
  0xff   : > { %4983 = vmatmul.mubr.bf16.gmra.mrb[92].mxu1 %v8776_v33  ;;  %v11307_v33 = vld [vmem:[%s10877_s6 + $0x760] sm:$0xff] }
 0x100   : > { %6139 = vmatmul.mubr.bf16.gmra.mrb[92].mxu0 %v8784_v35  ;;  %4990 = vmatprep.mubr.bf16.mxu1 %v8793_v37  ;;  %v11310_v35 = vld [vmem:[%s10877_s6 + $0x750] sm:$0xff]  ;;  %v1334_v43 = vunpack.c.l.s8.bf16 %v11307_v33 }
 0x101   : > { %6146 = vmatprep.mubr.bf16.mxu0 %v8801_v38  ;;  %v11313_v37 = vld [vmem:[%s10877_s6 + $0x770] sm:$0xff]  ;;  %v1326_v38 = vunpack.c.l.s8.bf16 %v11304_v32  ;;  %v1330_v44 = vunpack.c.l.s8.bf16 %v11310_v35 }
 0x102   : > { %v1338_v45 = vunpack.c.l.s8.bf16 %v11313_v37 }
 0x104   : > { %v8880_v6 = vcombine.low %v1330_v44, %v1338_v45 }
 0x107   : > { %4991 = vmatmul.mubr.bf16.gmra.mrb[96].mxu1 %v8792_v47  ;;  %v8864_v47 = vcombine.low %v1314_v14, %v1322_v15 }
 0x108   : > { %6147 = vmatmul.mubr.bf16.gmra.mrb[96].mxu0 %v8800_v48  ;;  %4998 = vmatprep.mubr.bf16.mxu1 %v8809_v49  ;;  %v8873_v48 = vcombine.high %v1326_v38, %v1334_v43  ;;  %v8881_v49 = vcombine.high %v1330_v44, %v1338_v45  ;;  %v10517_v45 = vld [vmem:[%s10877_s6 + $0x60] sm:$0xff] }
 0x109   : > { %6154 = vmatprep.mubr.bf16.mxu0 %v8817_v50  ;;  %v11320_v50 = vld [vmem:[%s10877_s6 + $0x780] sm:$0xff] }
 0x10a   : > { %v1342_v58 = vunpack.c.l.s8.bf16 %v11320_v50 }
 0x10f   : > { %4999 = vmatmul.mubr.bf16.gmra.mrb[100].mxu1 %v8808_v59  ;;  %v1350_v59 = vunpack.c.l.s8.bf16 %v11323_v55 }
 0x110   : > { %6155 = vmatmul.mubr.bf16.gmra.mrb[100].mxu0 %v8816_v60  ;;  %5006 = vmatprep.mubr.bf16.mxu1 %v8825_v61  ;;  %v1346_v60 = vunpack.c.l.s8.bf16 %v11326_v56  ;;  %v1354_v61 = vunpack.c.l.s8.bf16 %v11329_v57 }
 0x111   : > { %6162 = vmatprep.mubr.bf16.mxu0 %v8833_v62  ;;  %v8872_v62 = vcombine.low %v1326_v38, %v1334_v43  ;;  %v8889_v7 = vcombine.high %v1342_v58, %v1350_v59  ;;  %v8888_v15 = vcombine.low %v1342_v58, %v1350_v59  ;;  %v10516_v43 = vld [vmem:[%s10877_s6 + $0x40] sm:$0xff] }
 0x112   : > { %v8897_v8 = vcombine.high %v1346_v60, %v1354_v61  ;;  %v879_v44 = vunpack.c.h.s8.bf16 %v10516_v43  ;;  %v10452_v59 = vld [vmem:[%s12148_s1 + $0x100] sm:$0xff]  }
 0x117   : > { %5007 = vmatmul.mubr.bf16.gmra.mrb[104].mxu1 %v8824_v10  ;;  %v11339_v10 = vld [vmem:[%s10877_s6 + $0x7e0] sm:$0xff] }
 0x118   : > { %6163 = vmatmul.mubr.bf16.gmra.mrb[104].mxu0 %v8832_v11  ;;  %5014 = vmatprep.mubr.bf16.mxu1 %v8841_v12  ;;  %v11342_v11 = vld [vmem:[%s10877_s6 + $0x7d0] sm:$0xff]  ;;  %v1366_v31 = vunpack.c.l.s8.bf16 %v11339_v10 }
 0x119   : > { %6170 = vmatprep.mubr.bf16.mxu0 %v8849_v23  ;;  %v11345_v12 = vld [vmem:[%s10877_s6 + $0x7f0] sm:$0xff]  ;;  %v1358_v23 = vunpack.c.l.s8.bf16 %v11336_v9  ;;  %v1362_v13 = vunpack.c.l.s8.bf16 %v11342_v11 }
 0x11a   : > { %v1370_v14 = vunpack.c.l.s8.bf16 %v11345_v12 }
 0x11c   : > { %v8912_v38 = vcombine.low %v1362_v13, %v1370_v14 }
 0x11f   : > { %5015 = vmatmul.mubr.bf16.gmra.mrb[108].mxu1 %v8840_v16  ;;  %v8896_v16 = vcombine.low %v1346_v60, %v1354_v61  ;;  %v10520_v61 = vld [vmem:[%s10877_s6 + $0x80] sm:$0xff] }
 0x120   : > { %6171 = vmatmul.mubr.bf16.gmra.mrb[108].mxu0 %v8848_v27  ;;  %5022 = vmatprep.mubr.bf16.mxu1 %v8857_v28  ;;  %v8905_v27 = vcombine.high %v1358_v23, %v1366_v31  ;;  %v8913_v28 = vcombine.high %v1362_v13, %v1370_v14  ;;  %v10523_v13 = vld [vmem:[%s10877_s6 + $0xb0] sm:$0xff] }
 0x121   : > { %6178 = vmatprep.mubr.bf16.mxu0 %v8865_v30  ;;  %v8904_v30 = vcombine.low %v1358_v23, %v1366_v31  ;;  %v10522_v23 = vld [vmem:[%s10877_s6 + $0x90] sm:$0xff]  ;;  %v907_v14 = vunpack.c.h.s8.bf16 %v10523_v13 }
 0x122   : > { %v899_v31 = vunpack.c.h.s8.bf16 %v10522_v23  ;;  %v10529_v23 = vld [vmem:[%s10877_s6 + $0x120] sm:$0xff]  ;;  %v10530_v13 = vld [vmem:[%s10877_s6 + $0x110] sm:$0xff] }
 0x127   : > { %5023 = vmatmul.mubr.bf16.gmra.mrb[112].mxu1 %v8856_v46  ;;  %v887_v46 = vunpack.c.h.s8.bf16 %v10517_v45 }
 0x128   : > { %6179 = vmatmul.mubr.bf16.gmra.mrb[112].mxu0 %v8864_v47  ;;  %5030 = vmatprep.mubr.bf16.mxu1 %v8873_v48  ;;  %v10518_v47 = vld [vmem:[%s10877_s6 + $0x50] sm:$0xff] }
 0x129   : > { %6186 = vmatprep.mubr.bf16.mxu0 %v8881_v49  ;;  %v883_v48 = vunpack.c.h.s8.bf16 %v10518_v47  ;;  %v10519_v49 = vld [vmem:[%s10877_s6 + $0x70] sm:$0xff] }
 0x12a   : > { %v891_v58 = vunpack.c.h.s8.bf16 %v10519_v49 }
 0x12c   : > { %v8435_v60 = vcombine.high %v883_v48, %v891_v58 }
 0x12f   : > { %5031 = vmatmul.mubr.bf16.gmra.mrb[116].mxu1 %v8872_v62  ;;  %v895_v62 = vunpack.c.h.s8.bf16 %v10520_v61 }
 0x130   : > { %6187 = vmatmul.mubr.bf16.gmra.mrb[116].mxu0 %v8880_v6  ;;  %5038 = vmatprep.mubr.bf16.mxu1 %v8889_v7  ;;  %v10521_v6 = vld [vmem:[%s10877_s6 + $0xa0] sm:$0xff] }
 0x131   : > { %6194 = vmatprep.mubr.bf16.mxu0 %v8897_v8  ;;  %v903_v7 = vunpack.c.h.s8.bf16 %v10521_v6  ;;  %v10454_v8 = vld [vmem:[%s12148_s1 + $0x108] sm:$0xff]   ;;  %v10460_v6 = vld [vmem:[%s12148_s1 + $0x120] sm:$0xff]  }
 0x137   : > { %5039 = vmatmul.mubr.bf16.gmra.mrb[120].mxu1 %v8888_v15  ;;  %v8434_v15 = vcombine.low %v883_v48, %v891_v58  ;;  %v10527_v48 = vld [vmem:[%s10877_s6 + $0xf0] sm:$0xff]  ;;  %v10458_v58 = vld [vmem:[%s12148_s1 + $0x118] sm:$0xff]  }
 0x138   : > { %6195 = vmatmul.mubr.bf16.gmra.mrb[120].mxu0 %v8896_v16  ;;  %5046 = vmatprep.mubr.bf16.mxu1 %v8905_v27  ;;  %v8443_v16 = vcombine.high %v895_v62, %v903_v7  ;;  %v8451_v27 = vcombine.high %v899_v31, %v907_v14  ;;  %v923_v49 = vunpack.c.h.s8.bf16 %v10527_v48 }
 0x139   : > { %6202 = vmatprep.mubr.bf16.mxu0 %v8913_v28  ;;  %v10456_v28 = vld [vmem:[%s12148_s1 + $0x110] sm:$0xff]  }
 0x13f   : > { %5047 = vmatmul.mubr.bf16.gmra.mrb[124].mxu1 %v8904_v30  ;;  %v10457_v30 = vld [vmem:[%s12148_s1 + $0x310] sm:$0xff]  }
 0x140   : > { %6203 = vmatmul.mubr.bf16.gmra.mrb[124].mxu0 %v8912_v38  ;;  %5087 = vmatprep.mubr.bf16.mxu1 %v11185_v4  ;;  %v10453_v4 = vld [vmem:[%s12148_s1 + $0x300] sm:$0xff]  }
 0x141   : > { %6243 = vmatprep.mubr.bf16.mxu0 %v11191_v5  ;;  %v8427_v5 = vcombine.high %v879_v44, %v887_v46  ;;  %v10524_v38 = vld [vmem:[%s10877_s6 + $0xc0] sm:$0xff] }
 0x142   : > { %v911_v43 = vunpack.c.h.s8.bf16 %v10524_v38 }
 0x147   : > { %5088 = vmatmul.mubr.bf16.vlgmr.msra.gmra.mrb[0].mxu1 %v10922_v34  ;;  %v10455_v34 = vld [vmem:[%s12148_s1 + $0x308] sm:$0xff]  }
 0x148   : > { %6244 = vmatmul.mubr.bf16.vlgmr.msra.gmra.mrb[0].mxu0 %v10929_v36  ;;  %5345 = vmatpush1.bf16.msra.mxu1 %v10452_v59  ;;  %v8426_v36 = vcombine.low %v879_v44, %v887_v46  ;;  %v10525_v44 = vld [vmem:[%s10877_s6 + $0xe0] sm:$0xff]  ;;  %v10526_v46 = vld [vmem:[%s10877_s6 + $0xd0] sm:$0xff]  ;;  %v10459_v59 = vld [vmem:[%s12148_s1 + $0x318] sm:$0xff]  }
 0x149   : > { %6501 = vmatpush1.bf16.msra.mxu0 %v10453_v4  ;;  %5095 = vmatprep.mubr.bf16.mxu1 %v8427_v5  ;;  %v919_v45 = vunpack.c.h.s8.bf16 %v10525_v44  ;;  %v915_v47 = vunpack.c.h.s8.bf16 %v10526_v46  ;;  %v8442_v4 = vcombine.low %v895_v62, %v903_v7  ;;  %v8450_v5 = vcombine.low %v899_v31, %v907_v14  ;;  %v10461_v62 = vld [vmem:[%s12148_s1 + $0x320] sm:$0xff]   ;;  %v10464_v44 = vld [vmem:[%s12148_s1 + $0x130] sm:$0xff]  }
 0x14a   : > { %6251 = vmatprep.mubr.bf16.mxu0 %v8435_v60  ;;  %5346 = vmatprep.subr.bf16.mxu1 %v10758_v1  ;;  %v10528_v7 = vld [vmem:[%s10877_s6 + $0x100] sm:$0xff]  ;;  %v935_v31 = vunpack.c.h.s8.bf16 %v10529_v23  ;;  %v931_v14 = vunpack.c.h.s8.bf16 %v10530_v13 }
 0x14b   : > { %6502 = vmatprep.subr.bf16.mxu0 %v10758_v1  ;;  %v8459_v60 = vcombine.high %v911_v43, %v919_v45  ;;  %v8467_v61 = vcombine.high %v915_v47, %v923_v49  ;;  %v10468_v23 = vld [vmem:[%s12148_s1 + $0x140] sm:$0xff]  }
 0x14c   : > { %5347 = vmatpush1.bf16.msra.mxu1 %v10454_v8  ;;  %v927_v8 = vunpack.c.h.s8.bf16 %v10528_v7 }
 0x14d   : > { %6503 = vmatpush1.bf16.msra.mxu0 %v10455_v34  ;;  %5348 = vmatprep.subr.bf16.mxu1 %v10758_v1  ;;  %v10531_v34 = vld [vmem:[%s10877_s6 + $0x130] sm:$0xff] }
 0x14e   : > { %6504 = vmatprep.subr.bf16.mxu0 %v10758_v1 }
 0x14f   : > { %5096 = vmatmul.mubr.bf16.gmra.mrb[4].mxu1 %v8426_v36  ;;  %v939_v36 = vunpack.c.h.s8.bf16 %v10531_v34 }
 0x150   : > { %6252 = vmatmul.mubr.bf16.gmra.mrb[4].mxu0 %v8434_v15  ;;  %5103 = vmatprep.mubr.bf16.mxu1 %v8443_v16  ;;  %v10462_v15 = vld [vmem:[%s12148_s1 + $0x128] sm:$0xff]  }
 0x151   : > { %6259 = vmatprep.mubr.bf16.mxu0 %v8451_v27  ;;  %5349 = vmatpush1.bf16.msra.mxu1 %v10456_v28  ;;  %v10463_v16 = vld [vmem:[%s12148_s1 + $0x328] sm:$0xff]   ;;  %v8458_v27 = vcombine.low %v911_v43, %v919_v45  ;;  %v8466_v28 = vcombine.low %v915_v47, %v923_v49  ;;  %v8483_v38 = vcombine.high %v931_v14, %v939_v36  ;;  %v10465_v43 = vld [vmem:[%s12148_s1 + $0x330] sm:$0xff]   ;;  %v10532_v45 = vld [vmem:[%s10877_s6 + $0x140] sm:$0xff] }
 0x152   : > { %6505 = vmatpush1.bf16.msra.mxu0 %v10457_v30  ;;  %5350 = vmatprep.subr.bf16.mxu1 %v10758_v1  ;;  %v8475_v30 = vcombine.high %v927_v8, %v935_v31  ;;  %v943_v46 = vunpack.c.h.s8.bf16 %v10532_v45  ;;  %v10533_v47 = vld [vmem:[%s10877_s6 + $0x160] sm:$0xff]  ;;  %v10534_v49 = vld [vmem:[%s10877_s6 + $0x150] sm:$0xff] }
 0x153   : > { %6506 = vmatprep.subr.bf16.mxu0 %v10758_v1  ;;  %v951_v48 = vunpack.c.h.s8.bf16 %v10533_v47  ;;  %v10472_v47 = vld [vmem:[%s12148_s1 + $0x150] sm:$0xff]  }
 0x155   : > { %5351 = vmatpush1.bf16.msra.mxu1 %v10458_v58  ;;  %v947_v58 = vunpack.c.h.s8.bf16 %v10534_v49 }
 0x156   : > { %6507 = vmatpush1.bf16.msra.mxu0 %v10459_v59  ;;  %5352 = vmatprep.subr.bf16.mxu1 %v10758_v1  ;;  %v10535_v59 = vld [vmem:[%s10877_s6 + $0x170] sm:$0xff] }
 0x157   : > { %5104 = vmatmul.mubr.bf16.gmra.mrb[8].mxu1 %v8442_v4  ;;  %6508 = vmatprep.subr.bf16.mxu0 %v10758_v1  ;;  %v955_v4 = vunpack.c.h.s8.bf16 %v10535_v59 }
 0x158   : > { %6260 = vmatmul.mubr.bf16.gmra.mrb[8].mxu0 %v8450_v5  ;;  %5111 = vmatprep.mubr.bf16.mxu1 %v8459_v60  ;;  %v10466_v5 = vld [vmem:[%s12148_s1 + $0x138] sm:$0xff]  }
 0x159   : > { %6267 = vmatprep.mubr.bf16.mxu0 %v8467_v61  ;;  %5353 = vmatpush1.bf16.msra.mxu1 %v10460_v6  ;;  %v10467_v60 = vld [vmem:[%s12148_s1 + $0x338] sm:$0xff]   ;;  %v8474_v61 = vcombine.low %v927_v8, %v935_v31  ;;  %v8482_v6 = vcombine.low %v931_v14, %v939_v36  ;;  %v8499_v7 = vcombine.high %v947_v58, %v955_v4  ;;  %v10469_v8 = vld [vmem:[%s12148_s1 + $0x340] sm:$0xff]   ;;  %v10538_v36 = vld [vmem:[%s10877_s6 + $0x190] sm:$0xff] }
 0x15a   : > { %6509 = vmatpush1.bf16.msra.mxu0 %v10461_v62  ;;  %5354 = vmatprep.subr.bf16.mxu1 %v10758_v1  ;;  %v8491_v62 = vcombine.high %v943_v46, %v951_v48  ;;  %v10536_v31 = vld [vmem:[%s10877_s6 + $0x180] sm:$0xff] }
 0x15b   : > { %6510 = vmatprep.subr.bf16.mxu0 %v10758_v1  ;;  %v959_v13 = vunpack.c.h.s8.bf16 %v10536_v31  ;;  %v10537_v14 = vld [vmem:[%s10877_s6 + $0x1a0] sm:$0xff] }
 0x15c   : > { %v967_v34 = vunpack.c.h.s8.bf16 %v10537_v14  ;;  %v10545_v14 = vld [vmem:[%s10877_s6 + $0x220] sm:$0xff] }
 0x15d   : > { %5355 = vmatpush1.bf16.msra.mxu1 %v10462_v15  ;;  %v963_v15 = vunpack.c.h.s8.bf16 %v10538_v36  ;;  %v999_v36 = vunpack.c.h.s8.bf16 %v10545_v14  ;;  %v10476_v14 = vld [vmem:[%s12148_s1 + $0x160] sm:$0xff]  }
 0x15e   : > { %6511 = vmatpush1.bf16.msra.mxu0 %v10463_v16  ;;  %5356 = vmatprep.subr.bf16.mxu1 %v10758_v1  ;;  %v10539_v16 = vld [vmem:[%s10877_s6 + $0x1b0] sm:$0xff] }
 0x15f   : > { %5112 = vmatmul.mubr.bf16.gmra.mrb[12].mxu1 %v8458_v27  ;;  %6512 = vmatprep.subr.bf16.mxu0 %v10758_v1  ;;  %v971_v27 = vunpack.c.h.s8.bf16 %v10539_v16  ;;  %v10474_v16 = vld [vmem:[%s12148_s1 + $0x158] sm:$0xff]  }
 0x160   : > { %6268 = vmatmul.mubr.bf16.gmra.mrb[12].mxu0 %v8466_v28  ;;  %5119 = vmatprep.mubr.bf16.mxu1 %v8475_v30  ;;  %v10470_v28 = vld [vmem:[%s12148_s1 + $0x148] sm:$0xff]  }
 0x161   : > { %6275 = vmatprep.mubr.bf16.mxu0 %v8483_v38  ;;  %5357 = vmatpush1.bf16.msra.mxu1 %v10464_v44  ;;  %v10471_v30 = vld [vmem:[%s12148_s1 + $0x348] sm:$0xff]   ;;  %v8490_v38 = vcombine.low %v943_v46, %v951_v48  ;;  %v8498_v44 = vcombine.low %v947_v58, %v955_v4  ;;  %v8515_v45 = vcombine.high %v963_v15, %v971_v27  ;;  %v10473_v46 = vld [vmem:[%s12148_s1 + $0x350] sm:$0xff]   ;;  %v10540_v48 = vld [vmem:[%s10877_s6 + $0x1c0] sm:$0xff] }
 0x162   : > { %6513 = vmatpush1.bf16.msra.mxu0 %v10465_v43  ;;  %5358 = vmatprep.subr.bf16.mxu1 %v10758_v1  ;;  %v8507_v43 = vcombine.high %v959_v13, %v967_v34  ;;  %v975_v49 = vunpack.c.h.s8.bf16 %v10540_v48  ;;  %v10541_v58 = vld [vmem:[%s10877_s6 + $0x1e0] sm:$0xff]  ;;  %v10542_v4 = vld [vmem:[%s10877_s6 + $0x1d0] sm:$0xff] }
 0x163   : > { %6514 = vmatprep.subr.bf16.mxu0 %v10758_v1  ;;  %v983_v59 = vunpack.c.h.s8.bf16 %v10541_v58  ;;  %v10550_v58 = vld [vmem:[%s10877_s6 + $0x250] sm:$0xff] }
 0x165   : > { %5359 = vmatpush1.bf16.msra.mxu1 %v10466_v5  ;;  %v979_v5 = vunpack.c.h.s8.bf16 %v10542_v4 }
 0x166   : > { %6515 = vmatpush1.bf16.msra.mxu0 %v10467_v60  ;;  %5360 = vmatprep.subr.bf16.mxu1 %v10758_v1  ;;  %v10543_v60 = vld [vmem:[%s10877_s6 + $0x1f0] sm:$0xff] }
 0x167   : > { %5120 = vmatmul.mubr.bf16.gmra.mrb[16].mxu1 %v8474_v61  ;;  %6516 = vmatprep.subr.bf16.mxu0 %v10758_v1  ;;  %v987_v61 = vunpack.c.h.s8.bf16 %v10543_v60 }
 0x168   : > { %6276 = vmatmul.mubr.bf16.gmra.mrb[16].mxu0 %v8482_v6  ;;  %5127 = vmatprep.mubr.bf16.mxu1 %v8491_v62  ;;  %v8506_v6 = vcombine.low %v959_v13, %v967_v34  ;;  %v8514_v62 = vcombine.low %v963_v15, %v971_v27  ;;  %v10475_v13 = vld [vmem:[%s12148_s1 + $0x358] sm:$0xff]   ;;  %v10546_v34 = vld [vmem:[%s10877_s6 + $0x210] sm:$0xff] }
 0x169   : > { %6283 = vmatprep.mubr.bf16.mxu0 %v8499_v7  ;;  %5361 = vmatpush1.bf16.msra.mxu1 %v10468_v23  ;;  %v8523_v7 = vcombine.high %v975_v49, %v983_v59  ;;  %v8531_v23 = vcombine.high %v979_v5, %v987_v61  ;;  %v995_v15 = vunpack.c.h.s8.bf16 %v10546_v34  ;;  %v10547_v27 = vld [vmem:[%s10877_s6 + $0x230] sm:$0xff] }
 0x16a   : > { %6517 = vmatpush1.bf16.msra.mxu0 %v10469_v8  ;;  %5362 = vmatprep.subr.bf16.mxu1 %v10758_v1  ;;  %v10544_v8 = vld [vmem:[%s10877_s6 + $0x200] sm:$0xff] }
 0x16b   : > { %6518 = vmatprep.subr.bf16.mxu0 %v10758_v1  ;;  %v991_v31 = vunpack.c.h.s8.bf16 %v10544_v8 }
 0x16d   : > { %5363 = vmatpush1.bf16.msra.mxu1 %v10470_v28  ;;  %v1003_v28 = vunpack.c.h.s8.bf16 %v10547_v27  ;;  %v8538_v60 = vcombine.low %v991_v31, %v999_v36 }
 0x16e   : > { %6519 = vmatpush1.bf16.msra.mxu0 %v10471_v30  ;;  %5364 = vmatprep.subr.bf16.mxu1 %v10758_v1  ;;  %v8522_v30 = vcombine.low %v975_v49, %v983_v59  ;;  %v1011_v49 = vunpack.c.h.s8.bf16 %v10550_v58  ;;  %v10551_v59 = vld [vmem:[%s10877_s6 + $0x270] sm:$0xff] }
 0x16f   : > { %5128 = vmatmul.mubr.bf16.gmra.mrb[20].mxu1 %v8490_v38  ;;  %6520 = vmatprep.subr.bf16.mxu0 %v10758_v1  ;;  %v8530_v38 = vcombine.low %v979_v5, %v987_v61  ;;  %v1019_v4 = vunpack.c.h.s8.bf16 %v10551_v59  ;;  %v8546_v5 = vcombine.low %v995_v15, %v1003_v28 }
 0x170   : > { %6284 = vmatmul.mubr.bf16.gmra.mrb[20].mxu0 %v8498_v44  ;;  %5135 = vmatprep.mubr.bf16.mxu1 %v8507_v43  ;;  %v8539_v44 = vcombine.high %v991_v31, %v999_v36  ;;  %v8547_v43 = vcombine.high %v995_v15, %v1003_v28  ;;  %v10554_v31 = vld [vmem:[%s10877_s6 + $0x290] sm:$0xff] }
 0x171   : > { %6291 = vmatprep.mubr.bf16.mxu0 %v8515_v45  ;;  %5365 = vmatpush1.bf16.msra.mxu1 %v10472_v47  ;;  %v10548_v45 = vld [vmem:[%s10877_s6 + $0x240] sm:$0xff]  ;;  %v1027_v36 = vunpack.c.h.s8.bf16 %v10554_v31  ;;  %v8562_v27 = vcombine.low %v1011_v49, %v1019_v4 }
 0x172   : > { %6521 = vmatpush1.bf16.msra.mxu0 %v10473_v46  ;;  %5366 = vmatprep.subr.bf16.mxu1 %v10758_v1  ;;  %v1007_v47 = vunpack.c.h.s8.bf16 %v10548_v45  ;;  %v10549_v46 = vld [vmem:[%s10877_s6 + $0x260] sm:$0xff] }
 0x173   : > { %6522 = vmatprep.subr.bf16.mxu0 %v10758_v1  ;;  %v1015_v48 = vunpack.c.h.s8.bf16 %v10549_v46  ;;  %v10558_v46 = vld [vmem:[%s10877_s6 + $0x2d0] sm:$0xff] }
 0x175   : > { %5367 = vmatpush1.bf16.msra.mxu1 %v10474_v16  ;;  %v8555_v61 = vcombine.high %v1007_v47, %v1015_v48  ;;  %v10477_v16 = vld [vmem:[%s12148_s1 + $0x360] sm:$0xff]   ;;  %v8554_v15 = vcombine.low %v1007_v47, %v1015_v48  ;;  %v1043_v47 = vunpack.c.h.s8.bf16 %v10558_v46  ;;  %v10559_v48 = vld [vmem:[%s10877_s6 + $0x2f0] sm:$0xff] }
 0x176   : > { %6523 = vmatpush1.bf16.msra.mxu0 %v10475_v13  ;;  %5368 = vmatprep.subr.bf16.mxu1 %v10758_v1  ;;  %v10555_v13 = vld [vmem:[%s10877_s6 + $0x2b0] sm:$0xff]  ;;  %v1051_v58 = vunpack.c.h.s8.bf16 %v10559_v48 }
 0x177   : > { %5136 = vmatmul.mubr.bf16.gmra.mrb[24].mxu1 %v8506_v6  ;;  %6524 = vmatprep.subr.bf16.mxu0 %v10758_v1  ;;  %v8563_v6 = vcombine.high %v1011_v49, %v1019_v4  ;;  %v1035_v34 = vunpack.c.h.s8.bf16 %v10555_v13 }
 0x178   : > { %6292 = vmatmul.mubr.bf16.gmra.mrb[24].mxu0 %v8514_v62  ;;  %5143 = vmatprep.mubr.bf16.mxu1 %v8523_v7  ;;  %v10552_v62 = vld [vmem:[%s10877_s6 + $0x280] sm:$0xff]  ;;  %v8594_v13 = vcombine.low %v1043_v47, %v1051_v58 }
 0x179   : > { %6299 = vmatprep.mubr.bf16.mxu0 %v8531_v23  ;;  %v1023_v7 = vunpack.c.h.s8.bf16 %v10552_v62  ;;  %v10553_v23 = vld [vmem:[%s10877_s6 + $0x2a0] sm:$0xff]  ;;  %5369 = vmatpush1.bf16.msra.mxu1 %v10476_v14  ;;  %v8578_v49 = vcombine.low %v1027_v36, %v1035_v34  ;;  %v10479_v14 = vld [vmem:[%s12148_s1 + $0x368] sm:$0xff]  }
 0x17a   : > { %v1031_v8 = vunpack.c.h.s8.bf16 %v10553_v23  ;;  %6525 = vmatpush1.bf16.msra.mxu0 %v10477_v16  ;;  %5370 = vmatprep.subr.bf16.mxu1 %v10758_v1  ;;  %v10478_v23 = vld [vmem:[%s12148_s1 + $0x168] sm:$0xff]   ;;  %v10563_v16 = vld [vmem:[%s10877_s6 + $0x330] sm:$0xff] }
 0x17b   : > { %6526 = vmatprep.subr.bf16.mxu0 %v10758_v1  ;;  %v1067_v31 = vunpack.c.h.s8.bf16 %v10563_v16 }
 0x17c   : > { %v8571_v28 = vcombine.high %v1023_v7, %v1031_v8  ;;  %v8570_v59 = vcombine.low %v1023_v7, %v1031_v8  ;;  %v10562_v7 = vld [vmem:[%s10877_s6 + $0x310] sm:$0xff] }
 0x17d   : > { %v1059_v8 = vunpack.c.h.s8.bf16 %v10562_v7  ;;  %5371 = vmatpush1.bf16.msra.mxu1 %v10478_v23  ;;  %v10481_v23 = vld [vmem:[%s12148_s1 + $0x370] sm:$0xff]  }
 0x17e   : > { %6527 = vmatpush1.bf16.msra.mxu0 %v10479_v14  ;;  %5372 = vmatprep.subr.bf16.mxu1 %v10758_v1  ;;  %v10571_v14 = vld [vmem:[%s10877_s6 + $0x3b0] sm:$0xff] }
 0x17f   : > { %5144 = vmatmul.mubr.bf16.gmra.mrb[28].mxu1 %v8522_v30  ;;  %v8579_v30 = vcombine.high %v1027_v36, %v1035_v34  ;;  %6528 = vmatprep.subr.bf16.mxu0 %v10758_v1  ;;  %v1099_v7 = vunpack.c.h.s8.bf16 %v10571_v14 }
 0x180   : > { %6300 = vmatmul.mubr.bf16.gmra.mrb[28].mxu0 %v8530_v38  ;;  %5151 = vmatprep.mubr.bf16.mxu1 %v8539_v44  ;;  %v10556_v38 = vld [vmem:[%s10877_s6 + $0x2c0] sm:$0xff] }
 0x181   : > { %6307 = vmatprep.mubr.bf16.mxu0 %v8547_v43  ;;  %v1039_v44 = vunpack.c.h.s8.bf16 %v10556_v38  ;;  %v10557_v43 = vld [vmem:[%s10877_s6 + $0x2e0] sm:$0xff] }
 0x182   : > { %v1047_v45 = vunpack.c.h.s8.bf16 %v10557_v43  ;;  %v10566_v43 = vld [vmem:[%s10877_s6 + $0x350] sm:$0xff]  ;;  %6529 = vmatpush1.bf16.msra.mxu0 %v10481_v23 }
 0x183   : > { %6530 = vmatprep.subr.bf16.mxu0 %v10758_v1  ;;  %v10579_v23 = vld [vmem:[%s10877_s6 + $0x430] sm:$0xff] }
 0x184   : > { %v8587_v4 = vcombine.high %v1039_v44, %v1047_v45  ;;  %v8586_v36 = vcombine.low %v1039_v44, %v1047_v45  ;;  %v1075_v44 = vunpack.c.h.s8.bf16 %v10566_v43  ;;  %v10567_v45 = vld [vmem:[%s10877_s6 + $0x370] sm:$0xff] }
 0x185   : > { %v1083_v46 = vunpack.c.h.s8.bf16 %v10567_v45 }
 0x187   : > { %5152 = vmatmul.mubr.bf16.gmra.mrb[32].mxu1 %v8538_v60  ;;  %v8595_v60 = vcombine.high %v1043_v47, %v1051_v58  ;;  %v8610_v47 = vcombine.low %v1059_v8, %v1067_v31  ;;  %v8626_v16 = vcombine.low %v1075_v44, %v1083_v46 }
 0x188   : > { %6308 = vmatmul.mubr.bf16.gmra.mrb[32].mxu0 %v8546_v5  ;;  %5159 = vmatprep.mubr.bf16.mxu1 %v8555_v61  ;;  %v10560_v5 = vld [vmem:[%s10877_s6 + $0x300] sm:$0xff] }
 0x189   : > { %6315 = vmatprep.mubr.bf16.mxu0 %v8563_v6  ;;  %v1055_v61 = vunpack.c.h.s8.bf16 %v10560_v5  ;;  %v10561_v6 = vld [vmem:[%s10877_s6 + $0x320] sm:$0xff] }
 0x18a   : > { %v1063_v62 = vunpack.c.h.s8.bf16 %v10561_v6  ;;  %v10480_v6 = vld [vmem:[%s12148_s1 + $0x170] sm:$0xff]  }
 0x18b   : > { %5373 = vmatpush1.bf16.msra.mxu1 %v10480_v6  ;;  %v10483_v6 = vld [vmem:[%s12148_s1 + $0x378] sm:$0xff]  }
 0x18c   : > { %v8603_v34 = vcombine.high %v1055_v61, %v1063_v62  ;;  %v8602_v48 = vcombine.low %v1055_v61, %v1063_v62  ;;  %v10570_v61 = vld [vmem:[%s10877_s6 + $0x390] sm:$0xff]  ;;  %5374 = vmatprep.subr.bf16.mxu1 %v10758_v1  ;;  %6531 = vmatpush1.bf16.msra.mxu0 %v10483_v6 }
 0x18d   : > { %v1091_v62 = vunpack.c.h.s8.bf16 %v10570_v61  ;;  %v1131_v61 = vunpack.c.h.s8.bf16 %v10579_v23  ;;  %6789 = vmatprep.subr.bf16.mxu0 %v10758_v1  ;;  %v10587_v6 = vld [vmem:[%s10877_s6 + $0x4b0] sm:$0xff] }
 0x18f   : > { %5160 = vmatmul.mubr.bf16.gmra.mrb[36].mxu1 %v8554_v15  ;;  %v8611_v15 = vcombine.high %v1059_v8, %v1067_v31 }
 0x190   : > { %6316 = vmatmul.mubr.bf16.gmra.mrb[36].mxu0 %v8562_v27  ;;  %5167 = vmatprep.mubr.bf16.mxu1 %v8571_v28  ;;  %v10564_v27 = vld [vmem:[%s10877_s6 + $0x340] sm:$0xff] }
 0x191   : > { %6323 = vmatprep.mubr.bf16.mxu0 %v8579_v30  ;;  %v1071_v28 = vunpack.c.h.s8.bf16 %v10564_v27  ;;  %v10565_v30 = vld [vmem:[%s10877_s6 + $0x360] sm:$0xff] }
 0x192   : > { %v1079_v38 = vunpack.c.h.s8.bf16 %v10565_v30  ;;  %v10574_v30 = vld [vmem:[%s10877_s6 + $0x3d0] sm:$0xff] }
 0x194   : > { %v8619_v58 = vcombine.high %v1071_v28, %v1079_v38  ;;  %v8618_v8 = vcombine.low %v1071_v28, %v1079_v38  ;;  %v1107_v28 = vunpack.c.h.s8.bf16 %v10574_v30  ;;  %v10575_v38 = vld [vmem:[%s10877_s6 + $0x3f0] sm:$0xff] }
 0x195   : > { %v1115_v43 = vunpack.c.h.s8.bf16 %v10575_v38 }
 0x197   : > { %5168 = vmatmul.mubr.bf16.gmra.mrb[40].mxu1 %v8570_v59  ;;  %v8627_v59 = vcombine.high %v1075_v44, %v1083_v46  ;;  %v8642_v44 = vcombine.low %v1091_v62, %v1099_v7  ;;  %v8658_v14 = vcombine.low %v1107_v28, %v1115_v43 }
 0x198   : > { %6324 = vmatmul.mubr.bf16.gmra.mrb[40].mxu0 %v8578_v49  ;;  %5175 = vmatprep.mubr.bf16.mxu1 %v8587_v4  ;;  %v10568_v49 = vld [vmem:[%s10877_s6 + $0x380] sm:$0xff] }
 0x199   : > { %6331 = vmatprep.mubr.bf16.mxu0 %v8595_v60  ;;  %v1087_v4 = vunpack.c.h.s8.bf16 %v10568_v49  ;;  %v10569_v60 = vld [vmem:[%s10877_s6 + $0x3a0] sm:$0xff] }
 0x19a   : > { %v1095_v5 = vunpack.c.h.s8.bf16 %v10569_v60  ;;  %v10482_v60 = vld [vmem:[%s12148_s1 + $0x178] sm:$0xff]  }
 0x19b   : > { %5375 = vmatpush1.bf16.msra.mxu1 %v10482_v60 }
 0x19c   : > { %v8635_v31 = vcombine.high %v1087_v4, %v1095_v5  ;;  %v8634_v45 = vcombine.low %v1087_v4, %v1095_v5  ;;  %v10578_v4 = vld [vmem:[%s10877_s6 + $0x410] sm:$0xff]  ;;  %5633 = vmatprep.subr.bf16.mxu1 %v10758_v1 }
 0x19d   : > { %v1123_v5 = vunpack.c.h.s8.bf16 %v10578_v4  ;;  %v1163_v4 = vunpack.c.h.s8.bf16 %v10587_v6 }
 0x19f   : > { %5176 = vmatmul.mubr.bf16.gmra.mrb[44].mxu1 %v8586_v36  ;;  %v8643_v36 = vcombine.high %v1091_v62, %v1099_v7 }
 0x1a0   : > { %6332 = vmatmul.mubr.bf16.gmra.mrb[44].mxu0 %v8594_v13  ;;  %5183 = vmatprep.mubr.bf16.mxu1 %v8603_v34  ;;  %v10572_v13 = vld [vmem:[%s10877_s6 + $0x3c0] sm:$0xff] }
 0x1a1   : > { %6339 = vmatprep.mubr.bf16.mxu0 %v8611_v15  ;;  %v1103_v34 = vunpack.c.h.s8.bf16 %v10572_v13  ;;  %v10573_v15 = vld [vmem:[%s10877_s6 + $0x3e0] sm:$0xff] }
 0x1a2   : > { %v1111_v27 = vunpack.c.h.s8.bf16 %v10573_v15  ;;  %v10582_v15 = vld [vmem:[%s10877_s6 + $0x450] sm:$0xff] }
 0x1a4   : > { %v8651_v46 = vcombine.high %v1103_v34, %v1111_v27  ;;  %v8650_v62 = vcombine.low %v1103_v34, %v1111_v27  ;;  %v1139_v34 = vunpack.c.h.s8.bf16 %v10582_v15  ;;  %v10583_v27 = vld [vmem:[%s10877_s6 + $0x470] sm:$0xff] }
 0x1a5   : > { %v1147_v30 = vunpack.c.h.s8.bf16 %v10583_v27 }
 0x1a7   : > { %5184 = vmatmul.mubr.bf16.gmra.mrb[48].mxu1 %v8602_v48  ;;  %v8659_v48 = vcombine.high %v1107_v28, %v1115_v43  ;;  %v8674_v28 = vcombine.low %v1123_v5, %v1131_v61 }
 0x1a8   : > { %6340 = vmatmul.mubr.bf16.gmra.mrb[48].mxu0 %v8610_v47  ;;  %5191 = vmatprep.mubr.bf16.mxu1 %v8619_v58  ;;  %v10576_v47 = vld [vmem:[%s10877_s6 + $0x400] sm:$0xff] }
 0x1a9   : > { %6347 = vmatprep.mubr.bf16.mxu0 %v8627_v59  ;;  %v1119_v58 = vunpack.c.h.s8.bf16 %v10576_v47  ;;  %v10577_v59 = vld [vmem:[%s10877_s6 + $0x420] sm:$0xff] }
 0x1aa   : > { %v1127_v49 = vunpack.c.h.s8.bf16 %v10577_v59  ;;  %v10586_v59 = vld [vmem:[%s10877_s6 + $0x490] sm:$0xff] }
 0x1ab   : > { %v1155_v60 = vunpack.c.h.s8.bf16 %v10586_v59 }
 0x1ac   : > { %v8667_v7 = vcombine.high %v1119_v58, %v1127_v49  ;;  %v8666_v38 = vcombine.low %v1119_v58, %v1127_v49  ;;  %v8690_v49 = vcombine.low %v1139_v34, %v1147_v30 }
 0x1ad   : > { %v8707_v23 = vcombine.high %v1155_v60, %v1163_v4 }
 0x1af   : > { %5192 = vmatmul.mubr.bf16.gmra.mrb[52].mxu1 %v8618_v8  ;;  %v8675_v8 = vcombine.high %v1123_v5, %v1131_v61  ;;  %v10588_v61 = vld [vmem:[%s10877_s6 + $0x4c0] sm:$0xff] }
 0x1b0   : > { %6348 = vmatmul.mubr.bf16.gmra.mrb[52].mxu0 %v8626_v16  ;;  %5199 = vmatprep.mubr.bf16.mxu1 %v8635_v31  ;;  %v10580_v16 = vld [vmem:[%s10877_s6 + $0x440] sm:$0xff] }
 0x1b1   : > { %6355 = vmatprep.mubr.bf16.mxu0 %v8643_v36  ;;  %v1135_v31 = vunpack.c.h.s8.bf16 %v10580_v16  ;;  %v10581_v36 = vld [vmem:[%s10877_s6 + $0x460] sm:$0xff] }
 0x1b2   : > { %v1143_v13 = vunpack.c.h.s8.bf16 %v10581_v36  ;;  %v10591_v36 = vld [vmem:[%s10877_s6 + $0x4f0] sm:$0xff] }
 0x1b3   : > { %v1179_v15 = vunpack.c.h.s8.bf16 %v10591_v36 }
 0x1b4   : > { %v8683_v43 = vcombine.high %v1135_v31, %v1143_v13  ;;  %v8682_v58 = vcombine.low %v1135_v31, %v1143_v13  ;;  %v8706_v13 = vcombine.low %v1155_v60, %v1163_v4  ;;  %v10596_v4 = vld [vmem:[%s10877_s6 + $0x540] sm:$0xff] }
 0x1b7   : > { %5200 = vmatmul.mubr.bf16.gmra.mrb[56].mxu1 %v8634_v45  ;;  %v8691_v45 = vcombine.high %v1139_v34, %v1147_v30  ;;  %v10592_v30 = vld [vmem:[%s10877_s6 + $0x500] sm:$0xff] }
 0x1b8   : > { %6356 = vmatmul.mubr.bf16.gmra.mrb[56].mxu0 %v8642_v44  ;;  %5207 = vmatprep.mubr.bf16.mxu1 %v8651_v46  ;;  %v10584_v44 = vld [vmem:[%s10877_s6 + $0x480] sm:$0xff] }
 0x1b9   : > { %6363 = vmatprep.mubr.bf16.mxu0 %v8659_v48  ;;  %v1151_v46 = vunpack.c.h.s8.bf16 %v10584_v44  ;;  %v10585_v48 = vld [vmem:[%s10877_s6 + $0x4a0] sm:$0xff] }
 0x1ba   : > { %v1159_v47 = vunpack.c.h.s8.bf16 %v10585_v48  ;;  %v10595_v48 = vld [vmem:[%s10877_s6 + $0x530] sm:$0xff] }
 0x1bb   : > { %v1195_v59 = vunpack.c.h.s8.bf16 %v10595_v48 }
 0x1bc   : > { %v8699_v5 = vcombine.high %v1151_v46, %v1159_v47  ;;  %v8698_v31 = vcombine.low %v1151_v46, %v1159_v47 }
 0x1bf   : > { %5208 = vmatmul.mubr.bf16.gmra.mrb[60].mxu1 %v8650_v62  ;;  %v1167_v62 = vunpack.c.h.s8.bf16 %v10588_v61 }
 0x1c0   : > { %6364 = vmatmul.mubr.bf16.gmra.mrb[60].mxu0 %v8658_v14  ;;  %5215 = vmatprep.mubr.bf16.mxu1 %v8667_v7  ;;  %v10589_v14 = vld [vmem:[%s10877_s6 + $0x4e0] sm:$0xff] }
 0x1c1   : > { %6371 = vmatprep.mubr.bf16.mxu0 %v8675_v8  ;;  %v1175_v7 = vunpack.c.h.s8.bf16 %v10589_v14  ;;  %v10590_v8 = vld [vmem:[%s10877_s6 + $0x4d0] sm:$0xff] }
 0x1c2   : > { %v1171_v16 = vunpack.c.h.s8.bf16 %v10590_v8  ;;  %v10599_v14 = vld [vmem:[%s10877_s6 + $0x570] sm:$0xff] }
 0x1c3   : > { %v8715_v34 = vcombine.high %v1167_v62, %v1175_v7  ;;  %v8714_v46 = vcombine.low %v1167_v62, %v1175_v7  ;;  %v1211_v8 = vunpack.c.h.s8.bf16 %v10599_v14 }
 0x1c4   : > { %v8723_v27 = vcombine.high %v1171_v16, %v1179_v15  ;;  %v8722_v47 = vcombine.low %v1171_v16, %v1179_v15  ;;  %v10600_v15 = vld [vmem:[%s10877_s6 + $0x580] sm:$0xff] }
 0x1c7   : > { %5216 = vmatmul.mubr.bf16.gmra.mrb[64].mxu1 %v8666_v38  ;;  %v1183_v38 = vunpack.c.h.s8.bf16 %v10592_v30 }
 0x1c8   : > { %6372 = vmatmul.mubr.bf16.gmra.mrb[64].mxu0 %v8674_v28  ;;  %5223 = vmatprep.mubr.bf16.mxu1 %v8683_v43  ;;  %v10593_v28 = vld [vmem:[%s10877_s6 + $0x520] sm:$0xff] }
 0x1c9   : > { %6379 = vmatprep.mubr.bf16.mxu0 %v8691_v45  ;;  %v1191_v43 = vunpack.c.h.s8.bf16 %v10593_v28  ;;  %v10594_v45 = vld [vmem:[%s10877_s6 + $0x510] sm:$0xff] }
 0x1ca   : > { %v1187_v44 = vunpack.c.h.s8.bf16 %v10594_v45  ;;  %v10603_v28 = vld [vmem:[%s10877_s6 + $0x5b0] sm:$0xff] }
 0x1cb   : > { %v8731_v60 = vcombine.high %v1183_v38, %v1191_v43  ;;  %v8730_v62 = vcombine.low %v1183_v38, %v1191_v43  ;;  %v1227_v45 = vunpack.c.h.s8.bf16 %v10603_v28 }
 0x1cc   : > { %v8739_v6 = vcombine.high %v1187_v44, %v1195_v59  ;;  %v8738_v7 = vcombine.low %v1187_v44, %v1195_v59  ;;  %v1231_v44 = vunpack.c.h.s8.bf16 %v11214_v20  ;;  %v1239_v59 = vunpack.c.h.s8.bf16 %v11217_v19 }
 0x1cd   : > { %v1251_v20 = vunpack.c.h.s8.bf16 %v11230_v22  ;;  %v1259_v19 = vunpack.c.h.s8.bf16 %v11233_v24 }
 0x1ce   : > { %v8779_v14 = vcombine.high %v1231_v44, %v1239_v59 }
 0x1cf   : > { %5224 = vmatmul.mubr.bf16.gmra.mrb[68].mxu1 %v8682_v58  ;;  %v1199_v58 = vunpack.c.h.s8.bf16 %v10596_v4  ;;  %v8802_v22 = vcombine.low %v1251_v20, %v1259_v19 }
 0x1d0   : > { %6380 = vmatmul.mubr.bf16.gmra.mrb[68].mxu0 %v8690_v49  ;;  %5231 = vmatprep.mubr.bf16.mxu1 %v8699_v5  ;;  %v10597_v49 = vld [vmem:[%s10877_s6 + $0x560] sm:$0xff] }
 0x1d1   : > { %6387 = vmatprep.mubr.bf16.mxu0 %v8707_v23  ;;  %v1207_v5 = vunpack.c.h.s8.bf16 %v10597_v49  ;;  %v10598_v23 = vld [vmem:[%s10877_s6 + $0x550] sm:$0xff] }
 0x1d2   : > { %v1203_v61 = vunpack.c.h.s8.bf16 %v10598_v23 }
 0x1d3   : > { %v8747_v16 = vcombine.high %v1199_v58, %v1207_v5  ;;  %v8746_v48 = vcombine.low %v1199_v58, %v1207_v5  ;;  %v1247_v58 = vunpack.c.h.s8.bf16 %v11224_v17  ;;  %v1255_v5 = vunpack.c.h.s8.bf16 %v11227_v18 }
 0x1d4   : > { %v8755_v36 = vcombine.high %v1203_v61, %v1211_v8  ;;  %v1267_v17 = vunpack.c.h.s8.bf16 %v11246_v41  ;;  %v1275_v18 = vunpack.c.h.s8.bf16 %v11249_v42 }
 0x1d6   : > { %v8819_v24 = vcombine.high %v1267_v17, %v1275_v18  ;;  %v8818_v41 = vcombine.low %v1267_v17, %v1275_v18 }
 0x1d7   : > { %5232 = vmatmul.mubr.bf16.gmra.mrb[72].mxu1 %v8698_v31  ;;  %v1215_v31 = vunpack.c.h.s8.bf16 %v10600_v15  ;;  %v1271_v15 = vunpack.c.h.s8.bf16 %v11243_v40  ;;  %v1291_v40 = vunpack.c.h.s8.bf16 %v11265_v54 }
 0x1d8   : > { %6388 = vmatmul.mubr.bf16.gmra.mrb[72].mxu0 %v8706_v13  ;;  %5239 = vmatprep.mubr.bf16.mxu1 %v8715_v34  ;;  %v10601_v13 = vld [vmem:[%s10877_s6 + $0x5a0] sm:$0xff] }
 0x1d9   : > { %6395 = vmatprep.mubr.bf16.mxu0 %v8723_v27  ;;  %v1223_v34 = vunpack.c.h.s8.bf16 %v10601_v13  ;;  %v10602_v27 = vld [vmem:[%s10877_s6 + $0x590] sm:$0xff] }
 0x1da   : > { %v1219_v30 = vunpack.c.h.s8.bf16 %v10602_v27  ;;  %v1287_v27 = vunpack.c.h.s8.bf16 %v11259_v52  ;;  %v1307_v52 = vunpack.c.h.s8.bf16 %v11281_v3 }
 0x1db   : > { %v8763_v38 = vcombine.high %v1215_v31, %v1223_v34  ;;  %v8762_v49 = vcombine.low %v1215_v31, %v1223_v34  ;;  %v8794_v31 = vcombine.low %v1247_v58, %v1255_v5  ;;  %v1279_v34 = vunpack.c.h.s8.bf16 %v11256_v51 }
 0x1dc   : > { %v8771_v43 = vcombine.high %v1219_v30, %v1227_v45  ;;  %v8770_v23 = vcombine.low %v1219_v30, %v1227_v45  ;;  %v1295_v45 = vunpack.c.h.s8.bf16 %v11272_v63  ;;  %v1299_v51 = vunpack.c.h.s8.bf16 %v11278_v2 }
 0x1dd   : > { %v8827_v28 = vcombine.high %v1279_v34, %v1287_v27  ;;  %v1315_v63 = vunpack.c.h.s8.bf16 %v11294_v26 }
 0x1de   : > { %v8851_v54 = vcombine.high %v1299_v51, %v1307_v52  ;;  %v8850_v2 = vcombine.low %v1299_v51, %v1307_v52  ;;  %v623_v51 = vld [vmem:[%s10877_s6 + $0x88] sm:$0xff] }
 0x1df   : > { %5240 = vmatmul.mubr.bf16.gmra.mrb[76].mxu1 %v8714_v46  ;;  %v8754_v46 = vcombine.low %v1203_v61, %v1211_v8  ;;  %v8778_v61 = vcombine.low %v1231_v44, %v1239_v59  ;;  %v1319_v44 = vunpack.c.h.s8.bf16 %v11291_v25  ;;  %v1339_v25 = vunpack.c.h.s8.bf16 %v11313_v37  ;;  %v627_v52 = vld [vmem:[%s10877_s6 + $0xa8] sm:$0xff] }
 0x1e0   : > { %6396 = vmatmul.mubr.bf16.gmra.mrb[76].mxu0 %v8722_v47  ;;  %5247 = vmatprep.mubr.bf16.mxu1 %v8731_v60  ;;  %v10604_v47 = vld [vmem:[%s10877_s6 + $0x5d0] sm:$0xff] }
 0x1e1   : > { %6403 = vmatprep.mubr.bf16.mxu0 %v8739_v6  ;;  %v1235_v60 = vunpack.c.h.s8.bf16 %v10604_v47  ;;  %v10605_v6 = vld [vmem:[%s10877_s6 + $0x5f0] sm:$0xff] }
 0x1e2   : > { %v1243_v4 = vunpack.c.h.s8.bf16 %v10605_v6  ;;  %v1335_v6 = vunpack.c.h.s8.bf16 %v11307_v33  ;;  %v1355_v33 = vunpack.c.h.s8.bf16 %v11329_v57  ;;  %v1371_v57 = vunpack.c.h.s8.bf16 %v11345_v12 }
 0x1e4   : > { %v8786_v8 = vcombine.low %v1235_v60, %v1243_v4 }
 0x1e7   : > { %5248 = vmatmul.mubr.bf16.gmra.mrb[80].mxu1 %v8730_v62  ;;  %v8787_v62 = vcombine.high %v1235_v60, %v1243_v4  ;;  %v1327_v60 = vunpack.c.h.s8.bf16 %v11304_v32  ;;  %v1347_v32 = vunpack.c.h.s8.bf16 %v11326_v56  ;;  %v1363_v56 = vunpack.c.h.s8.bf16 %v11342_v11 }
 0x1e8   : > { %6404 = vmatmul.mubr.bf16.gmra.mrb[80].mxu0 %v8738_v7  ;;  %5255 = vmatprep.mubr.bf16.mxu1 %v8747_v16  ;;  %v8795_v7 = vcombine.high %v1247_v58, %v1255_v5  ;;  %v8803_v16 = vcombine.high %v1251_v20, %v1259_v19 }
 0x1e9   : > { %6411 = vmatprep.mubr.bf16.mxu0 %v8755_v36  ;;  %v1263_v36 = vunpack.c.h.s8.bf16 %v11240_v39  ;;  %v1283_v39 = vunpack.c.h.s8.bf16 %v11262_v53  ;;  %v8899_v58 = vcombine.high %v1347_v32, %v1355_v33  ;;  %v8898_v20 = vcombine.low %v1347_v32, %v1355_v33  ;;  %v10490_v33 = vld [vmem:[%s12148_s1 + $0x198] sm:$0xff]  }
 0x1ea   : > { %v8914_v17 = vcombine.low %v1363_v56, %v1371_v57 }
 0x1eb   : > { %v8811_v13 = vcombine.high %v1263_v36, %v1271_v15  ;;  %v8810_v30 = vcombine.low %v1263_v36, %v1271_v15  ;;  %v8835_v42 = vcombine.high %v1283_v39, %v1291_v40  ;;  %v8834_v53 = vcombine.low %v1283_v39, %v1291_v40  ;;  %v613_v36 = vld [vmem:[%s10877_s6 + $0x38] sm:$0xff] }
 0x1ec   : > { %v876_v12 = vunpack.c.l.s8.bf16 %v613_v36  ;;  %v10494_v36 = vld [vmem:[%s12148_s1 + $0x1a8] sm:$0xff]  }
 0x1ef   : > { %5256 = vmatmul.mubr.bf16.gmra.mrb[84].mxu1 %v8746_v48  ;;  %v1303_v48 = vunpack.c.h.s8.bf16 %v11275_v0  ;;  %v1323_v0 = vunpack.c.h.s8.bf16 %v11297_v29 }
 0x1f0   : > { %6412 = vmatmul.mubr.bf16.gmra.mrb[84].mxu0 %v8754_v46  ;;  %5263 = vmatprep.mubr.bf16.mxu1 %v8763_v38  ;;  %v8826_v46 = vcombine.low %v1279_v34, %v1287_v27  ;;  %v621_v34 = vld [vmem:[%s10877_s6 + $0x78] sm:$0xff] }
 0x1f1   : > { %6419 = vmatprep.mubr.bf16.mxu0 %v8771_v43  ;;  %v8843_v38 = vcombine.high %v1295_v45, %v1303_v48  ;;  %v1311_v43 = vunpack.c.h.s8.bf16 %v11288_v21  ;;  %v8842_v59 = vcombine.low %v1295_v45, %v1303_v48  ;;  %v8867_v3 = vcombine.high %v1315_v63, %v1323_v0  ;;  %v10485_v45 = vld [vmem:[%s12148_s1 + $0x380] sm:$0xff]  }
 0x1f2   : > { %v1331_v21 = vunpack.c.h.s8.bf16 %v11310_v35  ;;  %v8866_v26 = vcombine.low %v1315_v63, %v1323_v0 }
 0x1f3   : > { %v8859_v47 = vcombine.high %v1311_v43, %v1319_v44  ;;  %v8858_v4 = vcombine.low %v1311_v43, %v1319_v44  ;;  %v904_v43 = vunpack.c.l.s8.bf16 %v627_v52  ;;  %v10486_v44 = vld [vmem:[%s12148_s1 + $0x188] sm:$0xff]  }
 0x1f4   : > { %v8883_v29 = vcombine.high %v1331_v21, %v1339_v25  ;;  %v8882_v35 = vcombine.low %v1331_v21, %v1339_v25  ;;  %v635_v21 = vld [vmem:[%s10877_s6 + $0xe8] sm:$0xff]  ;;  %v10488_v25 = vld [vmem:[%s12148_s1 + $0x190] sm:$0xff]  }
 0x1f5   : > { %v659_v52 = vld [vmem:[%s10877_s6 + $0x1a8] sm:$0xff] }
 0x1f7   : > { %5264 = vmatmul.mubr.bf16.gmra.mrb[88].mxu1 %v8762_v49  ;;  %v8875_v49 = vcombine.high %v1327_v60, %v1335_v6 }
 0x1f8   : > { %6420 = vmatmul.mubr.bf16.gmra.mrb[88].mxu0 %v8770_v23  ;;  %5271 = vmatprep.mubr.bf16.mxu1 %v8779_v14  ;;  %v1343_v23 = vunpack.c.h.s8.bf16 %v11320_v50  ;;  %v1351_v14 = vunpack.c.h.s8.bf16 %v11323_v55  ;;  %v1359_v50 = vunpack.c.h.s8.bf16 %v11336_v9  ;;  %v1367_v55 = vunpack.c.h.s8.bf16 %v11339_v10 }
 0x1f9   : > { %6427 = vmatprep.mubr.bf16.mxu0 %v8787_v62  ;;  %v8874_v62 = vcombine.low %v1327_v60, %v1335_v6  ;;  %v631_v6 = vld [vmem:[%s10877_s6 + $0xc8] sm:$0xff] }
 0x1fa   : > { %v8891_v37 = vcombine.high %v1343_v23, %v1351_v14  ;;  %v8890_v5 = vcombine.low %v1343_v23, %v1351_v14  ;;  %v8907_v19 = vcombine.high %v1359_v50, %v1367_v55  ;;  %v8906_v15 = vcombine.low %v1359_v50, %v1367_v55  ;;  %v639_v55 = vld [vmem:[%s10877_s6 + $0x108] sm:$0xff] }
 0x1fb   : > { %v920_v23 = vunpack.c.l.s8.bf16 %v635_v21  ;;  %v663_v21 = vld [vmem:[%s10877_s6 + $0x1c8] sm:$0xff] }
 0x1ff   : > { %5272 = vmatmul.mubr.bf16.gmra.mrb[92].mxu1 %v8778_v61  ;;  %v8915_v61 = vcombine.high %v1363_v56, %v1371_v57  ;;  %v643_v56 = vld [vmem:[%s10877_s6 + $0x128] sm:$0xff]  ;;  %v10492_v57 = vld [vmem:[%s12148_s1 + $0x1a0] sm:$0xff]  }
 0x200   : > { %6428 = vmatmul.mubr.bf16.gmra.mrb[92].mxu0 %v8786_v8  ;;  %5279 = vmatprep.mubr.bf16.mxu1 %v8795_v7  ;;  %v607_v8 = vld [vmem:[%s10877_s6 + $0x8] sm:$0xff] }
 0x201   : > { %6435 = vmatprep.mubr.bf16.mxu0 %v8803_v16  ;;  %v611_v7 = vld [vmem:[%s10877_s6 + $0x28] sm:$0xff]  ;;  %v609_v16 = vld [vmem:[%s10877_s6 + $0x18] sm:$0xff]  ;;  %v864_v9 = vunpack.c.l.s8.bf16 %v607_v8  ;;  %v936_v8 = vunpack.c.l.s8.bf16 %v643_v56 }
 0x202   : > { %v872_v10 = vunpack.c.l.s8.bf16 %v611_v7  ;;  %v868_v11 = vunpack.c.l.s8.bf16 %v609_v16  ;;  %v673_v56 = vld [vmem:[%s10877_s6 + $0x218] sm:$0xff] }
 0x204   : > { %v8413_v18 = vcombine.high %v864_v9, %v872_v10 }
 0x207   : > { %5280 = vmatmul.mubr.bf16.gmra.mrb[96].mxu1 %v8794_v31  ;;  %v8421_v31 = vcombine.high %v868_v11, %v876_v12 }
 0x208   : > { %6436 = vmatmul.mubr.bf16.gmra.mrb[96].mxu0 %v8802_v22  ;;  %5287 = vmatprep.mubr.bf16.mxu1 %v8811_v13  ;;  %v615_v22 = vld [vmem:[%s10877_s6 + $0x48] sm:$0xff] }
 0x209   : > { %6443 = vmatprep.mubr.bf16.mxu0 %v8819_v24  ;;  %v619_v13 = vld [vmem:[%s10877_s6 + $0x68] sm:$0xff]  ;;  %v617_v24 = vld [vmem:[%s10877_s6 + $0x58] sm:$0xff]  ;;  %v880_v27 = vunpack.c.l.s8.bf16 %v615_v22 }
 0x20a   : > { %v888_v39 = vunpack.c.l.s8.bf16 %v619_v13  ;;  %v884_v40 = vunpack.c.l.s8.bf16 %v617_v24  ;;  %v649_v22 = vld [vmem:[%s10877_s6 + $0x158] sm:$0xff]  ;;  %v10497_v24 = vld [vmem:[%s12148_s1 + $0x3b0] sm:$0xff]  }
 0x20b   : > { %v653_v13 = vld [vmem:[%s10877_s6 + $0x178] sm:$0xff] }
 0x20c   : > { %v8429_v48 = vcombine.high %v880_v27, %v888_v39 }
 0x20f   : > { %5288 = vmatmul.mubr.bf16.gmra.mrb[100].mxu1 %v8810_v30  ;;  %v892_v30 = vunpack.c.l.s8.bf16 %v621_v34 }
 0x210   : > { %6444 = vmatmul.mubr.bf16.gmra.mrb[100].mxu0 %v8818_v41  ;;  %5295 = vmatprep.mubr.bf16.mxu1 %v8827_v28  ;;  %v8412_v41 = vcombine.low %v864_v9, %v872_v10  ;;  %v8420_v28 = vcombine.low %v868_v11, %v876_v12  ;;  %v10495_v9 = vld [vmem:[%s12148_s1 + $0x3a8] sm:$0xff]  }
 0x211   : > { %6451 = vmatprep.mubr.bf16.mxu0 %v8835_v42  ;;  %v10484_v42 = vld [vmem:[%s12148_s1 + $0x180] sm:$0xff]  }
 0x217   : > { %5296 = vmatmul.mubr.bf16.gmra.mrb[104].mxu1 %v8826_v46  ;;  %v8437_v46 = vcombine.high %v884_v40, %v892_v30 }
 0x218   : > { %6452 = vmatmul.mubr.bf16.gmra.mrb[104].mxu0 %v8834_v53  ;;  %5303 = vmatprep.mubr.bf16.mxu1 %v8843_v38  ;;  %v625_v53 = vld [vmem:[%s10877_s6 + $0x98] sm:$0xff] }
 0x219   : > { %6459 = vmatprep.mubr.bf16.mxu0 %v8851_v54  ;;  %v629_v38 = vld [vmem:[%s10877_s6 + $0xb8] sm:$0xff]  ;;  %v896_v54 = vunpack.c.l.s8.bf16 %v623_v51  ;;  %v900_v63 = vunpack.c.l.s8.bf16 %v625_v53  ;;  %v655_v51 = vld [vmem:[%s10877_s6 + $0x188] sm:$0xff] }
 0x21a   : > { %v908_v0 = vunpack.c.l.s8.bf16 %v629_v38  ;;  %v657_v53 = vld [vmem:[%s10877_s6 + $0x198] sm:$0xff] }
 0x21b   : > { %v661_v38 = vld [vmem:[%s10877_s6 + $0x1b8] sm:$0xff] }
 0x21c   : > { %v8453_v60 = vcombine.high %v900_v63, %v908_v0 }
 0x21f   : > { %5304 = vmatmul.mubr.bf16.gmra.mrb[108].mxu1 %v8842_v59  ;;  %v10487_v59 = vld [vmem:[%s12148_s1 + $0x388] sm:$0xff]  }
 0x220   : > { %6460 = vmatmul.mubr.bf16.gmra.mrb[108].mxu0 %v8850_v2  ;;  %5311 = vmatprep.mubr.bf16.mxu1 %v8859_v47  ;;  %v8428_v2 = vcombine.low %v880_v27, %v888_v39  ;;  %v8436_v47 = vcombine.low %v884_v40, %v892_v30  ;;  %v948_v39 = vunpack.c.l.s8.bf16 %v649_v22  ;;  %v956_v40 = vunpack.c.l.s8.bf16 %v653_v13  ;;  %v10498_v30 = vld [vmem:[%s12148_s1 + $0x1b8] sm:$0xff]  }
 0x221   : > { %6467 = vmatprep.mubr.bf16.mxu0 %v8867_v3  ;;  %v8445_v3 = vcombine.high %v896_v54, %v904_v43 }
 0x227   : > { %5312 = vmatmul.mubr.bf16.gmra.mrb[112].mxu1 %v8858_v4  ;;  %v633_v4 = vld [vmem:[%s10877_s6 + $0xd8] sm:$0xff] }
 0x228   : > { %6468 = vmatmul.mubr.bf16.gmra.mrb[112].mxu0 %v8866_v26  ;;  %5319 = vmatprep.mubr.bf16.mxu1 %v8875_v49  ;;  %v637_v26 = vld [vmem:[%s10877_s6 + $0xf8] sm:$0xff]  ;;  %v10489_v49 = vld [vmem:[%s12148_s1 + $0x390] sm:$0xff]   ;;  %v916_v14 = vunpack.c.l.s8.bf16 %v633_v4 }
 0x229   : > { %6475 = vmatprep.mubr.bf16.mxu0 %v8883_v29  ;;  %v912_v29 = vunpack.c.l.s8.bf16 %v631_v6  ;;  %v924_v32 = vunpack.c.l.s8.bf16 %v637_v26  ;;  %v10504_v4 = vld [vmem:[%s12148_s1 + $0x1d0] sm:$0xff]   ;;  %v665_v26 = vld [vmem:[%s10877_s6 + $0x1d8] sm:$0xff] }
 0x22b   : > { %v8469_v50 = vcombine.high %v916_v14, %v924_v32  ;;  %v8460_v10 = vcombine.low %v912_v29, %v920_v23  ;;  %v8468_v11 = vcombine.low %v916_v14, %v924_v32  ;;  %v980_v32 = vunpack.c.l.s8.bf16 %v665_v26  ;;  %v703_v26 = vld [vmem:[%s10877_s6 + $0x308] sm:$0xff] }
 0x22f   : > { %5320 = vmatmul.mubr.bf16.gmra.mrb[116].mxu1 %v8874_v62  ;;  %v10491_v62 = vld [vmem:[%s12148_s1 + $0x398] sm:$0xff]  }
 0x230   : > { %6476 = vmatmul.mubr.bf16.gmra.mrb[116].mxu0 %v8882_v35  ;;  %5327 = vmatprep.mubr.bf16.mxu1 %v8891_v37  ;;  %v8444_v35 = vcombine.low %v896_v54, %v904_v43  ;;  %v8452_v37 = vcombine.low %v900_v63, %v908_v0  ;;  %v10501_v54 = vld [vmem:[%s12148_s1 + $0x3c0] sm:$0xff]   ;;  %v960_v43 = vunpack.c.l.s8.bf16 %v655_v51  ;;  %v964_v63 = vunpack.c.l.s8.bf16 %v657_v53 }
 0x231   : > { %6483 = vmatprep.mubr.bf16.mxu0 %v8899_v58  ;;  %v8461_v58 = vcombine.high %v912_v29, %v920_v23  ;;  %v972_v0 = vunpack.c.l.s8.bf16 %v661_v38  ;;  %v10505_v29 = vld [vmem:[%s12148_s1 + $0x3d0] sm:$0xff]   ;;  %v976_v23 = vunpack.c.l.s8.bf16 %v663_v21  ;;  %v10509_v51 = vld [vmem:[%s12148_s1 + $0x3e0] sm:$0xff]  }
 0x233   : > { %v8517_v6 = vcombine.high %v964_v63, %v972_v0 }
 0x237   : > { %5328 = vmatmul.mubr.bf16.gmra.mrb[120].mxu1 %v8890_v5  ;;  %v641_v5 = vld [vmem:[%s10877_s6 + $0x118] sm:$0xff] }
 0x238   : > { %6484 = vmatmul.mubr.bf16.gmra.mrb[120].mxu0 %v8898_v20  ;;  %5335 = vmatprep.mubr.bf16.mxu1 %v8907_v19  ;;  %v645_v20 = vld [vmem:[%s10877_s6 + $0x138] sm:$0xff]  ;;  %v10493_v19 = vld [vmem:[%s12148_s1 + $0x3a0] sm:$0xff]   ;;  %v932_v7 = vunpack.c.l.s8.bf16 %v641_v5 }
 0x239   : > { %6491 = vmatprep.mubr.bf16.mxu0 %v8915_v61  ;;  %v928_v61 = vunpack.c.l.s8.bf16 %v639_v55  ;;  %v940_v16 = vunpack.c.l.s8.bf16 %v645_v20  ;;  %v675_v55 = vld [vmem:[%s10877_s6 + $0x228] sm:$0xff] }
 0x23a   : > { %v1000_v20 = vunpack.c.l.s8.bf16 %v675_v55 }
 0x23b   : > { %v8477_v12 = vcombine.high %v928_v61, %v936_v8 }
 0x23f   : > { %5336 = vmatmul.mubr.bf16.gmra.mrb[124].mxu1 %v8906_v15  ;;  %v8485_v15 = vcombine.high %v932_v7, %v940_v16 }
 0x240   : > { %6492 = vmatmul.mubr.bf16.gmra.mrb[124].mxu0 %v8914_v17  ;;  %5376 = vmatprep.mubr.bf16.mxu1 %v8413_v18  ;;  %v647_v17 = vld [vmem:[%s10877_s6 + $0x148] sm:$0xff] }
 0x241   : > { %6532 = vmatprep.mubr.bf16.mxu0 %v8421_v31  ;;  %v651_v18 = vld [vmem:[%s10877_s6 + $0x168] sm:$0xff]  ;;  %v10496_v31 = vld [vmem:[%s12148_s1 + $0x1b0] sm:$0xff]   ;;  %v944_v34 = vunpack.c.l.s8.bf16 %v647_v17  ;;  %v685_v17 = vld [vmem:[%s10877_s6 + $0x278] sm:$0xff] }
 0x242   : > { %v952_v27 = vunpack.c.l.s8.bf16 %v651_v18  ;;  %v1020_v13 = vunpack.c.l.s8.bf16 %v685_v17  ;;  %v721_v17 = vld [vmem:[%s10877_s6 + $0x398] sm:$0xff] }
 0x247   : > { %5377 = vmatmul.mubr.bf16.vlgmr.msra.gmra.mrb[0].mxu1 %v8412_v41  ;;  %v10499_v41 = vld [vmem:[%s12148_s1 + $0x3b8] sm:$0xff]  }
 0x248   : > { %6533 = vmatmul.mubr.bf16.vlgmr.msra.gmra.mrb[0].mxu0 %v8420_v28  ;;  %5634 = vmatpush1.bf16.msra.mxu1 %v10484_v42  ;;  %v8476_v28 = vcombine.low %v928_v61, %v936_v8  ;;  %v8484_v42 = vcombine.low %v932_v7, %v940_v16  ;;  %v10507_v61 = vld [vmem:[%s12148_s1 + $0x3d8] sm:$0xff]   ;;  %v996_v8 = vunpack.c.l.s8.bf16 %v673_v56 }
 0x249   : > { %6790 = vmatpush1.bf16.msra.mxu0 %v10485_v45  ;;  %5384 = vmatprep.mubr.bf16.mxu1 %v8429_v48  ;;  %v8493_v45 = vcombine.high %v944_v34, %v952_v27  ;;  %v8501_v48 = vcombine.high %v948_v39, %v956_v40 }
 0x24a   : > { %6540 = vmatprep.mubr.bf16.mxu0 %v8437_v46  ;;  %5635 = vmatprep.subr.bf16.mxu1 %v10758_v1  ;;  %v10500_v46 = vld [vmem:[%s12148_s1 + $0x1c0] sm:$0xff]  }
 0x24b   : > { %6791 = vmatprep.subr.bf16.mxu0 %v10758_v1 }
 0x24c   : > { %5636 = vmatpush1.bf16.msra.mxu1 %v10486_v44  ;;  %v968_v44 = vunpack.c.l.s8.bf16 %v659_v52 }
 0x24d   : > { %6792 = vmatpush1.bf16.msra.mxu0 %v10487_v59  ;;  %5637 = vmatprep.subr.bf16.mxu1 %v10758_v1  ;;  %v10502_v59 = vld [vmem:[%s12148_s1 + $0x1c8] sm:$0xff]  }
 0x24e   : > { %6793 = vmatprep.subr.bf16.mxu0 %v10758_v1 }
 0x24f   : > { %5385 = vmatmul.mubr.bf16.gmra.mrb[4].mxu1 %v8428_v2  ;;  %v10503_v2 = vld [vmem:[%s12148_s1 + $0x3c8] sm:$0xff]  }
 0x250   : > { %6541 = vmatmul.mubr.bf16.gmra.mrb[4].mxu0 %v8436_v47  ;;  %5392 = vmatprep.mubr.bf16.mxu1 %v8445_v3  ;;  %v8492_v47 = vcombine.low %v944_v34, %v952_v27  ;;  %v8500_v3 = vcombine.low %v948_v39, %v956_v40  ;;  %v687_v40 = vld [vmem:[%s10877_s6 + $0x288] sm:$0xff] }
 0x251   : > { %6548 = vmatprep.mubr.bf16.mxu0 %v8453_v60  ;;  %5638 = vmatpush1.bf16.msra.mxu1 %v10488_v25  ;;  %v8509_v60 = vcombine.high %v960_v43, %v968_v44  ;;  %v667_v25 = vld [vmem:[%s10877_s6 + $0x1e8] sm:$0xff] }
 0x252   : > { %6794 = vmatpush1.bf16.msra.mxu0 %v10489_v49  ;;  %5639 = vmatprep.subr.bf16.mxu1 %v10758_v1  ;;  %v669_v49 = vld [vmem:[%s10877_s6 + $0x1f8] sm:$0xff]  ;;  %v984_v14 = vunpack.c.l.s8.bf16 %v667_v25 }
 0x253   : > { %6795 = vmatprep.subr.bf16.mxu0 %v10758_v1 }
 0x254   : > { %v8524_v16 = vcombine.low %v976_v23, %v984_v14 }
 0x255   : > { %5640 = vmatpush1.bf16.msra.mxu1 %v10490_v33  ;;  %v988_v33 = vunpack.c.l.s8.bf16 %v669_v49  ;;  %v707_v49 = vld [vmem:[%s10877_s6 + $0x328] sm:$0xff] }
 0x256   : > { %6796 = vmatpush1.bf16.msra.mxu0 %v10491_v62  ;;  %5641 = vmatprep.subr.bf16.mxu1 %v10758_v1  ;;  %v8508_v62 = vcombine.low %v960_v43, %v968_v44  ;;  %v695_v44 = vld [vmem:[%s10877_s6 + $0x2c8] sm:$0xff] }
 0x257   : > { %5393 = vmatmul.mubr.bf16.gmra.mrb[8].mxu1 %v8444_v35  ;;  %6797 = vmatprep.subr.bf16.mxu0 %v10758_v1  ;;  %v8516_v35 = vcombine.low %v964_v63, %v972_v0  ;;  %v699_v63 = vld [vmem:[%s10877_s6 + $0x2e8] sm:$0xff]  ;;  %v697_v0 = vld [vmem:[%s10877_s6 + $0x2d8] sm:$0xff] }
 0x258   : > { %6549 = vmatmul.mubr.bf16.gmra.mrb[8].mxu0 %v8452_v37  ;;  %5400 = vmatprep.mubr.bf16.mxu1 %v8461_v58  ;;  %v8525_v37 = vcombine.high %v976_v23, %v984_v14  ;;  %v8533_v58 = vcombine.high %v980_v32, %v988_v33  ;;  %v709_v23 = vld [vmem:[%s10877_s6 + $0x338] sm:$0xff]  ;;  %v1056_v14 = vunpack.c.l.s8.bf16 %v703_v26 }
 0x259   : > { %6556 = vmatprep.mubr.bf16.mxu0 %v8469_v50  ;;  %5642 = vmatpush1.bf16.msra.mxu1 %v10492_v57  ;;  %v671_v50 = vld [vmem:[%s10877_s6 + $0x208] sm:$0xff]  ;;  %v677_v57 = vld [vmem:[%s10877_s6 + $0x238] sm:$0xff] }
 0x25a   : > { %6798 = vmatpush1.bf16.msra.mxu0 %v10493_v19  ;;  %5643 = vmatprep.subr.bf16.mxu1 %v10758_v1  ;;  %v992_v5 = vunpack.c.l.s8.bf16 %v671_v50  ;;  %v10506_v19 = vld [vmem:[%s12148_s1 + $0x1d8] sm:$0xff]   ;;  %v1004_v7 = vunpack.c.l.s8.bf16 %v677_v57  ;;  %v711_v57 = vld [vmem:[%s10877_s6 + $0x348] sm:$0xff] }
 0x25b   : > { %6799 = vmatprep.subr.bf16.mxu0 %v10758_v1 }
 0x25c   : > { %v8548_v34 = vcombine.low %v996_v8, %v1004_v7 }
 0x25d   : > { %5644 = vmatpush1.bf16.msra.mxu1 %v10494_v36  ;;  %v8532_v36 = vcombine.low %v980_v32, %v988_v33  ;;  %v1064_v32 = vunpack.c.l.s8.bf16 %v707_v49  ;;  %v10510_v33 = vld [vmem:[%s12148_s1 + $0x1e8] sm:$0xff]  }
 0x25e   : > { %6800 = vmatpush1.bf16.msra.mxu0 %v10495_v9  ;;  %5645 = vmatprep.subr.bf16.mxu1 %v10758_v1  ;;  %v8541_v9 = vcombine.high %v992_v5, %v1000_v20 }
 0x25f   : > { %5401 = vmatmul.mubr.bf16.gmra.mrb[12].mxu1 %v8460_v10  ;;  %6801 = vmatprep.subr.bf16.mxu0 %v10758_v1  ;;  %v8549_v10 = vcombine.high %v996_v8, %v1004_v7  ;;  %v8605_v55 = vcombine.high %v1056_v14, %v1064_v32 }
 0x260   : > { %6557 = vmatmul.mubr.bf16.gmra.mrb[12].mxu0 %v8468_v11  ;;  %5408 = vmatprep.mubr.bf16.mxu1 %v8477_v12  ;;  %v679_v11 = vld [vmem:[%s10877_s6 + $0x248] sm:$0xff] }
 0x261   : > { %6564 = vmatprep.mubr.bf16.mxu0 %v8485_v15  ;;  %5646 = vmatpush1.bf16.msra.mxu1 %v10496_v31  ;;  %v683_v12 = vld [vmem:[%s10877_s6 + $0x268] sm:$0xff]  ;;  %v681_v15 = vld [vmem:[%s10877_s6 + $0x258] sm:$0xff]  ;;  %v1008_v18 = vunpack.c.l.s8.bf16 %v679_v11 }
 0x262   : > { %6802 = vmatpush1.bf16.msra.mxu0 %v10497_v24  ;;  %5647 = vmatprep.subr.bf16.mxu1 %v10758_v1  ;;  %v1016_v31 = vunpack.c.l.s8.bf16 %v683_v12  ;;  %v1012_v22 = vunpack.c.l.s8.bf16 %v681_v15  ;;  %v8540_v24 = vcombine.low %v992_v5, %v1000_v20  ;;  %v715_v5 = vld [vmem:[%s10877_s6 + $0x368] sm:$0xff]  ;;  %v713_v20 = vld [vmem:[%s10877_s6 + $0x358] sm:$0xff] }
 0x263   : > { %6803 = vmatprep.subr.bf16.mxu0 %v10758_v1  ;;  %v1080_v8 = vunpack.c.l.s8.bf16 %v715_v5  ;;  %v1076_v7 = vunpack.c.l.s8.bf16 %v713_v20  ;;  %v719_v12 = vld [vmem:[%s10877_s6 + $0x388] sm:$0xff]  ;;  %v753_v20 = vld [vmem:[%s10877_s6 + $0x498] sm:$0xff] }
 0x264   : > { %v8557_v27 = vcombine.high %v1008_v18, %v1016_v31  ;;  %v8565_v39 = vcombine.high %v1012_v22, %v1020_v13  ;;  %v8556_v53 = vcombine.low %v1008_v18, %v1016_v31  ;;  %v8564_v38 = vcombine.low %v1012_v22, %v1020_v13  ;;  %v723_v15 = vld [vmem:[%s10877_s6 + $0x3a8] sm:$0xff]  ;;  %v725_v18 = vld [vmem:[%s10877_s6 + $0x3b8] sm:$0xff]  ;;  %v10512_v13 = vld [vmem:[%s12148_s1 + $0x1f0] sm:$0xff]  }
 0x265   : > { %5648 = vmatpush1.bf16.msra.mxu1 %v10498_v30  ;;  %v691_v30 = vld [vmem:[%s10877_s6 + $0x2a8] sm:$0xff]  ;;  %v1088_v31 = vunpack.c.l.s8.bf16 %v719_v12  ;;  %v1096_v22 = vunpack.c.l.s8.bf16 %v723_v15 }
 0x266   : > { %6804 = vmatpush1.bf16.msra.mxu0 %v10499_v41  ;;  %5649 = vmatprep.subr.bf16.mxu1 %v10758_v1  ;;  %v689_v41 = vld [vmem:[%s10877_s6 + $0x298] sm:$0xff]  ;;  %v755_v5 = vld [vmem:[%s10877_s6 + $0x4a8] sm:$0xff] }
 0x267   : > { %5409 = vmatmul.mubr.bf16.gmra.mrb[16].mxu1 %v8476_v28  ;;  %6805 = vmatprep.subr.bf16.mxu0 %v10758_v1  ;;  %v693_v28 = vld [vmem:[%s10877_s6 + $0x2b8] sm:$0xff]  ;;  %v1028_v52 = vunpack.c.l.s8.bf16 %v689_v41  ;;  %v759_v12 = vld [vmem:[%s10877_s6 + $0x4c8] sm:$0xff] }
 0x268   : > { %6565 = vmatmul.mubr.bf16.gmra.mrb[16].mxu0 %v8484_v42  ;;  %5416 = vmatprep.mubr.bf16.mxu1 %v8493_v45  ;;  %v1024_v42 = vunpack.c.l.s8.bf16 %v687_v40  ;;  %v1032_v45 = vunpack.c.l.s8.bf16 %v691_v30  ;;  %v8637_v30 = vcombine.high %v1088_v31, %v1096_v22  ;;  %v763_v15 = vld [vmem:[%s10877_s6 + $0x4e8] sm:$0xff] }
 0x269   : > { %6572 = vmatprep.mubr.bf16.mxu0 %v8501_v48  ;;  %5650 = vmatpush1.bf16.msra.mxu1 %v10500_v46  ;;  %v10508_v48 = vld [vmem:[%s12148_s1 + $0x1e0] sm:$0xff]   ;;  %v1036_v46 = vunpack.c.l.s8.bf16 %v693_v28  ;;  %v727_v28 = vld [vmem:[%s10877_s6 + $0x3c8] sm:$0xff] }
 0x26a   : > { %6806 = vmatpush1.bf16.msra.mxu0 %v10501_v54  ;;  %5651 = vmatprep.subr.bf16.mxu1 %v10758_v1  ;;  %v8573_v54 = vcombine.high %v1024_v42, %v1032_v45 }
 0x26b   : > { %6807 = vmatprep.subr.bf16.mxu0 %v10758_v1  ;;  %v8581_v43 = vcombine.high %v1028_v52, %v1036_v46  ;;  %v8580_v21 = vcombine.low %v1028_v52, %v1036_v46 }
 0x26d   : > { %5652 = vmatpush1.bf16.msra.mxu1 %v10502_v59  ;;  %v701_v59 = vld [vmem:[%s10877_s6 + $0x2f8] sm:$0xff] }
 0x26e   : > { %6808 = vmatpush1.bf16.msra.mxu0 %v10503_v2  ;;  %5653 = vmatprep.subr.bf16.mxu1 %v10758_v1  ;;  %v1040_v2 = vunpack.c.l.s8.bf16 %v695_v44  ;;  %v735_v44 = vld [vmem:[%s10877_s6 + $0x408] sm:$0xff] }
 0x26f   : > { %5417 = vmatmul.mubr.bf16.gmra.mrb[20].mxu1 %v8492_v47  ;;  %6809 = vmatprep.subr.bf16.mxu0 %v10758_v1  ;;  %v1048_v47 = vunpack.c.l.s8.bf16 %v699_v63  ;;  %v739_v63 = vld [vmem:[%s10877_s6 + $0x428] sm:$0xff] }
 0x270   : > { %6573 = vmatmul.mubr.bf16.gmra.mrb[20].mxu0 %v8500_v3  ;;  %5424 = vmatprep.mubr.bf16.mxu1 %v8509_v60  ;;  %v1044_v3 = vunpack.c.l.s8.bf16 %v697_v0  ;;  %v1052_v60 = vunpack.c.l.s8.bf16 %v701_v59  ;;  %v737_v0 = vld [vmem:[%s10877_s6 + $0x418] sm:$0xff] }
 0x271   : > { %6580 = vmatprep.mubr.bf16.mxu0 %v8517_v6  ;;  %5654 = vmatpush1.bf16.msra.mxu1 %v10504_v4  ;;  %v8572_v6 = vcombine.low %v1024_v42, %v1032_v45  ;;  %v8589_v25 = vcombine.high %v1040_v2, %v1048_v47  ;;  %v731_v42 = vld [vmem:[%s10877_s6 + $0x3e8] sm:$0xff]  ;;  %v729_v45 = vld [vmem:[%s10877_s6 + $0x3d8] sm:$0xff] }
 0x272   : > { %6810 = vmatpush1.bf16.msra.mxu0 %v10505_v29  ;;  %5655 = vmatprep.subr.bf16.mxu1 %v10758_v1  ;;  %v8597_v4 = vcombine.high %v1044_v3, %v1052_v60  ;;  %v705_v29 = vld [vmem:[%s10877_s6 + $0x318] sm:$0xff]  ;;  %v8596_v50 = vcombine.low %v1044_v3, %v1052_v60  ;;  %v1112_v52 = vunpack.c.l.s8.bf16 %v731_v42  ;;  %v1108_v46 = vunpack.c.l.s8.bf16 %v729_v45 }
 0x273   : > { %6811 = vmatprep.subr.bf16.mxu0 %v10758_v1  ;;  %v741_v59 = vld [vmem:[%s10877_s6 + $0x438] sm:$0xff] }
 0x274   : > { %v10514_v3 = vld [vmem:[%s12148_s1 + $0x1f8] sm:$0xff]  }
 0x275   : > { %5656 = vmatpush1.bf16.msra.mxu1 %v10506_v19  ;;  %v717_v19 = vld [vmem:[%s10877_s6 + $0x378] sm:$0xff] }
 0x276   : > { %6812 = vmatpush1.bf16.msra.mxu0 %v10507_v61  ;;  %5657 = vmatprep.subr.bf16.mxu1 %v10758_v1  ;;  %v1072_v61 = vunpack.c.l.s8.bf16 %v711_v57  ;;  %v10515_v60 = vld [vmem:[%s12148_s1 + $0x3f8] sm:$0xff]   ;;  %v751_v57 = vld [vmem:[%s10877_s6 + $0x488] sm:$0xff] }
 0x277   : > { %5425 = vmatmul.mubr.bf16.gmra.mrb[24].mxu1 %v8508_v62  ;;  %6813 = vmatprep.subr.bf16.mxu0 %v10758_v1  ;;  %v10511_v62 = vld [vmem:[%s12148_s1 + $0x3e8] sm:$0xff]   ;;  %v773_v42 = vld [vmem:[%s10877_s6 + $0x538] sm:$0xff] }
 0x278   : > { %6581 = vmatmul.mubr.bf16.gmra.mrb[24].mxu0 %v8516_v35  ;;  %5432 = vmatprep.mubr.bf16.mxu1 %v8525_v37  ;;  %v1060_v35 = vunpack.c.l.s8.bf16 %v705_v29  ;;  %v1068_v37 = vunpack.c.l.s8.bf16 %v709_v23  ;;  %v743_v29 = vld [vmem:[%s10877_s6 + $0x448] sm:$0xff] }
 0x279   : > { %6588 = vmatprep.mubr.bf16.mxu0 %v8533_v58  ;;  %5658 = vmatpush1.bf16.msra.mxu1 %v10508_v48  ;;  %v8588_v58 = vcombine.low %v1040_v2, %v1048_v47  ;;  %v733_v48 = vld [vmem:[%s10877_s6 + $0x3f8] sm:$0xff]  ;;  %v1120_v2 = vunpack.c.l.s8.bf16 %v735_v44  ;;  %v1128_v47 = vunpack.c.l.s8.bf16 %v739_v63  ;;  %v747_v23 = vld [vmem:[%s10877_s6 + $0x468] sm:$0xff] }
 0x27a   : > { %6814 = vmatpush1.bf16.msra.mxu0 %v10509_v51  ;;  %5659 = vmatprep.subr.bf16.mxu1 %v10758_v1  ;;  %v8613_v56 = vcombine.high %v1060_v35, %v1068_v37  ;;  %v1104_v51 = vunpack.c.l.s8.bf16 %v727_v28  ;;  %v769_v28 = vld [vmem:[%s10877_s6 + $0x518] sm:$0xff] }
 0x27b   : > { %6815 = vmatprep.subr.bf16.mxu0 %v10758_v1  ;;  %v8669_v26 = vcombine.high %v1120_v2, %v1128_v47  ;;  %v777_v44 = vld [vmem:[%s10877_s6 + $0x558] sm:$0xff] }
 0x27c   : > { %v781_v63 = vld [vmem:[%s10877_s6 + $0x578] sm:$0xff] }
 0x27d   : > { %5660 = vmatpush1.bf16.msra.mxu1 %v10510_v33  ;;  %v1136_v33 = vunpack.c.l.s8.bf16 %v743_v29 }
 0x27e   : > { %6816 = vmatpush1.bf16.msra.mxu0 %v10511_v62  ;;  %5661 = vmatprep.subr.bf16.mxu1 %v10758_v1  ;;  %v1144_v62 = vunpack.c.l.s8.bf16 %v747_v23 }
 0x27f   : > { %5433 = vmatmul.mubr.bf16.gmra.mrb[28].mxu1 %v8524_v16  ;;  %6817 = vmatprep.subr.bf16.mxu0 %v10758_v1  ;;  %v1084_v16 = vunpack.c.l.s8.bf16 %v717_v19  ;;  %v757_v19 = vld [vmem:[%s10877_s6 + $0x4b8] sm:$0xff] }
 0x280   : > { %6589 = vmatmul.mubr.bf16.gmra.mrb[28].mxu0 %v8532_v36  ;;  %5440 = vmatprep.mubr.bf16.mxu1 %v8541_v9  ;;  %v8604_v36 = vcombine.low %v1056_v14, %v1064_v32  ;;  %v8612_v9 = vcombine.low %v1060_v35, %v1068_v37  ;;  %v745_v14 = vld [vmem:[%s10877_s6 + $0x458] sm:$0xff] }
 0x281   : > { %6596 = vmatprep.mubr.bf16.mxu0 %v8549_v10  ;;  %v8621_v10 = vcombine.high %v1072_v61, %v1080_v8  ;;  %v8629_v11 = vcombine.high %v1076_v7, %v1084_v16  ;;  %5662 = vmatpush1.bf16.msra.mxu1 %v10512_v13  ;;  %v8628_v40 = vcombine.low %v1076_v7, %v1084_v16  ;;  %v749_v32 = vld [vmem:[%s10877_s6 + $0x478] sm:$0xff]  ;;  %v1140_v35 = vunpack.c.l.s8.bf16 %v745_v14 }
 0x282   : > { %5663 = vmatprep.subr.bf16.mxu1 %v10758_v1  ;;  %v1148_v37 = vunpack.c.l.s8.bf16 %v749_v32  ;;  %v1156_v7 = vunpack.c.l.s8.bf16 %v753_v20  ;;  %v1164_v16 = vunpack.c.l.s8.bf16 %v757_v19 }
 0x285   : > { %5664 = vmatpush1.bf16.msra.mxu1 %v10514_v3 }
 0x287   : > { %5441 = vmatmul.mubr.bf16.gmra.mrb[32].mxu1 %v8540_v24  ;;  %v10513_v24 = vld [vmem:[%s12148_s1 + $0x3f0] sm:$0xff]  }
 0x288   : > { %6597 = vmatmul.mubr.bf16.gmra.mrb[32].mxu0 %v8548_v34  ;;  %5448 = vmatprep.mubr.bf16.mxu1 %v8557_v27  ;;  %v1092_v34 = vunpack.c.l.s8.bf16 %v721_v17  ;;  %v1100_v27 = vunpack.c.l.s8.bf16 %v725_v18  ;;  %v761_v17 = vld [vmem:[%s10877_s6 + $0x4d8] sm:$0xff] }
 0x289   : > { %6604 = vmatprep.mubr.bf16.mxu0 %v8565_v39  ;;  %6818 = vmatpush1.bf16.msra.mxu0 %v10513_v24  ;;  %v8620_v39 = vcombine.low %v1072_v61, %v1080_v8  ;;  %v1152_v61 = vunpack.c.l.s8.bf16 %v751_v57  ;;  %v1160_v8 = vunpack.c.l.s8.bf16 %v755_v5  ;;  %v765_v18 = vld [vmem:[%s10877_s6 + $0x4f8] sm:$0xff]  ;;  %v1172_v13 = vunpack.c.l.s8.bf16 %v761_v17 }
 0x28a   : > { %6819 = vmatprep.subr.bf16.mxu0 %v10758_v1  ;;  %v8645_v41 = vcombine.high %v1092_v34, %v1100_v27  ;;  %v8636_v1 = vcombine.low %v1088_v31, %v1096_v22  ;;  %v1168_v31 = vunpack.c.l.s8.bf16 %v759_v12  ;;  %v1176_v22 = vunpack.c.l.s8.bf16 %v763_v15 }
 0x28b   : > { %v1180_v24 = vunpack.c.l.s8.bf16 %v765_v18 }
 0x28d   : > { %6820 = vmatpush1.bf16.msra.mxu0 %v10515_v60 }
 0x28f   : > { %5449 = vmatmul.mubr.bf16.gmra.mrb[36].mxu1 %v8556_v53  ;;  %v1116_v53 = vunpack.c.l.s8.bf16 %v733_v48 }
 0x290   : > { %6605 = vmatmul.mubr.bf16.gmra.mrb[36].mxu0 %v8564_v38  ;;  %5456 = vmatprep.mubr.bf16.mxu1 %v8573_v54  ;;  %v8644_v38 = vcombine.low %v1092_v34, %v1100_v27  ;;  %v8653_v54 = vcombine.high %v1104_v51, %v1112_v52  ;;  %v8700_v34 = vcombine.low %v1152_v61, %v1160_v8 }
 0x291   : > { %6612 = vmatprep.mubr.bf16.mxu0 %v8581_v43  ;;  %v8661_v43 = vcombine.high %v1108_v46, %v1116_v53  ;;  %v8708_v27 = vcombine.low %v1156_v7, %v1164_v16 }
 0x297   : > { %5457 = vmatmul.mubr.bf16.gmra.mrb[40].mxu1 %v8572_v6  ;;  %v1124_v6 = vunpack.c.l.s8.bf16 %v737_v0 }
 0x298   : > { %6613 = vmatmul.mubr.bf16.gmra.mrb[40].mxu0 %v8580_v21  ;;  %5464 = vmatprep.mubr.bf16.mxu1 %v8589_v25  ;;  %v1132_v21 = vunpack.c.l.s8.bf16 %v741_v59  ;;  %v8652_v25 = vcombine.low %v1104_v51, %v1112_v52  ;;  %v1188_v51 = vunpack.c.l.s8.bf16 %v769_v28  ;;  %v1196_v52 = vunpack.c.l.s8.bf16 %v773_v42 }
 0x299   : > { %6620 = vmatprep.mubr.bf16.mxu0 %v8597_v4  ;;  %v8660_v4 = vcombine.low %v1108_v46, %v1116_v53  ;;  %v8716_v46 = vcombine.low %v1168_v31, %v1176_v22  ;;  %v8724_v53 = vcombine.low %v1172_v13, %v1180_v24 }
 0x29a   : > { %v8677_v49 = vcombine.high %v1124_v6, %v1132_v21  ;;  %v8740_v60 = vcombine.low %v1188_v51, %v1196_v52 }
 0x29f   : > { %5465 = vmatmul.mubr.bf16.gmra.mrb[44].mxu1 %v8588_v58  ;;  %v8668_v58 = vcombine.low %v1120_v2, %v1128_v47  ;;  %v1204_v2 = vunpack.c.l.s8.bf16 %v777_v44  ;;  %v1212_v47 = vunpack.c.l.s8.bf16 %v781_v63 }
 0x2a0   : > { %6621 = vmatmul.mubr.bf16.gmra.mrb[44].mxu0 %v8596_v50  ;;  %5472 = vmatprep.mubr.bf16.mxu1 %v8605_v55  ;;  %v8676_v50 = vcombine.low %v1124_v6, %v1132_v21  ;;  %v8685_v55 = vcombine.high %v1136_v33, %v1144_v62 }
 0x2a1   : > { %6628 = vmatprep.mubr.bf16.mxu0 %v8613_v56  ;;  %v8693_v56 = vcombine.high %v1140_v35, %v1148_v37  ;;  %v8757_v21 = vcombine.high %v1204_v2, %v1212_v47 }
 0x2a7   : > { %5473 = vmatmul.mubr.bf16.gmra.mrb[48].mxu1 %v8604_v36  ;;  %v8684_v36 = vcombine.low %v1136_v33, %v1144_v62  ;;  %v8756_v62 = vcombine.low %v1204_v2, %v1212_v47 }
 0x2a8   : > { %6629 = vmatmul.mubr.bf16.gmra.mrb[48].mxu0 %v8612_v9  ;;  %5480 = vmatprep.mubr.bf16.mxu1 %v8621_v10  ;;  %v8692_v9 = vcombine.low %v1140_v35, %v1148_v37  ;;  %v8701_v10 = vcombine.high %v1152_v61, %v1160_v8 }
 0x2a9   : > { %6636 = vmatprep.mubr.bf16.mxu0 %v8629_v11  ;;  %v8709_v11 = vcombine.high %v1156_v7, %v1164_v16 }
 0x2af   : > { %5481 = vmatmul.mubr.bf16.gmra.mrb[52].mxu1 %v8620_v39  ;;  %v8717_v39 = vcombine.high %v1168_v31, %v1176_v22 }
 0x2b0   : > { %6637 = vmatmul.mubr.bf16.gmra.mrb[52].mxu0 %v8628_v40  ;;  %5488 = vmatprep.mubr.bf16.mxu1 %v8637_v30  ;;  %v8725_v40 = vcombine.high %v1172_v13, %v1180_v24  ;;  %v767_v30 = vld [vmem:[%s10877_s6 + $0x508] sm:$0xff] }
 0x2b1   : > { %6644 = vmatprep.mubr.bf16.mxu0 %v8645_v41  ;;  %v771_v41 = vld [vmem:[%s10877_s6 + $0x528] sm:$0xff]  ;;  %v1184_v45 = vunpack.c.l.s8.bf16 %v767_v30 }
 0x2b2   : > { %v1192_v48 = vunpack.c.l.s8.bf16 %v771_v41 }
 0x2b4   : > { %v8732_v3 = vcombine.low %v1184_v45, %v1192_v48 }
 0x2b7   : > { %5489 = vmatmul.mubr.bf16.gmra.mrb[56].mxu1 %v8636_v1  ;;  %v8733_v1 = vcombine.high %v1184_v45, %v1192_v48 }
 0x2b8   : > { %6645 = vmatmul.mubr.bf16.gmra.mrb[56].mxu0 %v8644_v38  ;;  %5496 = vmatprep.mubr.bf16.mxu1 %v8653_v54  ;;  %v8741_v38 = vcombine.high %v1188_v51, %v1196_v52  ;;  %v775_v54 = vld [vmem:[%s10877_s6 + $0x548] sm:$0xff] }
 0x2b9   : > { %6652 = vmatprep.mubr.bf16.mxu0 %v8661_v43  ;;  %v779_v43 = vld [vmem:[%s10877_s6 + $0x568] sm:$0xff]  ;;  %v1200_v0 = vunpack.c.l.s8.bf16 %v775_v54 }
 0x2ba   : > { %v1208_v59 = vunpack.c.l.s8.bf16 %v779_v43 }
 0x2bc   : > { %v8749_v6 = vcombine.high %v1200_v0, %v1208_v59  ;;  %v8748_v33 = vcombine.low %v1200_v0, %v1208_v59 }
 0x2bf   : > { %5497 = vmatmul.mubr.bf16.gmra.mrb[60].mxu1 %v8652_v25  ;;  %v783_v25 = vld [vmem:[%s10877_s6 + $0x588] sm:$0xff] }
 0x2c0   : > { %6653 = vmatmul.mubr.bf16.gmra.mrb[60].mxu0 %v8660_v4  ;;  %5504 = vmatprep.mubr.bf16.mxu1 %v8669_v26  ;;  %v787_v4 = vld [vmem:[%s10877_s6 + $0x5a8] sm:$0xff]  ;;  %v785_v26 = vld [vmem:[%s10877_s6 + $0x598] sm:$0xff]  ;;  %v1216_v29 = vunpack.c.l.s8.bf16 %v783_v25 }
 0x2c1   : > { %6660 = vmatprep.mubr.bf16.mxu0 %v8677_v49  ;;  %v789_v49 = vld [vmem:[%s10877_s6 + $0x5b8] sm:$0xff]  ;;  %v1224_v23 = vunpack.c.l.s8.bf16 %v787_v4  ;;  %v1220_v14 = vunpack.c.l.s8.bf16 %v785_v26 }
 0x2c2   : > { %v1228_v32 = vunpack.c.l.s8.bf16 %v789_v49 }
 0x2c3   : > { %v8765_v35 = vcombine.high %v1216_v29, %v1224_v23  ;;  %v8764_v61 = vcombine.low %v1216_v29, %v1224_v23 }
 0x2c4   : > { %v8773_v37 = vcombine.high %v1220_v14, %v1228_v32  ;;  %v8772_v8 = vcombine.low %v1220_v14, %v1228_v32 }
 0x2c7   : > { %5505 = vmatmul.mubr.bf16.gmra.mrb[64].mxu1 %v8668_v58  ;;  %v791_v58 = vld [vmem:[%s10877_s6 + $0x5c8] sm:$0xff] }
 0x2c8   : > { %6661 = vmatmul.mubr.bf16.gmra.mrb[64].mxu0 %v8676_v50  ;;  %5512 = vmatprep.mubr.bf16.mxu1 %v8685_v55  ;;  %v795_v50 = vld [vmem:[%s10877_s6 + $0x5e8] sm:$0xff]  ;;  %v793_v55 = vld [vmem:[%s10877_s6 + $0x5d8] sm:$0xff]  ;;  %v1232_v57 = vunpack.c.l.s8.bf16 %v791_v58 }
 0x2c9   : > { %6668 = vmatprep.mubr.bf16.mxu0 %v8693_v56  ;;  %v797_v56 = vld [vmem:[%s10877_s6 + $0x5f8] sm:$0xff]  ;;  %v1240_v5 = vunpack.c.l.s8.bf16 %v795_v50  ;;  %v1236_v20 = vunpack.c.l.s8.bf16 %v793_v55 }
 0x2ca   : > { %v1244_v19 = vunpack.c.l.s8.bf16 %v797_v56 }
 0x2cb   : > { %v8781_v7 = vcombine.high %v1232_v57, %v1240_v5  ;;  %v8780_v31 = vcombine.low %v1232_v57, %v1240_v5  ;;  %v7273_v57 = vld [vmem:[%s11853_s28] sm:$0xff] }
 0x2cc   : > { %v8789_v16 = vcombine.high %v1236_v20, %v1244_v19  ;;  %v8788_v22 = vcombine.low %v1236_v20, %v1244_v19  ;;  %7339 = vperm.xlu0 %10386, %v7273_v57   ;;  %v7287_v57 = vld [vmem:[%s11853_s28 + $0x70] sm:$0xff] }
 0x2cf   : > { %5513 = vmatmul.mubr.bf16.gmra.mrb[68].mxu1 %v8684_v36  ;;  %v799_v36 = vld [vmem:[%s10877_s6 + $0x608] sm:$0xff] }
 0x2d0   : > { %6669 = vmatmul.mubr.bf16.gmra.mrb[68].mxu0 %v8692_v9  ;;  %5520 = vmatprep.mubr.bf16.mxu1 %v8701_v10  ;;  %v803_v9 = vld [vmem:[%s10877_s6 + $0x628] sm:$0xff]  ;;  %v801_v10 = vld [vmem:[%s10877_s6 + $0x618] sm:$0xff]  ;;  %v1248_v12 = vunpack.c.l.s8.bf16 %v799_v36 }
 0x2d1   : > { %6676 = vmatprep.mubr.bf16.mxu0 %v8709_v11  ;;  %v805_v11 = vld [vmem:[%s10877_s6 + $0x638] sm:$0xff]  ;;  %v1256_v15 = vunpack.c.l.s8.bf16 %v803_v9  ;;  %v1252_v17 = vunpack.c.l.s8.bf16 %v801_v10  ;;  %v7275_v10 = vld [vmem:[%s11853_s28 + $0x10] sm:$0xff] }
 0x2d2   : > { %v1260_v18 = vunpack.c.l.s8.bf16 %v805_v11  ;;  %v841_v36 = vld [vmem:[%s10877_s6 + $0x758] sm:$0xff]  ;;  %7349 = vperm.xlu1 %10387, %v7275_v10  }
 0x2d3   : > { %v8797_v13 = vcombine.high %v1248_v12, %v1256_v15  ;;  %v8796_v45 = vcombine.low %v1248_v12, %v1256_v15  ;;  %v845_v9 = vld [vmem:[%s10877_s6 + $0x778] sm:$0xff]  ;;  %v1332_v15 = vunpack.c.l.s8.bf16 %v841_v36  ;;  %v10611_v36 = vld [vmem:[%s10877_s6 + $0x68] sm:$0xff] }
 0x2d4   : > { %v8805_v24 = vcombine.high %v1252_v17, %v1260_v18  ;;  %v8804_v48 = vcombine.low %v1252_v17, %v1260_v18  ;;  %v1340_v17 = vunpack.c.l.s8.bf16 %v845_v9  ;;  %v7276_v18 = vld [vmem:[%s11853_s28 + $0x18] sm:$0xff]  ;;  %v889_v9 = vunpack.c.h.s8.bf16 %v10611_v36  ;;  %v10627_v36 = vld [vmem:[%s10877_s6 + $0x168] sm:$0xff] }
 0x2d5   : > { %v10612_v10 = vld [vmem:[%s10877_s6 + $0x58] sm:$0xff] }
 0x2d6   : > { %7354 = vperm.xlu1 %10387, %v7276_v18  }
 0x2d7   : > { %5521 = vmatmul.mubr.bf16.gmra.mrb[72].mxu1 %v8700_v34  ;;  %v807_v34 = vld [vmem:[%s10877_s6 + $0x648] sm:$0xff] }
 0x2d8   : > { %6677 = vmatmul.mubr.bf16.gmra.mrb[72].mxu0 %v8708_v27  ;;  %5528 = vmatprep.mubr.bf16.mxu1 %v8717_v39  ;;  %v811_v27 = vld [vmem:[%s10877_s6 + $0x668] sm:$0xff]  ;;  %v809_v39 = vld [vmem:[%s10877_s6 + $0x658] sm:$0xff]  ;;  %v1264_v30 = vunpack.c.l.s8.bf16 %v807_v34 }
 0x2d9   : > { %6684 = vmatprep.mubr.bf16.mxu0 %v8725_v40  ;;  %v813_v40 = vld [vmem:[%s10877_s6 + $0x678] sm:$0xff]  ;;  %v1272_v41 = vunpack.c.l.s8.bf16 %v811_v27  ;;  %v1268_v28 = vunpack.c.l.s8.bf16 %v809_v39  ;;  %v847_v34 = vld [vmem:[%s10877_s6 + $0x788] sm:$0xff] }
 0x2da   : > { %v1276_v42 = vunpack.c.l.s8.bf16 %v813_v40  ;;  %v851_v27 = vld [vmem:[%s10877_s6 + $0x7a8] sm:$0xff]  ;;  %v849_v39 = vld [vmem:[%s10877_s6 + $0x798] sm:$0xff] }
 0x2db   : > { %v8813_v51 = vcombine.high %v1264_v30, %v1272_v41  ;;  %v8812_v0 = vcombine.low %v1264_v30, %v1272_v41  ;;  %v853_v40 = vld [vmem:[%s10877_s6 + $0x7b8] sm:$0xff]  ;;  %v7278_v30 = vld [vmem:[%s11853_s28 + $0x28] sm:$0xff]  ;;  %v7277_v41 = vld [vmem:[%s11853_s28 + $0x20] sm:$0xff] }
 0x2dc   : > { %v8821_v52 = vcombine.high %v1268_v28, %v1276_v42  ;;  %v8820_v59 = vcombine.low %v1268_v28, %v1276_v42  ;;  %v1344_v28 = vunpack.c.l.s8.bf16 %v847_v34  ;;  %v1352_v42 = vunpack.c.l.s8.bf16 %v851_v27  ;;  %7364 = vperm.xlu1 %10387, %v7278_v30   ;;  %v7294_v34 = vld [vmem:[%s11853_s28 + $0xa8] sm:$0xff]  ;;  %v7293_v27 = vld [vmem:[%s11853_s28 + $0xa0] sm:$0xff] }
 0x2dd   : > { %v10615_v30 = vld [vmem:[%s10877_s6 + $0xa8] sm:$0xff] }
 0x2df   : > { %5529 = vmatmul.mubr.bf16.gmra.mrb[76].mxu1 %v8716_v46  ;;  %v815_v46 = vld [vmem:[%s10877_s6 + $0x688] sm:$0xff] }
 0x2e0   : > { %6685 = vmatmul.mubr.bf16.gmra.mrb[76].mxu0 %v8724_v53  ;;  %5536 = vmatprep.mubr.bf16.mxu1 %v8733_v1  ;;  %v819_v53 = vld [vmem:[%s10877_s6 + $0x6a8] sm:$0xff]  ;;  %v817_v1 = vld [vmem:[%s10877_s6 + $0x698] sm:$0xff]  ;;  %v1280_v54 = vunpack.c.l.s8.bf16 %v815_v46  ;;  %v7279_v46 = vld [vmem:[%s11853_s28 + $0x30] sm:$0xff] }
 0x2e1   : > { %6692 = vmatprep.mubr.bf16.mxu0 %v8741_v38  ;;  %v821_v38 = vld [vmem:[%s10877_s6 + $0x6b8] sm:$0xff]  ;;  %v1288_v43 = vunpack.c.l.s8.bf16 %v819_v53  ;;  %v1284_v44 = vunpack.c.l.s8.bf16 %v817_v1  ;;  %v8884_v53 = vcombine.low %v1332_v15, %v1340_v17  ;;  %v8893_v1 = vcombine.high %v1344_v28, %v1352_v42 }
 0x2e2   : > { %v1292_v63 = vunpack.c.l.s8.bf16 %v821_v38 }
 0x2e3   : > { %v8829_v2 = vcombine.high %v1280_v54, %v1288_v43  ;;  %v8828_v29 = vcombine.low %v1280_v54, %v1288_v43  ;;  %v855_v54 = vld [vmem:[%s10877_s6 + $0x7c8] sm:$0xff] }
 0x2e4   : > { %v8837_v47 = vcombine.high %v1284_v44, %v1292_v63  ;;  %v8836_v23 = vcombine.low %v1284_v44, %v1292_v63  ;;  %v859_v43 = vld [vmem:[%s10877_s6 + $0x7e8] sm:$0xff]  ;;  %v857_v44 = vld [vmem:[%s10877_s6 + $0x7d8] sm:$0xff] }
 0x2e5   : > { %v861_v63 = vld [vmem:[%s10877_s6 + $0x7f8] sm:$0xff] }
 0x2e7   : > { %5537 = vmatmul.mubr.bf16.gmra.mrb[80].mxu1 %v8732_v3  ;;  %v823_v3 = vld [vmem:[%s10877_s6 + $0x6c8] sm:$0xff] }
 0x2e8   : > { %6693 = vmatmul.mubr.bf16.gmra.mrb[80].mxu0 %v8740_v60  ;;  %5544 = vmatprep.mubr.bf16.mxu1 %v8749_v6  ;;  %v827_v60 = vld [vmem:[%s10877_s6 + $0x6e8] sm:$0xff]  ;;  %v825_v6 = vld [vmem:[%s10877_s6 + $0x6d8] sm:$0xff]  ;;  %v1296_v25 = vunpack.c.l.s8.bf16 %v823_v3  ;;  %v1364_v3 = vunpack.c.l.s8.bf16 %v857_v44 }
 0x2e9   : > { %6700 = vmatprep.mubr.bf16.mxu0 %v8757_v21  ;;  %v829_v21 = vld [vmem:[%s10877_s6 + $0x6f8] sm:$0xff]  ;;  %v1304_v4 = vunpack.c.l.s8.bf16 %v827_v60  ;;  %v1300_v26 = vunpack.c.l.s8.bf16 %v825_v6  ;;  %v1372_v60 = vunpack.c.l.s8.bf16 %v861_v63  ;;  %v10618_v44 = vld [vmem:[%s10877_s6 + $0xc8] sm:$0xff] }
 0x2ea   : > { %v1308_v49 = vunpack.c.l.s8.bf16 %v829_v21  ;;  %v7284_v6 = vld [vmem:[%s11853_s28 + $0x58] sm:$0xff]  ;;  %v8892_v21 = vcombine.low %v1344_v28, %v1352_v42  ;;  %v913_v63 = vunpack.c.h.s8.bf16 %v10618_v44  ;;  %v10634_v44 = vld [vmem:[%s10877_s6 + $0x1c8] sm:$0xff] }
 0x2eb   : > { %v8845_v14 = vcombine.high %v1296_v25, %v1304_v4  ;;  %v8844_v5 = vcombine.low %v1296_v25, %v1304_v4  ;;  %v7283_v25 = vld [vmem:[%s11853_s28 + $0x50] sm:$0xff]  ;;  %v10616_v28 = vld [vmem:[%s10877_s6 + $0x98] sm:$0xff] }
 0x2ec   : > { %v8853_v32 = vcombine.high %v1300_v26, %v1308_v49  ;;  %v8852_v20 = vcombine.low %v1300_v26, %v1308_v49  ;;  %v8917_v49 = vcombine.high %v1364_v3, %v1372_v60  ;;  %v901_v42 = vunpack.c.h.s8.bf16 %v10616_v28  ;;  %v10632_v28 = vld [vmem:[%s10877_s6 + $0x198] sm:$0xff] }
 0x2ef   : > { %5545 = vmatmul.mubr.bf16.gmra.mrb[84].mxu1 %v8748_v33  ;;  %v831_v33 = vld [vmem:[%s10877_s6 + $0x708] sm:$0xff] }
 0x2f0   : > { %6701 = vmatmul.mubr.bf16.gmra.mrb[84].mxu0 %v8756_v62  ;;  %5552 = vmatprep.mubr.bf16.mxu1 %v8765_v35  ;;  %v835_v62 = vld [vmem:[%s10877_s6 + $0x728] sm:$0xff]  ;;  %v833_v35 = vld [vmem:[%s10877_s6 + $0x718] sm:$0xff]  ;;  %v1312_v58 = vunpack.c.l.s8.bf16 %v831_v33 }
 0x2f1   : > { %6708 = vmatprep.mubr.bf16.mxu0 %v8773_v37  ;;  %v837_v37 = vld [vmem:[%s10877_s6 + $0x738] sm:$0xff]  ;;  %v1320_v50 = vunpack.c.l.s8.bf16 %v835_v62  ;;  %v1316_v55 = vunpack.c.l.s8.bf16 %v833_v35  ;;  %v10607_v33 = vld [vmem:[%s10877_s6 + $0x28] sm:$0xff] }
 0x2f2   : > { %v1324_v56 = vunpack.c.l.s8.bf16 %v837_v37  ;;  %v873_v62 = vunpack.c.h.s8.bf16 %v10607_v33  ;;  %v10608_v35 = vld [vmem:[%s10877_s6 + $0x18] sm:$0xff]  ;;  %v10623_v33 = vld [vmem:[%s10877_s6 + $0x128] sm:$0xff] }
 0x2f3   : > { %v8861_v19 = vcombine.high %v1312_v58, %v1320_v50  ;;  %v869_v37 = vunpack.c.h.s8.bf16 %v10608_v35  ;;  %v10624_v35 = vld [vmem:[%s10877_s6 + $0x118] sm:$0xff] }
 0x2f7   : > { %5553 = vmatmul.mubr.bf16.gmra.mrb[88].mxu1 %v8764_v61  ;;  %v7274_v61 = vld [vmem:[%s11853_s28 + $0x8] sm:$0xff] }
 0x2f8   : > { %6709 = vmatmul.mubr.bf16.gmra.mrb[88].mxu0 %v8772_v8  ;;  %5560 = vmatprep.mubr.bf16.mxu1 %v8781_v7  ;;  %v8869_v8 = vcombine.high %v1316_v55, %v1324_v56  ;;  %v839_v7 = vld [vmem:[%s10877_s6 + $0x748] sm:$0xff] }
 0x2f9   : > { %6716 = vmatprep.mubr.bf16.mxu0 %v8789_v16  ;;  %v843_v16 = vld [vmem:[%s10877_s6 + $0x768] sm:$0xff]  ;;  %7344 = vperm.xlu0 %10386, %v7274_v61   ;;  %v1328_v11 = vunpack.c.l.s8.bf16 %v839_v7 }
 0x2fa   : > { %v1336_v12 = vunpack.c.l.s8.bf16 %v843_v16  ;;  %v7290_v61 = vld [vmem:[%s11853_s28 + $0x88] sm:$0xff] }
 0x2fb   : > { %v10610_v7 = vld [vmem:[%s10877_s6 + $0x48] sm:$0xff] }
 0x2fc   : > { %v881_v16 = vunpack.c.h.s8.bf16 %v10610_v7  ;;  %v10626_v7 = vld [vmem:[%s10877_s6 + $0x148] sm:$0xff] }
 0x2fd   : > { %7359 = vperm.xlu0 %10386, %v7277_v41   ;;  %v905_v41 = vunpack.c.h.s8.bf16 %v10615_v30  ;;  %v10631_v30 = vld [vmem:[%s10877_s6 + $0x1a8] sm:$0xff] }
 0x2ff   : > { %5561 = vmatmul.mubr.bf16.gmra.mrb[92].mxu1 %v8780_v31  ;;  %v8860_v31 = vcombine.low %v1312_v58, %v1320_v50  ;;  %v10609_v58 = vld [vmem:[%s10877_s6 + $0x38] sm:$0xff] }
 0x300   : > { %6717 = vmatmul.mubr.bf16.gmra.mrb[92].mxu0 %v8788_v22  ;;  %5568 = vmatprep.mubr.bf16.mxu1 %v8797_v13  ;;  %v8868_v22 = vcombine.low %v1316_v55, %v1324_v56  ;;  %v8877_v13 = vcombine.high %v1328_v11, %v1336_v12  ;;  %v877_v50 = vunpack.c.h.s8.bf16 %v10609_v58  ;;  %v7288_v55 = vld [vmem:[%s11853_s28 + $0x78] sm:$0xff] }
 0x301   : > { %6724 = vmatprep.mubr.bf16.mxu0 %v8805_v24  ;;  %v8885_v24 = vcombine.high %v1332_v15, %v1340_v17  ;;  %7369 = vperm.xlu0 %10386, %v7279_v46   ;;  %v7292_v17 = vld [vmem:[%s11853_s28 + $0x98] sm:$0xff]  ;;  %v7295_v46 = vld [vmem:[%s11853_s28 + $0xb0] sm:$0xff] }
 0x302   : > { %v10625_v58 = vld [vmem:[%s10877_s6 + $0x138] sm:$0xff] }
 0x307   : > { %5569 = vmatmul.mubr.bf16.gmra.mrb[96].mxu1 %v8796_v45  ;;  %v1348_v45 = vunpack.c.l.s8.bf16 %v849_v39  ;;  %v10614_v39 = vld [vmem:[%s10877_s6 + $0x88] sm:$0xff] }
 0x308   : > { %6725 = vmatmul.mubr.bf16.gmra.mrb[96].mxu0 %v8804_v48  ;;  %5576 = vmatprep.mubr.bf16.mxu1 %v8813_v51  ;;  %v1356_v48 = vunpack.c.l.s8.bf16 %v853_v40  ;;  %v7280_v51 = vld [vmem:[%s11853_s28 + $0x38] sm:$0xff]  ;;  %v897_v40 = vunpack.c.h.s8.bf16 %v10614_v39  ;;  %v10630_v39 = vld [vmem:[%s10877_s6 + $0x188] sm:$0xff] }
 0x309   : > { %6732 = vmatprep.mubr.bf16.mxu0 %v8821_v52  ;;  %v8876_v52 = vcombine.low %v1328_v11, %v1336_v12  ;;  %7374 = vperm.xlu1 %10387, %v7280_v51   ;;  %v885_v11 = vunpack.c.h.s8.bf16 %v10612_v10  ;;  %v10613_v12 = vld [vmem:[%s10877_s6 + $0x78] sm:$0xff] }
 0x30a   : > { %v8901_v38 = vcombine.high %v1348_v45, %v1356_v48  ;;  %v8900_v4 = vcombine.low %v1348_v45, %v1356_v48  ;;  %v893_v15 = vunpack.c.h.s8.bf16 %v10613_v12  ;;  %v10617_v45 = vld [vmem:[%s10877_s6 + $0xb8] sm:$0xff] }
 0x30b   : > { %v909_v48 = vunpack.c.h.s8.bf16 %v10617_v45  ;;  %v7296_v51 = vld [vmem:[%s11853_s28 + $0xb8] sm:$0xff] }
 0x30c   : > { %v10628_v10 = vld [vmem:[%s10877_s6 + $0x158] sm:$0xff] }
 0x30d   : > { %v10629_v12 = vld [vmem:[%s10877_s6 + $0x178] sm:$0xff] }
 0x30e   : > { %v10633_v45 = vld [vmem:[%s10877_s6 + $0x1b8] sm:$0xff] }
 0x30f   : > { %5577 = vmatmul.mubr.bf16.gmra.mrb[100].mxu1 %v8812_v0  ;;  %v7282_v0 = vld [vmem:[%s11853_s28 + $0x48] sm:$0xff] }
 0x310   : > { %6733 = vmatmul.mubr.bf16.gmra.mrb[100].mxu0 %v8820_v59  ;;  %5584 = vmatprep.mubr.bf16.mxu1 %v8829_v2  ;;  %v7281_v59 = vld [vmem:[%s11853_s28 + $0x40] sm:$0xff]  ;;  %v1360_v2 = vunpack.c.l.s8.bf16 %v855_v54  ;;  %v7298_v54 = vld [vmem:[%s11853_s28 + $0xc8] sm:$0xff] }
 0x311   : > { %6740 = vmatprep.mubr.bf16.mxu0 %v8837_v47  ;;  %v1368_v47 = vunpack.c.l.s8.bf16 %v859_v43  ;;  %7384 = vperm.xlu1 %10387, %v7282_v0   ;;  %v7297_v43 = vld [vmem:[%s11853_s28 + $0xc0] sm:$0xff]  ;;  %v10619_v0 = vld [vmem:[%s10877_s6 + $0xe8] sm:$0xff] }
 0x312   : > { %7379 = vperm.xlu0 %10386, %v7281_v59   ;;  %v921_v59 = vunpack.c.h.s8.bf16 %v10619_v0  ;;  %v10635_v0 = vld [vmem:[%s10877_s6 + $0x1e8] sm:$0xff] }
 0x313   : > { %v8909_v26 = vcombine.high %v1360_v2, %v1368_v47  ;;  %v8908_v56 = vcombine.low %v1360_v2, %v1368_v47  ;;  %v10620_v2 = vld [vmem:[%s10877_s6 + $0xd8] sm:$0xff] }
 0x314   : > { %v917_v47 = vunpack.c.h.s8.bf16 %v10620_v2  ;;  %v10636_v2 = vld [vmem:[%s10877_s6 + $0x1d8] sm:$0xff] }
 0x315   : > { %7394 = vperm.xlu1 %10387, %v7284_v6   ;;  %v7300_v6 = vld [vmem:[%s11853_s28 + $0xd8] sm:$0xff] }
 0x316   : > { %7389 = vperm.xlu0 %10386, %v7283_v25   ;;  %v7299_v25 = vld [vmem:[%s11853_s28 + $0xd0] sm:$0xff] }
 0x317   : > { %5585 = vmatmul.mubr.bf16.gmra.mrb[104].mxu1 %v8828_v29  ;;  %v7286_v29 = vld [vmem:[%s11853_s28 + $0x68] sm:$0xff] }
 0x318   : > { %6741 = vmatmul.mubr.bf16.gmra.mrb[104].mxu0 %v8836_v23  ;;  %5592 = vmatprep.mubr.bf16.mxu1 %v8845_v14  ;;  %v7285_v23 = vld [vmem:[%s11853_s28 + $0x60] sm:$0xff]  ;;  %v10606_v14 = vld [vmem:[%s10877_s6 + $0x8] sm:$0xff] }
 0x319   : > { %6748 = vmatprep.mubr.bf16.mxu0 %v8853_v32  ;;  %v865_v32 = vunpack.c.h.s8.bf16 %v10606_v14  ;;  %7404 = vperm.xlu1 %10387, %v7286_v29   ;;  %v7302_v29 = vld [vmem:[%s11853_s28 + $0xe8] sm:$0xff] }
 0x31a   : > { %7399 = vperm.xlu0 %10386, %v7285_v23   ;;  %v7301_v23 = vld [vmem:[%s11853_s28 + $0xe0] sm:$0xff]  ;;  %v10622_v14 = vld [vmem:[%s10877_s6 + $0x108] sm:$0xff] }
 0x31b   : > { %v8414_v18 = vcombine.low %v865_v32, %v873_v62 }
 0x31d   : > { %7414 = vperm.xlu1 %10387, %v7288_v55   ;;  %v7304_v55 = vld [vmem:[%s11853_s28 + $0xf8] sm:$0xff] }
 0x31e   : > { %7409 = vperm.xlu0 %10386, %v7287_v57   ;;  %v7303_v57 = vld [vmem:[%s11853_s28 + $0xf0] sm:$0xff] }
 0x31f   : > { %5593 = vmatmul.mubr.bf16.gmra.mrb[108].mxu1 %v8844_v5  ;;  %v8916_v5 = vcombine.low %v1364_v3, %v1372_v60  ;;  %v10621_v3 = vld [vmem:[%s10877_s6 + $0xf8] sm:$0xff] }
 0x320   : > { %6749 = vmatmul.mubr.bf16.gmra.mrb[108].mxu0 %v8852_v20  ;;  %5600 = vmatprep.mubr.bf16.mxu1 %v8861_v19  ;;  %v8415_v20 = vcombine.high %v865_v32, %v873_v62  ;;  %v8423_v19 = vcombine.high %v869_v37, %v877_v50  ;;  %v925_v60 = vunpack.c.h.s8.bf16 %v10621_v3  ;;  %v929_v32 = vunpack.c.h.s8.bf16 %v10622_v14  ;;  %v10637_v3 = vld [vmem:[%s10877_s6 + $0x1f8] sm:$0xff]  ;;  %v10638_v14 = vld [vmem:[%s10877_s6 + $0x208] sm:$0xff] }
 0x321   : > { %6756 = vmatprep.mubr.bf16.mxu0 %v8869_v8  ;;  %v7289_v8 = vld [vmem:[%s11853_s28 + $0x80] sm:$0xff]  ;;  %7424 = vperm.xlu1 %10387, %v7290_v61   ;;  %v937_v62 = vunpack.c.h.s8.bf16 %v10623_v33  ;;  %v7306_v61 = vld [vmem:[%s11853_s28 + $0x108] sm:$0xff] }
 0x322   : > { %7419 = vperm.xlu0 %10386, %v7289_v8   ;;  %v7305_v8 = vld [vmem:[%s11853_s28 + $0x100] sm:$0xff]  ;;  %v10639_v33 = vld [vmem:[%s10877_s6 + $0x228] sm:$0xff] }
 0x325   : > { %7434 = vperm.xlu1 %10387, %v7292_v17   ;;  %v7308_v17 = vld [vmem:[%s11853_s28 + $0x118] sm:$0xff] }
 0x327   : > { %5601 = vmatmul.mubr.bf16.gmra.mrb[112].mxu1 %v8860_v31  ;;  %v7291_v31 = vld [vmem:[%s11853_s28 + $0x90] sm:$0xff] }
 0x328   : > { %6757 = vmatmul.mubr.bf16.gmra.mrb[112].mxu0 %v8868_v22  ;;  %5608 = vmatprep.mubr.bf16.mxu1 %v8877_v13  ;;  %v8422_v22 = vcombine.low %v869_v37, %v877_v50  ;;  %v8431_v13 = vcombine.high %v881_v16, %v889_v9  ;;  %v933_v37 = vunpack.c.h.s8.bf16 %v10624_v35  ;;  %v941_v50 = vunpack.c.h.s8.bf16 %v10625_v58  ;;  %v10640_v35 = vld [vmem:[%s10877_s6 + $0x218] sm:$0xff] }
 0x329   : > { %6764 = vmatprep.mubr.bf16.mxu0 %v8885_v24  ;;  %v8439_v24 = vcombine.high %v885_v11, %v893_v15  ;;  %7429 = vperm.xlu0 %10386, %v7291_v31   ;;  %v7307_v31 = vld [vmem:[%s11853_s28 + $0x110] sm:$0xff]  ;;  %v10641_v58 = vld [vmem:[%s10877_s6 + $0x238] sm:$0xff] }
 0x32a   : > { %7444 = vperm.xlu1 %10387, %v7294_v34   ;;  %v7310_v34 = vld [vmem:[%s11853_s28 + $0x128] sm:$0xff] }
 0x32d   : > { %7439 = vperm.xlu0 %10386, %v7293_v27   ;;  %v7309_v27 = vld [vmem:[%s11853_s28 + $0x120] sm:$0xff] }
 0x32e   : > { %7454 = vperm.xlu1 %10387, %v7296_v51   ;;  %v7312_v51 = vld [vmem:[%s11853_s28 + $0x138] sm:$0xff] }
 0x32f   : > { %5609 = vmatmul.mubr.bf16.gmra.mrb[116].mxu1 %v8876_v52  ;;  %v8430_v52 = vcombine.low %v881_v16, %v889_v9  ;;  %v945_v16 = vunpack.c.h.s8.bf16 %v10626_v7  ;;  %v953_v9 = vunpack.c.h.s8.bf16 %v10627_v36  ;;  %v10642_v7 = vld [vmem:[%s10877_s6 + $0x248] sm:$0xff] }
 0x330   : > { %6765 = vmatmul.mubr.bf16.gmra.mrb[116].mxu0 %v8884_v53  ;;  %5616 = vmatprep.mubr.bf16.mxu1 %v8893_v1  ;;  %v8438_v53 = vcombine.low %v885_v11, %v893_v15  ;;  %v8447_v1 = vcombine.high %v897_v40, %v905_v41  ;;  %v949_v11 = vunpack.c.h.s8.bf16 %v10628_v10  ;;  %v957_v15 = vunpack.c.h.s8.bf16 %v10629_v12  ;;  %v10643_v36 = vld [vmem:[%s10877_s6 + $0x268] sm:$0xff]  ;;  %v10644_v10 = vld [vmem:[%s10877_s6 + $0x258] sm:$0xff] }
 0x331   : > { %6772 = vmatprep.mubr.bf16.mxu0 %v8901_v38  ;;  %v8455_v38 = vcombine.high %v901_v42, %v909_v48  ;;  %7449 = vperm.xlu0 %10386, %v7295_v46   ;;  %v7311_v46 = vld [vmem:[%s11853_s28 + $0x130] sm:$0xff]  ;;  %v10645_v12 = vld [vmem:[%s10877_s6 + $0x278] sm:$0xff] }
 0x332   : > { %7464 = vperm.xlu1 %10387, %v7298_v54   ;;  %v7314_v54 = vld [vmem:[%s11853_s28 + $0x148] sm:$0xff] }
 0x335   : > { %7459 = vperm.xlu0 %10386, %v7297_v43   ;;  %v7313_v43 = vld [vmem:[%s11853_s28 + $0x140] sm:$0xff] }
 0x336   : > { %7474 = vperm.xlu1 %10387, %v7300_v6   ;;  %v7316_v6 = vld [vmem:[%s11853_s28 + $0x158] sm:$0xff] }
 0x337   : > { %5617 = vmatmul.mubr.bf16.gmra.mrb[120].mxu1 %v8892_v21  ;;  %v8446_v21 = vcombine.low %v897_v40, %v905_v41  ;;  %v961_v40 = vunpack.c.h.s8.bf16 %v10630_v39  ;;  %v969_v41 = vunpack.c.h.s8.bf16 %v10631_v30  ;;  %v10646_v39 = vld [vmem:[%s10877_s6 + $0x288] sm:$0xff] }
 0x338   : > { %6773 = vmatmul.mubr.bf16.gmra.mrb[120].mxu0 %v8900_v4  ;;  %5624 = vmatprep.mubr.bf16.mxu1 %v8909_v26  ;;  %v8454_v4 = vcombine.low %v901_v42, %v909_v48  ;;  %v8463_v26 = vcombine.high %v913_v63, %v921_v59  ;;  %v965_v42 = vunpack.c.h.s8.bf16 %v10632_v28  ;;  %v973_v48 = vunpack.c.h.s8.bf16 %v10633_v45  ;;  %v10647_v30 = vld [vmem:[%s10877_s6 + $0x2a8] sm:$0xff]  ;;  %v10648_v28 = vld [vmem:[%s10877_s6 + $0x298] sm:$0xff] }
 0x339   : > { %6780 = vmatprep.mubr.bf16.mxu0 %v8917_v49  ;;  %v8471_v49 = vcombine.high %v917_v47, %v925_v60  ;;  %7469 = vperm.xlu0 %10386, %v7299_v25   ;;  %v7315_v25 = vld [vmem:[%s11853_s28 + $0x150] sm:$0xff]  ;;  %v10649_v45 = vld [vmem:[%s10877_s6 + $0x2b8] sm:$0xff] }
 0x33a   : > { %7484 = vperm.xlu1 %10387, %v7302_v29   ;;  %v7318_v29 = vld [vmem:[%s11853_s28 + $0x168] sm:$0xff] }
 0x33d   : > { %7479 = vperm.xlu0 %10386, %v7301_v23   ;;  %v7317_v23 = vld [vmem:[%s11853_s28 + $0x160] sm:$0xff] }
 0x33e   : > { %7494 = vperm.xlu1 %10387, %v7304_v55   ;;  %v7320_v55 = vld [vmem:[%s11853_s28 + $0x178] sm:$0xff] }
 0x33f   : > { %5625 = vmatmul.mubr.bf16.gmra.mrb[124].mxu1 %v8908_v56  ;;  %v8462_v56 = vcombine.low %v913_v63, %v921_v59  ;;  %v977_v63 = vunpack.c.h.s8.bf16 %v10634_v44  ;;  %v985_v59 = vunpack.c.h.s8.bf16 %v10635_v0  ;;  %v10650_v44 = vld [vmem:[%s10877_s6 + $0x2c8] sm:$0xff] }
 0x340   : > { %6781 = vmatmul.mubr.bf16.gmra.mrb[124].mxu0 %v8916_v5  ;;  %5665 = vmatprep.mubr.bf16.mxu1 %v8415_v20  ;;  %v8470_v5 = vcombine.low %v917_v47, %v925_v60  ;;  %v8479_v20 = vcombine.high %v929_v32, %v937_v62  ;;  %v981_v47 = vunpack.c.h.s8.bf16 %v10636_v2  ;;  %v989_v60 = vunpack.c.h.s8.bf16 %v10637_v3  ;;  %v10651_v0 = vld [vmem:[%s10877_s6 + $0x2e8] sm:$0xff]  ;;  %v10652_v2 = vld [vmem:[%s10877_s6 + $0x2d8] sm:$0xff] }
 0x341   : > { %6821 = vmatprep.mubr.bf16.mxu0 %v8423_v19  ;;  %v8487_v19 = vcombine.high %v933_v37, %v941_v50  ;;  %7489 = vperm.xlu0 %10386, %v7303_v57   ;;  %v7319_v57 = vld [vmem:[%s11853_s28 + $0x170] sm:$0xff]  ;;  %v10653_v3 = vld [vmem:[%s10877_s6 + $0x2f8] sm:$0xff] }
 0x342   : > { %7504 = vperm.xlu1 %10387, %v7306_v61   ;;  %v7322_v61 = vld [vmem:[%s11853_s28 + $0x188] sm:$0xff] }
 0x345   : > { %7499 = vperm.xlu0 %10386, %v7305_v8   ;;  %v7321_v8 = vld [vmem:[%s11853_s28 + $0x180] sm:$0xff] }
 0x346   : > { %7514 = vperm.xlu1 %10387, %v7308_v17   ;;  %v7324_v17 = vld [vmem:[%s11853_s28 + $0x198] sm:$0xff] }
 0x347   : > { %5666 = vmatmul.mubr.bf16.vlgmr.msra.gmra.mrb[0].mxu1 %v8414_v18  ;;  %v8478_v18 = vcombine.low %v929_v32, %v937_v62  ;;  %v993_v32 = vunpack.c.h.s8.bf16 %v10638_v14  ;;  %v1001_v62 = vunpack.c.h.s8.bf16 %v10639_v33  ;;  %v10654_v14 = vld [vmem:[%s10877_s6 + $0x308] sm:$0xff] }
 0x348   : > { %6822 = vmatmul.mubr.bf16.vlgmr.msra.gmra.mrb[0].mxu0 %v8422_v22  ;;  %5673 = vmatprep.mubr.bf16.mxu1 %v8431_v13  ;;  %v8486_v22 = vcombine.low %v933_v37, %v941_v50  ;;  %v8495_v13 = vcombine.high %v945_v16, %v953_v9  ;;  %v997_v37 = vunpack.c.h.s8.bf16 %v10640_v35  ;;  %v1005_v50 = vunpack.c.h.s8.bf16 %v10641_v58  ;;  %v10655_v33 = vld [vmem:[%s10877_s6 + $0x328] sm:$0xff]  ;;  %v10656_v35 = vld [vmem:[%s10877_s6 + $0x318] sm:$0xff] }
 0x349   : > { %6829 = vmatprep.mubr.bf16.mxu0 %v8439_v24  ;;  %v8503_v24 = vcombine.high %v949_v11, %v957_v15  ;;  %7509 = vperm.xlu0 %10386, %v7307_v31   ;;  %v7323_v31 = vld [vmem:[%s11853_s28 + $0x190] sm:$0xff]  ;;  %v10657_v58 = vld [vmem:[%s10877_s6 + $0x338] sm:$0xff] }
 0x34a   : > { %7524 = vperm.xlu1 %10387, %v7310_v34   ;;  %v7326_v34 = vld [vmem:[%s11853_s28 + $0x1a8] sm:$0xff] }
 0x34d   : > { %7519 = vperm.xlu0 %10386, %v7309_v27   ;;  %v7325_v27 = vld [vmem:[%s11853_s28 + $0x1a0] sm:$0xff] }
 0x34e   : > { %7534 = vperm.xlu1 %10387, %v7312_v51   ;;  %v7328_v51 = vld [vmem:[%s11853_s28 + $0x1b8] sm:$0xff] }
 0x34f   : > { %5674 = vmatmul.mubr.bf16.gmra.mrb[4].mxu1 %v8430_v52  ;;  %v8494_v52 = vcombine.low %v945_v16, %v953_v9  ;;  %v1009_v16 = vunpack.c.h.s8.bf16 %v10642_v7  ;;  %v1017_v9 = vunpack.c.h.s8.bf16 %v10643_v36  ;;  %v10659_v7 = vld [vmem:[%s10877_s6 + $0x368] sm:$0xff]  ;;  %v10660_v36 = vld [vmem:[%s10877_s6 + $0x358] sm:$0xff] }
 0x350   : > { %6830 = vmatmul.mubr.bf16.gmra.mrb[4].mxu0 %v8438_v53  ;;  %5681 = vmatprep.mubr.bf16.mxu1 %v8447_v1  ;;  %v8502_v53 = vcombine.low %v949_v11, %v957_v15  ;;  %v8511_v1 = vcombine.high %v961_v40, %v969_v41  ;;  %v1013_v11 = vunpack.c.h.s8.bf16 %v10644_v10  ;;  %v1021_v15 = vunpack.c.h.s8.bf16 %v10645_v12  ;;  %v10661_v10 = vld [vmem:[%s10877_s6 + $0x378] sm:$0xff] }
 0x351   : > { %6837 = vmatprep.mubr.bf16.mxu0 %v8455_v38  ;;  %v8519_v38 = vcombine.high %v965_v42, %v973_v48  ;;  %7529 = vperm.xlu0 %10386, %v7311_v46   ;;  %v7327_v46 = vld [vmem:[%s11853_s28 + $0x1b0] sm:$0xff] }
 0x352   : > { %7544 = vperm.xlu1 %10387, %v7314_v54   ;;  %v7330_v54 = vld [vmem:[%s11853_s28 + $0x1c8] sm:$0xff] }
 0x355   : > { %7539 = vperm.xlu0 %10386, %v7313_v43   ;;  %v7329_v43 = vld [vmem:[%s11853_s28 + $0x1c0] sm:$0xff] }
 0x356   : > { %7554 = vperm.xlu1 %10387, %v7316_v6   ;;  %v7332_v6 = vld [vmem:[%s11853_s28 + $0x1d8] sm:$0xff] }
 0x357   : > { %5682 = vmatmul.mubr.bf16.gmra.mrb[8].mxu1 %v8446_v21  ;;  %v8510_v21 = vcombine.low %v961_v40, %v969_v41  ;;  %v1025_v40 = vunpack.c.h.s8.bf16 %v10646_v39  ;;  %v1033_v41 = vunpack.c.h.s8.bf16 %v10647_v30  ;;  %v10665_v39 = vld [vmem:[%s10877_s6 + $0x3b8] sm:$0xff] }
 0x358   : > { %6838 = vmatmul.mubr.bf16.gmra.mrb[8].mxu0 %v8454_v4  ;;  %5689 = vmatprep.mubr.bf16.mxu1 %v8463_v26  ;;  %v8518_v4 = vcombine.low %v965_v42, %v973_v48  ;;  %v8527_v26 = vcombine.high %v977_v63, %v985_v59  ;;  %v1029_v42 = vunpack.c.h.s8.bf16 %v10648_v28  ;;  %v1037_v48 = vunpack.c.h.s8.bf16 %v10649_v45  ;;  %v10666_v45 = vld [vmem:[%s10877_s6 + $0x3c8] sm:$0xff] }
 0x359   : > { %6845 = vmatprep.mubr.bf16.mxu0 %v8471_v49  ;;  %v8535_v49 = vcombine.high %v981_v47, %v989_v60  ;;  %7549 = vperm.xlu0 %10386, %v7315_v25   ;;  %v7331_v25 = vld [vmem:[%s11853_s28 + $0x1d0] sm:$0xff] }
 0x35a   : > { %7564 = vperm.xlu1 %10387, %v7318_v29   ;;  %v7334_v29 = vld [vmem:[%s11853_s28 + $0x1e8] sm:$0xff] }
 0x35d   : > { %7559 = vperm.xlu0 %10386, %v7317_v23   ;;  %v7333_v23 = vld [vmem:[%s11853_s28 + $0x1e0] sm:$0xff] }
 0x35e   : > { %7574 = vperm.xlu1 %10387, %v7320_v55  }
 0x35f   : > { %5690 = vmatmul.mubr.bf16.gmra.mrb[12].mxu1 %v8462_v56  ;;  %v8526_v56 = vcombine.low %v977_v63, %v985_v59  ;;  %v1041_v63 = vunpack.c.h.s8.bf16 %v10650_v44  ;;  %v1049_v59 = vunpack.c.h.s8.bf16 %v10651_v0  ;;  %v10670_v0 = vld [vmem:[%s10877_s6 + $0x408] sm:$0xff] }
 0x360   : > { %6846 = vmatmul.mubr.bf16.gmra.mrb[12].mxu0 %v8470_v5  ;;  %5697 = vmatprep.mubr.bf16.mxu1 %v8479_v20  ;;  %v8534_v5 = vcombine.low %v981_v47, %v989_v60  ;;  %v8543_v20 = vcombine.high %v993_v32, %v1001_v62  ;;  %v1045_v47 = vunpack.c.h.s8.bf16 %v10652_v2  ;;  %v1053_v60 = vunpack.c.h.s8.bf16 %v10653_v3  ;;  %v10671_v2 = vld [vmem:[%s10877_s6 + $0x428] sm:$0xff]  ;;  %v10672_v3 = vld [vmem:[%s10877_s6 + $0x418] sm:$0xff] }
 0x361   : > { %6853 = vmatprep.mubr.bf16.mxu0 %v8487_v19  ;;  %v8551_v19 = vcombine.high %v997_v37, %v1005_v50  ;;  %7569 = vperm.xlu0 %10386, %v7319_v57   ;;  %v8590_v55 = vcombine.low %v1041_v63, %v1049_v59  ;;  %v7335_v57 = vld [vmem:[%s11853_s28 + $0x1f0] sm:$0xff] }
 0x362   : > { %7584 = vperm.xlu1 %10387, %v7322_v61   ;;  %v10658_v61 = vld [vmem:[%s10877_s6 + $0x348] sm:$0xff] }
 0x365   : > { %7579 = vperm.xlu0 %10386, %v7321_v8   ;;  %v1073_v8 = vunpack.c.h.s8.bf16 %v10658_v61  ;;  %v10680_v61 = vld [vmem:[%s10877_s6 + $0x498] sm:$0xff] }
 0x366   : > { %7594 = vperm.xlu1 %10387, %v7324_v17  }
 0x367   : > { %5698 = vmatmul.mubr.bf16.gmra.mrb[16].mxu1 %v8478_v18  ;;  %v8542_v18 = vcombine.low %v993_v32, %v1001_v62  ;;  %v1057_v32 = vunpack.c.h.s8.bf16 %v10654_v14  ;;  %v1065_v62 = vunpack.c.h.s8.bf16 %v10655_v33  ;;  %v10675_v14 = vld [vmem:[%s10877_s6 + $0x468] sm:$0xff]  ;;  %v10676_v33 = vld [vmem:[%s10877_s6 + $0x458] sm:$0xff] }
 0x368   : > { %6854 = vmatmul.mubr.bf16.gmra.mrb[16].mxu0 %v8486_v22  ;;  %5705 = vmatprep.mubr.bf16.mxu1 %v8495_v13  ;;  %v8550_v22 = vcombine.low %v997_v37, %v1005_v50  ;;  %v8559_v13 = vcombine.high %v1009_v16, %v1017_v9  ;;  %v1061_v37 = vunpack.c.h.s8.bf16 %v10656_v35  ;;  %v1069_v50 = vunpack.c.h.s8.bf16 %v10657_v58  ;;  %v10677_v35 = vld [vmem:[%s10877_s6 + $0x478] sm:$0xff] }
 0x369   : > { %6861 = vmatprep.mubr.bf16.mxu0 %v8503_v24  ;;  %v8567_v24 = vcombine.high %v1013_v11, %v1021_v15  ;;  %7589 = vperm.xlu0 %10386, %v7323_v31   ;;  %v8606_v12 = vcombine.low %v1057_v32, %v1065_v62  ;;  %v10662_v31 = vld [vmem:[%s10877_s6 + $0x388] sm:$0xff] }
 0x36a   : > { %7604 = vperm.xlu1 %10387, %v7326_v34   ;;  %v10664_v34 = vld [vmem:[%s10877_s6 + $0x398] sm:$0xff] }
 0x36d   : > { %7599 = vperm.xlu0 %10386, %v7325_v27   ;;  %v1093_v27 = vunpack.c.h.s8.bf16 %v10664_v34 }
 0x36e   : > { %7614 = vperm.xlu1 %10387, %v7328_v51   ;;  %v10667_v51 = vld [vmem:[%s10877_s6 + $0x3e8] sm:$0xff] }
 0x36f   : > { %5706 = vmatmul.mubr.bf16.gmra.mrb[20].mxu1 %v8494_v52  ;;  %v8558_v52 = vcombine.low %v1009_v16, %v1017_v9  ;;  %v1081_v16 = vunpack.c.h.s8.bf16 %v10659_v7  ;;  %v1077_v9 = vunpack.c.h.s8.bf16 %v10660_v36  ;;  %v10681_v7 = vld [vmem:[%s10877_s6 + $0x4b8] sm:$0xff] }
 0x370   : > { %6862 = vmatmul.mubr.bf16.gmra.mrb[20].mxu0 %v8502_v53  ;;  %5713 = vmatprep.mubr.bf16.mxu1 %v8511_v1  ;;  %v8566_v53 = vcombine.low %v1013_v11, %v1021_v15  ;;  %v8575_v1 = vcombine.high %v1025_v40, %v1033_v41  ;;  %v1085_v11 = vunpack.c.h.s8.bf16 %v10661_v10  ;;  %v8614_v15 = vcombine.low %v1061_v37, %v1069_v50 }
 0x371   : > { %6869 = vmatprep.mubr.bf16.mxu0 %v8519_v38  ;;  %v8583_v38 = vcombine.high %v1029_v42, %v1037_v48  ;;  %7609 = vperm.xlu0 %10386, %v7327_v46   ;;  %v8623_v17 = vcombine.high %v1073_v8, %v1081_v16  ;;  %v8622_v30 = vcombine.low %v1073_v8, %v1081_v16  ;;  %v10668_v46 = vld [vmem:[%s10877_s6 + $0x3d8] sm:$0xff]  ;;  %v1157_v8 = vunpack.c.h.s8.bf16 %v10680_v61 }
 0x372   : > { %7624 = vperm.xlu1 %10387, %v7330_v54   ;;  %v1165_v16 = vunpack.c.h.s8.bf16 %v10681_v7 }
 0x375   : > { %7619 = vperm.xlu0 %10386, %v7329_v43  }
 0x376   : > { %7634 = vperm.xlu1 %10387, %v7332_v6   ;;  %v10673_v6 = vld [vmem:[%s10877_s6 + $0x438] sm:$0xff] }
 0x377   : > { %5714 = vmatmul.mubr.bf16.gmra.mrb[24].mxu1 %v8510_v21  ;;  %v8574_v21 = vcombine.low %v1025_v40, %v1033_v41  ;;  %v1101_v40 = vunpack.c.h.s8.bf16 %v10665_v39  ;;  %v8630_v41 = vcombine.low %v1077_v9, %v1085_v11 }
 0x378   : > { %6870 = vmatmul.mubr.bf16.gmra.mrb[24].mxu0 %v8518_v4  ;;  %5721 = vmatprep.mubr.bf16.mxu1 %v8527_v26  ;;  %v8582_v4 = vcombine.low %v1029_v42, %v1037_v48  ;;  %v8591_v26 = vcombine.high %v1041_v63, %v1049_v59  ;;  %v1105_v48 = vunpack.c.h.s8.bf16 %v10666_v45  ;;  %v1121_v59 = vunpack.c.h.s8.bf16 %v10670_v0  ;;  %v10688_v45 = vld [vmem:[%s10877_s6 + $0x518] sm:$0xff] }
 0x379   : > { %6877 = vmatprep.mubr.bf16.mxu0 %v8535_v49  ;;  %v8599_v49 = vcombine.high %v1045_v47, %v1053_v60  ;;  %7629 = vperm.xlu0 %10386, %v7331_v25   ;;  %v8647_v42 = vcombine.high %v1093_v27, %v1101_v40  ;;  %v8646_v43 = vcombine.low %v1093_v27, %v1101_v40  ;;  %v10692_v0 = vld [vmem:[%s10877_s6 + $0x558] sm:$0xff] }
 0x37a   : > { %7644 = vperm.xlu1 %10387, %v7334_v29   ;;  %v10674_v29 = vld [vmem:[%s10877_s6 + $0x448] sm:$0xff]  ;;  %v8710_v27 = vcombine.low %v1157_v8, %v1165_v16 }
 0x37d   : > { %7639 = vperm.xlu0 %10386, %v7333_v23   ;;  %v1137_v23 = vunpack.c.h.s8.bf16 %v10674_v29  ;;  %v10696_v29 = vld [vmem:[%s10877_s6 + $0x598] sm:$0xff] }
 0x37f   : > { %5722 = vmatmul.mubr.bf16.gmra.mrb[28].mxu1 %v8526_v56  ;;  %v7336_v56 = vld [vmem:[%s11853_s28 + $0x1f8] sm:$0xff] }
 0x380   : > { %6878 = vmatmul.mubr.bf16.gmra.mrb[28].mxu0 %v8534_v5  ;;  %5729 = vmatprep.mubr.bf16.mxu1 %v8543_v20  ;;  %v8598_v5 = vcombine.low %v1045_v47, %v1053_v60  ;;  %v8607_v20 = vcombine.high %v1057_v32, %v1065_v62  ;;  %v1129_v47 = vunpack.c.h.s8.bf16 %v10671_v2  ;;  %v1125_v60 = vunpack.c.h.s8.bf16 %v10672_v3  ;;  %v10693_v2 = vld [vmem:[%s10877_s6 + $0x578] sm:$0xff] }
 0x381   : > { %6885 = vmatprep.mubr.bf16.mxu0 %v8551_v19  ;;  %v8615_v19 = vcombine.high %v1061_v37, %v1069_v50  ;;  %7654 = vperm.xlu1 %10387, %v7336_v56   ;;  %v1145_v32 = vunpack.c.h.s8.bf16 %v10675_v14  ;;  %v1141_v62 = vunpack.c.h.s8.bf16 %v10676_v33  ;;  %v1149_v37 = vunpack.c.h.s8.bf16 %v10677_v35  ;;  %v10697_v14 = vld [vmem:[%s10877_s6 + $0x5b8] sm:$0xff] }
 0x382   : > { %7649 = vperm.xlu0 %10386, %v7335_v57   ;;  %v8670_v58 = vcombine.low %v1121_v59, %v1129_v47  ;;  %v10678_v57 = vld [vmem:[%s10877_s6 + $0x488] sm:$0xff] }
 0x383   : > { %v8695_v56 = vcombine.high %v1141_v62, %v1149_v37  ;;  %v8686_v36 = vcombine.low %v1137_v23, %v1145_v32 }
 0x387   : > { %5730 = vmatmul.mubr.bf16.gmra.mrb[32].mxu1 %v8542_v18  ;;  %v8631_v18 = vcombine.high %v1077_v9, %v1085_v11  ;;  %v8694_v9 = vcombine.low %v1141_v62, %v1149_v37  ;;  %v8711_v11 = vcombine.high %v1157_v8, %v1165_v16 }
 0x388   : > { %6886 = vmatmul.mubr.bf16.gmra.mrb[32].mxu0 %v8550_v22  ;;  %5737 = vmatprep.mubr.bf16.mxu1 %v8559_v13  ;;  %v1089_v22 = vunpack.c.h.s8.bf16 %v10662_v31  ;;  %v10663_v13 = vld [vmem:[%s10877_s6 + $0x3a8] sm:$0xff]  ;;  %v10684_v31 = vld [vmem:[%s10877_s6 + $0x4d8] sm:$0xff] }
 0x389   : > { %6893 = vmatprep.mubr.bf16.mxu0 %v8567_v24  ;;  %v1097_v24 = vunpack.c.h.s8.bf16 %v10663_v13  ;;  %v10685_v13 = vld [vmem:[%s10877_s6 + $0x4f8] sm:$0xff] }
 0x38b   : > { %v8639_v28 = vcombine.high %v1089_v22, %v1097_v24  ;;  %v8638_v54 = vcombine.low %v1089_v22, %v1097_v24  ;;  %v1173_v22 = vunpack.c.h.s8.bf16 %v10684_v31  ;;  %v1181_v24 = vunpack.c.h.s8.bf16 %v10685_v13 }
 0x38d   : > { %v8727_v40 = vcombine.high %v1173_v22, %v1181_v24 }
 0x38f   : > { %5738 = vmatmul.mubr.bf16.gmra.mrb[36].mxu1 %v8558_v52  ;;  %v1113_v52 = vunpack.c.h.s8.bf16 %v10667_v51  ;;  %v10689_v51 = vld [vmem:[%s10877_s6 + $0x538] sm:$0xff] }
 0x390   : > { %6894 = vmatmul.mubr.bf16.gmra.mrb[36].mxu0 %v8566_v53  ;;  %5745 = vmatprep.mubr.bf16.mxu1 %v8575_v1  ;;  %v1109_v53 = vunpack.c.h.s8.bf16 %v10668_v46  ;;  %v10669_v1 = vld [vmem:[%s10877_s6 + $0x3f8] sm:$0xff] }
 0x391   : > { %6901 = vmatprep.mubr.bf16.mxu0 %v8583_v38  ;;  %v1117_v38 = vunpack.c.h.s8.bf16 %v10669_v1  ;;  %v8655_v44 = vcombine.high %v1105_v48, %v1113_v52  ;;  %v8654_v25 = vcombine.low %v1105_v48, %v1113_v52  ;;  %v1189_v48 = vunpack.c.h.s8.bf16 %v10688_v45 }
 0x392   : > { %v1197_v52 = vunpack.c.h.s8.bf16 %v10689_v51 }
 0x393   : > { %v8663_v63 = vcombine.high %v1109_v53, %v1117_v38 }
 0x397   : > { %5746 = vmatmul.mubr.bf16.gmra.mrb[40].mxu1 %v8574_v21  ;;  %v1133_v21 = vunpack.c.h.s8.bf16 %v10673_v6 }
 0x398   : > { %6902 = vmatmul.mubr.bf16.gmra.mrb[40].mxu0 %v8582_v4  ;;  %5753 = vmatprep.mubr.bf16.mxu1 %v8591_v26  ;;  %v8662_v4 = vcombine.low %v1109_v53, %v1117_v38  ;;  %v8671_v26 = vcombine.high %v1121_v59, %v1129_v47  ;;  %v8726_v53 = vcombine.low %v1173_v22, %v1181_v24  ;;  %v1205_v59 = vunpack.c.h.s8.bf16 %v10692_v0 }
 0x399   : > { %6909 = vmatprep.mubr.bf16.mxu0 %v8599_v49  ;;  %v8679_v49 = vcombine.high %v1125_v60, %v1133_v21  ;;  %v8678_v50 = vcombine.low %v1125_v60, %v1133_v21  ;;  %v8743_v38 = vcombine.high %v1189_v48, %v1197_v52  ;;  %v1213_v47 = vunpack.c.h.s8.bf16 %v10693_v2 }
 0x39a   : > { %v8742_v60 = vcombine.low %v1189_v48, %v1197_v52 }
 0x39b   : > { %v8759_v21 = vcombine.high %v1205_v59, %v1213_v47  ;;  %v8758_v62 = vcombine.low %v1205_v59, %v1213_v47 }
 0x39f   : > { %5754 = vmatmul.mubr.bf16.gmra.mrb[44].mxu1 %v8590_v55  ;;  %v8687_v55 = vcombine.high %v1137_v23, %v1145_v32  ;;  %v1221_v23 = vunpack.c.h.s8.bf16 %v10696_v29  ;;  %v1229_v32 = vunpack.c.h.s8.bf16 %v10697_v14  ;;  %v7340_v14 = vpop.permute.xlu0 %7339 }
 0x3a0   : > { %6910 = vmatmul.mubr.bf16.gmra.mrb[44].mxu0 %v8598_v5  ;;  %5761 = vmatprep.mubr.bf16.mxu1 %v8607_v20  ;;  %v1153_v5 = vunpack.c.h.s8.bf16 %v10678_v57  ;;  %v10679_v20 = vld [vmem:[%s10877_s6 + $0x4a8] sm:$0xff]  ;;  %v10700_v57 = vld [vmem:[%s10877_s6 + $0x5d8] sm:$0xff] }
 0x3a1   : > { %6917 = vmatprep.mubr.bf16.mxu0 %v8615_v19  ;;  %v1161_v19 = vunpack.c.h.s8.bf16 %v10679_v20  ;;  %v8775_v37 = vcombine.high %v1221_v23, %v1229_v32  ;;  %v10701_v20 = vld [vmem:[%s10877_s6 + $0x5f8] sm:$0xff]  ;;  %v8774_v8 = vcombine.low %v1221_v23, %v1229_v32 }
 0x3a3   : > { %v8703_v10 = vcombine.high %v1153_v5, %v1161_v19  ;;  %v8702_v34 = vcombine.low %v1153_v5, %v1161_v19  ;;  %v1237_v5 = vunpack.c.h.s8.bf16 %v10700_v57  ;;  %v1245_v19 = vunpack.c.h.s8.bf16 %v10701_v20  ;;  %v10721_v57 = vld [vmem:[%s10877_s6 + $0x738] sm:$0xff] }
 0x3a5   : > { %v8791_v16 = vcombine.high %v1237_v5, %v1245_v19  ;;  %v8790_v22 = vcombine.low %v1237_v5, %v1245_v19  ;;  %v1325_v5 = vunpack.c.h.s8.bf16 %v10721_v57  ;;  %v7345_v19 = vpop.permute.xlu0 %7344 }
 0x3a7   : > { %5762 = vmatmul.mubr.bf16.gmra.mrb[48].mxu1 %v8606_v12  ;;  %v10682_v12 = vld [vmem:[%s10877_s6 + $0x4c8] sm:$0xff] }
 0x3a8   : > { %6918 = vmatmul.mubr.bf16.gmra.mrb[48].mxu0 %v8614_v15  ;;  %5769 = vmatprep.mubr.bf16.mxu1 %v8623_v17  ;;  %v1169_v15 = vunpack.c.h.s8.bf16 %v10682_v12  ;;  %v10683_v17 = vld [vmem:[%s10877_s6 + $0x4e8] sm:$0xff]  ;;  %v10704_v12 = vld [vmem:[%s10877_s6 + $0x618] sm:$0xff] }
 0x3a9   : > { %6925 = vmatprep.mubr.bf16.mxu0 %v8631_v18  ;;  %v1177_v18 = vunpack.c.h.s8.bf16 %v10683_v17  ;;  %v10705_v17 = vld [vmem:[%s10877_s6 + $0x638] sm:$0xff] }
 0x3ab   : > { %v8719_v39 = vcombine.high %v1169_v15, %v1177_v18  ;;  %v8718_v46 = vcombine.low %v1169_v15, %v1177_v18  ;;  %v1253_v15 = vunpack.c.h.s8.bf16 %v10704_v12  ;;  %v1261_v18 = vunpack.c.h.s8.bf16 %v10705_v17 }
 0x3ad   : > { %v8807_v24 = vcombine.high %v1253_v15, %v1261_v18  ;;  %v8806_v48 = vcombine.low %v1253_v15, %v1261_v18 }
 0x3af   : > { %5770 = vmatmul.mubr.bf16.gmra.mrb[52].mxu1 %v8622_v30  ;;  %v10686_v30 = vld [vmem:[%s10877_s6 + $0x508] sm:$0xff] }
 0x3b0   : > { %6926 = vmatmul.mubr.bf16.gmra.mrb[52].mxu0 %v8630_v41  ;;  %5777 = vmatprep.mubr.bf16.mxu1 %v8639_v28  ;;  %v1185_v41 = vunpack.c.h.s8.bf16 %v10686_v30  ;;  %v10687_v28 = vld [vmem:[%s10877_s6 + $0x528] sm:$0xff]  ;;  %v10708_v30 = vld [vmem:[%s10877_s6 + $0x658] sm:$0xff] }
 0x3b1   : > { %6933 = vmatprep.mubr.bf16.mxu0 %v8647_v42  ;;  %v1193_v42 = vunpack.c.h.s8.bf16 %v10687_v28  ;;  %v10709_v28 = vld [vmem:[%s10877_s6 + $0x678] sm:$0xff] }
 0x3b3   : > { %v8735_v1 = vcombine.high %v1185_v41, %v1193_v42  ;;  %v8734_v3 = vcombine.low %v1185_v41, %v1193_v42  ;;  %v1269_v41 = vunpack.c.h.s8.bf16 %v10708_v30  ;;  %v1277_v42 = vunpack.c.h.s8.bf16 %v10709_v28 }
 0x3b5   : > { %v8823_v52 = vcombine.high %v1269_v41, %v1277_v42  ;;  %v8822_v59 = vcombine.low %v1269_v41, %v1277_v42  ;;  %v10723_v41 = vld [vmem:[%s10877_s6 + $0x768] sm:$0xff]  ;;  %v7350_v42 = vpop.permute.xlu1 %7349 }
 0x3b6   : > { %v1337_v28 = vunpack.c.h.s8.bf16 %v10723_v41 }
 0x3b7   : > { %5778 = vmatmul.mubr.bf16.gmra.mrb[56].mxu1 %v8638_v54  ;;  %v10690_v54 = vld [vmem:[%s10877_s6 + $0x548] sm:$0xff] }
 0x3b8   : > { %6934 = vmatmul.mubr.bf16.gmra.mrb[56].mxu0 %v8646_v43  ;;  %5785 = vmatprep.mubr.bf16.mxu1 %v8655_v44  ;;  %v1201_v43 = vunpack.c.h.s8.bf16 %v10690_v54  ;;  %v10691_v44 = vld [vmem:[%s10877_s6 + $0x568] sm:$0xff]  ;;  %v10712_v54 = vld [vmem:[%s10877_s6 + $0x698] sm:$0xff] }
 0x3b9   : > { %6941 = vmatprep.mubr.bf16.mxu0 %v8663_v63  ;;  %v1209_v63 = vunpack.c.h.s8.bf16 %v10691_v44  ;;  %v10713_v44 = vld [vmem:[%s10877_s6 + $0x6b8] sm:$0xff] }
 0x3bb   : > { %v8751_v6 = vcombine.high %v1201_v43, %v1209_v63  ;;  %v8750_v33 = vcombine.low %v1201_v43, %v1209_v63  ;;  %v1285_v43 = vunpack.c.h.s8.bf16 %v10712_v54  ;;  %v1293_v63 = vunpack.c.h.s8.bf16 %v10713_v44 }
 0x3bd   : > { %v8839_v47 = vcombine.high %v1285_v43, %v1293_v63  ;;  %v8838_v23 = vcombine.low %v1285_v43, %v1293_v63 }
 0x3bf   : > { %5786 = vmatmul.mubr.bf16.gmra.mrb[60].mxu1 %v8654_v25  ;;  %v10694_v25 = vld [vmem:[%s10877_s6 + $0x588] sm:$0xff] }
 0x3c0   : > { %6942 = vmatmul.mubr.bf16.gmra.mrb[60].mxu0 %v8662_v4  ;;  %5793 = vmatprep.mubr.bf16.mxu1 %v8671_v26  ;;  %v1217_v4 = vunpack.c.h.s8.bf16 %v10694_v25  ;;  %v10695_v26 = vld [vmem:[%s10877_s6 + $0x5a8] sm:$0xff]  ;;  %v10716_v25 = vld [vmem:[%s10877_s6 + $0x6d8] sm:$0xff] }
 0x3c1   : > { %6949 = vmatprep.mubr.bf16.mxu0 %v8679_v49  ;;  %v1225_v49 = vunpack.c.h.s8.bf16 %v10695_v26  ;;  %v10717_v26 = vld [vmem:[%s10877_s6 + $0x6f8] sm:$0xff] }
 0x3c3   : > { %v8767_v35 = vcombine.high %v1217_v4, %v1225_v49  ;;  %v8766_v61 = vcombine.low %v1217_v4, %v1225_v49  ;;  %v1301_v4 = vunpack.c.h.s8.bf16 %v10716_v25  ;;  %v1309_v49 = vunpack.c.h.s8.bf16 %v10717_v26 }
 0x3c7   : > { %5794 = vmatmul.mubr.bf16.gmra.mrb[64].mxu1 %v8670_v58  ;;  %v10698_v58 = vld [vmem:[%s10877_s6 + $0x5c8] sm:$0xff] }
 0x3c8   : > { %6950 = vmatmul.mubr.bf16.gmra.mrb[64].mxu0 %v8678_v50  ;;  %5801 = vmatprep.mubr.bf16.mxu1 %v8687_v55  ;;  %v1233_v50 = vunpack.c.h.s8.bf16 %v10698_v58  ;;  %v10699_v55 = vld [vmem:[%s10877_s6 + $0x5e8] sm:$0xff] }
 0x3c9   : > { %6957 = vmatprep.mubr.bf16.mxu0 %v8695_v56  ;;  %v1241_v56 = vunpack.c.h.s8.bf16 %v10699_v55  ;;  %v10720_v55 = vld [vmem:[%s10877_s6 + $0x718] sm:$0xff] }
 0x3cb   : > { %v8783_v7 = vcombine.high %v1233_v50, %v1241_v56  ;;  %v8782_v31 = vcombine.low %v1233_v50, %v1241_v56  ;;  %v9180_v50 = vld [vmem:[%s12049_s7] sm:$0xff]   ;;  %v1317_v56 = vunpack.c.h.s8.bf16 %v10720_v55 }
 0x3cd   : > { %v8871_v18 = vcombine.high %v1317_v56, %v1325_v5  ;;  %v8870_v44 = vcombine.low %v1317_v56, %v1325_v5  ;;  %v10729_v56 = vld [vmem:[%s10877_s6 + $0x7b8] sm:$0xff] }
 0x3ce   : > { %v1357_v57 = vunpack.c.h.s8.bf16 %v10729_v56 }
 0x3cf   : > { %5802 = vmatmul.mubr.bf16.gmra.mrb[68].mxu1 %v8686_v36  ;;  %v10702_v36 = vld [vmem:[%s10877_s6 + $0x608] sm:$0xff] }
 0x3d0   : > { %6958 = vmatmul.mubr.bf16.gmra.mrb[68].mxu0 %v8694_v9  ;;  %5809 = vmatprep.mubr.bf16.mxu1 %v8703_v10  ;;  %v1249_v9 = vunpack.c.h.s8.bf16 %v10702_v36  ;;  %v10703_v10 = vld [vmem:[%s10877_s6 + $0x628] sm:$0xff]  ;;  %v9181_v36 = vunpack.c.l.bf16 %v9180_v50 }
 0x3d1   : > { %6965 = vmatprep.mubr.bf16.mxu0 %v8711_v11  ;;  %v1257_v11 = vunpack.c.h.s8.bf16 %v10703_v10 }
 0x3d3   : > { %v8799_v13 = vcombine.high %v1249_v9, %v1257_v11  ;;  %v8798_v45 = vcombine.low %v1249_v9, %v1257_v11  ;;  %v8854_v11 = vcombine.low %v1301_v4, %v1309_v49 }
 0x3d7   : > { %5810 = vmatmul.mubr.bf16.gmra.mrb[72].mxu1 %v8702_v34  ;;  %v10706_v34 = vld [vmem:[%s10877_s6 + $0x648] sm:$0xff] }
 0x3d8   : > { %6966 = vmatmul.mubr.bf16.gmra.mrb[72].mxu0 %v8710_v27  ;;  %5817 = vmatprep.mubr.bf16.mxu1 %v8719_v39  ;;  %v1265_v27 = vunpack.c.h.s8.bf16 %v10706_v34  ;;  %v10707_v39 = vld [vmem:[%s10877_s6 + $0x668] sm:$0xff] }
 0x3d9   : > { %6973 = vmatprep.mubr.bf16.mxu0 %v8727_v40  ;;  %v1273_v40 = vunpack.c.h.s8.bf16 %v10707_v39  ;;  %v9467_v39 = vld [vmem:[%s12049_s7 + $0x8] sm:$0xff]  }
 0x3db   : > { %v8815_v51 = vcombine.high %v1265_v27, %v1273_v40  ;;  %v8814_v0 = vcombine.low %v1265_v27, %v1273_v40  ;;  %v10722_v40 = vld [vmem:[%s10877_s6 + $0x748] sm:$0xff] }
 0x3dc   : > { %v1329_v30 = vunpack.c.h.s8.bf16 %v10722_v40 }
 0x3df   : > { %5818 = vmatmul.mubr.bf16.gmra.mrb[76].mxu1 %v8718_v46  ;;  %v10710_v46 = vld [vmem:[%s10877_s6 + $0x688] sm:$0xff] }
 0x3e0   : > { %6974 = vmatmul.mubr.bf16.gmra.mrb[76].mxu0 %v8726_v53  ;;  %5825 = vmatprep.mubr.bf16.mxu1 %v8735_v1  ;;  %v1281_v53 = vunpack.c.h.s8.bf16 %v10710_v46  ;;  %v10711_v1 = vld [vmem:[%s10877_s6 + $0x6a8] sm:$0xff] }
 0x3e1   : > { %6981 = vmatprep.mubr.bf16.mxu0 %v8743_v38  ;;  %v1289_v38 = vunpack.c.h.s8.bf16 %v10711_v1 }
 0x3e3   : > { %v8831_v2 = vcombine.high %v1281_v53, %v1289_v38  ;;  %v8830_v29 = vcombine.low %v1281_v53, %v1289_v38  ;;  %v9185_v38 = vunpack.c.l.bf16 %v9467_v39 }
 0x3e7   : > { %5826 = vmatmul.mubr.bf16.gmra.mrb[80].mxu1 %v8734_v3  ;;  %v10714_v3 = vld [vmem:[%s10877_s6 + $0x6c8] sm:$0xff] }
 0x3e8   : > { %6982 = vmatmul.mubr.bf16.gmra.mrb[80].mxu0 %v8742_v60  ;;  %5833 = vmatprep.mubr.bf16.mxu1 %v8751_v6  ;;  %v1297_v60 = vunpack.c.h.s8.bf16 %v10714_v3  ;;  %v10715_v6 = vld [vmem:[%s10877_s6 + $0x6e8] sm:$0xff]  ;;  %v8879_v3 = vcombine.high %v1329_v30, %v1337_v28 }
 0x3e9   : > { %6989 = vmatprep.mubr.bf16.mxu0 %v8759_v21  ;;  %v1305_v21 = vunpack.c.h.s8.bf16 %v10715_v6 }
 0x3eb   : > { %v8847_v32 = vcombine.high %v1297_v60, %v1305_v21 }
 0x3ef   : > { %5834 = vmatmul.mubr.bf16.gmra.mrb[84].mxu1 %v8750_v33  ;;  %v8855_v33 = vcombine.high %v1301_v4, %v1309_v49  ;;  %v9186_v49 = vunpack.c.h.bf16 %v9467_v39 }
 0x3f0   : > { %6990 = vmatmul.mubr.bf16.gmra.mrb[84].mxu0 %v8758_v62  ;;  %5841 = vmatprep.mubr.bf16.mxu1 %v8767_v35  ;;  %v10718_v62 = vld [vmem:[%s10877_s6 + $0x708] sm:$0xff] }
 0x3f1   : > { %6997 = vmatprep.mubr.bf16.mxu0 %v8775_v37  ;;  %v1313_v35 = vunpack.c.h.s8.bf16 %v10718_v62  ;;  %v10719_v37 = vld [vmem:[%s10877_s6 + $0x728] sm:$0xff] }
 0x3f2   : > { %v1321_v58 = vunpack.c.h.s8.bf16 %v10719_v37  ;;  %v10726_v62 = vld [vmem:[%s10877_s6 + $0x788] sm:$0xff] }
 0x3f3   : > { %v10727_v37 = vld [vmem:[%s10877_s6 + $0x7a8] sm:$0xff] }
 0x3f4   : > { %v8863_v12 = vcombine.high %v1313_v35, %v1321_v58  ;;  %v8862_v43 = vcombine.low %v1313_v35, %v1321_v58  ;;  %v1345_v35 = vunpack.c.h.s8.bf16 %v10726_v62  ;;  %v1353_v58 = vunpack.c.h.s8.bf16 %v10727_v37 }
 0x3f7   : > { %5842 = vmatmul.mubr.bf16.gmra.mrb[88].mxu1 %v8766_v61 }
 0x3f8   : > { %6998 = vmatmul.mubr.bf16.gmra.mrb[88].mxu0 %v8774_v8  ;;  %5849 = vmatprep.mubr.bf16.mxu1 %v8783_v7  ;;  %v8846_v7 = vcombine.low %v1297_v60, %v1305_v21 }
 0x3f9   : > { %7005 = vmatprep.mubr.bf16.mxu0 %v8791_v16 }
 0x3ff   : > { %5850 = vmatmul.mubr.bf16.gmra.mrb[92].mxu1 %v8782_v31 }
 0x400   : > { %7006 = vmatmul.mubr.bf16.gmra.mrb[92].mxu0 %v8790_v22  ;;  %5857 = vmatprep.mubr.bf16.mxu1 %v8799_v13 }
 0x401   : > { %7013 = vmatprep.mubr.bf16.mxu0 %v8807_v24  ;;  %v9182_v24 = vunpack.c.h.bf16 %v9180_v50  ;;  %v10728_v50 = vld [vmem:[%s10877_s6 + $0x798] sm:$0xff] }
 0x402   : > { %v1349_v55 = vunpack.c.h.s8.bf16 %v10728_v50 }
 0x407   : > { %5858 = vmatmul.mubr.bf16.gmra.mrb[96].mxu1 %v8798_v45  ;;  %v10724_v45 = vld [vmem:[%s10877_s6 + $0x758] sm:$0xff] }
 0x408   : > { %7014 = vmatmul.mubr.bf16.gmra.mrb[96].mxu0 %v8806_v48  ;;  %5865 = vmatprep.mubr.bf16.mxu1 %v8815_v51  ;;  %v1333_v48 = vunpack.c.h.s8.bf16 %v10724_v45  ;;  %v10725_v51 = vld [vmem:[%s10877_s6 + $0x778] sm:$0xff] }
 0x409   : > { %7021 = vmatprep.mubr.bf16.mxu0 %v8823_v52  ;;  %v1341_v52 = vunpack.c.h.s8.bf16 %v10725_v51 }
 0x40b   : > { %v8887_v21 = vcombine.high %v1333_v48, %v1341_v52 }
 0x40f   : > { %5866 = vmatmul.mubr.bf16.gmra.mrb[100].mxu1 %v8814_v0 }
 0x410   : > { %7022 = vmatmul.mubr.bf16.gmra.mrb[100].mxu0 %v8822_v59  ;;  %5873 = vmatprep.mubr.bf16.mxu1 %v8831_v2 }
 0x411   : > { %7029 = vmatprep.mubr.bf16.mxu0 %v8839_v47 }
 0x417   : > { %5874 = vmatmul.mubr.bf16.gmra.mrb[104].mxu1 %v8830_v29 }
 0x418   : > { %7030 = vmatmul.mubr.bf16.gmra.mrb[104].mxu0 %v8838_v23  ;;  %5881 = vmatprep.mubr.bf16.mxu1 %v8847_v32  ;;  %v7355_v23 = vpop.permute.xlu1 %7354 }
 0x419   : > { %7037 = vmatprep.mubr.bf16.mxu0 %v8855_v33  ;;  %v9468_v33 = vld [vmem:[%s12049_s7 + $0x10] sm:$0xff]  }
 0x41a   : > { %v5667_v20 = vpop.f32.mrb[0].mxu1 }
 0x41b   : > { %v6823_v61 = vpop.f32.mrb[0].mxu0  ;;  %v5669_v8 = vpop.f32.mrb[1].mxu1 }
 0x41c   : > { %v9529_v16 = vadd.f32 %v6823_v61, %v5667_v20  ;;  %v6825_v9 = vpop.f32.mrb[1].mxu0  ;;  %v5670_v10 = vpop.f32.mrb[2].mxu1  ;;  %v9189_v8 = vunpack.c.l.bf16 %v9468_v33 }
 0x41d   : > { %v6826_v15 = vpop.f32.mrb[2].mxu0  ;;  %v5672_v17 = vpop.f32.mrb[3].mxu1 }
 0x41e   : > { %v7657_v31 = vmul.f32 %v9529_v16, %v7340_v14  ;;  %v9530_v22 = vadd.f32 %v6826_v15, %v5670_v10  ;;  %v6828_v13 = vpop.f32.mrb[3].mxu0  ;;  %v7360_v20 = vpop.permute.xlu0 %7359  ;;  %v8878_v16 = vcombine.low %v1329_v30, %v1337_v28  ;;  %v8895_v17 = vcombine.high %v1345_v35, %v1353_v58  ;;  %v9469_v28 = vld [vmem:[%s12049_s7 + $0x18] sm:$0xff]  }
 0x41f   : > { %5882 = vmatmul.mubr.bf16.gmra.mrb[108].mxu1 %v8846_v7  ;;  %v7365_v40 = vpop.permute.xlu1 %7364 }
 0x420   : > { %v7849_v34 = vadd.f32 %v9181_v36, %v7657_v31  ;;  %v7658_v27 = vmul.f32 %v9530_v22, %v7345_v19  ;;  %7038 = vmatmul.mubr.bf16.gmra.mrb[108].mxu0 %v8854_v11  ;;  %5889 = vmatprep.mubr.bf16.mxu1 %v8863_v12  ;;  %v8886_v36 = vcombine.low %v1333_v48, %v1341_v52  ;;  %v10731_v48 = vld [vmem:[%s10877_s6 + $0x7e8] sm:$0xff]  ;;  %v10732_v52 = vld [vmem:[%s10877_s6 + $0x7d8] sm:$0xff] }
 0x421   : > { %7045 = vmatprep.mubr.bf16.mxu0 %v8871_v18  ;;  %v8903_v22 = vcombine.high %v1349_v55, %v1357_v57  ;;  %v1369_v51 = vunpack.c.h.s8.bf16 %v10731_v48 }
 0x422   : > { %v7850_v46 = vadd.f32 %v9182_v24, %v7658_v27  ;;  %v5675_v53 = vpop.f32.mrb[4].mxu1  ;;  %v7913_v63 = vmax.f32 %v7849_v34, 0.0  ;;  %v9190_v27 = vunpack.c.h.bf16 %v9468_v33 }
 0x423   : > { %v6831_v1 = vpop.f32.mrb[4].mxu0  ;;  %v5677_v54 = vpop.f32.mrb[5].mxu1 }
 0x424   : > { %v7914_v0 = vmax.f32 %v7850_v46, 0.0  ;;  %v9531_v59 = vadd.f32 %v6831_v1, %v5675_v53  ;;  %v6833_v2 = vpop.f32.mrb[5].mxu0  ;;  %v5678_v47 = vpop.f32.mrb[6].mxu1  ;;  %v1365_v46 = vunpack.c.h.s8.bf16 %v10732_v52  ;;  %v10733_v53 = vld [vmem:[%s10877_s6 + $0x7f8] sm:$0xff] }
 0x425   : > { %v6834_v60 = vpop.f32.mrb[6].mxu0  ;;  %v5680_v6 = vpop.f32.mrb[7].mxu1  ;;  %v1373_v1 = vunpack.c.h.s8.bf16 %v10733_v53  ;;  %v8902_v2 = vcombine.low %v1349_v55, %v1357_v57 }
 0x426   : > { %v9310_v25 = vpack.c.bf16 %v7914_v0, %v7913_v63  ;;  %v7659_v4 = vmul.f32 %v9531_v59, %v7350_v42  ;;  %v9532_v26 = vadd.f32 %v6834_v60, %v5678_v47  ;;  %v6836_v29 = vpop.f32.mrb[7].mxu0  ;;  %v10730_v42 = vld [vmem:[%s10877_s6 + $0x7c8] sm:$0xff]  ;;  %v9193_v63 = vunpack.c.l.bf16 %v9469_v28  ;;  %v7375_v62 = vpop.permute.xlu1 %7374 }
 0x427   : > { %5890 = vmatmul.mubr.bf16.gmra.mrb[112].mxu1 %v8862_v43  ;;  %v1361_v45 = vunpack.c.h.s8.bf16 %v10730_v42  ;;  %v8894_v59 = vcombine.low %v1345_v35, %v1353_v58  ;;  %v9470_v58 = vld [vmem:[%s12049_s7 + $0x20] sm:$0xff]  }
 0x428   : > { %9311 = vst [vmem:[%s12066_s10] sm:$0xff] %v9310_v25   ;;  %v7851_v14 = vadd.f32 %v9185_v38, %v7659_v4  ;;  %v7660_v32 = vmul.f32 %v9532_v26, %v7355_v23  ;;  %7046 = vmatmul.mubr.bf16.gmra.mrb[112].mxu0 %v8870_v44  ;;  %5897 = vmatprep.mubr.bf16.mxu1 %v8879_v3  ;;  %v7370_v38 = vpop.permute.xlu0 %7369 }
 0x429   : > { %7053 = vmatprep.mubr.bf16.mxu0 %v8887_v21  ;;  %v8911_v25 = vcombine.high %v1361_v45, %v1369_v51 }
 0x42a   : > { %v7852_v5 = vadd.f32 %v9186_v49, %v7660_v32  ;;  %v5683_v19 = vpop.f32.mrb[8].mxu1  ;;  %v7915_v9 = vmax.f32 %v7851_v14, 0.0  ;;  %v8919_v49 = vcombine.high %v1365_v46, %v1373_v1  ;;  %v9194_v32 = vunpack.c.h.bf16 %v9469_v28 }
 0x42b   : > { %v6839_v61 = vpop.f32.mrb[8].mxu0  ;;  %v5685_v7 = vpop.f32.mrb[9].mxu1 }
 0x42c   : > { %v7916_v10 = vmax.f32 %v7852_v5, 0.0  ;;  %v9533_v11 = vadd.f32 %v6839_v61, %v5683_v19  ;;  %v6841_v12 = vpop.f32.mrb[9].mxu0  ;;  %v5686_v15 = vpop.f32.mrb[10].mxu1  ;;  %v9197_v5 = vunpack.c.l.bf16 %v9470_v58  ;;  %v8910_v19 = vcombine.low %v1361_v45, %v1369_v51 }
 0x42d   : > { %v6842_v18 = vpop.f32.mrb[10].mxu0  ;;  %v5688_v31 = vpop.f32.mrb[11].mxu1 }
 0x42e   : > { %v9315_v13 = vpack.c.bf16 %v7916_v10, %v7915_v9  ;;  %v7661_v24 = vmul.f32 %v9533_v11, %v7360_v20  ;;  %v9534_v34 = vadd.f32 %v6842_v18, %v5686_v15  ;;  %v6844_v39 = vpop.f32.mrb[11].mxu0  ;;  %v7380_v50 = vpop.permute.xlu0 %7379  ;;  %v8918_v9 = vcombine.low %v1365_v46, %v1373_v1 }
 0x42f   : > { %5898 = vmatmul.mubr.bf16.gmra.mrb[116].mxu1 %v8878_v16  ;;  %v9198_v18 = vunpack.c.h.bf16 %v9470_v58 }
 0x430   : > { %9498 = vst [vmem:[%s12066_s10 + $0x8] sm:$0xff] %v9315_v13   ;;  %v7853_v30 = vadd.f32 %v9189_v8, %v7661_v24  ;;  %v7662_v41 = vmul.f32 %v9534_v34, %v7365_v40  ;;  %7054 = vmatmul.mubr.bf16.gmra.mrb[116].mxu0 %v8886_v36  ;;  %5905 = vmatprep.mubr.bf16.mxu1 %v8895_v17  ;;  %v9471_v34 = vld [vmem:[%s12049_s7 + $0x28] sm:$0xff]  }
 0x431   : > { %7061 = vmatprep.mubr.bf16.mxu0 %v8903_v22  ;;  %v7385_v22 = vpop.permute.xlu1 %7384  ;;  %v9201_v48 = vunpack.c.l.bf16 %v9471_v34 }
 0x432   : > { %v7854_v54 = vadd.f32 %v9190_v27, %v7662_v41  ;;  %v5691_v43 = vpop.f32.mrb[12].mxu1  ;;  %v7917_v47 = vmax.f32 %v7853_v30, 0.0  ;;  %v7390_v27 = vpop.permute.xlu0 %7389 }
 0x433   : > { %v6847_v44 = vpop.f32.mrb[12].mxu0  ;;  %v5693_v0 = vpop.f32.mrb[13].mxu1 }
 0x434   : > { %v7918_v3 = vmax.f32 %v7854_v54, 0.0  ;;  %v9535_v60 = vadd.f32 %v6847_v44, %v5691_v43  ;;  %v6849_v6 = vpop.f32.mrb[13].mxu0  ;;  %v5694_v21 = vpop.f32.mrb[14].mxu1  ;;  %v9202_v43 = vunpack.c.h.bf16 %v9471_v34 }
 0x435   : > { %v6850_v4 = vpop.f32.mrb[14].mxu0  ;;  %v5696_v26 = vpop.f32.mrb[15].mxu1 }
 0x436   : > { %v9320_v29 = vpack.c.bf16 %v7918_v3, %v7917_v47  ;;  %v7663_v23 = vmul.f32 %v9535_v60, %v7370_v38  ;;  %v9536_v14 = vadd.f32 %v6850_v4, %v5694_v21  ;;  %v6852_v33 = vpop.f32.mrb[15].mxu0  ;;  %v7400_v47 = vpop.permute.xlu0 %7399 }
 0x437   : > { %5906 = vmatmul.mubr.bf16.gmra.mrb[120].mxu1 %v8894_v59 }
 0x438   : > { %9499 = vst [vmem:[%s12066_s10 + $0x10] sm:$0xff] %v9320_v29   ;;  %v7855_v35 = vadd.f32 %v9193_v63, %v7663_v23  ;;  %v7664_v37 = vmul.f32 %v9536_v14, %v7375_v62  ;;  %7062 = vmatmul.mubr.bf16.gmra.mrb[120].mxu0 %v8902_v2  ;;  %5913 = vmatprep.mubr.bf16.mxu1 %v8911_v25  ;;  %v7395_v63 = vpop.permute.xlu1 %7394  ;;  %v9472_v2 = vld [vmem:[%s12049_s7 + $0x30] sm:$0xff]  }
 0x439   : > { %7069 = vmatprep.mubr.bf16.mxu0 %v8919_v49  ;;  %v9205_v49 = vunpack.c.l.bf16 %v9472_v2 }
 0x43a   : > { %v7856_v55 = vadd.f32 %v9194_v32, %v7664_v37  ;;  %v5699_v56 = vpop.f32.mrb[16].mxu1  ;;  %v7919_v61 = vmax.f32 %v7855_v35, 0.0  ;;  %v9206_v37 = vunpack.c.h.bf16 %v9472_v2 }
 0x43b   : > { %v6855_v57 = vpop.f32.mrb[16].mxu0  ;;  %v5701_v20 = vpop.f32.mrb[17].mxu1 }
 0x43c   : > { %v7920_v8 = vmax.f32 %v7856_v55, 0.0  ;;  %v9537_v7 = vadd.f32 %v6855_v57, %v5699_v56  ;;  %v6857_v16 = vpop.f32.mrb[17].mxu0  ;;  %v5702_v36 = vpop.f32.mrb[18].mxu1  ;;  %v9473_v57 = vld [vmem:[%s12049_s7 + $0x38] sm:$0xff]  }
 0x43d   : > { %v6858_v10 = vpop.f32.mrb[18].mxu0  ;;  %v5704_v11 = vpop.f32.mrb[19].mxu1 }
 0x43e   : > { %v9325_v12 = vpack.c.bf16 %v7920_v8, %v7919_v61  ;;  %v7665_v15 = vmul.f32 %v9537_v7, %v7380_v50  ;;  %v9538_v17 = vadd.f32 %v6858_v10, %v5702_v36  ;;  %v6860_v31 = vpop.f32.mrb[19].mxu0  ;;  %v7405_v50 = vpop.permute.xlu1 %7404 }
 0x43f   : > { %5914 = vmatmul.mubr.bf16.gmra.mrb[124].mxu1 %v8910_v19 }
 0x440   : > { %9500 = vst [vmem:[%s12066_s10 + $0x18] sm:$0xff] %v9325_v12   ;;  %v7857_v13 = vadd.f32 %v9197_v5, %v7665_v15  ;;  %v7666_v24 = vmul.f32 %v9538_v17, %v7385_v22  ;;  %7070 = vmatmul.mubr.bf16.gmra.mrb[124].mxu0 %v8918_v9  ;;  %v7410_v5 = vpop.permute.xlu0 %7409  ;;  %v9209_v9 = vunpack.c.l.bf16 %v9473_v57  ;;  %v9210_v22 = vunpack.c.h.bf16 %v9473_v57 }
 0x442   : > { %v7858_v39 = vadd.f32 %v9198_v18, %v7666_v24  ;;  %v5707_v40 = vpop.f32.mrb[20].mxu1  ;;  %v7921_v28 = vmax.f32 %v7857_v13, 0.0  ;;  %v7415_v24 = vpop.permute.xlu1 %7414 }
 0x443   : > { %v6863_v30 = vpop.f32.mrb[20].mxu0  ;;  %v5709_v41 = vpop.f32.mrb[21].mxu1 }
 0x444   : > { %v7922_v42 = vmax.f32 %v7858_v39, 0.0  ;;  %v9539_v45 = vadd.f32 %v6863_v30, %v5707_v40  ;;  %v6865_v51 = vpop.f32.mrb[21].mxu0  ;;  %v5710_v52 = vpop.f32.mrb[22].mxu1  ;;  %v9474_v39 = vld [vmem:[%s12049_s7 + $0x40] sm:$0xff]  }
 0x445   : > { %v6866_v46 = vpop.f32.mrb[22].mxu0  ;;  %v5712_v53 = vpop.f32.mrb[23].mxu1 }
 0x446   : > { %v9330_v1 = vpack.c.bf16 %v7922_v42, %v7921_v28  ;;  %v7667_v38 = vmul.f32 %v9539_v45, %v7390_v27  ;;  %v9540_v54 = vadd.f32 %v6866_v46, %v5710_v52  ;;  %v6868_v44 = vpop.f32.mrb[23].mxu0  ;;  %v7420_v40 = vpop.permute.xlu0 %7419  ;;  %v9213_v52 = vunpack.c.l.bf16 %v9474_v39 }
 0x448   : > { %9501 = vst [vmem:[%s12066_s10 + $0x20] sm:$0xff] %v9330_v1   ;;  %v7859_v0 = vadd.f32 %v9201_v48, %v7667_v38  ;;  %v7668_v59 = vmul.f32 %v9540_v54, %v7395_v63  ;;  %v9214_v63 = vunpack.c.h.bf16 %v9474_v39 }
 0x44a   : > { %v7860_v3 = vadd.f32 %v9202_v43, %v7668_v59  ;;  %v5715_v60 = vpop.f32.mrb[24].mxu1  ;;  %v7923_v25 = vmax.f32 %v7859_v0, 0.0  ;;  %v7425_v59 = vpop.permute.xlu1 %7424 }
 0x44b   : > { %v6871_v6 = vpop.f32.mrb[24].mxu0  ;;  %v5717_v21 = vpop.f32.mrb[25].mxu1 }
 0x44c   : > { %v7924_v4 = vmax.f32 %v7860_v3, 0.0  ;;  %v9541_v26 = vadd.f32 %v6871_v6, %v5715_v60  ;;  %v6873_v29 = vpop.f32.mrb[25].mxu0  ;;  %v5718_v23 = vpop.f32.mrb[26].mxu1  ;;  %v9475_v3 = vld [vmem:[%s12049_s7 + $0x48] sm:$0xff]  }
 0x44d   : > { %v6874_v14 = vpop.f32.mrb[26].mxu0  ;;  %v5720_v32 = vpop.f32.mrb[27].mxu1 }
 0x44e   : > { %v9335_v33 = vpack.c.bf16 %v7924_v4, %v7923_v25  ;;  %v7669_v62 = vmul.f32 %v9541_v26, %v7400_v47  ;;  %v9542_v35 = vadd.f32 %v6874_v14, %v5718_v23  ;;  %v6876_v58 = vpop.f32.mrb[27].mxu0  ;;  %v7430_v60 = vpop.permute.xlu0 %7429  ;;  %v9217_v23 = vunpack.c.l.bf16 %v9475_v3 }
 0x450   : > { %9502 = vst [vmem:[%s12066_s10 + $0x28] sm:$0xff] %v9335_v33   ;;  %v7861_v55 = vadd.f32 %v9205_v49, %v7669_v62  ;;  %v7670_v56 = vmul.f32 %v9542_v35, %v7405_v50  ;;  %v9218_v50 = vunpack.c.h.bf16 %v9475_v3 }
 0x452   : > { %v7862_v20 = vadd.f32 %v9206_v37, %v7670_v56  ;;  %v5723_v19 = vpop.f32.mrb[28].mxu1  ;;  %v7925_v7 = vmax.f32 %v7861_v55, 0.0  ;;  %v7435_v56 = vpop.permute.xlu1 %7434 }
 0x453   : > { %v6879_v61 = vpop.f32.mrb[28].mxu0  ;;  %v5725_v8 = vpop.f32.mrb[29].mxu1 }
 0x454   : > { %v7926_v16 = vmax.f32 %v7862_v20, 0.0  ;;  %v9543_v36 = vadd.f32 %v6879_v61, %v5723_v19  ;;  %v6881_v10 = vpop.f32.mrb[29].mxu0  ;;  %v5726_v11 = vpop.f32.mrb[30].mxu1  ;;  %v9476_v20 = vld [vmem:[%s12049_s7 + $0x50] sm:$0xff]  }
 0x455   : > { %v6882_v12 = vpop.f32.mrb[30].mxu0  ;;  %v5728_v15 = vpop.f32.mrb[31].mxu1 }
 0x456   : > { %v9340_v17 = vpack.c.bf16 %v7926_v16, %v7925_v7  ;;  %v7671_v18 = vmul.f32 %v9543_v36, %v7410_v5  ;;  %v9544_v31 = vadd.f32 %v6882_v12, %v5726_v11  ;;  %v6884_v13 = vpop.f32.mrb[31].mxu0  ;;  %v7440_v19 = vpop.permute.xlu0 %7439  ;;  %v9221_v11 = vunpack.c.l.bf16 %v9476_v20 }
 0x458   : > { %9503 = vst [vmem:[%s12066_s10 + $0x30] sm:$0xff] %v9340_v17   ;;  %v7863_v34 = vadd.f32 %v9209_v9, %v7671_v18  ;;  %v7672_v27 = vmul.f32 %v9544_v31, %v7415_v24  ;;  %v9222_v24 = vunpack.c.h.bf16 %v9476_v20 }
 0x45a   : > { %v7864_v30 = vadd.f32 %v9210_v22, %v7672_v27  ;;  %v5731_v41 = vpop.f32.mrb[32].mxu1  ;;  %v7927_v45 = vmax.f32 %v7863_v34, 0.0  ;;  %v7445_v27 = vpop.permute.xlu1 %7444 }
 0x45b   : > { %v6887_v28 = vpop.f32.mrb[32].mxu0  ;;  %v5733_v42 = vpop.f32.mrb[33].mxu1 }
 0x45c   : > { %v7928_v48 = vmax.f32 %v7864_v30, 0.0  ;;  %v9545_v51 = vadd.f32 %v6887_v28, %v5731_v41  ;;  %v6889_v46 = vpop.f32.mrb[33].mxu0  ;;  %v5734_v53 = vpop.f32.mrb[34].mxu1  ;;  %v9477_v30 = vld [vmem:[%s12049_s7 + $0x58] sm:$0xff]  }
 0x45d   : > { %v6890_v1 = vpop.f32.mrb[34].mxu0  ;;  %v5736_v38 = vpop.f32.mrb[35].mxu1 }
 0x45e   : > { %v9345_v54 = vpack.c.bf16 %v7928_v48, %v7927_v45  ;;  %v7673_v43 = vmul.f32 %v9545_v51, %v7420_v40  ;;  %v9546_v44 = vadd.f32 %v6890_v1, %v5734_v53  ;;  %v6892_v0 = vpop.f32.mrb[35].mxu0  ;;  %v7450_v41 = vpop.permute.xlu0 %7449  ;;  %v9225_v53 = vunpack.c.l.bf16 %v9477_v30 }
 0x460   : > { %9504 = vst [vmem:[%s12066_s10 + $0x38] sm:$0xff] %v9345_v54   ;;  %v7865_v2 = vadd.f32 %v9213_v52, %v7673_v43  ;;  %v7674_v47 = vmul.f32 %v9546_v44, %v7425_v59  ;;  %v9226_v59 = vunpack.c.h.bf16 %v9477_v30 }
 0x462   : > { %v7866_v6 = vadd.f32 %v9214_v63, %v7674_v47  ;;  %v5739_v21 = vpop.f32.mrb[36].mxu1  ;;  %v7929_v26 = vmax.f32 %v7865_v2, 0.0  ;;  %v7455_v47 = vpop.permute.xlu1 %7454 }
 0x463   : > { %v6895_v25 = vpop.f32.mrb[36].mxu0  ;;  %v5741_v4 = vpop.f32.mrb[37].mxu1 }
 0x464   : > { %v7930_v49 = vmax.f32 %v7866_v6, 0.0  ;;  %v9547_v29 = vadd.f32 %v6895_v25, %v5739_v21  ;;  %v6897_v14 = vpop.f32.mrb[37].mxu0  ;;  %v5742_v32 = vpop.f32.mrb[38].mxu1  ;;  %v9478_v6 = vld [vmem:[%s12049_s7 + $0x60] sm:$0xff]  }
 0x465   : > { %v6898_v33 = vpop.f32.mrb[38].mxu0  ;;  %v5744_v62 = vpop.f32.mrb[39].mxu1 }
 0x466   : > { %v9350_v35 = vpack.c.bf16 %v7930_v49, %v7929_v26  ;;  %v7675_v37 = vmul.f32 %v9547_v29, %v7430_v60  ;;  %v9548_v58 = vadd.f32 %v6898_v33, %v5742_v32  ;;  %v6900_v55 = vpop.f32.mrb[39].mxu0  ;;  %v7460_v21 = vpop.permute.xlu0 %7459  ;;  %v9229_v32 = vunpack.c.l.bf16 %v9478_v6 }
 0x468   : > { %9505 = vst [vmem:[%s12066_s10 + $0x40] sm:$0xff] %v9350_v35   ;;  %v7867_v57 = vadd.f32 %v9217_v23, %v7675_v37  ;;  %v7676_v5 = vmul.f32 %v9548_v58, %v7435_v56  ;;  %v9230_v56 = vunpack.c.h.bf16 %v9478_v6 }
 0x46a   : > { %v7868_v61 = vadd.f32 %v9218_v50, %v7676_v5  ;;  %v5747_v8 = vpop.f32.mrb[40].mxu1  ;;  %v7931_v36 = vmax.f32 %v7867_v57, 0.0  ;;  %v7465_v5 = vpop.permute.xlu1 %7464 }
 0x46b   : > { %v6903_v7 = vpop.f32.mrb[40].mxu0  ;;  %v5749_v16 = vpop.f32.mrb[41].mxu1 }
 0x46c   : > { %v7932_v9 = vmax.f32 %v7868_v61, 0.0  ;;  %v9549_v10 = vadd.f32 %v6903_v7, %v5747_v8  ;;  %v6905_v12 = vpop.f32.mrb[41].mxu0  ;;  %v5750_v15 = vpop.f32.mrb[42].mxu1  ;;  %v9479_v61 = vld [vmem:[%s12049_s7 + $0x68] sm:$0xff]  }
 0x46d   : > { %v6906_v17 = vpop.f32.mrb[42].mxu0  ;;  %v5752_v18 = vpop.f32.mrb[43].mxu1 }
 0x46e   : > { %v9355_v31 = vpack.c.bf16 %v7932_v9, %v7931_v36  ;;  %v7677_v22 = vmul.f32 %v9549_v10, %v7440_v19  ;;  %v9550_v13 = vadd.f32 %v6906_v17, %v5750_v15  ;;  %v6908_v34 = vpop.f32.mrb[43].mxu0  ;;  %v7470_v8 = vpop.permute.xlu0 %7469  ;;  %v9233_v15 = vunpack.c.l.bf16 %v9479_v61 }
 0x470   : > { %9506 = vst [vmem:[%s12066_s10 + $0x48] sm:$0xff] %v9355_v31   ;;  %v7869_v39 = vadd.f32 %v9221_v11, %v7677_v22  ;;  %v7678_v40 = vmul.f32 %v9550_v13, %v7445_v27  ;;  %v9234_v27 = vunpack.c.h.bf16 %v9479_v61 }
 0x472   : > { %v7870_v28 = vadd.f32 %v9222_v24, %v7678_v40  ;;  %v5755_v42 = vpop.f32.mrb[44].mxu1  ;;  %v7933_v51 = vmax.f32 %v7869_v39, 0.0  ;;  %v7475_v40 = vpop.permute.xlu1 %7474 }
 0x473   : > { %v6911_v45 = vpop.f32.mrb[44].mxu0  ;;  %v5757_v48 = vpop.f32.mrb[45].mxu1 }
 0x474   : > { %v7934_v52 = vmax.f32 %v7870_v28, 0.0  ;;  %v9551_v46 = vadd.f32 %v6911_v45, %v5755_v42  ;;  %v6913_v1 = vpop.f32.mrb[45].mxu0  ;;  %v5758_v38 = vpop.f32.mrb[46].mxu1  ;;  %v9480_v28 = vld [vmem:[%s12049_s7 + $0x70] sm:$0xff]  }
 0x475   : > { %v6914_v54 = vpop.f32.mrb[46].mxu0  ;;  %v5760_v43 = vpop.f32.mrb[47].mxu1 }
 0x476   : > { %v9360_v44 = vpack.c.bf16 %v7934_v52, %v7933_v51  ;;  %v7679_v63 = vmul.f32 %v9551_v46, %v7450_v41  ;;  %v9552_v0 = vadd.f32 %v6914_v54, %v5758_v38  ;;  %v6916_v2 = vpop.f32.mrb[47].mxu0  ;;  %v7480_v42 = vpop.permute.xlu0 %7479  ;;  %v9237_v38 = vunpack.c.l.bf16 %v9480_v28 }
 0x478   : > { %9507 = vst [vmem:[%s12066_s10 + $0x50] sm:$0xff] %v9360_v44   ;;  %v7871_v3 = vadd.f32 %v9225_v53, %v7679_v63  ;;  %v7680_v60 = vmul.f32 %v9552_v0, %v7455_v47  ;;  %v9238_v47 = vunpack.c.h.bf16 %v9480_v28 }
 0x47a   : > { %v7872_v25 = vadd.f32 %v9226_v59, %v7680_v60  ;;  %v5763_v4 = vpop.f32.mrb[48].mxu1  ;;  %v7935_v29 = vmax.f32 %v7871_v3, 0.0  ;;  %v7485_v60 = vpop.permute.xlu1 %7484 }
 0x47b   : > { %v6919_v26 = vpop.f32.mrb[48].mxu0  ;;  %v5765_v49 = vpop.f32.mrb[49].mxu1 }
 0x47c   : > { %v7936_v23 = vmax.f32 %v7872_v25, 0.0  ;;  %v9553_v14 = vadd.f32 %v6919_v26, %v5763_v4  ;;  %v6921_v33 = vpop.f32.mrb[49].mxu0  ;;  %v5766_v62 = vpop.f32.mrb[50].mxu1  ;;  %v9481_v25 = vld [vmem:[%s12049_s7 + $0x78] sm:$0xff]  }
 0x47d   : > { %v6922_v35 = vpop.f32.mrb[50].mxu0  ;;  %v5768_v37 = vpop.f32.mrb[51].mxu1 }
 0x47e   : > { %v9365_v58 = vpack.c.bf16 %v7936_v23, %v7935_v29  ;;  %v7681_v50 = vmul.f32 %v9553_v14, %v7460_v21  ;;  %v9554_v55 = vadd.f32 %v6922_v35, %v5766_v62  ;;  %v6924_v57 = vpop.f32.mrb[51].mxu0  ;;  %v7490_v4 = vpop.permute.xlu0 %7489  ;;  %v9241_v62 = vunpack.c.l.bf16 %v9481_v25 }
 0x480   : > { %9508 = vst [vmem:[%s12066_s10 + $0x58] sm:$0xff] %v9365_v58   ;;  %v7873_v20 = vadd.f32 %v9229_v32, %v7681_v50  ;;  %v7682_v19 = vmul.f32 %v9554_v55, %v7465_v5  ;;  %v9242_v5 = vunpack.c.h.bf16 %v9481_v25 }
 0x482   : > { %v7874_v7 = vadd.f32 %v9230_v56, %v7682_v19  ;;  %v5771_v16 = vpop.f32.mrb[52].mxu1  ;;  %v7937_v10 = vmax.f32 %v7873_v20, 0.0  ;;  %v7495_v19 = vpop.permute.xlu1 %7494 }
 0x483   : > { %v6927_v36 = vpop.f32.mrb[52].mxu0  ;;  %v5773_v9 = vpop.f32.mrb[53].mxu1 }
 0x484   : > { %v7938_v11 = vmax.f32 %v7874_v7, 0.0  ;;  %v9555_v12 = vadd.f32 %v6927_v36, %v5771_v16  ;;  %v6929_v17 = vpop.f32.mrb[53].mxu0  ;;  %v5774_v18 = vpop.f32.mrb[54].mxu1  ;;  %v9482_v7 = vld [vmem:[%s12049_s7 + $0x80] sm:$0xff]  }
 0x485   : > { %v6930_v31 = vpop.f32.mrb[54].mxu0  ;;  %v5776_v22 = vpop.f32.mrb[55].mxu1 }
 0x486   : > { %v9370_v13 = vpack.c.bf16 %v7938_v11, %v7937_v10  ;;  %v7683_v24 = vmul.f32 %v9555_v12, %v7470_v8  ;;  %v9556_v34 = vadd.f32 %v6930_v31, %v5774_v18  ;;  %v6932_v39 = vpop.f32.mrb[55].mxu0  ;;  %v7500_v16 = vpop.permute.xlu0 %7499  ;;  %v9245_v18 = vunpack.c.l.bf16 %v9482_v7 }
 0x488   : > { %9509 = vst [vmem:[%s12066_s10 + $0x60] sm:$0xff] %v9370_v13   ;;  %v7875_v30 = vadd.f32 %v9233_v15, %v7683_v24  ;;  %v7684_v41 = vmul.f32 %v9556_v34, %v7475_v40  ;;  %v9246_v40 = vunpack.c.h.bf16 %v9482_v7 }
 0x48a   : > { %v7876_v45 = vadd.f32 %v9234_v27, %v7684_v41  ;;  %v5779_v48 = vpop.f32.mrb[56].mxu1  ;;  %v7939_v46 = vmax.f32 %v7875_v30, 0.0  ;;  %v7505_v41 = vpop.permute.xlu1 %7504 }
 0x48b   : > { %v6935_v51 = vpop.f32.mrb[56].mxu0  ;;  %v5781_v52 = vpop.f32.mrb[57].mxu1 }
 0x48c   : > { %v7940_v53 = vmax.f32 %v7876_v45, 0.0  ;;  %v9557_v1 = vadd.f32 %v6935_v51, %v5779_v48  ;;  %v6937_v54 = vpop.f32.mrb[57].mxu0  ;;  %v5782_v43 = vpop.f32.mrb[58].mxu1  ;;  %v9483_v45 = vld [vmem:[%s12049_s7 + $0x88] sm:$0xff]  }
 0x48d   : > { %v6938_v44 = vpop.f32.mrb[58].mxu0  ;;  %v5784_v63 = vpop.f32.mrb[59].mxu1 }
 0x48e   : > { %v9375_v0 = vpack.c.bf16 %v7940_v53, %v7939_v46  ;;  %v7685_v59 = vmul.f32 %v9557_v1, %v7480_v42  ;;  %v9558_v2 = vadd.f32 %v6938_v44, %v5782_v43  ;;  %v6940_v3 = vpop.f32.mrb[59].mxu0  ;;  %v7510_v48 = vpop.permute.xlu0 %7509  ;;  %v9249_v43 = vunpack.c.l.bf16 %v9483_v45 }
 0x490   : > { %9510 = vst [vmem:[%s12066_s10 + $0x68] sm:$0xff] %v9375_v0   ;;  %v7877_v6 = vadd.f32 %v9237_v38, %v7685_v59  ;;  %v7686_v21 = vmul.f32 %v9558_v2, %v7485_v60  ;;  %v9250_v60 = vunpack.c.h.bf16 %v9483_v45 }
 0x492   : > { %v7878_v26 = vadd.f32 %v9238_v47, %v7686_v21  ;;  %v5787_v49 = vpop.f32.mrb[60].mxu1  ;;  %v7941_v14 = vmax.f32 %v7877_v6, 0.0  ;;  %v7515_v21 = vpop.permute.xlu1 %7514 }
 0x493   : > { %v6943_v29 = vpop.f32.mrb[60].mxu0  ;;  %v5789_v23 = vpop.f32.mrb[61].mxu1 }
 0x494   : > { %v7942_v32 = vmax.f32 %v7878_v26, 0.0  ;;  %v9559_v33 = vadd.f32 %v6943_v29, %v5787_v49  ;;  %v6945_v35 = vpop.f32.mrb[61].mxu0  ;;  %v5790_v37 = vpop.f32.mrb[62].mxu1  ;;  %v9484_v26 = vld [vmem:[%s12049_s7 + $0x90] sm:$0xff]  }
 0x495   : > { %v6946_v58 = vpop.f32.mrb[62].mxu0  ;;  %v5792_v50 = vpop.f32.mrb[63].mxu1 }
 0x496   : > { %v9380_v55 = vpack.c.bf16 %v7942_v32, %v7941_v14  ;;  %v7687_v56 = vmul.f32 %v9559_v33, %v7490_v4  ;;  %v9560_v57 = vadd.f32 %v6946_v58, %v5790_v37  ;;  %v6948_v20 = vpop.f32.mrb[63].mxu0  ;;  %v7520_v49 = vpop.permute.xlu0 %7519  ;;  %v9253_v37 = vunpack.c.l.bf16 %v9484_v26 }
 0x498   : > { %9511 = vst [vmem:[%s12066_s10 + $0x70] sm:$0xff] %v9380_v55   ;;  %v7879_v61 = vadd.f32 %v9241_v62, %v7687_v56  ;;  %v7688_v8 = vmul.f32 %v9560_v57, %v7495_v19  ;;  %v9254_v19 = vunpack.c.h.bf16 %v9484_v26 }
 0x49a   : > { %v7880_v36 = vadd.f32 %v9242_v5, %v7688_v8  ;;  %v5795_v9 = vpop.f32.mrb[64].mxu1  ;;  %v7943_v12 = vmax.f32 %v7879_v61, 0.0  ;;  %v7525_v8 = vpop.permute.xlu1 %7524 }
 0x49b   : > { %v6951_v10 = vpop.f32.mrb[64].mxu0  ;;  %v5797_v11 = vpop.f32.mrb[65].mxu1 }
 0x49c   : > { %v7944_v15 = vmax.f32 %v7880_v36, 0.0  ;;  %v9561_v17 = vadd.f32 %v6951_v10, %v5795_v9  ;;  %v6953_v31 = vpop.f32.mrb[65].mxu0  ;;  %v5798_v22 = vpop.f32.mrb[66].mxu1  ;;  %v9485_v36 = vld [vmem:[%s12049_s7 + $0x98] sm:$0xff]  }
 0x49d   : > { %v6954_v13 = vpop.f32.mrb[66].mxu0  ;;  %v5800_v24 = vpop.f32.mrb[67].mxu1 }
 0x49e   : > { %v9385_v34 = vpack.c.bf16 %v7944_v15, %v7943_v12  ;;  %v7689_v27 = vmul.f32 %v9561_v17, %v7500_v16  ;;  %v9562_v39 = vadd.f32 %v6954_v13, %v5798_v22  ;;  %v6956_v30 = vpop.f32.mrb[67].mxu0  ;;  %v7530_v9 = vpop.permute.xlu0 %7529  ;;  %v9257_v22 = vunpack.c.l.bf16 %v9485_v36 }
 0x4a0   : > { %9512 = vst [vmem:[%s12066_s10 + $0x78] sm:$0xff] %v9385_v34   ;;  %v7881_v28 = vadd.f32 %v9245_v18, %v7689_v27  ;;  %v7690_v42 = vmul.f32 %v9562_v39, %v7505_v41  ;;  %v9258_v41 = vunpack.c.h.bf16 %v9485_v36 }
 0x4a2   : > { %v7882_v51 = vadd.f32 %v9246_v40, %v7690_v42  ;;  %v5803_v52 = vpop.f32.mrb[68].mxu1  ;;  %v7945_v1 = vmax.f32 %v7881_v28, 0.0  ;;  %v7535_v42 = vpop.permute.xlu1 %7534 }
 0x4a3   : > { %v6959_v46 = vpop.f32.mrb[68].mxu0  ;;  %v5805_v53 = vpop.f32.mrb[69].mxu1 }
 0x4a4   : > { %v7946_v38 = vmax.f32 %v7882_v51, 0.0  ;;  %v9563_v54 = vadd.f32 %v6959_v46, %v5803_v52  ;;  %v6961_v44 = vpop.f32.mrb[69].mxu0  ;;  %v5806_v63 = vpop.f32.mrb[70].mxu1  ;;  %v9486_v51 = vld [vmem:[%s12049_s7 + $0xa0] sm:$0xff]  }
 0x4a5   : > { %v6962_v0 = vpop.f32.mrb[70].mxu0  ;;  %v5808_v59 = vpop.f32.mrb[71].mxu1 }
 0x4a6   : > { %v9390_v2 = vpack.c.bf16 %v7946_v38, %v7945_v1  ;;  %v7691_v47 = vmul.f32 %v9563_v54, %v7510_v48  ;;  %v9564_v3 = vadd.f32 %v6962_v0, %v5806_v63  ;;  %v6964_v6 = vpop.f32.mrb[71].mxu0  ;;  %v7540_v52 = vpop.permute.xlu0 %7539  ;;  %v9261_v63 = vunpack.c.l.bf16 %v9486_v51 }
 0x4a8   : > { %9513 = vst [vmem:[%s12066_s10 + $0x80] sm:$0xff] %v9390_v2   ;;  %v7883_v25 = vadd.f32 %v9249_v43, %v7691_v47  ;;  %v7692_v4 = vmul.f32 %v9564_v3, %v7515_v21  ;;  %v9262_v21 = vunpack.c.h.bf16 %v9486_v51 }
 0x4aa   : > { %v7884_v29 = vadd.f32 %v9250_v60, %v7692_v4  ;;  %v5811_v23 = vpop.f32.mrb[72].mxu1  ;;  %v7947_v33 = vmax.f32 %v7883_v25, 0.0  ;;  %v7545_v4 = vpop.permute.xlu1 %7544 }
 0x4ab   : > { %v6967_v14 = vpop.f32.mrb[72].mxu0  ;;  %v5813_v32 = vpop.f32.mrb[73].mxu1 }
 0x4ac   : > { %v7948_v62 = vmax.f32 %v7884_v29, 0.0  ;;  %v9565_v35 = vadd.f32 %v6967_v14, %v5811_v23  ;;  %v6969_v58 = vpop.f32.mrb[73].mxu0  ;;  %v5814_v50 = vpop.f32.mrb[74].mxu1  ;;  %v9487_v29 = vld [vmem:[%s12049_s7 + $0xa8] sm:$0xff]  }
 0x4ad   : > { %v6970_v55 = vpop.f32.mrb[74].mxu0  ;;  %v5816_v56 = vpop.f32.mrb[75].mxu1 }
 0x4ae   : > { %v9395_v57 = vpack.c.bf16 %v7948_v62, %v7947_v33  ;;  %v7693_v5 = vmul.f32 %v9565_v35, %v7520_v49  ;;  %v9566_v20 = vadd.f32 %v6970_v55, %v5814_v50  ;;  %v6972_v61 = vpop.f32.mrb[75].mxu0  ;;  %v7550_v23 = vpop.permute.xlu0 %7549  ;;  %v9265_v50 = vunpack.c.l.bf16 %v9487_v29 }
 0x4b0   : > { %9514 = vst [vmem:[%s12066_s10 + $0x88] sm:$0xff] %v9395_v57   ;;  %v7885_v7 = vadd.f32 %v9253_v37, %v7693_v5  ;;  %v7694_v16 = vmul.f32 %v9566_v20, %v7525_v8  ;;  %v9266_v8 = vunpack.c.h.bf16 %v9487_v29 }
 0x4b2   : > { %v7886_v10 = vadd.f32 %v9254_v19, %v7694_v16  ;;  %v5819_v11 = vpop.f32.mrb[76].mxu1  ;;  %v7949_v17 = vmax.f32 %v7885_v7, 0.0  ;;  %v7555_v16 = vpop.permute.xlu1 %7554 }
 0x4b3   : > { %v6975_v12 = vpop.f32.mrb[76].mxu0  ;;  %v5821_v15 = vpop.f32.mrb[77].mxu1 }
 0x4b4   : > { %v7950_v18 = vmax.f32 %v7886_v10, 0.0  ;;  %v9567_v31 = vadd.f32 %v6975_v12, %v5819_v11  ;;  %v6977_v13 = vpop.f32.mrb[77].mxu0  ;;  %v5822_v24 = vpop.f32.mrb[78].mxu1  ;;  %v9488_v10 = vld [vmem:[%s12049_s7 + $0xb0] sm:$0xff]  }
 0x4b5   : > { %v6978_v34 = vpop.f32.mrb[78].mxu0  ;;  %v5824_v27 = vpop.f32.mrb[79].mxu1 }
 0x4b6   : > { %v9400_v39 = vpack.c.bf16 %v7950_v18, %v7949_v17  ;;  %v7695_v40 = vmul.f32 %v9567_v31, %v7530_v9  ;;  %v9568_v30 = vadd.f32 %v6978_v34, %v5822_v24  ;;  %v6980_v28 = vpop.f32.mrb[79].mxu0  ;;  %v7560_v11 = vpop.permute.xlu0 %7559  ;;  %v9269_v24 = vunpack.c.l.bf16 %v9488_v10 }
 0x4b8   : > { %9515 = vst [vmem:[%s12066_s10 + $0x90] sm:$0xff] %v9400_v39   ;;  %v7887_v45 = vadd.f32 %v9257_v22, %v7695_v40  ;;  %v7696_v48 = vmul.f32 %v9568_v30, %v7535_v42  ;;  %v9270_v42 = vunpack.c.h.bf16 %v9488_v10 }
 0x4ba   : > { %v7888_v46 = vadd.f32 %v9258_v41, %v7696_v48  ;;  %v5827_v53 = vpop.f32.mrb[80].mxu1  ;;  %v7951_v54 = vmax.f32 %v7887_v45, 0.0  ;;  %v7565_v48 = vpop.permute.xlu1 %7564 }
 0x4bb   : > { %v6983_v1 = vpop.f32.mrb[80].mxu0  ;;  %v5829_v38 = vpop.f32.mrb[81].mxu1 }
 0x4bc   : > { %v7952_v43 = vmax.f32 %v7888_v46, 0.0  ;;  %v9569_v44 = vadd.f32 %v6983_v1, %v5827_v53  ;;  %v6985_v0 = vpop.f32.mrb[81].mxu0  ;;  %v5830_v59 = vpop.f32.mrb[82].mxu1  ;;  %v9489_v46 = vld [vmem:[%s12049_s7 + $0xb8] sm:$0xff]  }
 0x4bd   : > { %v6986_v2 = vpop.f32.mrb[82].mxu0  ;;  %v5832_v47 = vpop.f32.mrb[83].mxu1 }
 0x4be   : > { %v9405_v3 = vpack.c.bf16 %v7952_v43, %v7951_v54  ;;  %v7697_v60 = vmul.f32 %v9569_v44, %v7540_v52  ;;  %v9570_v6 = vadd.f32 %v6986_v2, %v5830_v59  ;;  %v6988_v25 = vpop.f32.mrb[83].mxu0  ;;  %v7570_v53 = vpop.permute.xlu0 %7569  ;;  %v9273_v59 = vunpack.c.l.bf16 %v9489_v46 }
 0x4c0   : > { %9516 = vst [vmem:[%s12066_s10 + $0x98] sm:$0xff] %v9405_v3   ;;  %v7889_v26 = vadd.f32 %v9261_v63, %v7697_v60  ;;  %v7698_v49 = vmul.f32 %v9570_v6, %v7545_v4  ;;  %v9274_v4 = vunpack.c.h.bf16 %v9489_v46 }
 0x4c2   : > { %v7890_v14 = vadd.f32 %v9262_v21, %v7698_v49  ;;  %v5835_v32 = vpop.f32.mrb[84].mxu1  ;;  %v7953_v35 = vmax.f32 %v7889_v26, 0.0  ;;  %v7575_v49 = vpop.permute.xlu1 %7574 }
 0x4c3   : > { %v6991_v33 = vpop.f32.mrb[84].mxu0  ;;  %v5837_v62 = vpop.f32.mrb[85].mxu1 }
 0x4c4   : > { %v7954_v37 = vmax.f32 %v7890_v14, 0.0  ;;  %v9571_v58 = vadd.f32 %v6991_v33, %v5835_v32  ;;  %v6993_v55 = vpop.f32.mrb[85].mxu0  ;;  %v5838_v56 = vpop.f32.mrb[86].mxu1  ;;  %v9490_v14 = vld [vmem:[%s12049_s7 + $0xc0] sm:$0xff]  }
 0x4c5   : > { %v6994_v57 = vpop.f32.mrb[86].mxu0  ;;  %v5840_v5 = vpop.f32.mrb[87].mxu1 }
 0x4c6   : > { %v9410_v20 = vpack.c.bf16 %v7954_v37, %v7953_v35  ;;  %v7699_v19 = vmul.f32 %v9571_v58, %v7550_v23  ;;  %v9572_v61 = vadd.f32 %v6994_v57, %v5838_v56  ;;  %v6996_v7 = vpop.f32.mrb[87].mxu0  ;;  %v7580_v32 = vpop.permute.xlu0 %7579  ;;  %v9277_v56 = vunpack.c.l.bf16 %v9490_v14 }
 0x4c8   : > { %9517 = vst [vmem:[%s12066_s10 + $0xa0] sm:$0xff] %v9410_v20   ;;  %v7891_v36 = vadd.f32 %v9265_v50, %v7699_v19  ;;  %v7700_v9 = vmul.f32 %v9572_v61, %v7555_v16  ;;  %v9278_v16 = vunpack.c.h.bf16 %v9490_v14 }
 0x4ca   : > { %v7892_v12 = vadd.f32 %v9266_v8, %v7700_v9  ;;  %v5843_v15 = vpop.f32.mrb[88].mxu1  ;;  %v7955_v31 = vmax.f32 %v7891_v36, 0.0  ;;  %v7585_v9 = vpop.permute.xlu1 %7584 }
 0x4cb   : > { %v6999_v17 = vpop.f32.mrb[88].mxu0  ;;  %v5845_v18 = vpop.f32.mrb[89].mxu1 }
 0x4cc   : > { %v7956_v22 = vmax.f32 %v7892_v12, 0.0  ;;  %v9573_v13 = vadd.f32 %v6999_v17, %v5843_v15  ;;  %v7001_v34 = vpop.f32.mrb[89].mxu0  ;;  %v5846_v27 = vpop.f32.mrb[90].mxu1  ;;  %v9491_v12 = vld [vmem:[%s12049_s7 + $0xc8] sm:$0xff]  }
 0x4cd   : > { %v7002_v39 = vpop.f32.mrb[90].mxu0  ;;  %v5848_v40 = vpop.f32.mrb[91].mxu1 }
 0x4ce   : > { %v9415_v30 = vpack.c.bf16 %v7956_v22, %v7955_v31  ;;  %v7701_v41 = vmul.f32 %v9573_v13, %v7560_v11  ;;  %v9574_v28 = vadd.f32 %v7002_v39, %v5846_v27  ;;  %v7004_v45 = vpop.f32.mrb[91].mxu0  ;;  %v7590_v15 = vpop.permute.xlu0 %7589  ;;  %v9281_v27 = vunpack.c.l.bf16 %v9491_v12 }
 0x4d0   : > { %9518 = vst [vmem:[%s12066_s10 + $0xa8] sm:$0xff] %v9415_v30   ;;  %v7893_v51 = vadd.f32 %v9269_v24, %v7701_v41  ;;  %v7702_v52 = vmul.f32 %v9574_v28, %v7565_v48  ;;  %v9282_v48 = vunpack.c.h.bf16 %v9491_v12 }
 0x4d2   : > { %v7894_v1 = vadd.f32 %v9270_v42, %v7702_v52  ;;  %v5851_v38 = vpop.f32.mrb[92].mxu1  ;;  %v7957_v44 = vmax.f32 %v7893_v51, 0.0  ;;  %v7595_v52 = vpop.permute.xlu1 %7594 }
 0x4d3   : > { %v7007_v54 = vpop.f32.mrb[92].mxu0  ;;  %v5853_v43 = vpop.f32.mrb[93].mxu1 }
 0x4d4   : > { %v7958_v63 = vmax.f32 %v7894_v1, 0.0  ;;  %v9575_v0 = vadd.f32 %v7007_v54, %v5851_v38  ;;  %v7009_v2 = vpop.f32.mrb[93].mxu0  ;;  %v5854_v47 = vpop.f32.mrb[94].mxu1  ;;  %v9492_v1 = vld [vmem:[%s12049_s7 + $0xd0] sm:$0xff]  }
 0x4d5   : > { %v7010_v3 = vpop.f32.mrb[94].mxu0  ;;  %v5856_v60 = vpop.f32.mrb[95].mxu1 }
 0x4d6   : > { %v9420_v6 = vpack.c.bf16 %v7958_v63, %v7957_v44  ;;  %v7703_v21 = vmul.f32 %v9575_v0, %v7570_v53  ;;  %v9576_v25 = vadd.f32 %v7010_v3, %v5854_v47  ;;  %v7012_v26 = vpop.f32.mrb[95].mxu0  ;;  %v7600_v38 = vpop.permute.xlu0 %7599  ;;  %v9285_v47 = vunpack.c.l.bf16 %v9492_v1 }
 0x4d8   : > { %9519 = vst [vmem:[%s12066_s10 + $0xb0] sm:$0xff] %v9420_v6   ;;  %v7895_v29 = vadd.f32 %v9273_v59, %v7703_v21  ;;  %v7704_v23 = vmul.f32 %v9576_v25, %v7575_v49  ;;  %v9286_v49 = vunpack.c.h.bf16 %v9492_v1 }
 0x4da   : > { %v7896_v33 = vadd.f32 %v9274_v4, %v7704_v23  ;;  %v5859_v62 = vpop.f32.mrb[96].mxu1  ;;  %v7959_v58 = vmax.f32 %v7895_v29, 0.0  ;;  %v7605_v23 = vpop.permute.xlu1 %7604 }
 0x4db   : > { %v7015_v35 = vpop.f32.mrb[96].mxu0  ;;  %v5861_v37 = vpop.f32.mrb[97].mxu1 }
 0x4dc   : > { %v7960_v50 = vmax.f32 %v7896_v33, 0.0  ;;  %v9577_v55 = vadd.f32 %v7015_v35, %v5859_v62  ;;  %v7017_v57 = vpop.f32.mrb[97].mxu0  ;;  %v5862_v5 = vpop.f32.mrb[98].mxu1  ;;  %v9493_v33 = vld [vmem:[%s12049_s7 + $0xd8] sm:$0xff]  }
 0x4dd   : > { %v7018_v20 = vpop.f32.mrb[98].mxu0  ;;  %v5864_v19 = vpop.f32.mrb[99].mxu1 }
 0x4de   : > { %v9425_v61 = vpack.c.bf16 %v7960_v50, %v7959_v58  ;;  %v7705_v8 = vmul.f32 %v9577_v55, %v7580_v32  ;;  %v9578_v7 = vadd.f32 %v7018_v20, %v5862_v5  ;;  %v7020_v36 = vpop.f32.mrb[99].mxu0  ;;  %v7610_v62 = vpop.permute.xlu0 %7609  ;;  %v9289_v5 = vunpack.c.l.bf16 %v9493_v33 }
 0x4e0   : > { %9520 = vst [vmem:[%s12066_s10 + $0xb8] sm:$0xff] %v9425_v61   ;;  %v7897_v10 = vadd.f32 %v9277_v56, %v7705_v8  ;;  %v7706_v11 = vmul.f32 %v9578_v7, %v7585_v9  ;;  %v9290_v9 = vunpack.c.h.bf16 %v9493_v33 }
 0x4e2   : > { %v7898_v17 = vadd.f32 %v9278_v16, %v7706_v11  ;;  %v5867_v18 = vpop.f32.mrb[100].mxu1  ;;  %v7961_v13 = vmax.f32 %v7897_v10, 0.0  ;;  %v7615_v11 = vpop.permute.xlu1 %7614 }
 0x4e3   : > { %v7023_v31 = vpop.f32.mrb[100].mxu0  ;;  %v5869_v22 = vpop.f32.mrb[101].mxu1 }
 0x4e4   : > { %v7962_v24 = vmax.f32 %v7898_v17, 0.0  ;;  %v9579_v34 = vadd.f32 %v7023_v31, %v5867_v18  ;;  %v7025_v39 = vpop.f32.mrb[101].mxu0  ;;  %v5870_v40 = vpop.f32.mrb[102].mxu1  ;;  %v9494_v17 = vld [vmem:[%s12049_s7 + $0xe0] sm:$0xff]  }
 0x4e5   : > { %v7026_v30 = vpop.f32.mrb[102].mxu0  ;;  %v5872_v41 = vpop.f32.mrb[103].mxu1 }
 0x4e6   : > { %v9430_v28 = vpack.c.bf16 %v7962_v24, %v7961_v13  ;;  %v7707_v42 = vmul.f32 %v9579_v34, %v7590_v15  ;;  %v9580_v45 = vadd.f32 %v7026_v30, %v5870_v40  ;;  %v7028_v51 = vpop.f32.mrb[103].mxu0  ;;  %v7620_v18 = vpop.permute.xlu0 %7619  ;;  %v9293_v40 = vunpack.c.l.bf16 %v9494_v17 }
 0x4e8   : > { %9521 = vst [vmem:[%s12066_s10 + $0xc0] sm:$0xff] %v9430_v28   ;;  %v7899_v46 = vadd.f32 %v9281_v27, %v7707_v42  ;;  %v7708_v53 = vmul.f32 %v9580_v45, %v7595_v52  ;;  %v9294_v52 = vunpack.c.h.bf16 %v9494_v17 }
 0x4ea   : > { %v7900_v54 = vadd.f32 %v9282_v48, %v7708_v53  ;;  %v5875_v43 = vpop.f32.mrb[104].mxu1  ;;  %v7963_v0 = vmax.f32 %v7899_v46, 0.0  ;;  %v7625_v53 = vpop.permute.xlu1 %7624 }
 0x4eb   : > { %v7031_v44 = vpop.f32.mrb[104].mxu0  ;;  %v5877_v63 = vpop.f32.mrb[105].mxu1 }
 0x4ec   : > { %v7964_v59 = vmax.f32 %v7900_v54, 0.0  ;;  %v9581_v2 = vadd.f32 %v7031_v44, %v5875_v43  ;;  %v7033_v3 = vpop.f32.mrb[105].mxu0  ;;  %v5878_v60 = vpop.f32.mrb[106].mxu1  ;;  %v9495_v54 = vld [vmem:[%s12049_s7 + $0xe8] sm:$0xff]  }
 0x4ed   : > { %v7034_v6 = vpop.f32.mrb[106].mxu0  ;;  %v5880_v21 = vpop.f32.mrb[107].mxu1 }
 0x4ee   : > { %v9435_v25 = vpack.c.bf16 %v7964_v59, %v7963_v0  ;;  %v7709_v4 = vmul.f32 %v9581_v2, %v7600_v38  ;;  %v9582_v26 = vadd.f32 %v7034_v6, %v5878_v60  ;;  %v7036_v29 = vpop.f32.mrb[107].mxu0  ;;  %v7630_v43 = vpop.permute.xlu0 %7629  ;;  %v9297_v60 = vunpack.c.l.bf16 %v9495_v54 }
 0x4f0   : > { %9522 = vst [vmem:[%s12066_s10 + $0xc8] sm:$0xff] %v9435_v25   ;;  %v7901_v14 = vadd.f32 %v9285_v47, %v7709_v4  ;;  %v7710_v32 = vmul.f32 %v9582_v26, %v7605_v23  ;;  %v9298_v23 = vunpack.c.h.bf16 %v9495_v54 }
 0x4f2   : > { %v7902_v35 = vadd.f32 %v9286_v49, %v7710_v32  ;;  %v5883_v37 = vpop.f32.mrb[108].mxu1  ;;  %v7965_v55 = vmax.f32 %v7901_v14, 0.0  ;;  %v7635_v32 = vpop.permute.xlu1 %7634 }
 0x4f3   : > { %v7039_v58 = vpop.f32.mrb[108].mxu0  ;;  %v5885_v50 = vpop.f32.mrb[109].mxu1 }
 0x4f4   : > { %v7966_v56 = vmax.f32 %v7902_v35, 0.0  ;;  %v9583_v57 = vadd.f32 %v7039_v58, %v5883_v37  ;;  %v7041_v20 = vpop.f32.mrb[109].mxu0  ;;  %v5886_v19 = vpop.f32.mrb[110].mxu1  ;;  %v9496_v35 = vld [vmem:[%s12049_s7 + $0xf0] sm:$0xff]  }
 0x4f5   : > { %v7042_v61 = vpop.f32.mrb[110].mxu0  ;;  %v5888_v8 = vpop.f32.mrb[111].mxu1 }
 0x4f6   : > { %v9440_v7 = vpack.c.bf16 %v7966_v56, %v7965_v55  ;;  %v7711_v16 = vmul.f32 %v9583_v57, %v7610_v62  ;;  %v9584_v36 = vadd.f32 %v7042_v61, %v5886_v19  ;;  %v7044_v10 = vpop.f32.mrb[111].mxu0  ;;  %v7640_v37 = vpop.permute.xlu0 %7639  ;;  %v9301_v19 = vunpack.c.l.bf16 %v9496_v35 }
 0x4f8   : > { %9523 = vst [vmem:[%s12066_s10 + $0xd0] sm:$0xff] %v9440_v7   ;;  %v7903_v12 = vadd.f32 %v9289_v5, %v7711_v16  ;;  %v7712_v15 = vmul.f32 %v9584_v36, %v7615_v11  ;;  %v9302_v11 = vunpack.c.h.bf16 %v9496_v35 }
 0x4fa   : > { %v7904_v31 = vadd.f32 %v9290_v9, %v7712_v15  ;;  %v5891_v22 = vpop.f32.mrb[112].mxu1  ;;  %v7967_v34 = vmax.f32 %v7903_v12, 0.0  ;;  %v7645_v15 = vpop.permute.xlu1 %7644 }
 0x4fb   : > { %v7047_v13 = vpop.f32.mrb[112].mxu0  ;;  %v5893_v24 = vpop.f32.mrb[113].mxu1 }
 0x4fc   : > { %v7968_v27 = vmax.f32 %v7904_v31, 0.0  ;;  %v9585_v39 = vadd.f32 %v7047_v13, %v5891_v22  ;;  %v7049_v30 = vpop.f32.mrb[113].mxu0  ;;  %v5894_v41 = vpop.f32.mrb[114].mxu1  ;;  %v9497_v31 = vld [vmem:[%s12049_s7 + $0xf8] sm:$0xff]  }
 0x4fd   : > { %v7050_v28 = vpop.f32.mrb[114].mxu0  ;;  %v5896_v42 = vpop.f32.mrb[115].mxu1 }
 0x4fe   : > { %v9445_v45 = vpack.c.bf16 %v7968_v27, %v7967_v34  ;;  %v7713_v48 = vmul.f32 %v9585_v39, %v7620_v18  ;;  %v9586_v51 = vadd.f32 %v7050_v28, %v5894_v41  ;;  %v7052_v46 = vpop.f32.mrb[115].mxu0  ;;  %v7650_v22 = vpop.permute.xlu0 %7649  ;;  %v9305_v41 = vunpack.c.l.bf16 %v9497_v31 }
 0x500   : > { %9524 = vst [vmem:[%s12066_s10 + $0xd8] sm:$0xff] %v9445_v45   ;;  %v7905_v1 = vadd.f32 %v9293_v40, %v7713_v48  ;;  %v7714_v38 = vmul.f32 %v9586_v51, %v7625_v53  ;;  %v9306_v53 = vunpack.c.h.bf16 %v9497_v31 }
 0x502   : > { %v7906_v44 = vadd.f32 %v9294_v52, %v7714_v38  ;;  %v5899_v63 = vpop.f32.mrb[116].mxu1  ;;  %v7969_v2 = vmax.f32 %v7905_v1, 0.0  ;;  %v7655_v38 = vpop.permute.xlu1 %7654 }
 0x503   : > { %v7055_v0 = vpop.f32.mrb[116].mxu0  ;;  %v5901_v59 = vpop.f32.mrb[117].mxu1 }
 0x504   : > { %v7970_v47 = vmax.f32 %v7906_v44, 0.0  ;;  %v9587_v3 = vadd.f32 %v7055_v0, %v5899_v63  ;;  %v7057_v6 = vpop.f32.mrb[117].mxu0  ;;  %v5902_v21 = vpop.f32.mrb[118].mxu1 }
 0x505   : > { %v7058_v25 = vpop.f32.mrb[118].mxu0  ;;  %v5904_v4 = vpop.f32.mrb[119].mxu1 }
 0x506   : > { %v9450_v26 = vpack.c.bf16 %v7970_v47, %v7969_v2  ;;  %v7715_v49 = vmul.f32 %v9587_v3, %v7630_v43  ;;  %v9588_v29 = vadd.f32 %v7058_v25, %v5902_v21  ;;  %v7060_v14 = vpop.f32.mrb[119].mxu0 }
 0x508   : > { %9525 = vst [vmem:[%s12066_s10 + $0xe0] sm:$0xff] %v9450_v26   ;;  %v7907_v33 = vadd.f32 %v9297_v60, %v7715_v49  ;;  %v7716_v62 = vmul.f32 %v9588_v29, %v7635_v32 }
 0x50a   : > { %v7908_v58 = vadd.f32 %v9298_v23, %v7716_v62  ;;  %v5907_v50 = vpop.f32.mrb[120].mxu1  ;;  %v7971_v57 = vmax.f32 %v7907_v33, 0.0 }
 0x50b   : > { %v7063_v55 = vpop.f32.mrb[120].mxu0  ;;  %v5909_v56 = vpop.f32.mrb[121].mxu1 }
 0x50c   : > { %v7972_v5 = vmax.f32 %v7908_v58, 0.0  ;;  %v9589_v20 = vadd.f32 %v7063_v55, %v5907_v50  ;;  %v7065_v61 = vpop.f32.mrb[121].mxu0  ;;  %v5910_v8 = vpop.f32.mrb[122].mxu1 }
 0x50d   : > { %v7066_v7 = vpop.f32.mrb[122].mxu0  ;;  %v5912_v16 = vpop.f32.mrb[123].mxu1 }
 0x50e   : > { %v9455_v36 = vpack.c.bf16 %v7972_v5, %v7971_v57  ;;  %v7717_v9 = vmul.f32 %v9589_v20, %v7640_v37  ;;  %v9590_v10 = vadd.f32 %v7066_v7, %v5910_v8  ;;  %v7068_v12 = vpop.f32.mrb[123].mxu0 }
 0x510   : > { %9526 = vst [vmem:[%s12066_s10 + $0xe8] sm:$0xff] %v9455_v36   ;;  %v7909_v17 = vadd.f32 %v9301_v19, %v7717_v9  ;;  %v7718_v18 = vmul.f32 %v9590_v10, %v7645_v15 }
 0x512   : > { %v7910_v13 = vadd.f32 %v9302_v11, %v7718_v18  ;;  %v5915_v24 = vpop.f32.mrb[124].mxu1  ;;  %v7973_v39 = vmax.f32 %v7909_v17, 0.0 }
 0x513   : > { %v7071_v34 = vpop.f32.mrb[124].mxu0  ;;  %v5917_v27 = vpop.f32.mrb[125].mxu1 }
 0x514   : > { %v7974_v40 = vmax.f32 %v7910_v13, 0.0  ;;  %v9591_v30 = vadd.f32 %v7071_v34, %v5915_v24  ;;  %v7073_v28 = vpop.f32.mrb[125].mxu0  ;;  %v5918_v42 = vpop.f32.mrb[126].mxu1 }
 0x515   : > { %v7074_v45 = vpop.f32.mrb[126].mxu0  ;;  %v5920_v48 = vpop.f32.mrb[127].mxu1 }
 0x516   : > { %v9460_v51 = vpack.c.bf16 %v7974_v40, %v7973_v39  ;;  %v7719_v52 = vmul.f32 %v9591_v30, %v7650_v22  ;;  %v9592_v46 = vadd.f32 %v7074_v45, %v5918_v42  ;;  %v7076_v1 = vpop.f32.mrb[127].mxu0 }
 0x518   : > { %9527 = vst [vmem:[%s12066_s10 + $0xf0] sm:$0xff] %v9460_v51   ;;  %v7911_v54 = vadd.f32 %v9305_v41, %v7719_v52  ;;  %v7720_v43 = vmul.f32 %v9592_v46, %v7655_v38 }
 0x51a   : > { %v7912_v44 = vadd.f32 %v9306_v53, %v7720_v43  ;;  %v7975_v63 = vmax.f32 %v7911_v54, 0.0 }
 0x51c   : > { %v7976_v0 = vmax.f32 %v7912_v44, 0.0 }
 0x51e   : > { %v9465_v59 = vpack.c.bf16 %v7976_v0, %v7975_v63 }
 0x520   : > { %9528 = vst [vmem:[%s12066_s10 + $0xf8] sm:$0xff] %v9465_v59  }
 0x521 PF: > { %s14_s17 = sadd.s32 1, %s10756_s17   ;;  %s12152_s15 = smov %s10752_s16 }
 0x522   : > { %p11_p5 = scmp.ge.s32.totalorder %s14_s17, 6   ;;  %s12153_s16 = smov %s12155_s18 }
 0x524   :  { %13 = sbr.rel (!%p11_p5) target bundleno = 2 (0x2), region = 81 }

// kernel: gnn_encoder.7
= control target key start
LH: loop header
LB: loop body
LE: loop exit
PB: predicated region body
PF: predicated region fallthrough
CT: control target
= control target key end

     0   :  { %s10145_s15 = smov 0   ;;  %s10147_s16 = smov 0   ;;  %s11540_s0 = inlined_call_operand.vmem [shape: s8[2048,2048], index: 0, kind: input, shape index: {}]   ;;  %s11541_s1 = inlined_call_operand.vmem [shape: bf16[2048,128], index: 1, kind: input, shape index: {}]   ;;  %s11542_s2 = inlined_call_operand.vmem [shape: bf16[2048,128], index: 2, kind: input, shape index: {}]   ;;  %s11543_s3 = inlined_call_operand.vmem [shape: f32[2048,1], index: 3, kind: input, shape index: {}]   ;;  %s11544_s4 = inlined_call_operand.vmem [shape: f32[2048,128], index: 4, kind: output, shape index: {}]  }
   0x1   :  { %s10149_s17 = smov 0  }
   0x2 LB: > { %s26_s18 = sadd.s32 1, %s10113_s16  ;;  %p8078_p0 = scmp.ge.s32.totalorder %s10117_s17, 1  ;;  %s10117_s17 = sphi %s10149_s17, %s14_s17   ;;  %s10113_s16 = sphi %s10147_s16, %s11546_s16   ;;  %s10109_s15 = sphi %s10145_s15, %s11545_s15  }
   0x3   : > { %p28_p1 = scmp.ge.s32.totalorder %s26_s18, 4  ;;  %p205_p2 = scmp.lt.s32.totalorder %s10117_s17, 5 }
   0x5   : > { %s11548_s18 = smov (%p28_p1, %s26_s18), 0  ;;  %p206_p3 = pnand %p8078_p0, %p205_p2 }
   0x6   : > { %v9749_v0 = vld [vmem:[%s11541_s1] sm:$0xff] (!%p206_p3)   ;;  %v10119_v1 = vmov (!%p206_p3), 0   ;;  %v9751_v3 = vld [vmem:[%s11541_s1 + $0x8] sm:$0xff] (!%p206_p3)   ;;  %v9753_v5 = vld [vmem:[%s11541_s1 + $0x10] sm:$0xff] (!%p206_p3)   ;;  %s8079_s13 = sshll.u32 (!%p206_p3), %s10109_s15, 6 }
   0x7   : > { %209 = sbr.rel (%p206_p3) target bundleno = 1309 (0x51d), region = 36  ;;  %4766 = vmatprep.subr.bf16.mxu1 (!%p206_p3), %v10119_v1  ;;  %5922 = vmatprep.subr.bf16.mxu0 (!%p206_p3), %v10119_v1  ;;  %v9750_v2 = vld [vmem:[%s11541_s1 + $0x200] sm:$0xff] (!%p206_p3)   ;;  %v9752_v4 = vld [vmem:[%s11541_s1 + $0x208] sm:$0xff] (!%p206_p3)   ;;  %v9754_v6 = vld [vmem:[%s11541_s1 + $0x210] sm:$0xff] (!%p206_p3)   ;;  %p248_p4 = scmp.lt.s32.totalorder (!%p206_p3), %s8079_s13, 255 }
   0x8   : > { %4767 = vmatpush1.bf16.msra.mxu1 (!%p206_p3), %v9749_v0  ;;  %9747 = vset.pattern.permute.xlu0 (!%p206_p3), %v10119_v1  ;;  %v9755_v7 = vld [vmem:[%s11541_s1 + $0x18] sm:$0xff] (!%p206_p3)   ;;  %v9757_v9 = vld [vmem:[%s11541_s1 + $0x20] sm:$0xff] (!%p206_p3)   ;;  %v9759_v11 = vld [vmem:[%s11541_s1 + $0x28] sm:$0xff] (!%p206_p3)  }
   0x9   : > { %5923 = vmatpush1.bf16.msra.mxu0 (!%p206_p3), %v9750_v2  ;;  %4768 = vmatprep.subr.bf16.mxu1 (!%p206_p3), %v10119_v1  ;;  %v9756_v8 = vld [vmem:[%s11541_s1 + $0x218] sm:$0xff] (!%p206_p3)   ;;  %v9758_v10 = vld [vmem:[%s11541_s1 + $0x220] sm:$0xff] (!%p206_p3)   ;;  %v9760_v12 = vld [vmem:[%s11541_s1 + $0x228] sm:$0xff] (!%p206_p3)  }
   0xa   : > { %5924 = vmatprep.subr.bf16.mxu0 (!%p206_p3), %v10119_v1  ;;  %9748 = vset.pattern.permute.xlu1 (!%p206_p3), %v10119_v1  ;;  %v9761_v13 = vld [vmem:[%s11541_s1 + $0x30] sm:$0xff] (!%p206_p3)   ;;  %v9763_v15 = vld [vmem:[%s11541_s1 + $0x38] sm:$0xff] (!%p206_p3)   ;;  %v9765_v17 = vld [vmem:[%s11541_s1 + $0x40] sm:$0xff] (!%p206_p3)  }
   0xb   : > { %v9762_v14 = vld [vmem:[%s11541_s1 + $0x230] sm:$0xff] (!%p206_p3)   ;;  %v9764_v16 = vld [vmem:[%s11541_s1 + $0x238] sm:$0xff] (!%p206_p3)   ;;  %v9766_v18 = vld [vmem:[%s11541_s1 + $0x240] sm:$0xff] (!%p206_p3)  }
   0xc   : > { %4769 = vmatpush1.bf16.msra.mxu1 (!%p206_p3), %v9751_v3  ;;  %v9767_v27 = vld [vmem:[%s11541_s1 + $0x48] sm:$0xff] (!%p206_p3)   ;;  %v9769_v37 = vld [vmem:[%s11541_s1 + $0x50] sm:$0xff] (!%p206_p3)   ;;  %v9771_v39 = vld [vmem:[%s11541_s1 + $0x58] sm:$0xff] (!%p206_p3)  }
   0xd   : > { %5925 = vmatpush1.bf16.msra.mxu0 (!%p206_p3), %v9752_v4  ;;  %4770 = vmatprep.subr.bf16.mxu1 (!%p206_p3), %v10119_v1  ;;  %v9768_v32 = vld [vmem:[%s11541_s1 + $0x248] sm:$0xff] (!%p206_p3)   ;;  %v9770_v38 = vld [vmem:[%s11541_s1 + $0x250] sm:$0xff] (!%p206_p3)   ;;  %v9772_v40 = vld [vmem:[%s11541_s1 + $0x258] sm:$0xff] (!%p206_p3)  }
   0xe   : > { %5926 = vmatprep.subr.bf16.mxu0 %v10119_v1  ;;  %s11550_s13 = smov (!%p248_p4, %s8079_s13), 255  ;;  %v9773_v41 = vld [vmem:[%s11541_s1 + $0x60] sm:$0xff]   ;;  %v9775_v43 = vld [vmem:[%s11541_s1 + $0x68] sm:$0xff]   ;;  %v9777_v45 = vld [vmem:[%s11541_s1 + $0x70] sm:$0xff]  }
   0xf   : > { %s8730_s27 = sshll.u32 %s11550_s13, 5  ;;  %v9774_v42 = vld [vmem:[%s11541_s1 + $0x260] sm:$0xff]   ;;  %v9776_v44 = vld [vmem:[%s11541_s1 + $0x268] sm:$0xff]   ;;  %v9778_v46 = vld [vmem:[%s11541_s1 + $0x270] sm:$0xff]   ;;  %s8085_s25 = sshll.u32 %s11550_s13, 3 }
  0x10   : > { %4771 = vmatpush1.bf16.msra.mxu1 %v9753_v5  ;;  %s10238_s6 = scalar_lea.vmem %s11540_s0, %s8730_s27  ;;  %v9779_v51 = vld [vmem:[%s11541_s1 + $0x78] sm:$0xff]   ;;  %v9781_v59 = vld [vmem:[%s11541_s1 + $0x80] sm:$0xff]   ;;  %s11216_s28 = scalar_lea.vmem %s11543_s3, %s8085_s25 }
  0x11   : > { %5927 = vmatpush1.bf16.msra.mxu0 %v9754_v6  ;;  %4772 = vmatprep.subr.bf16.mxu1 %v10119_v1  ;;  %v10249_v19 = vld [vmem:[%s10238_s6] sm:$0xff]  ;;  %v10255_v21 = vld [vmem:[%s10238_s6 + $0x10] sm:$0xff]  ;;  %v9780_v52 = vld [vmem:[%s11541_s1 + $0x278] sm:$0xff]   ;;  %s8083_s29 = sshll.u32 %s11550_s13, 2  ;;  %s11422_s10 = scalar_lea.vmem %s11544_s4, %s8085_s25 }
  0x12   : > { %5928 = vmatprep.subr.bf16.mxu0 %v10119_v1  ;;  %v10252_v20 = vld [vmem:[%s10238_s6 + $0x20] sm:$0xff]  ;;  %v862_v22 = vunpack.c.l.s8.bf16 %v10249_v19  ;;  %v863_v23 = vunpack.c.h.s8.bf16 %v10249_v19  ;;  %v10262_v26 = vld [vmem:[%s10238_s6 + $0x30] sm:$0xff]  ;;  %v866_v28 = vunpack.c.l.s8.bf16 %v10255_v21  ;;  %v867_v29 = vunpack.c.h.s8.bf16 %v10255_v21  ;;  %v9783_v6 = vld [vmem:[%s11541_s1 + $0x88] sm:$0xff]   ;;  %s11410_s7 = scalar_lea.vmem %s11542_s2, %s8083_s29 }
  0x13   : > { %v870_v24 = vunpack.c.l.s8.bf16 %v10252_v20  ;;  %v871_v25 = vunpack.c.h.s8.bf16 %v10252_v20  ;;  %v874_v30 = vunpack.c.l.s8.bf16 %v10262_v26  ;;  %v875_v31 = vunpack.c.h.s8.bf16 %v10262_v26  ;;  %v614_v47 = vld [vmem:[%s10238_s6 + $0x40] sm:$0xff]  ;;  %v616_v49 = vld [vmem:[%s10238_s6 + $0x50] sm:$0xff] }
  0x14   : > { %4773 = vmatpush1.bf16.msra.mxu1 %v9755_v7  ;;  %v618_v48 = vld [vmem:[%s10238_s6 + $0x60] sm:$0xff]  ;;  %v620_v50 = vld [vmem:[%s10238_s6 + $0x70] sm:$0xff]  ;;  %v878_v53 = vunpack.c.l.s8.bf16 %v614_v47  ;;  %v882_v55 = vunpack.c.l.s8.bf16 %v616_v49 }
  0x15   : > { %5929 = vmatpush1.bf16.msra.mxu0 %v9756_v8  ;;  %4774 = vmatprep.subr.bf16.mxu1 %v10119_v1  ;;  %v8089_v33 = vcombine.high %v862_v22, %v870_v24  ;;  %v10283_v34 = vcombine.low %v863_v23, %v871_v25  ;;  %v8097_v35 = vcombine.high %v866_v28, %v874_v30  ;;  %v886_v54 = vunpack.c.l.s8.bf16 %v618_v48  ;;  %v9782_v60 = vld [vmem:[%s11541_s1 + $0x280] sm:$0xff]   ;;  %v624_v2 = vld [vmem:[%s10238_s6 + $0x90] sm:$0xff] }
  0x16   : > { %5930 = vmatprep.subr.bf16.mxu0 %v10119_v1  ;;  %v10290_v36 = vcombine.low %v867_v29, %v875_v31  ;;  %v890_v56 = vunpack.c.l.s8.bf16 %v620_v50  ;;  %v8088_v57 = vcombine.low %v862_v22, %v870_v24  ;;  %v8096_v58 = vcombine.low %v866_v28, %v874_v30  ;;  %v622_v62 = vld [vmem:[%s10238_s6 + $0x80] sm:$0xff]  ;;  %v628_v3 = vld [vmem:[%s10238_s6 + $0xb0] sm:$0xff]  ;;  %v9787_v28 = vld [vmem:[%s11541_s1 + $0x98] sm:$0xff]  }
  0x17   : > { %4798 = vmatprep.mubr.bf16.mxu1 %v8089_v33  ;;  %5954 = vmatprep.mubr.bf16.mxu0 %v8097_v35  ;;  %v8105_v61 = vcombine.high %v878_v53, %v886_v54  ;;  %v626_v63 = vld [vmem:[%s10238_s6 + $0xa0] sm:$0xff]  ;;  %v894_v4 = vunpack.c.l.s8.bf16 %v622_v62  ;;  %v898_v7 = vunpack.c.l.s8.bf16 %v624_v2  ;;  %v906_v8 = vunpack.c.l.s8.bf16 %v628_v3  ;;  %v9786_v22 = vld [vmem:[%s11541_s1 + $0x290] sm:$0xff]   ;;  %v9788_v33 = vld [vmem:[%s11541_s1 + $0x298] sm:$0xff]  }
  0x18   : > { %4775 = vmatpush1.bf16.msra.mxu1 %v9757_v9  ;;  %v8113_v0 = vcombine.high %v882_v55, %v890_v56  ;;  %v902_v5 = vunpack.c.l.s8.bf16 %v626_v63  ;;  %v9784_v9 = vld [vmem:[%s11541_s1 + $0x288] sm:$0xff]   ;;  %v754_v20 = vld [vmem:[%s10238_s6 + $0x4a0] sm:$0xff]  ;;  %v752_v19 = vld [vmem:[%s10238_s6 + $0x490] sm:$0xff] }
  0x19   : > { %5931 = vmatpush1.bf16.msra.mxu0 %v9758_v10  ;;  %4776 = vmatprep.subr.bf16.mxu1 %v10119_v1  ;;  %v8104_v10 = vcombine.low %v878_v53, %v886_v54  ;;  %v9791_v50 = vld [vmem:[%s11541_s1 + $0xa8] sm:$0xff]   ;;  %v646_v53 = vld [vmem:[%s10238_s6 + $0x140] sm:$0xff]  ;;  %v1154_v26 = vunpack.c.l.s8.bf16 %v752_v19 }
  0x1a   : > { %5932 = vmatprep.subr.bf16.mxu0 %v10119_v1  ;;  %v8120_v35 = vcombine.low %v894_v4, %v902_v5  ;;  %v650_v54 = vld [vmem:[%s10238_s6 + $0x160] sm:$0xff]  ;;  %v942_v62 = vunpack.c.l.s8.bf16 %v646_v53 }
  0x1b   : > { %v950_v63 = vunpack.c.l.s8.bf16 %v650_v54  ;;  %v10578_v19 = vld [vmem:[%s10238_s6 + $0x5e0] sm:$0xff] }
  0x1c   : > { %4777 = vmatpush1.bf16.msra.mxu1 %v9759_v11  ;;  %v630_v11 = vld [vmem:[%s10238_s6 + $0xc0] sm:$0xff] }
  0x1d   : > { %5933 = vmatpush1.bf16.msra.mxu0 %v9760_v12  ;;  %4778 = vmatprep.subr.bf16.mxu1 %v10119_v1  ;;  %v8112_v12 = vcombine.low %v882_v55, %v890_v56  ;;  %v910_v24 = vunpack.c.l.s8.bf16 %v630_v11  ;;  %v9793_v55 = vld [vmem:[%s11541_s1 + $0xb0] sm:$0xff]  }
  0x1e   : > { %5934 = vmatprep.subr.bf16.mxu0 %v10119_v1  ;;  %v656_v11 = vld [vmem:[%s10238_s6 + $0x190] sm:$0xff] }
  0x20   : > { %4779 = vmatpush1.bf16.msra.mxu1 %v9761_v13  ;;  %v8121_v13 = vcombine.high %v894_v4, %v902_v5  ;;  %v9796_v4 = vld [vmem:[%s11541_s1 + $0x2b8] sm:$0xff]  }
  0x21   : > { %5935 = vmatpush1.bf16.msra.mxu0 %v9762_v14  ;;  %4780 = vmatprep.subr.bf16.mxu1 %v10119_v1  ;;  %v634_v14 = vld [vmem:[%s10238_s6 + $0xe0] sm:$0xff] }
  0x22   : > { %5936 = vmatprep.subr.bf16.mxu0 %v10119_v1 }
  0x24   : > { %4781 = vmatpush1.bf16.msra.mxu1 %v9763_v15  ;;  %v632_v15 = vld [vmem:[%s10238_s6 + $0xd0] sm:$0xff] }
  0x25   : > { %5937 = vmatpush1.bf16.msra.mxu0 %v9764_v16  ;;  %4782 = vmatprep.subr.bf16.mxu1 %v10119_v1  ;;  %v8129_v16 = vcombine.high %v898_v7, %v906_v8  ;;  %v914_v30 = vunpack.c.l.s8.bf16 %v632_v15 }
  0x26   : > { %5938 = vmatprep.subr.bf16.mxu0 %v10119_v1 }
  0x28   : > { %4783 = vmatpush1.bf16.msra.mxu1 %v9765_v17  ;;  %v9785_v17 = vld [vmem:[%s11541_s1 + $0x90] sm:$0xff]  }
  0x29   : > { %5939 = vmatpush1.bf16.msra.mxu0 %v9766_v18  ;;  %4784 = vmatprep.subr.bf16.mxu1 %v10119_v1  ;;  %v636_v18 = vld [vmem:[%s10238_s6 + $0xf0] sm:$0xff] }
  0x2a   : > { %5940 = vmatprep.subr.bf16.mxu0 %v10119_v1 }
  0x2c   : > { %4785 = vmatpush1.bf16.msra.mxu1 %v9767_v27  ;;  %v918_v27 = vunpack.c.l.s8.bf16 %v634_v14 }
  0x2d   : > { %5941 = vmatpush1.bf16.msra.mxu0 %v9768_v32  ;;  %4786 = vmatprep.subr.bf16.mxu1 %v10119_v1  ;;  %v922_v32 = vunpack.c.l.s8.bf16 %v636_v18 }
  0x2e   : > { %5942 = vmatprep.subr.bf16.mxu0 %v10119_v1 }
  0x2f   : > { %v8144_v56 = vcombine.low %v914_v30, %v922_v32 }
  0x30   : > { %4787 = vmatpush1.bf16.msra.mxu1 %v9769_v37  ;;  %v638_v37 = vld [vmem:[%s10238_s6 + $0x100] sm:$0xff] }
  0x31   : > { %5943 = vmatpush1.bf16.msra.mxu0 %v9770_v38  ;;  %4788 = vmatprep.subr.bf16.mxu1 %v10119_v1  ;;  %v642_v38 = vld [vmem:[%s10238_s6 + $0x120] sm:$0xff] }
  0x32   : > { %5944 = vmatprep.subr.bf16.mxu0 %v10119_v1  ;;  %v934_v47 = vunpack.c.l.s8.bf16 %v642_v38  ;;  %v668_v38 = vld [vmem:[%s10238_s6 + $0x1f0] sm:$0xff] }
  0x34   : > { %4789 = vmatpush1.bf16.msra.mxu1 %v9771_v39  ;;  %v9789_v39 = vld [vmem:[%s11541_s1 + $0xa0] sm:$0xff]  }
  0x35   : > { %5945 = vmatpush1.bf16.msra.mxu0 %v9772_v40  ;;  %4790 = vmatprep.subr.bf16.mxu1 %v10119_v1  ;;  %v8128_v40 = vcombine.low %v898_v7, %v906_v8  ;;  %v658_v7 = vld [vmem:[%s10238_s6 + $0x1a0] sm:$0xff] }
  0x36   : > { %5946 = vmatprep.subr.bf16.mxu0 %v10119_v1  ;;  %v9797_v8 = vld [vmem:[%s11541_s1 + $0xc0] sm:$0xff]  }
  0x38   : > { %4791 = vmatpush1.bf16.msra.mxu1 %v9773_v41  ;;  %v8137_v41 = vcombine.high %v910_v24, %v918_v27 }
  0x39   : > { %5947 = vmatpush1.bf16.msra.mxu0 %v9774_v42  ;;  %4792 = vmatprep.subr.bf16.mxu1 %v10119_v1  ;;  %v640_v42 = vld [vmem:[%s10238_s6 + $0x110] sm:$0xff] }
  0x3a   : > { %5948 = vmatprep.subr.bf16.mxu0 %v10119_v1  ;;  %v930_v48 = vunpack.c.l.s8.bf16 %v640_v42 }
  0x3c   : > { %4793 = vmatpush1.bf16.msra.mxu1 %v9775_v43  ;;  %v644_v43 = vld [vmem:[%s10238_s6 + $0x130] sm:$0xff] }
  0x3d   : > { %5949 = vmatpush1.bf16.msra.mxu0 %v9776_v44  ;;  %4794 = vmatprep.subr.bf16.mxu1 %v10119_v1  ;;  %v9790_v44 = vld [vmem:[%s11541_s1 + $0x2a0] sm:$0xff]   ;;  %v938_v49 = vunpack.c.l.s8.bf16 %v644_v43 }
  0x3e   : > { %5950 = vmatprep.subr.bf16.mxu0 %v10119_v1 }
  0x40   : > { %4795 = vmatpush1.bf16.msra.mxu1 %v9777_v45  ;;  %v8145_v45 = vcombine.high %v914_v30, %v922_v32  ;;  %v666_v30 = vld [vmem:[%s10238_s6 + $0x1e0] sm:$0xff]  ;;  %v9801_v32 = vld [vmem:[%s11541_s1 + $0xd0] sm:$0xff]  }
  0x41   : > { %5951 = vmatpush1.bf16.msra.mxu0 %v9778_v46  ;;  %4796 = vmatprep.subr.bf16.mxu1 %v10119_v1  ;;  %v926_v46 = vunpack.c.l.s8.bf16 %v638_v37  ;;  %v664_v37 = vld [vmem:[%s10238_s6 + $0x1d0] sm:$0xff]  ;;  %v982_v42 = vunpack.c.l.s8.bf16 %v666_v30  ;;  %v694_v30 = vld [vmem:[%s10238_s6 + $0x2c0] sm:$0xff] }
  0x42   : > { %5952 = vmatprep.subr.bf16.mxu0 %v10119_v1  ;;  %v978_v43 = vunpack.c.l.s8.bf16 %v664_v37  ;;  %v696_v37 = vld [vmem:[%s10238_s6 + $0x2d0] sm:$0xff] }
  0x43   : > { %v8152_v5 = vcombine.low %v926_v46, %v934_v47 }
  0x44   : > { %4797 = vmatpush1.bf16.msra.mxu1 %v9779_v51  ;;  %v9792_v51 = vld [vmem:[%s11541_s1 + $0x2a8] sm:$0xff]  }
  0x45   : > { %5953 = vmatpush1.bf16.msra.mxu0 %v9780_v52  ;;  %5055 = vmatprep.subr.bf16.mxu1 %v10119_v1  ;;  %v8136_v52 = vcombine.low %v910_v24, %v918_v27  ;;  %v9800_v24 = vld [vmem:[%s11541_s1 + $0x2c8] sm:$0xff]   ;;  %v8168_v27 = vcombine.low %v942_v62, %v950_v63 }
  0x46   : > { %6211 = vmatprep.subr.bf16.mxu0 %v10119_v1 }
  0x47   : > { %4799 = vmatmul.mubr.bf16.vlgmr.msra.gmra.mrb[0].mxu1 %v8088_v57  ;;  %v8153_v57 = vcombine.high %v926_v46, %v934_v47  ;;  %v670_v46 = vld [vmem:[%s10238_s6 + $0x200] sm:$0xff] }
  0x48   : > { %5955 = vmatmul.mubr.bf16.vlgmr.msra.gmra.mrb[0].mxu0 %v8096_v58  ;;  %5056 = vmatpush1.bf16.msra.mxu1 %v9781_v59  ;;  %v648_v58 = vld [vmem:[%s10238_s6 + $0x150] sm:$0xff]  ;;  %v674_v47 = vld [vmem:[%s10238_s6 + $0x220] sm:$0xff]  ;;  %v990_v53 = vunpack.c.l.s8.bf16 %v670_v46 }
  0x49   : > { %6212 = vmatpush1.bf16.msra.mxu0 %v9782_v60  ;;  %4806 = vmatprep.mubr.bf16.mxu1 %v8105_v61  ;;  %v652_v59 = vld [vmem:[%s10238_s6 + $0x170] sm:$0xff]  ;;  %v8161_v61 = vcombine.high %v930_v48, %v938_v49  ;;  %v946_v2 = vunpack.c.l.s8.bf16 %v648_v58  ;;  %v998_v54 = vunpack.c.l.s8.bf16 %v674_v47 }
  0x4a   : > { %5962 = vmatprep.mubr.bf16.mxu0 %v8113_v0  ;;  %5057 = vmatprep.subr.bf16.mxu1 %v10119_v1  ;;  %v9794_v60 = vld [vmem:[%s11541_s1 + $0x2b0] sm:$0xff]   ;;  %v9795_v0 = vld [vmem:[%s11541_s1 + $0xb8] sm:$0xff]   ;;  %v954_v3 = vunpack.c.l.s8.bf16 %v652_v59 }
  0x4b   : > { %6213 = vmatprep.subr.bf16.mxu0 %v10119_v1 }
  0x4c   : > { %5058 = vmatpush1.bf16.msra.mxu1 %v9783_v6  ;;  %v654_v6 = vld [vmem:[%s10238_s6 + $0x180] sm:$0xff]  ;;  %v8177_v14 = vcombine.high %v946_v2, %v954_v3 }
  0x4d   : > { %6214 = vmatpush1.bf16.msra.mxu0 %v9784_v9  ;;  %5059 = vmatprep.subr.bf16.mxu1 %v10119_v1  ;;  %v8160_v9 = vcombine.low %v930_v48, %v938_v49  ;;  %v958_v15 = vunpack.c.l.s8.bf16 %v654_v6 }
  0x4e   : > { %6215 = vmatprep.subr.bf16.mxu0 %v10119_v1 }
  0x4f   : > { %4807 = vmatmul.mubr.bf16.gmra.mrb[4].mxu1 %v8104_v10  ;;  %v8169_v10 = vcombine.high %v942_v62, %v950_v63  ;;  %v8217_v63 = vcombine.high %v990_v53, %v998_v54 }
  0x50   : > { %5963 = vmatmul.mubr.bf16.gmra.mrb[4].mxu0 %v8112_v12  ;;  %4814 = vmatprep.mubr.bf16.mxu1 %v8121_v13  ;;  %v660_v12 = vld [vmem:[%s10238_s6 + $0x1b0] sm:$0xff]  ;;  %v9798_v13 = vld [vmem:[%s11541_s1 + $0x2c0] sm:$0xff]  }
  0x51   : > { %5970 = vmatprep.mubr.bf16.mxu0 %v8129_v16  ;;  %5060 = vmatpush1.bf16.msra.mxu1 %v9785_v17  ;;  %v966_v16 = vunpack.c.l.s8.bf16 %v658_v7  ;;  %v962_v17 = vunpack.c.l.s8.bf16 %v656_v11  ;;  %v970_v18 = vunpack.c.l.s8.bf16 %v660_v12 }
  0x52   : > { %6216 = vmatpush1.bf16.msra.mxu0 %v9786_v22  ;;  %5061 = vmatprep.subr.bf16.mxu1 %v10119_v1  ;;  %v9799_v22 = vld [vmem:[%s11541_s1 + $0xc8] sm:$0xff]  }
  0x53   : > { %6217 = vmatprep.subr.bf16.mxu0 %v10119_v1  ;;  %v8192_v48 = vcombine.low %v962_v17, %v970_v18 }
  0x55   : > { %5062 = vmatpush1.bf16.msra.mxu1 %v9787_v28  ;;  %v662_v28 = vld [vmem:[%s10238_s6 + $0x1c0] sm:$0xff] }
  0x56   : > { %6218 = vmatpush1.bf16.msra.mxu0 %v9788_v33  ;;  %5063 = vmatprep.subr.bf16.mxu1 %v10119_v1  ;;  %v8176_v33 = vcombine.low %v946_v2, %v954_v3  ;;  %v684_v2 = vld [vmem:[%s10238_s6 + $0x270] sm:$0xff] }
  0x57   : > { %4815 = vmatmul.mubr.bf16.gmra.mrb[8].mxu1 %v8120_v35  ;;  %6219 = vmatprep.subr.bf16.mxu0 %v10119_v1  ;;  %v8185_v35 = vcombine.high %v958_v15, %v966_v16  ;;  %v1018_v7 = vunpack.c.l.s8.bf16 %v684_v2  ;;  %v716_v2 = vld [vmem:[%s10238_s6 + $0x370] sm:$0xff] }
  0x58   : > { %5971 = vmatmul.mubr.bf16.gmra.mrb[8].mxu0 %v8128_v40  ;;  %4822 = vmatprep.mubr.bf16.mxu1 %v8137_v41  ;;  %v8193_v40 = vcombine.high %v962_v17, %v970_v18  ;;  %v974_v41 = vunpack.c.l.s8.bf16 %v662_v28  ;;  %v9805_v18 = vld [vmem:[%s11541_s1 + $0xe0] sm:$0xff]  }
  0x59   : > { %5978 = vmatprep.mubr.bf16.mxu0 %v8145_v45  ;;  %5064 = vmatpush1.bf16.msra.mxu1 %v9789_v39  ;;  %v9802_v39 = vld [vmem:[%s11541_s1 + $0x2d0] sm:$0xff]   ;;  %v8184_v45 = vcombine.low %v958_v15, %v966_v16 }
  0x5a   : > { %6220 = vmatpush1.bf16.msra.mxu0 %v9790_v44  ;;  %5065 = vmatprep.subr.bf16.mxu1 %v10119_v1  ;;  %v986_v44 = vunpack.c.l.s8.bf16 %v668_v38  ;;  %v8201_v49 = vcombine.high %v974_v41, %v982_v42  ;;  %v8200_v59 = vcombine.low %v974_v41, %v982_v42  ;;  %v700_v38 = vld [vmem:[%s10238_s6 + $0x2f0] sm:$0xff]  ;;  %v1042_v42 = vunpack.c.l.s8.bf16 %v696_v37 }
  0x5b   : > { %6221 = vmatprep.subr.bf16.mxu0 %v10119_v1  ;;  %v728_v37 = vld [vmem:[%s10238_s6 + $0x3d0] sm:$0xff] }
  0x5c   : > { %v8208_v62 = vcombine.low %v978_v43, %v986_v44 }
  0x5d   : > { %5066 = vmatpush1.bf16.msra.mxu1 %v9791_v50  ;;  %v672_v50 = vld [vmem:[%s10238_s6 + $0x210] sm:$0xff] }
  0x5e   : > { %6222 = vmatpush1.bf16.msra.mxu0 %v9792_v51  ;;  %5067 = vmatprep.subr.bf16.mxu1 %v10119_v1  ;;  %v676_v51 = vld [vmem:[%s10238_s6 + $0x230] sm:$0xff] }
  0x5f   : > { %4823 = vmatmul.mubr.bf16.gmra.mrb[12].mxu1 %v8136_v52  ;;  %6223 = vmatprep.subr.bf16.mxu0 %v10119_v1  ;;  %v8209_v52 = vcombine.high %v978_v43, %v986_v44  ;;  %v1002_v58 = vunpack.c.l.s8.bf16 %v676_v51  ;;  %v1050_v43 = vunpack.c.l.s8.bf16 %v700_v38  ;;  %v708_v51 = vld [vmem:[%s10238_s6 + $0x330] sm:$0xff] }
  0x60   : > { %5979 = vmatmul.mubr.bf16.gmra.mrb[12].mxu0 %v8144_v56  ;;  %4830 = vmatprep.mubr.bf16.mxu1 %v8153_v57  ;;  %v9804_v56 = vld [vmem:[%s11541_s1 + $0x2d8] sm:$0xff]   ;;  %v994_v57 = vunpack.c.l.s8.bf16 %v672_v50  ;;  %v704_v50 = vld [vmem:[%s10238_s6 + $0x310] sm:$0xff] }
  0x61   : > { %5986 = vmatprep.mubr.bf16.mxu0 %v8161_v61  ;;  %5068 = vmatpush1.bf16.msra.mxu1 %v9793_v55  ;;  %v9803_v55 = vld [vmem:[%s11541_s1 + $0xd8] sm:$0xff]   ;;  %v682_v61 = vld [vmem:[%s10238_s6 + $0x260] sm:$0xff]  ;;  %v8273_v47 = vcombine.high %v1042_v42, %v1050_v43  ;;  %v732_v38 = vld [vmem:[%s10238_s6 + $0x3f0] sm:$0xff] }
  0x62   : > { %6224 = vmatpush1.bf16.msra.mxu0 %v9794_v60  ;;  %5069 = vmatprep.subr.bf16.mxu1 %v10119_v1  ;;  %v678_v60 = vld [vmem:[%s10238_s6 + $0x240] sm:$0xff]  ;;  %v8225_v3 = vcombine.high %v994_v57, %v1002_v58  ;;  %v8224_v11 = vcombine.low %v994_v57, %v1002_v58  ;;  %v1066_v57 = vunpack.c.l.s8.bf16 %v708_v51 }
  0x63   : > { %6225 = vmatprep.subr.bf16.mxu0 %v10119_v1 }
  0x65   : > { %5070 = vmatpush1.bf16.msra.mxu1 %v9795_v0  ;;  %v680_v0 = vld [vmem:[%s10238_s6 + $0x250] sm:$0xff] }
  0x66   : > { %6226 = vmatpush1.bf16.msra.mxu0 %v9796_v4  ;;  %5071 = vmatprep.subr.bf16.mxu1 %v10119_v1  ;;  %v1006_v4 = vunpack.c.l.s8.bf16 %v678_v60  ;;  %v1010_v6 = vunpack.c.l.s8.bf16 %v680_v0  ;;  %v712_v0 = vld [vmem:[%s10238_s6 + $0x350] sm:$0xff] }
  0x67   : > { %4831 = vmatmul.mubr.bf16.gmra.mrb[16].mxu1 %v8152_v5  ;;  %6227 = vmatprep.subr.bf16.mxu0 %v10119_v1  ;;  %v1014_v5 = vunpack.c.l.s8.bf16 %v682_v61 }
  0x68   : > { %5987 = vmatmul.mubr.bf16.gmra.mrb[16].mxu0 %v8160_v9  ;;  %4838 = vmatprep.mubr.bf16.mxu1 %v8169_v10  ;;  %v686_v9 = vld [vmem:[%s10238_s6 + $0x280] sm:$0xff]  ;;  %v8241_v15 = vcombine.high %v1010_v6, %v1018_v7 }
  0x69   : > { %5994 = vmatprep.mubr.bf16.mxu0 %v8177_v14  ;;  %5072 = vmatpush1.bf16.msra.mxu1 %v9797_v8  ;;  %v8216_v8 = vcombine.low %v990_v53, %v998_v54  ;;  %v690_v10 = vld [vmem:[%s10238_s6 + $0x2a0] sm:$0xff]  ;;  %v8233_v12 = vcombine.high %v1006_v4, %v1014_v5  ;;  %v692_v14 = vld [vmem:[%s10238_s6 + $0x2b0] sm:$0xff]  ;;  %v1022_v16 = vunpack.c.l.s8.bf16 %v686_v9  ;;  %v8232_v28 = vcombine.low %v1006_v4, %v1014_v5  ;;  %v9807_v54 = vld [vmem:[%s11541_s1 + $0xe8] sm:$0xff]  }
  0x6a   : > { %6228 = vmatpush1.bf16.msra.mxu0 %v9798_v13  ;;  %5073 = vmatprep.subr.bf16.mxu1 %v10119_v1  ;;  %v688_v13 = vld [vmem:[%s10238_s6 + $0x290] sm:$0xff]  ;;  %v1030_v17 = vunpack.c.l.s8.bf16 %v690_v10  ;;  %v1074_v5 = vunpack.c.l.s8.bf16 %v712_v0 }
  0x6b   : > { %6229 = vmatprep.subr.bf16.mxu0 %v10119_v1  ;;  %v748_v0 = vld [vmem:[%s10238_s6 + $0x470] sm:$0xff] }
  0x6c   : > { %v8248_v44 = vcombine.low %v1022_v16, %v1030_v17 }
  0x6d   : > { %5074 = vmatpush1.bf16.msra.mxu1 %v9799_v22  ;;  %v9806_v22 = vld [vmem:[%s11541_s1 + $0x2e0] sm:$0xff]  }
  0x6e   : > { %6230 = vmatpush1.bf16.msra.mxu0 %v9800_v24  ;;  %5075 = vmatprep.subr.bf16.mxu1 %v10119_v1  ;;  %v1026_v24 = vunpack.c.l.s8.bf16 %v688_v13  ;;  %v720_v13 = vld [vmem:[%s10238_s6 + $0x390] sm:$0xff] }
  0x6f   : > { %4839 = vmatmul.mubr.bf16.gmra.mrb[20].mxu1 %v8168_v27  ;;  %6231 = vmatprep.subr.bf16.mxu0 %v10119_v1  ;;  %v1034_v27 = vunpack.c.l.s8.bf16 %v692_v14  ;;  %v724_v14 = vld [vmem:[%s10238_s6 + $0x3b0] sm:$0xff] }
  0x70   : > { %5995 = vmatmul.mubr.bf16.gmra.mrb[20].mxu0 %v8176_v33  ;;  %4846 = vmatprep.mubr.bf16.mxu1 %v8185_v35  ;;  %v8240_v33 = vcombine.low %v1010_v6, %v1018_v7  ;;  %v8249_v35 = vcombine.high %v1022_v16, %v1030_v17  ;;  %v1082_v6 = vunpack.c.l.s8.bf16 %v716_v2  ;;  %v9809_v17 = vld [vmem:[%s11541_s1 + $0xf0] sm:$0xff]  }
  0x71   : > { %6002 = vmatprep.mubr.bf16.mxu0 %v8193_v40  ;;  %5076 = vmatpush1.bf16.msra.mxu1 %v9801_v32  ;;  %v698_v32 = vld [vmem:[%s10238_s6 + $0x2e0] sm:$0xff]  ;;  %v1038_v40 = vunpack.c.l.s8.bf16 %v694_v30 }
  0x72   : > { %6232 = vmatpush1.bf16.msra.mxu0 %v9802_v39  ;;  %5077 = vmatprep.subr.bf16.mxu1 %v10119_v1  ;;  %v8257_v39 = vcombine.high %v1026_v24, %v1034_v27  ;;  %v1046_v41 = vunpack.c.l.s8.bf16 %v698_v32  ;;  %v8305_v10 = vcombine.high %v1074_v5, %v1082_v6 }
  0x73   : > { %6233 = vmatprep.subr.bf16.mxu0 %v10119_v1 }
  0x74   : > { %v8265_v46 = vcombine.high %v1038_v40, %v1046_v41  ;;  %v8264_v58 = vcombine.low %v1038_v40, %v1046_v41  ;;  %v1106_v41 = vunpack.c.l.s8.bf16 %v728_v37 }
  0x75   : > { %5078 = vmatpush1.bf16.msra.mxu1 %v9803_v55  ;;  %v9808_v55 = vld [vmem:[%s11541_s1 + $0x2e8] sm:$0xff]  }
  0x76   : > { %6234 = vmatpush1.bf16.msra.mxu0 %v9804_v56  ;;  %5079 = vmatprep.subr.bf16.mxu1 %v10119_v1  ;;  %v1058_v56 = vunpack.c.l.s8.bf16 %v704_v50  ;;  %v740_v50 = vld [vmem:[%s10238_s6 + $0x430] sm:$0xff] }
  0x77   : > { %4847 = vmatmul.mubr.bf16.gmra.mrb[24].mxu1 %v8184_v45  ;;  %6235 = vmatprep.subr.bf16.mxu0 %v10119_v1  ;;  %v8256_v45 = vcombine.low %v1026_v24, %v1034_v27  ;;  %v1098_v24 = vunpack.c.l.s8.bf16 %v724_v14 }
  0x78   : > { %6003 = vmatmul.mubr.bf16.gmra.mrb[24].mxu0 %v8192_v48  ;;  %4854 = vmatprep.mubr.bf16.mxu1 %v8201_v49  ;;  %v702_v48 = vld [vmem:[%s10238_s6 + $0x300] sm:$0xff]  ;;  %v8289_v61 = vcombine.high %v1058_v56, %v1066_v57 }
  0x79   : > { %6010 = vmatprep.mubr.bf16.mxu0 %v8209_v52  ;;  %5080 = vmatpush1.bf16.msra.mxu1 %v9805_v18  ;;  %v706_v49 = vld [vmem:[%s10238_s6 + $0x320] sm:$0xff]  ;;  %v1054_v52 = vunpack.c.l.s8.bf16 %v702_v48  ;;  %v9810_v18 = vld [vmem:[%s11541_s1 + $0x2f0] sm:$0xff]  }
  0x7a   : > { %6236 = vmatpush1.bf16.msra.mxu0 %v9806_v22  ;;  %5081 = vmatprep.subr.bf16.mxu1 %v10119_v1  ;;  %v1062_v53 = vunpack.c.l.s8.bf16 %v706_v49  ;;  %v1090_v22 = vunpack.c.l.s8.bf16 %v720_v13  ;;  %v738_v48 = vld [vmem:[%s10238_s6 + $0x420] sm:$0xff]  ;;  %v736_v49 = vld [vmem:[%s10238_s6 + $0x410] sm:$0xff] }
  0x7b   : > { %6237 = vmatprep.subr.bf16.mxu0 %v10119_v1 }
  0x7c   : > { %v8281_v60 = vcombine.high %v1054_v52, %v1062_v53  ;;  %v8280_v7 = vcombine.low %v1054_v52, %v1062_v53  ;;  %v8321_v32 = vcombine.high %v1090_v22, %v1098_v24  ;;  %v1126_v52 = vunpack.c.l.s8.bf16 %v738_v48  ;;  %v9811_v53 = vld [vmem:[%s11541_s1 + $0xf8] sm:$0xff]  }
  0x7d   : > { %5082 = vmatpush1.bf16.msra.mxu1 %v9807_v54  ;;  %v9812_v54 = vld [vmem:[%s11541_s1 + $0x2f8] sm:$0xff]  }
  0x7e   : > { %6238 = vmatpush1.bf16.msra.mxu0 %v9808_v55  ;;  %5083 = vmatprep.subr.bf16.mxu1 %v10119_v1  ;;  %v1122_v55 = vunpack.c.l.s8.bf16 %v736_v49 }
  0x7f   : > { %4855 = vmatmul.mubr.bf16.gmra.mrb[28].mxu1 %v8200_v59  ;;  %6239 = vmatprep.subr.bf16.mxu0 %v10119_v1  ;;  %v8272_v59 = vcombine.low %v1042_v42, %v1050_v43  ;;  %v1114_v42 = vunpack.c.l.s8.bf16 %v732_v38  ;;  %v766_v38 = vld [vmem:[%s10238_s6 + $0x500] sm:$0xff] }
  0x80   : > { %6011 = vmatmul.mubr.bf16.gmra.mrb[28].mxu0 %v8208_v62  ;;  %4862 = vmatprep.mubr.bf16.mxu1 %v8217_v63  ;;  %v710_v62 = vld [vmem:[%s10238_s6 + $0x340] sm:$0xff] }
  0x81   : > { %6018 = vmatprep.mubr.bf16.mxu0 %v8225_v3  ;;  %v714_v63 = vld [vmem:[%s10238_s6 + $0x360] sm:$0xff]  ;;  %v1070_v3 = vunpack.c.l.s8.bf16 %v710_v62  ;;  %5084 = vmatpush1.bf16.msra.mxu1 %v9809_v17 }
  0x82   : > { %v1078_v4 = vunpack.c.l.s8.bf16 %v714_v63  ;;  %6240 = vmatpush1.bf16.msra.mxu0 %v9810_v18  ;;  %5085 = vmatprep.subr.bf16.mxu1 %v10119_v1  ;;  %v746_v62 = vld [vmem:[%s10238_s6 + $0x460] sm:$0xff]  ;;  %v744_v63 = vld [vmem:[%s10238_s6 + $0x450] sm:$0xff] }
  0x83   : > { %6241 = vmatprep.subr.bf16.mxu0 %v10119_v1  ;;  %v762_v17 = vld [vmem:[%s10238_s6 + $0x4e0] sm:$0xff]  ;;  %v760_v18 = vld [vmem:[%s10238_s6 + $0x4d0] sm:$0xff] }
  0x84   : > { %v8297_v9 = vcombine.high %v1070_v3, %v1078_v4  ;;  %v8296_v27 = vcombine.low %v1070_v3, %v1078_v4  ;;  %v1142_v3 = vunpack.c.l.s8.bf16 %v746_v62  ;;  %v10546_v4 = vcombine.high %v863_v23, %v871_v25  ;;  %v756_v23 = vld [vmem:[%s10238_s6 + $0x4b0] sm:$0xff]  ;;  %v782_v62 = vld [vmem:[%s10238_s6 + $0x580] sm:$0xff] }
  0x85   : > { %5086 = vmatpush1.bf16.msra.mxu1 %v9811_v53  ;;  %v1158_v25 = vunpack.c.l.s8.bf16 %v754_v20  ;;  %v780_v53 = vld [vmem:[%s10238_s6 + $0x570] sm:$0xff]  ;;  %v10575_v20 = vld [vmem:[%s10238_s6 + $0x5c0] sm:$0xff] }
  0x86   : > { %6242 = vmatpush1.bf16.msra.mxu0 %v9812_v54  ;;  %5344 = vmatprep.subr.bf16.mxu1 %v10119_v1 }
  0x87   : > { %4863 = vmatmul.mubr.bf16.gmra.mrb[32].mxu1 %v8216_v8  ;;  %v8288_v8 = vcombine.low %v1058_v56, %v1066_v57  ;;  %v1130_v56 = vunpack.c.l.s8.bf16 %v740_v50  ;;  %6500 = vmatprep.subr.bf16.mxu0 %v10119_v1  ;;  %v774_v50 = vld [vmem:[%s10238_s6 + $0x540] sm:$0xff] }
  0x88   : > { %6019 = vmatmul.mubr.bf16.gmra.mrb[32].mxu0 %v8224_v11  ;;  %4870 = vmatprep.mubr.bf16.mxu1 %v8233_v12  ;;  %v718_v11 = vld [vmem:[%s10238_s6 + $0x380] sm:$0xff]  ;;  %v1198_v54 = vunpack.c.l.s8.bf16 %v774_v50 }
  0x89   : > { %6026 = vmatprep.mubr.bf16.mxu0 %v8241_v15  ;;  %v722_v12 = vld [vmem:[%s10238_s6 + $0x3a0] sm:$0xff]  ;;  %v1086_v15 = vunpack.c.l.s8.bf16 %v718_v11 }
  0x8a   : > { %v1094_v16 = vunpack.c.l.s8.bf16 %v722_v12  ;;  %v750_v12 = vld [vmem:[%s10238_s6 + $0x480] sm:$0xff] }
  0x8b   : > { %v1150_v21 = vunpack.c.l.s8.bf16 %v750_v12 }
  0x8c   : > { %v8313_v30 = vcombine.high %v1086_v15, %v1094_v16  ;;  %v8312_v43 = vcombine.low %v1086_v15, %v1094_v16  ;;  %v758_v16 = vld [vmem:[%s10238_s6 + $0x4c0] sm:$0xff] }
  0x8d   : > { %v8377_v14 = vcombine.high %v1150_v21, %v1158_v25 }
  0x8f   : > { %4871 = vmatmul.mubr.bf16.gmra.mrb[36].mxu1 %v8232_v28  ;;  %v8304_v28 = vcombine.low %v1074_v5, %v1082_v6  ;;  %v10552_v5 = vcombine.high %v867_v29, %v875_v31  ;;  %v1138_v6 = vunpack.c.l.s8.bf16 %v744_v63  ;;  %v1162_v29 = vunpack.c.l.s8.bf16 %v756_v23  ;;  %v786_v63 = vld [vmem:[%s10238_s6 + $0x5a0] sm:$0xff]  ;;  %v792_v23 = vld [vmem:[%s10238_s6 + $0x5d0] sm:$0xff] }
  0x90   : > { %6027 = vmatmul.mubr.bf16.gmra.mrb[36].mxu0 %v8240_v33  ;;  %4878 = vmatprep.mubr.bf16.mxu1 %v8249_v35  ;;  %v726_v33 = vld [vmem:[%s10238_s6 + $0x3c0] sm:$0xff] }
  0x91   : > { %6034 = vmatprep.mubr.bf16.mxu0 %v8257_v39  ;;  %v730_v35 = vld [vmem:[%s10238_s6 + $0x3e0] sm:$0xff]  ;;  %v1102_v39 = vunpack.c.l.s8.bf16 %v726_v33  ;;  %v8385_v15 = vcombine.high %v1154_v26, %v1162_v29  ;;  %v8384_v33 = vcombine.low %v1154_v26, %v1162_v29  ;;  %v1238_v26 = vunpack.c.l.s8.bf16 %v10578_v19 }
  0x92   : > { %v1110_v40 = vunpack.c.l.s8.bf16 %v730_v35  ;;  %v1234_v29 = vunpack.c.l.s8.bf16 %v792_v23 }
  0x94   : > { %v8328_v57 = vcombine.low %v1102_v39, %v1110_v40 }
  0x97   : > { %4879 = vmatmul.mubr.bf16.gmra.mrb[40].mxu1 %v8248_v44  ;;  %v8320_v44 = vcombine.low %v1090_v22, %v1098_v24  ;;  %v764_v22 = vld [vmem:[%s10238_s6 + $0x4f0] sm:$0xff]  ;;  %v1166_v24 = vunpack.c.l.s8.bf16 %v758_v16 }
  0x98   : > { %6035 = vmatmul.mubr.bf16.gmra.mrb[40].mxu0 %v8256_v45  ;;  %4886 = vmatprep.mubr.bf16.mxu1 %v8265_v46  ;;  %v8329_v45 = vcombine.high %v1102_v39, %v1110_v40  ;;  %v8337_v46 = vcombine.high %v1106_v41, %v1114_v42  ;;  %v770_v39 = vld [vmem:[%s10238_s6 + $0x520] sm:$0xff]  ;;  %v768_v40 = vld [vmem:[%s10238_s6 + $0x510] sm:$0xff] }
  0x99   : > { %6042 = vmatprep.mubr.bf16.mxu0 %v8273_v47  ;;  %v734_v47 = vld [vmem:[%s10238_s6 + $0x400] sm:$0xff] }
  0x9a   : > { %v1118_v51 = vunpack.c.l.s8.bf16 %v734_v47 }
  0x9f   : > { %4887 = vmatmul.mubr.bf16.gmra.mrb[44].mxu1 %v8264_v58  ;;  %v8336_v58 = vcombine.low %v1106_v41, %v1114_v42  ;;  %v772_v41 = vld [vmem:[%s10238_s6 + $0x530] sm:$0xff]  ;;  %v1182_v42 = vunpack.c.l.s8.bf16 %v766_v38 }
  0xa0   : > { %6043 = vmatmul.mubr.bf16.gmra.mrb[44].mxu0 %v8272_v59  ;;  %4894 = vmatprep.mubr.bf16.mxu1 %v8281_v60  ;;  %v8345_v59 = vcombine.high %v1118_v51, %v1126_v52  ;;  %v8353_v60 = vcombine.high %v1122_v55, %v1130_v56 }
  0xa1   : > { %6050 = vmatprep.mubr.bf16.mxu0 %v8289_v61  ;;  %v742_v61 = vld [vmem:[%s10238_s6 + $0x440] sm:$0xff] }
  0xa2   : > { %v1134_v2 = vunpack.c.l.s8.bf16 %v742_v61 }
  0xa4   : > { %v8360_v31 = vcombine.low %v1134_v2, %v1142_v3 }
  0xa7   : > { %4895 = vmatmul.mubr.bf16.gmra.mrb[48].mxu1 %v8280_v7  ;;  %v1146_v7 = vunpack.c.l.s8.bf16 %v748_v0  ;;  %v784_v0 = vld [vmem:[%s10238_s6 + $0x590] sm:$0xff] }
  0xa8   : > { %6051 = vmatmul.mubr.bf16.gmra.mrb[48].mxu0 %v8288_v8  ;;  %4902 = vmatprep.mubr.bf16.mxu1 %v8297_v9  ;;  %v8344_v8 = vcombine.low %v1118_v51, %v1126_v52  ;;  %v8352_v9 = vcombine.low %v1122_v55, %v1130_v56  ;;  %v778_v51 = vld [vmem:[%s10238_s6 + $0x560] sm:$0xff]  ;;  %v776_v52 = vld [vmem:[%s10238_s6 + $0x550] sm:$0xff] }
  0xa9   : > { %6058 = vmatprep.mubr.bf16.mxu0 %v8305_v10  ;;  %v8361_v10 = vcombine.high %v1134_v2, %v1142_v3  ;;  %v8369_v11 = vcombine.high %v1138_v6, %v1146_v7  ;;  %v8368_v13 = vcombine.low %v1138_v6, %v1146_v7  ;;  %v1206_v55 = vunpack.c.l.s8.bf16 %v778_v51  ;;  %v788_v2 = vld [vmem:[%s10238_s6 + $0x5b0] sm:$0xff]  ;;  %v10617_v51 = vld [vmem:[%s10238_s6 + $0x680] sm:$0xff] }
  0xaa   : > { %v1202_v56 = vunpack.c.l.s8.bf16 %v776_v52  ;;  %v1214_v3 = vunpack.c.l.s8.bf16 %v782_v62  ;;  %v1222_v6 = vunpack.c.l.s8.bf16 %v786_v63  ;;  %v1218_v7 = vunpack.c.l.s8.bf16 %v784_v0  ;;  %v10620_v52 = vld [vmem:[%s10238_s6 + $0x6a0] sm:$0xff] }
  0xab   : > { %v10633_v63 = vld [vmem:[%s10238_s6 + $0x6c0] sm:$0xff] }
  0xac   : > { %v10636_v0 = vld [vmem:[%s10238_s6 + $0x6e0] sm:$0xff] }
  0xaf   : > { %4903 = vmatmul.mubr.bf16.gmra.mrb[52].mxu1 %v8296_v27  ;;  %v1174_v27 = vunpack.c.l.s8.bf16 %v762_v17  ;;  %v10585_v17 = vld [vmem:[%s10238_s6 + $0x600] sm:$0xff] }
  0xb0   : > { %6059 = vmatmul.mubr.bf16.gmra.mrb[52].mxu0 %v8304_v28  ;;  %4910 = vmatprep.mubr.bf16.mxu1 %v8313_v30  ;;  %v1170_v28 = vunpack.c.l.s8.bf16 %v760_v18  ;;  %v1178_v30 = vunpack.c.l.s8.bf16 %v764_v22  ;;  %v10588_v18 = vld [vmem:[%s10238_s6 + $0x620] sm:$0xff]  ;;  %v10591_v22 = vld [vmem:[%s10238_s6 + $0x610] sm:$0xff] }
  0xb1   : > { %6066 = vmatprep.mubr.bf16.mxu0 %v8321_v32  ;;  %v8376_v32 = vcombine.low %v1150_v21, %v1158_v25  ;;  %v8393_v35 = vcombine.high %v1166_v24, %v1174_v27  ;;  %v796_v21 = vld [vmem:[%s10238_s6 + $0x5f0] sm:$0xff]  ;;  %v1230_v25 = vunpack.c.l.s8.bf16 %v10575_v20 }
  0xb2   : > { %v8401_v37 = vcombine.high %v1170_v28, %v1178_v30  ;;  %v8400_v47 = vcombine.low %v1170_v28, %v1178_v30  ;;  %v1254_v28 = vunpack.c.l.s8.bf16 %v10588_v18  ;;  %v1250_v30 = vunpack.c.l.s8.bf16 %v10591_v22 }
  0xb7   : > { %4911 = vmatmul.mubr.bf16.gmra.mrb[56].mxu1 %v8312_v43  ;;  %v1190_v43 = vunpack.c.l.s8.bf16 %v770_v39  ;;  %v10601_v39 = vld [vmem:[%s10238_s6 + $0x640] sm:$0xff] }
  0xb8   : > { %6067 = vmatmul.mubr.bf16.gmra.mrb[56].mxu0 %v8320_v44  ;;  %4918 = vmatprep.mubr.bf16.mxu1 %v8329_v45  ;;  %v1186_v44 = vunpack.c.l.s8.bf16 %v768_v40  ;;  %v1194_v45 = vunpack.c.l.s8.bf16 %v772_v41  ;;  %v10604_v40 = vld [vmem:[%s10238_s6 + $0x660] sm:$0xff]  ;;  %v10607_v41 = vld [vmem:[%s10238_s6 + $0x650] sm:$0xff] }
  0xb9   : > { %6074 = vmatprep.mubr.bf16.mxu0 %v8337_v46  ;;  %v8392_v46 = vcombine.low %v1166_v24, %v1174_v27  ;;  %v8409_v48 = vcombine.high %v1182_v42, %v1190_v43  ;;  %v10594_v24 = vld [vmem:[%s10238_s6 + $0x630] sm:$0xff]  ;;  %v1246_v27 = vunpack.c.l.s8.bf16 %v10585_v17 }
  0xba   : > { %v8417_v49 = vcombine.high %v1186_v44, %v1194_v45 }
  0xbf   : > { %4919 = vmatmul.mubr.bf16.gmra.mrb[60].mxu1 %v8328_v57  ;;  %v1210_v57 = vunpack.c.l.s8.bf16 %v780_v53  ;;  %v10623_v53 = vld [vmem:[%s10238_s6 + $0x690] sm:$0xff] }
  0xc0   : > { %6075 = vmatmul.mubr.bf16.gmra.mrb[60].mxu0 %v8336_v58  ;;  %4926 = vmatprep.mubr.bf16.mxu1 %v8345_v59  ;;  %v8408_v58 = vcombine.low %v1182_v42, %v1190_v43  ;;  %v8416_v59 = vcombine.low %v1186_v44, %v1194_v45  ;;  %v10610_v42 = vld [vmem:[%s10238_s6 + $0x670] sm:$0xff]  ;;  %v1262_v43 = vunpack.c.l.s8.bf16 %v10601_v39  ;;  %v1270_v44 = vunpack.c.l.s8.bf16 %v10604_v40 }
  0xc1   : > { %6082 = vmatprep.mubr.bf16.mxu0 %v8353_v60  ;;  %v8425_v60 = vcombine.high %v1198_v54, %v1206_v55  ;;  %v8433_v61 = vcombine.high %v1202_v56, %v1210_v57  ;;  %v1266_v45 = vunpack.c.l.s8.bf16 %v10607_v41 }
  0xc7   : > { %4927 = vmatmul.mubr.bf16.gmra.mrb[64].mxu1 %v8344_v8  ;;  %v1226_v8 = vunpack.c.l.s8.bf16 %v788_v2  ;;  %v10639_v2 = vld [vmem:[%s10238_s6 + $0x6d0] sm:$0xff] }
  0xc8   : > { %6083 = vmatmul.mubr.bf16.gmra.mrb[64].mxu0 %v8352_v9  ;;  %4934 = vmatprep.mubr.bf16.mxu1 %v8361_v10  ;;  %v8424_v9 = vcombine.low %v1198_v54, %v1206_v55  ;;  %v8432_v10 = vcombine.low %v1202_v56, %v1210_v57  ;;  %v10626_v54 = vld [vmem:[%s10238_s6 + $0x6b0] sm:$0xff]  ;;  %v1278_v55 = vunpack.c.l.s8.bf16 %v10617_v51  ;;  %v1286_v56 = vunpack.c.l.s8.bf16 %v10620_v52 }
  0xc9   : > { %6090 = vmatprep.mubr.bf16.mxu0 %v8369_v11  ;;  %v8441_v11 = vcombine.high %v1214_v3, %v1222_v6  ;;  %v8449_v12 = vcombine.high %v1218_v7, %v1226_v8  ;;  %v1282_v57 = vunpack.c.l.s8.bf16 %v10623_v53 }
  0xcf   : > { %4935 = vmatmul.mubr.bf16.gmra.mrb[68].mxu1 %v8360_v31  ;;  %v1242_v31 = vunpack.c.l.s8.bf16 %v796_v21  ;;  %v10649_v21 = vld [vmem:[%s10238_s6 + $0x700] sm:$0xff] }
  0xd0   : > { %6091 = vmatmul.mubr.bf16.gmra.mrb[68].mxu0 %v8368_v13  ;;  %4942 = vmatprep.mubr.bf16.mxu1 %v8377_v14  ;;  %v8440_v13 = vcombine.low %v1214_v3, %v1222_v6  ;;  %v8448_v14 = vcombine.low %v1218_v7, %v1226_v8  ;;  %v10642_v3 = vld [vmem:[%s10238_s6 + $0x6f0] sm:$0xff]  ;;  %v1294_v6 = vunpack.c.l.s8.bf16 %v10633_v63  ;;  %v1302_v7 = vunpack.c.l.s8.bf16 %v10636_v0 }
  0xd1   : > { %6098 = vmatprep.mubr.bf16.mxu0 %v8385_v15  ;;  %v8457_v15 = vcombine.high %v1230_v25, %v1238_v26  ;;  %v8465_v16 = vcombine.high %v1234_v29, %v1242_v31  ;;  %v1298_v8 = vunpack.c.l.s8.bf16 %v10639_v2 }
  0xd7   : > { %4943 = vmatmul.mubr.bf16.gmra.mrb[72].mxu1 %v8376_v32  ;;  %v1258_v32 = vunpack.c.l.s8.bf16 %v10594_v24 }
  0xd8   : > { %6099 = vmatmul.mubr.bf16.gmra.mrb[72].mxu0 %v8384_v33  ;;  %4950 = vmatprep.mubr.bf16.mxu1 %v8393_v35  ;;  %v8456_v33 = vcombine.low %v1230_v25, %v1238_v26  ;;  %v8464_v35 = vcombine.low %v1234_v29, %v1242_v31  ;;  %v10652_v25 = vld [vmem:[%s10238_s6 + $0x720] sm:$0xff]  ;;  %v10655_v26 = vld [vmem:[%s10238_s6 + $0x710] sm:$0xff]  ;;  %v1310_v31 = vunpack.c.l.s8.bf16 %v10649_v21 }
  0xd9   : > { %6106 = vmatprep.mubr.bf16.mxu0 %v8401_v37  ;;  %v8473_v37 = vcombine.high %v1246_v27, %v1254_v28  ;;  %v8481_v38 = vcombine.high %v1250_v30, %v1258_v32  ;;  %v10658_v29 = vld [vmem:[%s10238_s6 + $0x730] sm:$0xff] }
  0xdf   : > { %4951 = vmatmul.mubr.bf16.gmra.mrb[76].mxu1 %v8392_v46  ;;  %v1274_v46 = vunpack.c.l.s8.bf16 %v10610_v42 }
  0xe0   : > { %6107 = vmatmul.mubr.bf16.gmra.mrb[76].mxu0 %v8400_v47  ;;  %4958 = vmatprep.mubr.bf16.mxu1 %v8409_v48  ;;  %v8472_v47 = vcombine.low %v1246_v27, %v1254_v28  ;;  %v8480_v48 = vcombine.low %v1250_v30, %v1258_v32  ;;  %v10665_v32 = vld [vmem:[%s10238_s6 + $0x740] sm:$0xff] }
  0xe1   : > { %6114 = vmatprep.mubr.bf16.mxu0 %v8417_v49  ;;  %v8489_v49 = vcombine.high %v1262_v43, %v1270_v44  ;;  %v8497_v50 = vcombine.high %v1266_v45, %v1274_v46 }
  0xe7   : > { %4959 = vmatmul.mubr.bf16.gmra.mrb[80].mxu1 %v8408_v58  ;;  %v1290_v58 = vunpack.c.l.s8.bf16 %v10626_v54 }
  0xe8   : > { %6115 = vmatmul.mubr.bf16.gmra.mrb[80].mxu0 %v8416_v59  ;;  %4966 = vmatprep.mubr.bf16.mxu1 %v8425_v60  ;;  %v8488_v59 = vcombine.low %v1262_v43, %v1270_v44  ;;  %v8496_v60 = vcombine.low %v1266_v45, %v1274_v46 }
  0xe9   : > { %6122 = vmatprep.mubr.bf16.mxu0 %v8433_v61  ;;  %v8505_v61 = vcombine.high %v1278_v55, %v1286_v56  ;;  %v8513_v62 = vcombine.high %v1282_v57, %v1290_v58 }
  0xef   : > { %4967 = vmatmul.mubr.bf16.gmra.mrb[84].mxu1 %v8424_v9  ;;  %v1306_v9 = vunpack.c.l.s8.bf16 %v10642_v3 }
  0xf0   : > { %6123 = vmatmul.mubr.bf16.gmra.mrb[84].mxu0 %v8432_v10  ;;  %4974 = vmatprep.mubr.bf16.mxu1 %v8441_v11  ;;  %v8504_v10 = vcombine.low %v1278_v55, %v1286_v56  ;;  %v8512_v11 = vcombine.low %v1282_v57, %v1290_v58  ;;  %v10684_v55 = vld [vmem:[%s10238_s6 + $0x7a0] sm:$0xff]  ;;  %v10687_v56 = vld [vmem:[%s10238_s6 + $0x790] sm:$0xff] }
  0xf1   : > { %6130 = vmatprep.mubr.bf16.mxu0 %v8449_v12  ;;  %v8521_v12 = vcombine.high %v1294_v6, %v1302_v7  ;;  %v8529_v23 = vcombine.high %v1298_v8, %v1306_v9  ;;  %v8528_v27 = vcombine.low %v1298_v8, %v1306_v9  ;;  %v10690_v57 = vld [vmem:[%s10238_s6 + $0x7b0] sm:$0xff]  ;;  %v10697_v9 = vld [vmem:[%s10238_s6 + $0x7c0] sm:$0xff] }
  0xf7   : > { %4975 = vmatmul.mubr.bf16.gmra.mrb[88].mxu1 %v8440_v13  ;;  %v1318_v13 = vunpack.c.l.s8.bf16 %v10652_v25 }
  0xf8   : > { %6131 = vmatmul.mubr.bf16.gmra.mrb[88].mxu0 %v8448_v14  ;;  %4982 = vmatprep.mubr.bf16.mxu1 %v8457_v15  ;;  %v1314_v14 = vunpack.c.l.s8.bf16 %v10655_v26  ;;  %v1322_v15 = vunpack.c.l.s8.bf16 %v10658_v29 }
  0xf9   : > { %6138 = vmatprep.mubr.bf16.mxu0 %v8465_v16  ;;  %v8520_v16 = vcombine.low %v1294_v6, %v1302_v7  ;;  %v8537_v28 = vcombine.high %v1310_v31, %v1318_v13  ;;  %v8536_v46 = vcombine.low %v1310_v31, %v1318_v13 }
  0xfa   : > { %v8545_v30 = vcombine.high %v1314_v14, %v1322_v15 }
  0xff   : > { %4983 = vmatmul.mubr.bf16.gmra.mrb[92].mxu1 %v8456_v33  ;;  %v10668_v33 = vld [vmem:[%s10238_s6 + $0x760] sm:$0xff] }
 0x100   : > { %6139 = vmatmul.mubr.bf16.gmra.mrb[92].mxu0 %v8464_v35  ;;  %4990 = vmatprep.mubr.bf16.mxu1 %v8473_v37  ;;  %v10671_v35 = vld [vmem:[%s10238_s6 + $0x750] sm:$0xff]  ;;  %v1334_v43 = vunpack.c.l.s8.bf16 %v10668_v33 }
 0x101   : > { %6146 = vmatprep.mubr.bf16.mxu0 %v8481_v38  ;;  %v10674_v37 = vld [vmem:[%s10238_s6 + $0x770] sm:$0xff]  ;;  %v1326_v38 = vunpack.c.l.s8.bf16 %v10665_v32  ;;  %v1330_v44 = vunpack.c.l.s8.bf16 %v10671_v35 }
 0x102   : > { %v1338_v45 = vunpack.c.l.s8.bf16 %v10674_v37 }
 0x104   : > { %v8560_v6 = vcombine.low %v1330_v44, %v1338_v45 }
 0x107   : > { %4991 = vmatmul.mubr.bf16.gmra.mrb[96].mxu1 %v8472_v47  ;;  %v8544_v47 = vcombine.low %v1314_v14, %v1322_v15 }
 0x108   : > { %6147 = vmatmul.mubr.bf16.gmra.mrb[96].mxu0 %v8480_v48  ;;  %4998 = vmatprep.mubr.bf16.mxu1 %v8489_v49  ;;  %v8553_v48 = vcombine.high %v1326_v38, %v1334_v43  ;;  %v8561_v49 = vcombine.high %v1330_v44, %v1338_v45  ;;  %v9878_v45 = vld [vmem:[%s10238_s6 + $0x60] sm:$0xff] }
 0x109   : > { %6154 = vmatprep.mubr.bf16.mxu0 %v8497_v50  ;;  %v10681_v50 = vld [vmem:[%s10238_s6 + $0x780] sm:$0xff] }
 0x10a   : > { %v1342_v58 = vunpack.c.l.s8.bf16 %v10681_v50 }
 0x10f   : > { %4999 = vmatmul.mubr.bf16.gmra.mrb[100].mxu1 %v8488_v59  ;;  %v1350_v59 = vunpack.c.l.s8.bf16 %v10684_v55 }
 0x110   : > { %6155 = vmatmul.mubr.bf16.gmra.mrb[100].mxu0 %v8496_v60  ;;  %5006 = vmatprep.mubr.bf16.mxu1 %v8505_v61  ;;  %v1346_v60 = vunpack.c.l.s8.bf16 %v10687_v56  ;;  %v1354_v61 = vunpack.c.l.s8.bf16 %v10690_v57 }
 0x111   : > { %6162 = vmatprep.mubr.bf16.mxu0 %v8513_v62  ;;  %v8552_v62 = vcombine.low %v1326_v38, %v1334_v43  ;;  %v8569_v7 = vcombine.high %v1342_v58, %v1350_v59  ;;  %v8568_v15 = vcombine.low %v1342_v58, %v1350_v59  ;;  %v9877_v43 = vld [vmem:[%s10238_s6 + $0x40] sm:$0xff] }
 0x112   : > { %v8577_v8 = vcombine.high %v1346_v60, %v1354_v61  ;;  %v879_v44 = vunpack.c.h.s8.bf16 %v9877_v43  ;;  %v9813_v59 = vld [vmem:[%s11541_s1 + $0x100] sm:$0xff]  }
 0x117   : > { %5007 = vmatmul.mubr.bf16.gmra.mrb[104].mxu1 %v8504_v10  ;;  %v10700_v10 = vld [vmem:[%s10238_s6 + $0x7e0] sm:$0xff] }
 0x118   : > { %6163 = vmatmul.mubr.bf16.gmra.mrb[104].mxu0 %v8512_v11  ;;  %5014 = vmatprep.mubr.bf16.mxu1 %v8521_v12  ;;  %v10703_v11 = vld [vmem:[%s10238_s6 + $0x7d0] sm:$0xff]  ;;  %v1366_v31 = vunpack.c.l.s8.bf16 %v10700_v10 }
 0x119   : > { %6170 = vmatprep.mubr.bf16.mxu0 %v8529_v23  ;;  %v10706_v12 = vld [vmem:[%s10238_s6 + $0x7f0] sm:$0xff]  ;;  %v1358_v23 = vunpack.c.l.s8.bf16 %v10697_v9  ;;  %v1362_v13 = vunpack.c.l.s8.bf16 %v10703_v11 }
 0x11a   : > { %v1370_v14 = vunpack.c.l.s8.bf16 %v10706_v12 }
 0x11c   : > { %v8592_v38 = vcombine.low %v1362_v13, %v1370_v14 }
 0x11f   : > { %5015 = vmatmul.mubr.bf16.gmra.mrb[108].mxu1 %v8520_v16  ;;  %v8576_v16 = vcombine.low %v1346_v60, %v1354_v61  ;;  %v9881_v61 = vld [vmem:[%s10238_s6 + $0x80] sm:$0xff] }
 0x120   : > { %6171 = vmatmul.mubr.bf16.gmra.mrb[108].mxu0 %v8528_v27  ;;  %5022 = vmatprep.mubr.bf16.mxu1 %v8537_v28  ;;  %v8585_v27 = vcombine.high %v1358_v23, %v1366_v31  ;;  %v8593_v28 = vcombine.high %v1362_v13, %v1370_v14  ;;  %v9884_v13 = vld [vmem:[%s10238_s6 + $0xb0] sm:$0xff] }
 0x121   : > { %6178 = vmatprep.mubr.bf16.mxu0 %v8545_v30  ;;  %v8584_v30 = vcombine.low %v1358_v23, %v1366_v31  ;;  %v9883_v23 = vld [vmem:[%s10238_s6 + $0x90] sm:$0xff]  ;;  %v907_v14 = vunpack.c.h.s8.bf16 %v9884_v13 }
 0x122   : > { %v899_v31 = vunpack.c.h.s8.bf16 %v9883_v23  ;;  %v9890_v23 = vld [vmem:[%s10238_s6 + $0x120] sm:$0xff]  ;;  %v9891_v13 = vld [vmem:[%s10238_s6 + $0x110] sm:$0xff] }
 0x127   : > { %5023 = vmatmul.mubr.bf16.gmra.mrb[112].mxu1 %v8536_v46  ;;  %v887_v46 = vunpack.c.h.s8.bf16 %v9878_v45 }
 0x128   : > { %6179 = vmatmul.mubr.bf16.gmra.mrb[112].mxu0 %v8544_v47  ;;  %5030 = vmatprep.mubr.bf16.mxu1 %v8553_v48  ;;  %v9879_v47 = vld [vmem:[%s10238_s6 + $0x50] sm:$0xff] }
 0x129   : > { %6186 = vmatprep.mubr.bf16.mxu0 %v8561_v49  ;;  %v883_v48 = vunpack.c.h.s8.bf16 %v9879_v47  ;;  %v9880_v49 = vld [vmem:[%s10238_s6 + $0x70] sm:$0xff] }
 0x12a   : > { %v891_v58 = vunpack.c.h.s8.bf16 %v9880_v49 }
 0x12c   : > { %v8115_v60 = vcombine.high %v883_v48, %v891_v58 }
 0x12f   : > { %5031 = vmatmul.mubr.bf16.gmra.mrb[116].mxu1 %v8552_v62  ;;  %v895_v62 = vunpack.c.h.s8.bf16 %v9881_v61 }
 0x130   : > { %6187 = vmatmul.mubr.bf16.gmra.mrb[116].mxu0 %v8560_v6  ;;  %5038 = vmatprep.mubr.bf16.mxu1 %v8569_v7  ;;  %v9882_v6 = vld [vmem:[%s10238_s6 + $0xa0] sm:$0xff] }
 0x131   : > { %6194 = vmatprep.mubr.bf16.mxu0 %v8577_v8  ;;  %v903_v7 = vunpack.c.h.s8.bf16 %v9882_v6  ;;  %v9815_v8 = vld [vmem:[%s11541_s1 + $0x108] sm:$0xff]   ;;  %v9821_v6 = vld [vmem:[%s11541_s1 + $0x120] sm:$0xff]  }
 0x137   : > { %5039 = vmatmul.mubr.bf16.gmra.mrb[120].mxu1 %v8568_v15  ;;  %v8114_v15 = vcombine.low %v883_v48, %v891_v58  ;;  %v9888_v48 = vld [vmem:[%s10238_s6 + $0xf0] sm:$0xff]  ;;  %v9819_v58 = vld [vmem:[%s11541_s1 + $0x118] sm:$0xff]  }
 0x138   : > { %6195 = vmatmul.mubr.bf16.gmra.mrb[120].mxu0 %v8576_v16  ;;  %5046 = vmatprep.mubr.bf16.mxu1 %v8585_v27  ;;  %v8123_v16 = vcombine.high %v895_v62, %v903_v7  ;;  %v8131_v27 = vcombine.high %v899_v31, %v907_v14  ;;  %v923_v49 = vunpack.c.h.s8.bf16 %v9888_v48 }
 0x139   : > { %6202 = vmatprep.mubr.bf16.mxu0 %v8593_v28  ;;  %v9817_v28 = vld [vmem:[%s11541_s1 + $0x110] sm:$0xff]  }
 0x13f   : > { %5047 = vmatmul.mubr.bf16.gmra.mrb[124].mxu1 %v8584_v30  ;;  %v9818_v30 = vld [vmem:[%s11541_s1 + $0x310] sm:$0xff]  }
 0x140   : > { %6203 = vmatmul.mubr.bf16.gmra.mrb[124].mxu0 %v8592_v38  ;;  %5087 = vmatprep.mubr.bf16.mxu1 %v10546_v4  ;;  %v9814_v4 = vld [vmem:[%s11541_s1 + $0x300] sm:$0xff]  }
 0x141   : > { %6243 = vmatprep.mubr.bf16.mxu0 %v10552_v5  ;;  %v8107_v5 = vcombine.high %v879_v44, %v887_v46  ;;  %v9885_v38 = vld [vmem:[%s10238_s6 + $0xc0] sm:$0xff] }
 0x142   : > { %v911_v43 = vunpack.c.h.s8.bf16 %v9885_v38 }
 0x147   : > { %5088 = vmatmul.mubr.bf16.vlgmr.msra.gmra.mrb[0].mxu1 %v10283_v34  ;;  %v9816_v34 = vld [vmem:[%s11541_s1 + $0x308] sm:$0xff]  }
 0x148   : > { %6244 = vmatmul.mubr.bf16.vlgmr.msra.gmra.mrb[0].mxu0 %v10290_v36  ;;  %5345 = vmatpush1.bf16.msra.mxu1 %v9813_v59  ;;  %v8106_v36 = vcombine.low %v879_v44, %v887_v46  ;;  %v9886_v44 = vld [vmem:[%s10238_s6 + $0xe0] sm:$0xff]  ;;  %v9887_v46 = vld [vmem:[%s10238_s6 + $0xd0] sm:$0xff]  ;;  %v9820_v59 = vld [vmem:[%s11541_s1 + $0x318] sm:$0xff]  }
 0x149   : > { %6501 = vmatpush1.bf16.msra.mxu0 %v9814_v4  ;;  %5095 = vmatprep.mubr.bf16.mxu1 %v8107_v5  ;;  %v919_v45 = vunpack.c.h.s8.bf16 %v9886_v44  ;;  %v915_v47 = vunpack.c.h.s8.bf16 %v9887_v46  ;;  %v8122_v4 = vcombine.low %v895_v62, %v903_v7  ;;  %v8130_v5 = vcombine.low %v899_v31, %v907_v14  ;;  %v9822_v62 = vld [vmem:[%s11541_s1 + $0x320] sm:$0xff]   ;;  %v9825_v44 = vld [vmem:[%s11541_s1 + $0x130] sm:$0xff]  }
 0x14a   : > { %6251 = vmatprep.mubr.bf16.mxu0 %v8115_v60  ;;  %5346 = vmatprep.subr.bf16.mxu1 %v10119_v1  ;;  %v9889_v7 = vld [vmem:[%s10238_s6 + $0x100] sm:$0xff]  ;;  %v935_v31 = vunpack.c.h.s8.bf16 %v9890_v23  ;;  %v931_v14 = vunpack.c.h.s8.bf16 %v9891_v13 }
 0x14b   : > { %6502 = vmatprep.subr.bf16.mxu0 %v10119_v1  ;;  %v8139_v60 = vcombine.high %v911_v43, %v919_v45  ;;  %v8147_v61 = vcombine.high %v915_v47, %v923_v49  ;;  %v9829_v23 = vld [vmem:[%s11541_s1 + $0x140] sm:$0xff]  }
 0x14c   : > { %5347 = vmatpush1.bf16.msra.mxu1 %v9815_v8  ;;  %v927_v8 = vunpack.c.h.s8.bf16 %v9889_v7 }
 0x14d   : > { %6503 = vmatpush1.bf16.msra.mxu0 %v9816_v34  ;;  %5348 = vmatprep.subr.bf16.mxu1 %v10119_v1  ;;  %v9892_v34 = vld [vmem:[%s10238_s6 + $0x130] sm:$0xff] }
 0x14e   : > { %6504 = vmatprep.subr.bf16.mxu0 %v10119_v1 }
 0x14f   : > { %5096 = vmatmul.mubr.bf16.gmra.mrb[4].mxu1 %v8106_v36  ;;  %v939_v36 = vunpack.c.h.s8.bf16 %v9892_v34 }
 0x150   : > { %6252 = vmatmul.mubr.bf16.gmra.mrb[4].mxu0 %v8114_v15  ;;  %5103 = vmatprep.mubr.bf16.mxu1 %v8123_v16  ;;  %v9823_v15 = vld [vmem:[%s11541_s1 + $0x128] sm:$0xff]  }
 0x151   : > { %6259 = vmatprep.mubr.bf16.mxu0 %v8131_v27  ;;  %5349 = vmatpush1.bf16.msra.mxu1 %v9817_v28  ;;  %v9824_v16 = vld [vmem:[%s11541_s1 + $0x328] sm:$0xff]   ;;  %v8138_v27 = vcombine.low %v911_v43, %v919_v45  ;;  %v8146_v28 = vcombine.low %v915_v47, %v923_v49  ;;  %v8163_v38 = vcombine.high %v931_v14, %v939_v36  ;;  %v9826_v43 = vld [vmem:[%s11541_s1 + $0x330] sm:$0xff]   ;;  %v9893_v45 = vld [vmem:[%s10238_s6 + $0x140] sm:$0xff] }
 0x152   : > { %6505 = vmatpush1.bf16.msra.mxu0 %v9818_v30  ;;  %5350 = vmatprep.subr.bf16.mxu1 %v10119_v1  ;;  %v8155_v30 = vcombine.high %v927_v8, %v935_v31  ;;  %v943_v46 = vunpack.c.h.s8.bf16 %v9893_v45  ;;  %v9894_v47 = vld [vmem:[%s10238_s6 + $0x160] sm:$0xff]  ;;  %v9895_v49 = vld [vmem:[%s10238_s6 + $0x150] sm:$0xff] }
 0x153   : > { %6506 = vmatprep.subr.bf16.mxu0 %v10119_v1  ;;  %v951_v48 = vunpack.c.h.s8.bf16 %v9894_v47  ;;  %v9833_v47 = vld [vmem:[%s11541_s1 + $0x150] sm:$0xff]  }
 0x155   : > { %5351 = vmatpush1.bf16.msra.mxu1 %v9819_v58  ;;  %v947_v58 = vunpack.c.h.s8.bf16 %v9895_v49 }
 0x156   : > { %6507 = vmatpush1.bf16.msra.mxu0 %v9820_v59  ;;  %5352 = vmatprep.subr.bf16.mxu1 %v10119_v1  ;;  %v9896_v59 = vld [vmem:[%s10238_s6 + $0x170] sm:$0xff] }
 0x157   : > { %5104 = vmatmul.mubr.bf16.gmra.mrb[8].mxu1 %v8122_v4  ;;  %6508 = vmatprep.subr.bf16.mxu0 %v10119_v1  ;;  %v955_v4 = vunpack.c.h.s8.bf16 %v9896_v59 }
 0x158   : > { %6260 = vmatmul.mubr.bf16.gmra.mrb[8].mxu0 %v8130_v5  ;;  %5111 = vmatprep.mubr.bf16.mxu1 %v8139_v60  ;;  %v9827_v5 = vld [vmem:[%s11541_s1 + $0x138] sm:$0xff]  }
 0x159   : > { %6267 = vmatprep.mubr.bf16.mxu0 %v8147_v61  ;;  %5353 = vmatpush1.bf16.msra.mxu1 %v9821_v6  ;;  %v9828_v60 = vld [vmem:[%s11541_s1 + $0x338] sm:$0xff]   ;;  %v8154_v61 = vcombine.low %v927_v8, %v935_v31  ;;  %v8162_v6 = vcombine.low %v931_v14, %v939_v36  ;;  %v8179_v7 = vcombine.high %v947_v58, %v955_v4  ;;  %v9830_v8 = vld [vmem:[%s11541_s1 + $0x340] sm:$0xff]   ;;  %v9899_v36 = vld [vmem:[%s10238_s6 + $0x190] sm:$0xff] }
 0x15a   : > { %6509 = vmatpush1.bf16.msra.mxu0 %v9822_v62  ;;  %5354 = vmatprep.subr.bf16.mxu1 %v10119_v1  ;;  %v8171_v62 = vcombine.high %v943_v46, %v951_v48  ;;  %v9897_v31 = vld [vmem:[%s10238_s6 + $0x180] sm:$0xff] }
 0x15b   : > { %6510 = vmatprep.subr.bf16.mxu0 %v10119_v1  ;;  %v959_v13 = vunpack.c.h.s8.bf16 %v9897_v31  ;;  %v9898_v14 = vld [vmem:[%s10238_s6 + $0x1a0] sm:$0xff] }
 0x15c   : > { %v967_v34 = vunpack.c.h.s8.bf16 %v9898_v14  ;;  %v9906_v14 = vld [vmem:[%s10238_s6 + $0x220] sm:$0xff] }
 0x15d   : > { %5355 = vmatpush1.bf16.msra.mxu1 %v9823_v15  ;;  %v963_v15 = vunpack.c.h.s8.bf16 %v9899_v36  ;;  %v999_v36 = vunpack.c.h.s8.bf16 %v9906_v14  ;;  %v9837_v14 = vld [vmem:[%s11541_s1 + $0x160] sm:$0xff]  }
 0x15e   : > { %6511 = vmatpush1.bf16.msra.mxu0 %v9824_v16  ;;  %5356 = vmatprep.subr.bf16.mxu1 %v10119_v1  ;;  %v9900_v16 = vld [vmem:[%s10238_s6 + $0x1b0] sm:$0xff] }
 0x15f   : > { %5112 = vmatmul.mubr.bf16.gmra.mrb[12].mxu1 %v8138_v27  ;;  %6512 = vmatprep.subr.bf16.mxu0 %v10119_v1  ;;  %v971_v27 = vunpack.c.h.s8.bf16 %v9900_v16  ;;  %v9835_v16 = vld [vmem:[%s11541_s1 + $0x158] sm:$0xff]  }
 0x160   : > { %6268 = vmatmul.mubr.bf16.gmra.mrb[12].mxu0 %v8146_v28  ;;  %5119 = vmatprep.mubr.bf16.mxu1 %v8155_v30  ;;  %v9831_v28 = vld [vmem:[%s11541_s1 + $0x148] sm:$0xff]  }
 0x161   : > { %6275 = vmatprep.mubr.bf16.mxu0 %v8163_v38  ;;  %5357 = vmatpush1.bf16.msra.mxu1 %v9825_v44  ;;  %v9832_v30 = vld [vmem:[%s11541_s1 + $0x348] sm:$0xff]   ;;  %v8170_v38 = vcombine.low %v943_v46, %v951_v48  ;;  %v8178_v44 = vcombine.low %v947_v58, %v955_v4  ;;  %v8195_v45 = vcombine.high %v963_v15, %v971_v27  ;;  %v9834_v46 = vld [vmem:[%s11541_s1 + $0x350] sm:$0xff]   ;;  %v9901_v48 = vld [vmem:[%s10238_s6 + $0x1c0] sm:$0xff] }
 0x162   : > { %6513 = vmatpush1.bf16.msra.mxu0 %v9826_v43  ;;  %5358 = vmatprep.subr.bf16.mxu1 %v10119_v1  ;;  %v8187_v43 = vcombine.high %v959_v13, %v967_v34  ;;  %v975_v49 = vunpack.c.h.s8.bf16 %v9901_v48  ;;  %v9902_v58 = vld [vmem:[%s10238_s6 + $0x1e0] sm:$0xff]  ;;  %v9903_v4 = vld [vmem:[%s10238_s6 + $0x1d0] sm:$0xff] }
 0x163   : > { %6514 = vmatprep.subr.bf16.mxu0 %v10119_v1  ;;  %v983_v59 = vunpack.c.h.s8.bf16 %v9902_v58  ;;  %v9911_v58 = vld [vmem:[%s10238_s6 + $0x250] sm:$0xff] }
 0x165   : > { %5359 = vmatpush1.bf16.msra.mxu1 %v9827_v5  ;;  %v979_v5 = vunpack.c.h.s8.bf16 %v9903_v4 }
 0x166   : > { %6515 = vmatpush1.bf16.msra.mxu0 %v9828_v60  ;;  %5360 = vmatprep.subr.bf16.mxu1 %v10119_v1  ;;  %v9904_v60 = vld [vmem:[%s10238_s6 + $0x1f0] sm:$0xff] }
 0x167   : > { %5120 = vmatmul.mubr.bf16.gmra.mrb[16].mxu1 %v8154_v61  ;;  %6516 = vmatprep.subr.bf16.mxu0 %v10119_v1  ;;  %v987_v61 = vunpack.c.h.s8.bf16 %v9904_v60 }
 0x168   : > { %6276 = vmatmul.mubr.bf16.gmra.mrb[16].mxu0 %v8162_v6  ;;  %5127 = vmatprep.mubr.bf16.mxu1 %v8171_v62  ;;  %v8186_v6 = vcombine.low %v959_v13, %v967_v34  ;;  %v8194_v62 = vcombine.low %v963_v15, %v971_v27  ;;  %v9836_v13 = vld [vmem:[%s11541_s1 + $0x358] sm:$0xff]   ;;  %v9907_v34 = vld [vmem:[%s10238_s6 + $0x210] sm:$0xff] }
 0x169   : > { %6283 = vmatprep.mubr.bf16.mxu0 %v8179_v7  ;;  %5361 = vmatpush1.bf16.msra.mxu1 %v9829_v23  ;;  %v8203_v7 = vcombine.high %v975_v49, %v983_v59  ;;  %v8211_v23 = vcombine.high %v979_v5, %v987_v61  ;;  %v995_v15 = vunpack.c.h.s8.bf16 %v9907_v34  ;;  %v9908_v27 = vld [vmem:[%s10238_s6 + $0x230] sm:$0xff] }
 0x16a   : > { %6517 = vmatpush1.bf16.msra.mxu0 %v9830_v8  ;;  %5362 = vmatprep.subr.bf16.mxu1 %v10119_v1  ;;  %v9905_v8 = vld [vmem:[%s10238_s6 + $0x200] sm:$0xff] }
 0x16b   : > { %6518 = vmatprep.subr.bf16.mxu0 %v10119_v1  ;;  %v991_v31 = vunpack.c.h.s8.bf16 %v9905_v8 }
 0x16d   : > { %5363 = vmatpush1.bf16.msra.mxu1 %v9831_v28  ;;  %v1003_v28 = vunpack.c.h.s8.bf16 %v9908_v27  ;;  %v8218_v60 = vcombine.low %v991_v31, %v999_v36 }
 0x16e   : > { %6519 = vmatpush1.bf16.msra.mxu0 %v9832_v30  ;;  %5364 = vmatprep.subr.bf16.mxu1 %v10119_v1  ;;  %v8202_v30 = vcombine.low %v975_v49, %v983_v59  ;;  %v1011_v49 = vunpack.c.h.s8.bf16 %v9911_v58  ;;  %v9912_v59 = vld [vmem:[%s10238_s6 + $0x270] sm:$0xff] }
 0x16f   : > { %5128 = vmatmul.mubr.bf16.gmra.mrb[20].mxu1 %v8170_v38  ;;  %6520 = vmatprep.subr.bf16.mxu0 %v10119_v1  ;;  %v8210_v38 = vcombine.low %v979_v5, %v987_v61  ;;  %v1019_v4 = vunpack.c.h.s8.bf16 %v9912_v59  ;;  %v8226_v5 = vcombine.low %v995_v15, %v1003_v28 }
 0x170   : > { %6284 = vmatmul.mubr.bf16.gmra.mrb[20].mxu0 %v8178_v44  ;;  %5135 = vmatprep.mubr.bf16.mxu1 %v8187_v43  ;;  %v8219_v44 = vcombine.high %v991_v31, %v999_v36  ;;  %v8227_v43 = vcombine.high %v995_v15, %v1003_v28  ;;  %v9915_v31 = vld [vmem:[%s10238_s6 + $0x290] sm:$0xff] }
 0x171   : > { %6291 = vmatprep.mubr.bf16.mxu0 %v8195_v45  ;;  %5365 = vmatpush1.bf16.msra.mxu1 %v9833_v47  ;;  %v9909_v45 = vld [vmem:[%s10238_s6 + $0x240] sm:$0xff]  ;;  %v1027_v36 = vunpack.c.h.s8.bf16 %v9915_v31  ;;  %v8242_v27 = vcombine.low %v1011_v49, %v1019_v4 }
 0x172   : > { %6521 = vmatpush1.bf16.msra.mxu0 %v9834_v46  ;;  %5366 = vmatprep.subr.bf16.mxu1 %v10119_v1  ;;  %v1007_v47 = vunpack.c.h.s8.bf16 %v9909_v45  ;;  %v9910_v46 = vld [vmem:[%s10238_s6 + $0x260] sm:$0xff] }
 0x173   : > { %6522 = vmatprep.subr.bf16.mxu0 %v10119_v1  ;;  %v1015_v48 = vunpack.c.h.s8.bf16 %v9910_v46  ;;  %v9919_v46 = vld [vmem:[%s10238_s6 + $0x2d0] sm:$0xff] }
 0x175   : > { %5367 = vmatpush1.bf16.msra.mxu1 %v9835_v16  ;;  %v8235_v61 = vcombine.high %v1007_v47, %v1015_v48  ;;  %v9838_v16 = vld [vmem:[%s11541_s1 + $0x360] sm:$0xff]   ;;  %v8234_v15 = vcombine.low %v1007_v47, %v1015_v48  ;;  %v1043_v47 = vunpack.c.h.s8.bf16 %v9919_v46  ;;  %v9920_v48 = vld [vmem:[%s10238_s6 + $0x2f0] sm:$0xff] }
 0x176   : > { %6523 = vmatpush1.bf16.msra.mxu0 %v9836_v13  ;;  %5368 = vmatprep.subr.bf16.mxu1 %v10119_v1  ;;  %v9916_v13 = vld [vmem:[%s10238_s6 + $0x2b0] sm:$0xff]  ;;  %v1051_v58 = vunpack.c.h.s8.bf16 %v9920_v48 }
 0x177   : > { %5136 = vmatmul.mubr.bf16.gmra.mrb[24].mxu1 %v8186_v6  ;;  %6524 = vmatprep.subr.bf16.mxu0 %v10119_v1  ;;  %v8243_v6 = vcombine.high %v1011_v49, %v1019_v4  ;;  %v1035_v34 = vunpack.c.h.s8.bf16 %v9916_v13 }
 0x178   : > { %6292 = vmatmul.mubr.bf16.gmra.mrb[24].mxu0 %v8194_v62  ;;  %5143 = vmatprep.mubr.bf16.mxu1 %v8203_v7  ;;  %v9913_v62 = vld [vmem:[%s10238_s6 + $0x280] sm:$0xff]  ;;  %v8274_v13 = vcombine.low %v1043_v47, %v1051_v58 }
 0x179   : > { %6299 = vmatprep.mubr.bf16.mxu0 %v8211_v23  ;;  %v1023_v7 = vunpack.c.h.s8.bf16 %v9913_v62  ;;  %v9914_v23 = vld [vmem:[%s10238_s6 + $0x2a0] sm:$0xff]  ;;  %5369 = vmatpush1.bf16.msra.mxu1 %v9837_v14  ;;  %v8258_v49 = vcombine.low %v1027_v36, %v1035_v34  ;;  %v9840_v14 = vld [vmem:[%s11541_s1 + $0x368] sm:$0xff]  }
 0x17a   : > { %v1031_v8 = vunpack.c.h.s8.bf16 %v9914_v23  ;;  %6525 = vmatpush1.bf16.msra.mxu0 %v9838_v16  ;;  %5370 = vmatprep.subr.bf16.mxu1 %v10119_v1  ;;  %v9839_v23 = vld [vmem:[%s11541_s1 + $0x168] sm:$0xff]   ;;  %v9924_v16 = vld [vmem:[%s10238_s6 + $0x330] sm:$0xff] }
 0x17b   : > { %6526 = vmatprep.subr.bf16.mxu0 %v10119_v1  ;;  %v1067_v31 = vunpack.c.h.s8.bf16 %v9924_v16 }
 0x17c   : > { %v8251_v28 = vcombine.high %v1023_v7, %v1031_v8  ;;  %v8250_v59 = vcombine.low %v1023_v7, %v1031_v8  ;;  %v9923_v7 = vld [vmem:[%s10238_s6 + $0x310] sm:$0xff] }
 0x17d   : > { %v1059_v8 = vunpack.c.h.s8.bf16 %v9923_v7  ;;  %5371 = vmatpush1.bf16.msra.mxu1 %v9839_v23  ;;  %v9842_v23 = vld [vmem:[%s11541_s1 + $0x370] sm:$0xff]  }
 0x17e   : > { %6527 = vmatpush1.bf16.msra.mxu0 %v9840_v14  ;;  %5372 = vmatprep.subr.bf16.mxu1 %v10119_v1  ;;  %v9932_v14 = vld [vmem:[%s10238_s6 + $0x3b0] sm:$0xff] }
 0x17f   : > { %5144 = vmatmul.mubr.bf16.gmra.mrb[28].mxu1 %v8202_v30  ;;  %v8259_v30 = vcombine.high %v1027_v36, %v1035_v34  ;;  %6528 = vmatprep.subr.bf16.mxu0 %v10119_v1  ;;  %v1099_v7 = vunpack.c.h.s8.bf16 %v9932_v14 }
 0x180   : > { %6300 = vmatmul.mubr.bf16.gmra.mrb[28].mxu0 %v8210_v38  ;;  %5151 = vmatprep.mubr.bf16.mxu1 %v8219_v44  ;;  %v9917_v38 = vld [vmem:[%s10238_s6 + $0x2c0] sm:$0xff] }
 0x181   : > { %6307 = vmatprep.mubr.bf16.mxu0 %v8227_v43  ;;  %v1039_v44 = vunpack.c.h.s8.bf16 %v9917_v38  ;;  %v9918_v43 = vld [vmem:[%s10238_s6 + $0x2e0] sm:$0xff] }
 0x182   : > { %v1047_v45 = vunpack.c.h.s8.bf16 %v9918_v43  ;;  %v9927_v43 = vld [vmem:[%s10238_s6 + $0x350] sm:$0xff]  ;;  %6529 = vmatpush1.bf16.msra.mxu0 %v9842_v23 }
 0x183   : > { %6530 = vmatprep.subr.bf16.mxu0 %v10119_v1  ;;  %v9940_v23 = vld [vmem:[%s10238_s6 + $0x430] sm:$0xff] }
 0x184   : > { %v8267_v4 = vcombine.high %v1039_v44, %v1047_v45  ;;  %v8266_v36 = vcombine.low %v1039_v44, %v1047_v45  ;;  %v1075_v44 = vunpack.c.h.s8.bf16 %v9927_v43  ;;  %v9928_v45 = vld [vmem:[%s10238_s6 + $0x370] sm:$0xff] }
 0x185   : > { %v1083_v46 = vunpack.c.h.s8.bf16 %v9928_v45 }
 0x187   : > { %5152 = vmatmul.mubr.bf16.gmra.mrb[32].mxu1 %v8218_v60  ;;  %v8275_v60 = vcombine.high %v1043_v47, %v1051_v58  ;;  %v8290_v47 = vcombine.low %v1059_v8, %v1067_v31  ;;  %v8306_v16 = vcombine.low %v1075_v44, %v1083_v46 }
 0x188   : > { %6308 = vmatmul.mubr.bf16.gmra.mrb[32].mxu0 %v8226_v5  ;;  %5159 = vmatprep.mubr.bf16.mxu1 %v8235_v61  ;;  %v9921_v5 = vld [vmem:[%s10238_s6 + $0x300] sm:$0xff] }
 0x189   : > { %6315 = vmatprep.mubr.bf16.mxu0 %v8243_v6  ;;  %v1055_v61 = vunpack.c.h.s8.bf16 %v9921_v5  ;;  %v9922_v6 = vld [vmem:[%s10238_s6 + $0x320] sm:$0xff] }
 0x18a   : > { %v1063_v62 = vunpack.c.h.s8.bf16 %v9922_v6  ;;  %v9841_v6 = vld [vmem:[%s11541_s1 + $0x170] sm:$0xff]  }
 0x18b   : > { %5373 = vmatpush1.bf16.msra.mxu1 %v9841_v6  ;;  %v9844_v6 = vld [vmem:[%s11541_s1 + $0x378] sm:$0xff]  }
 0x18c   : > { %v8283_v34 = vcombine.high %v1055_v61, %v1063_v62  ;;  %v8282_v48 = vcombine.low %v1055_v61, %v1063_v62  ;;  %v9931_v61 = vld [vmem:[%s10238_s6 + $0x390] sm:$0xff]  ;;  %5374 = vmatprep.subr.bf16.mxu1 %v10119_v1  ;;  %6531 = vmatpush1.bf16.msra.mxu0 %v9844_v6 }
 0x18d   : > { %v1091_v62 = vunpack.c.h.s8.bf16 %v9931_v61  ;;  %v1131_v61 = vunpack.c.h.s8.bf16 %v9940_v23  ;;  %6789 = vmatprep.subr.bf16.mxu0 %v10119_v1  ;;  %v9948_v6 = vld [vmem:[%s10238_s6 + $0x4b0] sm:$0xff] }
 0x18f   : > { %5160 = vmatmul.mubr.bf16.gmra.mrb[36].mxu1 %v8234_v15  ;;  %v8291_v15 = vcombine.high %v1059_v8, %v1067_v31 }
 0x190   : > { %6316 = vmatmul.mubr.bf16.gmra.mrb[36].mxu0 %v8242_v27  ;;  %5167 = vmatprep.mubr.bf16.mxu1 %v8251_v28  ;;  %v9925_v27 = vld [vmem:[%s10238_s6 + $0x340] sm:$0xff] }
 0x191   : > { %6323 = vmatprep.mubr.bf16.mxu0 %v8259_v30  ;;  %v1071_v28 = vunpack.c.h.s8.bf16 %v9925_v27  ;;  %v9926_v30 = vld [vmem:[%s10238_s6 + $0x360] sm:$0xff] }
 0x192   : > { %v1079_v38 = vunpack.c.h.s8.bf16 %v9926_v30  ;;  %v9935_v30 = vld [vmem:[%s10238_s6 + $0x3d0] sm:$0xff] }
 0x194   : > { %v8299_v58 = vcombine.high %v1071_v28, %v1079_v38  ;;  %v8298_v8 = vcombine.low %v1071_v28, %v1079_v38  ;;  %v1107_v28 = vunpack.c.h.s8.bf16 %v9935_v30  ;;  %v9936_v38 = vld [vmem:[%s10238_s6 + $0x3f0] sm:$0xff] }
 0x195   : > { %v1115_v43 = vunpack.c.h.s8.bf16 %v9936_v38 }
 0x197   : > { %5168 = vmatmul.mubr.bf16.gmra.mrb[40].mxu1 %v8250_v59  ;;  %v8307_v59 = vcombine.high %v1075_v44, %v1083_v46  ;;  %v8322_v44 = vcombine.low %v1091_v62, %v1099_v7  ;;  %v8338_v14 = vcombine.low %v1107_v28, %v1115_v43 }
 0x198   : > { %6324 = vmatmul.mubr.bf16.gmra.mrb[40].mxu0 %v8258_v49  ;;  %5175 = vmatprep.mubr.bf16.mxu1 %v8267_v4  ;;  %v9929_v49 = vld [vmem:[%s10238_s6 + $0x380] sm:$0xff] }
 0x199   : > { %6331 = vmatprep.mubr.bf16.mxu0 %v8275_v60  ;;  %v1087_v4 = vunpack.c.h.s8.bf16 %v9929_v49  ;;  %v9930_v60 = vld [vmem:[%s10238_s6 + $0x3a0] sm:$0xff] }
 0x19a   : > { %v1095_v5 = vunpack.c.h.s8.bf16 %v9930_v60  ;;  %v9843_v60 = vld [vmem:[%s11541_s1 + $0x178] sm:$0xff]  }
 0x19b   : > { %5375 = vmatpush1.bf16.msra.mxu1 %v9843_v60 }
 0x19c   : > { %v8315_v31 = vcombine.high %v1087_v4, %v1095_v5  ;;  %v8314_v45 = vcombine.low %v1087_v4, %v1095_v5  ;;  %v9939_v4 = vld [vmem:[%s10238_s6 + $0x410] sm:$0xff]  ;;  %5633 = vmatprep.subr.bf16.mxu1 %v10119_v1 }
 0x19d   : > { %v1123_v5 = vunpack.c.h.s8.bf16 %v9939_v4  ;;  %v1163_v4 = vunpack.c.h.s8.bf16 %v9948_v6 }
 0x19f   : > { %5176 = vmatmul.mubr.bf16.gmra.mrb[44].mxu1 %v8266_v36  ;;  %v8323_v36 = vcombine.high %v1091_v62, %v1099_v7 }
 0x1a0   : > { %6332 = vmatmul.mubr.bf16.gmra.mrb[44].mxu0 %v8274_v13  ;;  %5183 = vmatprep.mubr.bf16.mxu1 %v8283_v34  ;;  %v9933_v13 = vld [vmem:[%s10238_s6 + $0x3c0] sm:$0xff] }
 0x1a1   : > { %6339 = vmatprep.mubr.bf16.mxu0 %v8291_v15  ;;  %v1103_v34 = vunpack.c.h.s8.bf16 %v9933_v13  ;;  %v9934_v15 = vld [vmem:[%s10238_s6 + $0x3e0] sm:$0xff] }
 0x1a2   : > { %v1111_v27 = vunpack.c.h.s8.bf16 %v9934_v15  ;;  %v9943_v15 = vld [vmem:[%s10238_s6 + $0x450] sm:$0xff] }
 0x1a4   : > { %v8331_v46 = vcombine.high %v1103_v34, %v1111_v27  ;;  %v8330_v62 = vcombine.low %v1103_v34, %v1111_v27  ;;  %v1139_v34 = vunpack.c.h.s8.bf16 %v9943_v15  ;;  %v9944_v27 = vld [vmem:[%s10238_s6 + $0x470] sm:$0xff] }
 0x1a5   : > { %v1147_v30 = vunpack.c.h.s8.bf16 %v9944_v27 }
 0x1a7   : > { %5184 = vmatmul.mubr.bf16.gmra.mrb[48].mxu1 %v8282_v48  ;;  %v8339_v48 = vcombine.high %v1107_v28, %v1115_v43  ;;  %v8354_v28 = vcombine.low %v1123_v5, %v1131_v61 }
 0x1a8   : > { %6340 = vmatmul.mubr.bf16.gmra.mrb[48].mxu0 %v8290_v47  ;;  %5191 = vmatprep.mubr.bf16.mxu1 %v8299_v58  ;;  %v9937_v47 = vld [vmem:[%s10238_s6 + $0x400] sm:$0xff] }
 0x1a9   : > { %6347 = vmatprep.mubr.bf16.mxu0 %v8307_v59  ;;  %v1119_v58 = vunpack.c.h.s8.bf16 %v9937_v47  ;;  %v9938_v59 = vld [vmem:[%s10238_s6 + $0x420] sm:$0xff] }
 0x1aa   : > { %v1127_v49 = vunpack.c.h.s8.bf16 %v9938_v59  ;;  %v9947_v59 = vld [vmem:[%s10238_s6 + $0x490] sm:$0xff] }
 0x1ab   : > { %v1155_v60 = vunpack.c.h.s8.bf16 %v9947_v59 }
 0x1ac   : > { %v8347_v7 = vcombine.high %v1119_v58, %v1127_v49  ;;  %v8346_v38 = vcombine.low %v1119_v58, %v1127_v49  ;;  %v8370_v49 = vcombine.low %v1139_v34, %v1147_v30 }
 0x1ad   : > { %v8387_v23 = vcombine.high %v1155_v60, %v1163_v4 }
 0x1af   : > { %5192 = vmatmul.mubr.bf16.gmra.mrb[52].mxu1 %v8298_v8  ;;  %v8355_v8 = vcombine.high %v1123_v5, %v1131_v61  ;;  %v9949_v61 = vld [vmem:[%s10238_s6 + $0x4c0] sm:$0xff] }
 0x1b0   : > { %6348 = vmatmul.mubr.bf16.gmra.mrb[52].mxu0 %v8306_v16  ;;  %5199 = vmatprep.mubr.bf16.mxu1 %v8315_v31  ;;  %v9941_v16 = vld [vmem:[%s10238_s6 + $0x440] sm:$0xff] }
 0x1b1   : > { %6355 = vmatprep.mubr.bf16.mxu0 %v8323_v36  ;;  %v1135_v31 = vunpack.c.h.s8.bf16 %v9941_v16  ;;  %v9942_v36 = vld [vmem:[%s10238_s6 + $0x460] sm:$0xff] }
 0x1b2   : > { %v1143_v13 = vunpack.c.h.s8.bf16 %v9942_v36  ;;  %v9952_v36 = vld [vmem:[%s10238_s6 + $0x4f0] sm:$0xff] }
 0x1b3   : > { %v1179_v15 = vunpack.c.h.s8.bf16 %v9952_v36 }
 0x1b4   : > { %v8363_v43 = vcombine.high %v1135_v31, %v1143_v13  ;;  %v8362_v58 = vcombine.low %v1135_v31, %v1143_v13  ;;  %v8386_v13 = vcombine.low %v1155_v60, %v1163_v4  ;;  %v9957_v4 = vld [vmem:[%s10238_s6 + $0x540] sm:$0xff] }
 0x1b7   : > { %5200 = vmatmul.mubr.bf16.gmra.mrb[56].mxu1 %v8314_v45  ;;  %v8371_v45 = vcombine.high %v1139_v34, %v1147_v30  ;;  %v9953_v30 = vld [vmem:[%s10238_s6 + $0x500] sm:$0xff] }
 0x1b8   : > { %6356 = vmatmul.mubr.bf16.gmra.mrb[56].mxu0 %v8322_v44  ;;  %5207 = vmatprep.mubr.bf16.mxu1 %v8331_v46  ;;  %v9945_v44 = vld [vmem:[%s10238_s6 + $0x480] sm:$0xff] }
 0x1b9   : > { %6363 = vmatprep.mubr.bf16.mxu0 %v8339_v48  ;;  %v1151_v46 = vunpack.c.h.s8.bf16 %v9945_v44  ;;  %v9946_v48 = vld [vmem:[%s10238_s6 + $0x4a0] sm:$0xff] }
 0x1ba   : > { %v1159_v47 = vunpack.c.h.s8.bf16 %v9946_v48  ;;  %v9956_v48 = vld [vmem:[%s10238_s6 + $0x530] sm:$0xff] }
 0x1bb   : > { %v1195_v59 = vunpack.c.h.s8.bf16 %v9956_v48 }
 0x1bc   : > { %v8379_v5 = vcombine.high %v1151_v46, %v1159_v47  ;;  %v8378_v31 = vcombine.low %v1151_v46, %v1159_v47 }
 0x1bf   : > { %5208 = vmatmul.mubr.bf16.gmra.mrb[60].mxu1 %v8330_v62  ;;  %v1167_v62 = vunpack.c.h.s8.bf16 %v9949_v61 }
 0x1c0   : > { %6364 = vmatmul.mubr.bf16.gmra.mrb[60].mxu0 %v8338_v14  ;;  %5215 = vmatprep.mubr.bf16.mxu1 %v8347_v7  ;;  %v9950_v14 = vld [vmem:[%s10238_s6 + $0x4e0] sm:$0xff] }
 0x1c1   : > { %6371 = vmatprep.mubr.bf16.mxu0 %v8355_v8  ;;  %v1175_v7 = vunpack.c.h.s8.bf16 %v9950_v14  ;;  %v9951_v8 = vld [vmem:[%s10238_s6 + $0x4d0] sm:$0xff] }
 0x1c2   : > { %v1171_v16 = vunpack.c.h.s8.bf16 %v9951_v8  ;;  %v9960_v14 = vld [vmem:[%s10238_s6 + $0x570] sm:$0xff] }
 0x1c3   : > { %v8395_v34 = vcombine.high %v1167_v62, %v1175_v7  ;;  %v8394_v46 = vcombine.low %v1167_v62, %v1175_v7  ;;  %v1211_v8 = vunpack.c.h.s8.bf16 %v9960_v14 }
 0x1c4   : > { %v8403_v27 = vcombine.high %v1171_v16, %v1179_v15  ;;  %v8402_v47 = vcombine.low %v1171_v16, %v1179_v15  ;;  %v9961_v15 = vld [vmem:[%s10238_s6 + $0x580] sm:$0xff] }
 0x1c7   : > { %5216 = vmatmul.mubr.bf16.gmra.mrb[64].mxu1 %v8346_v38  ;;  %v1183_v38 = vunpack.c.h.s8.bf16 %v9953_v30 }
 0x1c8   : > { %6372 = vmatmul.mubr.bf16.gmra.mrb[64].mxu0 %v8354_v28  ;;  %5223 = vmatprep.mubr.bf16.mxu1 %v8363_v43  ;;  %v9954_v28 = vld [vmem:[%s10238_s6 + $0x520] sm:$0xff] }
 0x1c9   : > { %6379 = vmatprep.mubr.bf16.mxu0 %v8371_v45  ;;  %v1191_v43 = vunpack.c.h.s8.bf16 %v9954_v28  ;;  %v9955_v45 = vld [vmem:[%s10238_s6 + $0x510] sm:$0xff] }
 0x1ca   : > { %v1187_v44 = vunpack.c.h.s8.bf16 %v9955_v45  ;;  %v9964_v28 = vld [vmem:[%s10238_s6 + $0x5b0] sm:$0xff] }
 0x1cb   : > { %v8411_v60 = vcombine.high %v1183_v38, %v1191_v43  ;;  %v8410_v62 = vcombine.low %v1183_v38, %v1191_v43  ;;  %v1227_v45 = vunpack.c.h.s8.bf16 %v9964_v28 }
 0x1cc   : > { %v8419_v6 = vcombine.high %v1187_v44, %v1195_v59  ;;  %v8418_v7 = vcombine.low %v1187_v44, %v1195_v59  ;;  %v1231_v44 = vunpack.c.h.s8.bf16 %v10575_v20  ;;  %v1239_v59 = vunpack.c.h.s8.bf16 %v10578_v19 }
 0x1cd   : > { %v1251_v20 = vunpack.c.h.s8.bf16 %v10591_v22  ;;  %v1259_v19 = vunpack.c.h.s8.bf16 %v10594_v24 }
 0x1ce   : > { %v8459_v14 = vcombine.high %v1231_v44, %v1239_v59 }
 0x1cf   : > { %5224 = vmatmul.mubr.bf16.gmra.mrb[68].mxu1 %v8362_v58  ;;  %v1199_v58 = vunpack.c.h.s8.bf16 %v9957_v4  ;;  %v8482_v22 = vcombine.low %v1251_v20, %v1259_v19 }
 0x1d0   : > { %6380 = vmatmul.mubr.bf16.gmra.mrb[68].mxu0 %v8370_v49  ;;  %5231 = vmatprep.mubr.bf16.mxu1 %v8379_v5  ;;  %v9958_v49 = vld [vmem:[%s10238_s6 + $0x560] sm:$0xff] }
 0x1d1   : > { %6387 = vmatprep.mubr.bf16.mxu0 %v8387_v23  ;;  %v1207_v5 = vunpack.c.h.s8.bf16 %v9958_v49  ;;  %v9959_v23 = vld [vmem:[%s10238_s6 + $0x550] sm:$0xff] }
 0x1d2   : > { %v1203_v61 = vunpack.c.h.s8.bf16 %v9959_v23 }
 0x1d3   : > { %v8427_v16 = vcombine.high %v1199_v58, %v1207_v5  ;;  %v8426_v48 = vcombine.low %v1199_v58, %v1207_v5  ;;  %v1247_v58 = vunpack.c.h.s8.bf16 %v10585_v17  ;;  %v1255_v5 = vunpack.c.h.s8.bf16 %v10588_v18 }
 0x1d4   : > { %v8435_v36 = vcombine.high %v1203_v61, %v1211_v8  ;;  %v1267_v17 = vunpack.c.h.s8.bf16 %v10607_v41  ;;  %v1275_v18 = vunpack.c.h.s8.bf16 %v10610_v42 }
 0x1d6   : > { %v8499_v24 = vcombine.high %v1267_v17, %v1275_v18  ;;  %v8498_v41 = vcombine.low %v1267_v17, %v1275_v18 }
 0x1d7   : > { %5232 = vmatmul.mubr.bf16.gmra.mrb[72].mxu1 %v8378_v31  ;;  %v1215_v31 = vunpack.c.h.s8.bf16 %v9961_v15  ;;  %v1271_v15 = vunpack.c.h.s8.bf16 %v10604_v40  ;;  %v1291_v40 = vunpack.c.h.s8.bf16 %v10626_v54 }
 0x1d8   : > { %6388 = vmatmul.mubr.bf16.gmra.mrb[72].mxu0 %v8386_v13  ;;  %5239 = vmatprep.mubr.bf16.mxu1 %v8395_v34  ;;  %v9962_v13 = vld [vmem:[%s10238_s6 + $0x5a0] sm:$0xff] }
 0x1d9   : > { %6395 = vmatprep.mubr.bf16.mxu0 %v8403_v27  ;;  %v1223_v34 = vunpack.c.h.s8.bf16 %v9962_v13  ;;  %v9963_v27 = vld [vmem:[%s10238_s6 + $0x590] sm:$0xff] }
 0x1da   : > { %v1219_v30 = vunpack.c.h.s8.bf16 %v9963_v27  ;;  %v1287_v27 = vunpack.c.h.s8.bf16 %v10620_v52  ;;  %v1307_v52 = vunpack.c.h.s8.bf16 %v10642_v3 }
 0x1db   : > { %v8443_v38 = vcombine.high %v1215_v31, %v1223_v34  ;;  %v8442_v49 = vcombine.low %v1215_v31, %v1223_v34  ;;  %v8474_v31 = vcombine.low %v1247_v58, %v1255_v5  ;;  %v1279_v34 = vunpack.c.h.s8.bf16 %v10617_v51 }
 0x1dc   : > { %v8451_v43 = vcombine.high %v1219_v30, %v1227_v45  ;;  %v8450_v23 = vcombine.low %v1219_v30, %v1227_v45  ;;  %v1295_v45 = vunpack.c.h.s8.bf16 %v10633_v63  ;;  %v1299_v51 = vunpack.c.h.s8.bf16 %v10639_v2 }
 0x1dd   : > { %v8507_v28 = vcombine.high %v1279_v34, %v1287_v27  ;;  %v1315_v63 = vunpack.c.h.s8.bf16 %v10655_v26 }
 0x1de   : > { %v8531_v54 = vcombine.high %v1299_v51, %v1307_v52  ;;  %v8530_v2 = vcombine.low %v1299_v51, %v1307_v52  ;;  %v623_v51 = vld [vmem:[%s10238_s6 + $0x88] sm:$0xff] }
 0x1df   : > { %5240 = vmatmul.mubr.bf16.gmra.mrb[76].mxu1 %v8394_v46  ;;  %v8434_v46 = vcombine.low %v1203_v61, %v1211_v8  ;;  %v8458_v61 = vcombine.low %v1231_v44, %v1239_v59  ;;  %v1319_v44 = vunpack.c.h.s8.bf16 %v10652_v25  ;;  %v1339_v25 = vunpack.c.h.s8.bf16 %v10674_v37  ;;  %v627_v52 = vld [vmem:[%s10238_s6 + $0xa8] sm:$0xff] }
 0x1e0   : > { %6396 = vmatmul.mubr.bf16.gmra.mrb[76].mxu0 %v8402_v47  ;;  %5247 = vmatprep.mubr.bf16.mxu1 %v8411_v60  ;;  %v9965_v47 = vld [vmem:[%s10238_s6 + $0x5d0] sm:$0xff] }
 0x1e1   : > { %6403 = vmatprep.mubr.bf16.mxu0 %v8419_v6  ;;  %v1235_v60 = vunpack.c.h.s8.bf16 %v9965_v47  ;;  %v9966_v6 = vld [vmem:[%s10238_s6 + $0x5f0] sm:$0xff] }
 0x1e2   : > { %v1243_v4 = vunpack.c.h.s8.bf16 %v9966_v6  ;;  %v1335_v6 = vunpack.c.h.s8.bf16 %v10668_v33  ;;  %v1355_v33 = vunpack.c.h.s8.bf16 %v10690_v57  ;;  %v1371_v57 = vunpack.c.h.s8.bf16 %v10706_v12 }
 0x1e4   : > { %v8466_v8 = vcombine.low %v1235_v60, %v1243_v4 }
 0x1e7   : > { %5248 = vmatmul.mubr.bf16.gmra.mrb[80].mxu1 %v8410_v62  ;;  %v8467_v62 = vcombine.high %v1235_v60, %v1243_v4  ;;  %v1327_v60 = vunpack.c.h.s8.bf16 %v10665_v32  ;;  %v1347_v32 = vunpack.c.h.s8.bf16 %v10687_v56  ;;  %v1363_v56 = vunpack.c.h.s8.bf16 %v10703_v11 }
 0x1e8   : > { %6404 = vmatmul.mubr.bf16.gmra.mrb[80].mxu0 %v8418_v7  ;;  %5255 = vmatprep.mubr.bf16.mxu1 %v8427_v16  ;;  %v8475_v7 = vcombine.high %v1247_v58, %v1255_v5  ;;  %v8483_v16 = vcombine.high %v1251_v20, %v1259_v19 }
 0x1e9   : > { %6411 = vmatprep.mubr.bf16.mxu0 %v8435_v36  ;;  %v1263_v36 = vunpack.c.h.s8.bf16 %v10601_v39  ;;  %v1283_v39 = vunpack.c.h.s8.bf16 %v10623_v53  ;;  %v8579_v58 = vcombine.high %v1347_v32, %v1355_v33  ;;  %v8578_v20 = vcombine.low %v1347_v32, %v1355_v33  ;;  %v9851_v33 = vld [vmem:[%s11541_s1 + $0x198] sm:$0xff]  }
 0x1ea   : > { %v8594_v17 = vcombine.low %v1363_v56, %v1371_v57 }
 0x1eb   : > { %v8491_v13 = vcombine.high %v1263_v36, %v1271_v15  ;;  %v8490_v30 = vcombine.low %v1263_v36, %v1271_v15  ;;  %v8515_v42 = vcombine.high %v1283_v39, %v1291_v40  ;;  %v8514_v53 = vcombine.low %v1283_v39, %v1291_v40  ;;  %v613_v36 = vld [vmem:[%s10238_s6 + $0x38] sm:$0xff] }
 0x1ec   : > { %v876_v12 = vunpack.c.l.s8.bf16 %v613_v36  ;;  %v9855_v36 = vld [vmem:[%s11541_s1 + $0x1a8] sm:$0xff]  }
 0x1ef   : > { %5256 = vmatmul.mubr.bf16.gmra.mrb[84].mxu1 %v8426_v48  ;;  %v1303_v48 = vunpack.c.h.s8.bf16 %v10636_v0  ;;  %v1323_v0 = vunpack.c.h.s8.bf16 %v10658_v29 }
 0x1f0   : > { %6412 = vmatmul.mubr.bf16.gmra.mrb[84].mxu0 %v8434_v46  ;;  %5263 = vmatprep.mubr.bf16.mxu1 %v8443_v38  ;;  %v8506_v46 = vcombine.low %v1279_v34, %v1287_v27  ;;  %v621_v34 = vld [vmem:[%s10238_s6 + $0x78] sm:$0xff] }
 0x1f1   : > { %6419 = vmatprep.mubr.bf16.mxu0 %v8451_v43  ;;  %v8523_v38 = vcombine.high %v1295_v45, %v1303_v48  ;;  %v1311_v43 = vunpack.c.h.s8.bf16 %v10649_v21  ;;  %v8522_v59 = vcombine.low %v1295_v45, %v1303_v48  ;;  %v8547_v3 = vcombine.high %v1315_v63, %v1323_v0  ;;  %v9846_v45 = vld [vmem:[%s11541_s1 + $0x380] sm:$0xff]  }
 0x1f2   : > { %v1331_v21 = vunpack.c.h.s8.bf16 %v10671_v35  ;;  %v8546_v26 = vcombine.low %v1315_v63, %v1323_v0 }
 0x1f3   : > { %v8539_v47 = vcombine.high %v1311_v43, %v1319_v44  ;;  %v8538_v4 = vcombine.low %v1311_v43, %v1319_v44  ;;  %v904_v43 = vunpack.c.l.s8.bf16 %v627_v52  ;;  %v9847_v44 = vld [vmem:[%s11541_s1 + $0x188] sm:$0xff]  }
 0x1f4   : > { %v8563_v29 = vcombine.high %v1331_v21, %v1339_v25  ;;  %v8562_v35 = vcombine.low %v1331_v21, %v1339_v25  ;;  %v635_v21 = vld [vmem:[%s10238_s6 + $0xe8] sm:$0xff]  ;;  %v9849_v25 = vld [vmem:[%s11541_s1 + $0x190] sm:$0xff]  }
 0x1f5   : > { %v659_v52 = vld [vmem:[%s10238_s6 + $0x1a8] sm:$0xff] }
 0x1f7   : > { %5264 = vmatmul.mubr.bf16.gmra.mrb[88].mxu1 %v8442_v49  ;;  %v8555_v49 = vcombine.high %v1327_v60, %v1335_v6 }
 0x1f8   : > { %6420 = vmatmul.mubr.bf16.gmra.mrb[88].mxu0 %v8450_v23  ;;  %5271 = vmatprep.mubr.bf16.mxu1 %v8459_v14  ;;  %v1343_v23 = vunpack.c.h.s8.bf16 %v10681_v50  ;;  %v1351_v14 = vunpack.c.h.s8.bf16 %v10684_v55  ;;  %v1359_v50 = vunpack.c.h.s8.bf16 %v10697_v9  ;;  %v1367_v55 = vunpack.c.h.s8.bf16 %v10700_v10 }
 0x1f9   : > { %6427 = vmatprep.mubr.bf16.mxu0 %v8467_v62  ;;  %v8554_v62 = vcombine.low %v1327_v60, %v1335_v6  ;;  %v631_v6 = vld [vmem:[%s10238_s6 + $0xc8] sm:$0xff] }
 0x1fa   : > { %v8571_v37 = vcombine.high %v1343_v23, %v1351_v14  ;;  %v8570_v5 = vcombine.low %v1343_v23, %v1351_v14  ;;  %v8587_v19 = vcombine.high %v1359_v50, %v1367_v55  ;;  %v8586_v15 = vcombine.low %v1359_v50, %v1367_v55  ;;  %v639_v55 = vld [vmem:[%s10238_s6 + $0x108] sm:$0xff] }
 0x1fb   : > { %v920_v23 = vunpack.c.l.s8.bf16 %v635_v21  ;;  %v663_v21 = vld [vmem:[%s10238_s6 + $0x1c8] sm:$0xff] }
 0x1ff   : > { %5272 = vmatmul.mubr.bf16.gmra.mrb[92].mxu1 %v8458_v61  ;;  %v8595_v61 = vcombine.high %v1363_v56, %v1371_v57  ;;  %v643_v56 = vld [vmem:[%s10238_s6 + $0x128] sm:$0xff]  ;;  %v9853_v57 = vld [vmem:[%s11541_s1 + $0x1a0] sm:$0xff]  }
 0x200   : > { %6428 = vmatmul.mubr.bf16.gmra.mrb[92].mxu0 %v8466_v8  ;;  %5279 = vmatprep.mubr.bf16.mxu1 %v8475_v7  ;;  %v607_v8 = vld [vmem:[%s10238_s6 + $0x8] sm:$0xff] }
 0x201   : > { %6435 = vmatprep.mubr.bf16.mxu0 %v8483_v16  ;;  %v611_v7 = vld [vmem:[%s10238_s6 + $0x28] sm:$0xff]  ;;  %v609_v16 = vld [vmem:[%s10238_s6 + $0x18] sm:$0xff]  ;;  %v864_v9 = vunpack.c.l.s8.bf16 %v607_v8  ;;  %v936_v8 = vunpack.c.l.s8.bf16 %v643_v56 }
 0x202   : > { %v872_v10 = vunpack.c.l.s8.bf16 %v611_v7  ;;  %v868_v11 = vunpack.c.l.s8.bf16 %v609_v16  ;;  %v673_v56 = vld [vmem:[%s10238_s6 + $0x218] sm:$0xff] }
 0x204   : > { %v8093_v18 = vcombine.high %v864_v9, %v872_v10 }
 0x207   : > { %5280 = vmatmul.mubr.bf16.gmra.mrb[96].mxu1 %v8474_v31  ;;  %v8101_v31 = vcombine.high %v868_v11, %v876_v12 }
 0x208   : > { %6436 = vmatmul.mubr.bf16.gmra.mrb[96].mxu0 %v8482_v22  ;;  %5287 = vmatprep.mubr.bf16.mxu1 %v8491_v13  ;;  %v615_v22 = vld [vmem:[%s10238_s6 + $0x48] sm:$0xff] }
 0x209   : > { %6443 = vmatprep.mubr.bf16.mxu0 %v8499_v24  ;;  %v619_v13 = vld [vmem:[%s10238_s6 + $0x68] sm:$0xff]  ;;  %v617_v24 = vld [vmem:[%s10238_s6 + $0x58] sm:$0xff]  ;;  %v880_v27 = vunpack.c.l.s8.bf16 %v615_v22 }
 0x20a   : > { %v888_v39 = vunpack.c.l.s8.bf16 %v619_v13  ;;  %v884_v40 = vunpack.c.l.s8.bf16 %v617_v24  ;;  %v649_v22 = vld [vmem:[%s10238_s6 + $0x158] sm:$0xff]  ;;  %v9858_v24 = vld [vmem:[%s11541_s1 + $0x3b0] sm:$0xff]  }
 0x20b   : > { %v653_v13 = vld [vmem:[%s10238_s6 + $0x178] sm:$0xff] }
 0x20c   : > { %v8109_v48 = vcombine.high %v880_v27, %v888_v39 }
 0x20f   : > { %5288 = vmatmul.mubr.bf16.gmra.mrb[100].mxu1 %v8490_v30  ;;  %v892_v30 = vunpack.c.l.s8.bf16 %v621_v34 }
 0x210   : > { %6444 = vmatmul.mubr.bf16.gmra.mrb[100].mxu0 %v8498_v41  ;;  %5295 = vmatprep.mubr.bf16.mxu1 %v8507_v28  ;;  %v8092_v41 = vcombine.low %v864_v9, %v872_v10  ;;  %v8100_v28 = vcombine.low %v868_v11, %v876_v12  ;;  %v9856_v9 = vld [vmem:[%s11541_s1 + $0x3a8] sm:$0xff]  }
 0x211   : > { %6451 = vmatprep.mubr.bf16.mxu0 %v8515_v42  ;;  %v9845_v42 = vld [vmem:[%s11541_s1 + $0x180] sm:$0xff]  }
 0x217   : > { %5296 = vmatmul.mubr.bf16.gmra.mrb[104].mxu1 %v8506_v46  ;;  %v8117_v46 = vcombine.high %v884_v40, %v892_v30 }
 0x218   : > { %6452 = vmatmul.mubr.bf16.gmra.mrb[104].mxu0 %v8514_v53  ;;  %5303 = vmatprep.mubr.bf16.mxu1 %v8523_v38  ;;  %v625_v53 = vld [vmem:[%s10238_s6 + $0x98] sm:$0xff] }
 0x219   : > { %6459 = vmatprep.mubr.bf16.mxu0 %v8531_v54  ;;  %v629_v38 = vld [vmem:[%s10238_s6 + $0xb8] sm:$0xff]  ;;  %v896_v54 = vunpack.c.l.s8.bf16 %v623_v51  ;;  %v900_v63 = vunpack.c.l.s8.bf16 %v625_v53  ;;  %v655_v51 = vld [vmem:[%s10238_s6 + $0x188] sm:$0xff] }
 0x21a   : > { %v908_v0 = vunpack.c.l.s8.bf16 %v629_v38  ;;  %v657_v53 = vld [vmem:[%s10238_s6 + $0x198] sm:$0xff] }
 0x21b   : > { %v661_v38 = vld [vmem:[%s10238_s6 + $0x1b8] sm:$0xff] }
 0x21c   : > { %v8133_v60 = vcombine.high %v900_v63, %v908_v0 }
 0x21f   : > { %5304 = vmatmul.mubr.bf16.gmra.mrb[108].mxu1 %v8522_v59  ;;  %v9848_v59 = vld [vmem:[%s11541_s1 + $0x388] sm:$0xff]  }
 0x220   : > { %6460 = vmatmul.mubr.bf16.gmra.mrb[108].mxu0 %v8530_v2  ;;  %5311 = vmatprep.mubr.bf16.mxu1 %v8539_v47  ;;  %v8108_v2 = vcombine.low %v880_v27, %v888_v39  ;;  %v8116_v47 = vcombine.low %v884_v40, %v892_v30  ;;  %v948_v39 = vunpack.c.l.s8.bf16 %v649_v22  ;;  %v956_v40 = vunpack.c.l.s8.bf16 %v653_v13  ;;  %v9859_v30 = vld [vmem:[%s11541_s1 + $0x1b8] sm:$0xff]  }
 0x221   : > { %6467 = vmatprep.mubr.bf16.mxu0 %v8547_v3  ;;  %v8125_v3 = vcombine.high %v896_v54, %v904_v43 }
 0x227   : > { %5312 = vmatmul.mubr.bf16.gmra.mrb[112].mxu1 %v8538_v4  ;;  %v633_v4 = vld [vmem:[%s10238_s6 + $0xd8] sm:$0xff] }
 0x228   : > { %6468 = vmatmul.mubr.bf16.gmra.mrb[112].mxu0 %v8546_v26  ;;  %5319 = vmatprep.mubr.bf16.mxu1 %v8555_v49  ;;  %v637_v26 = vld [vmem:[%s10238_s6 + $0xf8] sm:$0xff]  ;;  %v9850_v49 = vld [vmem:[%s11541_s1 + $0x390] sm:$0xff]   ;;  %v916_v14 = vunpack.c.l.s8.bf16 %v633_v4 }
 0x229   : > { %6475 = vmatprep.mubr.bf16.mxu0 %v8563_v29  ;;  %v912_v29 = vunpack.c.l.s8.bf16 %v631_v6  ;;  %v924_v32 = vunpack.c.l.s8.bf16 %v637_v26  ;;  %v9865_v4 = vld [vmem:[%s11541_s1 + $0x1d0] sm:$0xff]   ;;  %v665_v26 = vld [vmem:[%s10238_s6 + $0x1d8] sm:$0xff] }
 0x22b   : > { %v8149_v50 = vcombine.high %v916_v14, %v924_v32  ;;  %v8140_v10 = vcombine.low %v912_v29, %v920_v23  ;;  %v8148_v11 = vcombine.low %v916_v14, %v924_v32  ;;  %v980_v32 = vunpack.c.l.s8.bf16 %v665_v26  ;;  %v703_v26 = vld [vmem:[%s10238_s6 + $0x308] sm:$0xff] }
 0x22f   : > { %5320 = vmatmul.mubr.bf16.gmra.mrb[116].mxu1 %v8554_v62  ;;  %v9852_v62 = vld [vmem:[%s11541_s1 + $0x398] sm:$0xff]  }
 0x230   : > { %6476 = vmatmul.mubr.bf16.gmra.mrb[116].mxu0 %v8562_v35  ;;  %5327 = vmatprep.mubr.bf16.mxu1 %v8571_v37  ;;  %v8124_v35 = vcombine.low %v896_v54, %v904_v43  ;;  %v8132_v37 = vcombine.low %v900_v63, %v908_v0  ;;  %v9862_v54 = vld [vmem:[%s11541_s1 + $0x3c0] sm:$0xff]   ;;  %v960_v43 = vunpack.c.l.s8.bf16 %v655_v51  ;;  %v964_v63 = vunpack.c.l.s8.bf16 %v657_v53 }
 0x231   : > { %6483 = vmatprep.mubr.bf16.mxu0 %v8579_v58  ;;  %v8141_v58 = vcombine.high %v912_v29, %v920_v23  ;;  %v972_v0 = vunpack.c.l.s8.bf16 %v661_v38  ;;  %v9866_v29 = vld [vmem:[%s11541_s1 + $0x3d0] sm:$0xff]   ;;  %v976_v23 = vunpack.c.l.s8.bf16 %v663_v21  ;;  %v9870_v51 = vld [vmem:[%s11541_s1 + $0x3e0] sm:$0xff]  }
 0x233   : > { %v8197_v6 = vcombine.high %v964_v63, %v972_v0 }
 0x237   : > { %5328 = vmatmul.mubr.bf16.gmra.mrb[120].mxu1 %v8570_v5  ;;  %v641_v5 = vld [vmem:[%s10238_s6 + $0x118] sm:$0xff] }
 0x238   : > { %6484 = vmatmul.mubr.bf16.gmra.mrb[120].mxu0 %v8578_v20  ;;  %5335 = vmatprep.mubr.bf16.mxu1 %v8587_v19  ;;  %v645_v20 = vld [vmem:[%s10238_s6 + $0x138] sm:$0xff]  ;;  %v9854_v19 = vld [vmem:[%s11541_s1 + $0x3a0] sm:$0xff]   ;;  %v932_v7 = vunpack.c.l.s8.bf16 %v641_v5 }
 0x239   : > { %6491 = vmatprep.mubr.bf16.mxu0 %v8595_v61  ;;  %v928_v61 = vunpack.c.l.s8.bf16 %v639_v55  ;;  %v940_v16 = vunpack.c.l.s8.bf16 %v645_v20  ;;  %v675_v55 = vld [vmem:[%s10238_s6 + $0x228] sm:$0xff] }
 0x23a   : > { %v1000_v20 = vunpack.c.l.s8.bf16 %v675_v55 }
 0x23b   : > { %v8157_v12 = vcombine.high %v928_v61, %v936_v8 }
 0x23f   : > { %5336 = vmatmul.mubr.bf16.gmra.mrb[124].mxu1 %v8586_v15  ;;  %v8165_v15 = vcombine.high %v932_v7, %v940_v16 }
 0x240   : > { %6492 = vmatmul.mubr.bf16.gmra.mrb[124].mxu0 %v8594_v17  ;;  %5376 = vmatprep.mubr.bf16.mxu1 %v8093_v18  ;;  %v647_v17 = vld [vmem:[%s10238_s6 + $0x148] sm:$0xff] }
 0x241   : > { %6532 = vmatprep.mubr.bf16.mxu0 %v8101_v31  ;;  %v651_v18 = vld [vmem:[%s10238_s6 + $0x168] sm:$0xff]  ;;  %v9857_v31 = vld [vmem:[%s11541_s1 + $0x1b0] sm:$0xff]   ;;  %v944_v34 = vunpack.c.l.s8.bf16 %v647_v17  ;;  %v685_v17 = vld [vmem:[%s10238_s6 + $0x278] sm:$0xff] }
 0x242   : > { %v952_v27 = vunpack.c.l.s8.bf16 %v651_v18  ;;  %v1020_v13 = vunpack.c.l.s8.bf16 %v685_v17  ;;  %v721_v17 = vld [vmem:[%s10238_s6 + $0x398] sm:$0xff] }
 0x247   : > { %5377 = vmatmul.mubr.bf16.vlgmr.msra.gmra.mrb[0].mxu1 %v8092_v41  ;;  %v9860_v41 = vld [vmem:[%s11541_s1 + $0x3b8] sm:$0xff]  }
 0x248   : > { %6533 = vmatmul.mubr.bf16.vlgmr.msra.gmra.mrb[0].mxu0 %v8100_v28  ;;  %5634 = vmatpush1.bf16.msra.mxu1 %v9845_v42  ;;  %v8156_v28 = vcombine.low %v928_v61, %v936_v8  ;;  %v8164_v42 = vcombine.low %v932_v7, %v940_v16  ;;  %v9868_v61 = vld [vmem:[%s11541_s1 + $0x3d8] sm:$0xff]   ;;  %v996_v8 = vunpack.c.l.s8.bf16 %v673_v56 }
 0x249   : > { %6790 = vmatpush1.bf16.msra.mxu0 %v9846_v45  ;;  %5384 = vmatprep.mubr.bf16.mxu1 %v8109_v48  ;;  %v8173_v45 = vcombine.high %v944_v34, %v952_v27  ;;  %v8181_v48 = vcombine.high %v948_v39, %v956_v40 }
 0x24a   : > { %6540 = vmatprep.mubr.bf16.mxu0 %v8117_v46  ;;  %5635 = vmatprep.subr.bf16.mxu1 %v10119_v1  ;;  %v9861_v46 = vld [vmem:[%s11541_s1 + $0x1c0] sm:$0xff]  }
 0x24b   : > { %6791 = vmatprep.subr.bf16.mxu0 %v10119_v1 }
 0x24c   : > { %5636 = vmatpush1.bf16.msra.mxu1 %v9847_v44  ;;  %v968_v44 = vunpack.c.l.s8.bf16 %v659_v52 }
 0x24d   : > { %6792 = vmatpush1.bf16.msra.mxu0 %v9848_v59  ;;  %5637 = vmatprep.subr.bf16.mxu1 %v10119_v1  ;;  %v9863_v59 = vld [vmem:[%s11541_s1 + $0x1c8] sm:$0xff]  }
 0x24e   : > { %6793 = vmatprep.subr.bf16.mxu0 %v10119_v1 }
 0x24f   : > { %5385 = vmatmul.mubr.bf16.gmra.mrb[4].mxu1 %v8108_v2  ;;  %v9864_v2 = vld [vmem:[%s11541_s1 + $0x3c8] sm:$0xff]  }
 0x250   : > { %6541 = vmatmul.mubr.bf16.gmra.mrb[4].mxu0 %v8116_v47  ;;  %5392 = vmatprep.mubr.bf16.mxu1 %v8125_v3  ;;  %v8172_v47 = vcombine.low %v944_v34, %v952_v27  ;;  %v8180_v3 = vcombine.low %v948_v39, %v956_v40  ;;  %v687_v40 = vld [vmem:[%s10238_s6 + $0x288] sm:$0xff] }
 0x251   : > { %6548 = vmatprep.mubr.bf16.mxu0 %v8133_v60  ;;  %5638 = vmatpush1.bf16.msra.mxu1 %v9849_v25  ;;  %v8189_v60 = vcombine.high %v960_v43, %v968_v44  ;;  %v667_v25 = vld [vmem:[%s10238_s6 + $0x1e8] sm:$0xff] }
 0x252   : > { %6794 = vmatpush1.bf16.msra.mxu0 %v9850_v49  ;;  %5639 = vmatprep.subr.bf16.mxu1 %v10119_v1  ;;  %v669_v49 = vld [vmem:[%s10238_s6 + $0x1f8] sm:$0xff]  ;;  %v984_v14 = vunpack.c.l.s8.bf16 %v667_v25 }
 0x253   : > { %6795 = vmatprep.subr.bf16.mxu0 %v10119_v1 }
 0x254   : > { %v8204_v16 = vcombine.low %v976_v23, %v984_v14 }
 0x255   : > { %5640 = vmatpush1.bf16.msra.mxu1 %v9851_v33  ;;  %v988_v33 = vunpack.c.l.s8.bf16 %v669_v49  ;;  %v707_v49 = vld [vmem:[%s10238_s6 + $0x328] sm:$0xff] }
 0x256   : > { %6796 = vmatpush1.bf16.msra.mxu0 %v9852_v62  ;;  %5641 = vmatprep.subr.bf16.mxu1 %v10119_v1  ;;  %v8188_v62 = vcombine.low %v960_v43, %v968_v44  ;;  %v695_v44 = vld [vmem:[%s10238_s6 + $0x2c8] sm:$0xff] }
 0x257   : > { %5393 = vmatmul.mubr.bf16.gmra.mrb[8].mxu1 %v8124_v35  ;;  %6797 = vmatprep.subr.bf16.mxu0 %v10119_v1  ;;  %v8196_v35 = vcombine.low %v964_v63, %v972_v0  ;;  %v699_v63 = vld [vmem:[%s10238_s6 + $0x2e8] sm:$0xff]  ;;  %v697_v0 = vld [vmem:[%s10238_s6 + $0x2d8] sm:$0xff] }
 0x258   : > { %6549 = vmatmul.mubr.bf16.gmra.mrb[8].mxu0 %v8132_v37  ;;  %5400 = vmatprep.mubr.bf16.mxu1 %v8141_v58  ;;  %v8205_v37 = vcombine.high %v976_v23, %v984_v14  ;;  %v8213_v58 = vcombine.high %v980_v32, %v988_v33  ;;  %v709_v23 = vld [vmem:[%s10238_s6 + $0x338] sm:$0xff]  ;;  %v1056_v14 = vunpack.c.l.s8.bf16 %v703_v26 }
 0x259   : > { %6556 = vmatprep.mubr.bf16.mxu0 %v8149_v50  ;;  %5642 = vmatpush1.bf16.msra.mxu1 %v9853_v57  ;;  %v671_v50 = vld [vmem:[%s10238_s6 + $0x208] sm:$0xff]  ;;  %v677_v57 = vld [vmem:[%s10238_s6 + $0x238] sm:$0xff] }
 0x25a   : > { %6798 = vmatpush1.bf16.msra.mxu0 %v9854_v19  ;;  %5643 = vmatprep.subr.bf16.mxu1 %v10119_v1  ;;  %v992_v5 = vunpack.c.l.s8.bf16 %v671_v50  ;;  %v9867_v19 = vld [vmem:[%s11541_s1 + $0x1d8] sm:$0xff]   ;;  %v1004_v7 = vunpack.c.l.s8.bf16 %v677_v57  ;;  %v711_v57 = vld [vmem:[%s10238_s6 + $0x348] sm:$0xff] }
 0x25b   : > { %6799 = vmatprep.subr.bf16.mxu0 %v10119_v1 }
 0x25c   : > { %v8228_v34 = vcombine.low %v996_v8, %v1004_v7 }
 0x25d   : > { %5644 = vmatpush1.bf16.msra.mxu1 %v9855_v36  ;;  %v8212_v36 = vcombine.low %v980_v32, %v988_v33  ;;  %v1064_v32 = vunpack.c.l.s8.bf16 %v707_v49  ;;  %v9871_v33 = vld [vmem:[%s11541_s1 + $0x1e8] sm:$0xff]  }
 0x25e   : > { %6800 = vmatpush1.bf16.msra.mxu0 %v9856_v9  ;;  %5645 = vmatprep.subr.bf16.mxu1 %v10119_v1  ;;  %v8221_v9 = vcombine.high %v992_v5, %v1000_v20 }
 0x25f   : > { %5401 = vmatmul.mubr.bf16.gmra.mrb[12].mxu1 %v8140_v10  ;;  %6801 = vmatprep.subr.bf16.mxu0 %v10119_v1  ;;  %v8229_v10 = vcombine.high %v996_v8, %v1004_v7  ;;  %v8285_v55 = vcombine.high %v1056_v14, %v1064_v32 }
 0x260   : > { %6557 = vmatmul.mubr.bf16.gmra.mrb[12].mxu0 %v8148_v11  ;;  %5408 = vmatprep.mubr.bf16.mxu1 %v8157_v12  ;;  %v679_v11 = vld [vmem:[%s10238_s6 + $0x248] sm:$0xff] }
 0x261   : > { %6564 = vmatprep.mubr.bf16.mxu0 %v8165_v15  ;;  %5646 = vmatpush1.bf16.msra.mxu1 %v9857_v31  ;;  %v683_v12 = vld [vmem:[%s10238_s6 + $0x268] sm:$0xff]  ;;  %v681_v15 = vld [vmem:[%s10238_s6 + $0x258] sm:$0xff]  ;;  %v1008_v18 = vunpack.c.l.s8.bf16 %v679_v11 }
 0x262   : > { %6802 = vmatpush1.bf16.msra.mxu0 %v9858_v24  ;;  %5647 = vmatprep.subr.bf16.mxu1 %v10119_v1  ;;  %v1016_v31 = vunpack.c.l.s8.bf16 %v683_v12  ;;  %v1012_v22 = vunpack.c.l.s8.bf16 %v681_v15  ;;  %v8220_v24 = vcombine.low %v992_v5, %v1000_v20  ;;  %v715_v5 = vld [vmem:[%s10238_s6 + $0x368] sm:$0xff]  ;;  %v713_v20 = vld [vmem:[%s10238_s6 + $0x358] sm:$0xff] }
 0x263   : > { %6803 = vmatprep.subr.bf16.mxu0 %v10119_v1  ;;  %v1080_v8 = vunpack.c.l.s8.bf16 %v715_v5  ;;  %v1076_v7 = vunpack.c.l.s8.bf16 %v713_v20  ;;  %v719_v12 = vld [vmem:[%s10238_s6 + $0x388] sm:$0xff]  ;;  %v753_v20 = vld [vmem:[%s10238_s6 + $0x498] sm:$0xff] }
 0x264   : > { %v8237_v27 = vcombine.high %v1008_v18, %v1016_v31  ;;  %v8245_v39 = vcombine.high %v1012_v22, %v1020_v13  ;;  %v8236_v53 = vcombine.low %v1008_v18, %v1016_v31  ;;  %v8244_v38 = vcombine.low %v1012_v22, %v1020_v13  ;;  %v723_v15 = vld [vmem:[%s10238_s6 + $0x3a8] sm:$0xff]  ;;  %v725_v18 = vld [vmem:[%s10238_s6 + $0x3b8] sm:$0xff]  ;;  %v9873_v13 = vld [vmem:[%s11541_s1 + $0x1f0] sm:$0xff]  }
 0x265   : > { %5648 = vmatpush1.bf16.msra.mxu1 %v9859_v30  ;;  %v691_v30 = vld [vmem:[%s10238_s6 + $0x2a8] sm:$0xff]  ;;  %v1088_v31 = vunpack.c.l.s8.bf16 %v719_v12  ;;  %v1096_v22 = vunpack.c.l.s8.bf16 %v723_v15 }
 0x266   : > { %6804 = vmatpush1.bf16.msra.mxu0 %v9860_v41  ;;  %5649 = vmatprep.subr.bf16.mxu1 %v10119_v1  ;;  %v689_v41 = vld [vmem:[%s10238_s6 + $0x298] sm:$0xff]  ;;  %v755_v5 = vld [vmem:[%s10238_s6 + $0x4a8] sm:$0xff] }
 0x267   : > { %5409 = vmatmul.mubr.bf16.gmra.mrb[16].mxu1 %v8156_v28  ;;  %6805 = vmatprep.subr.bf16.mxu0 %v10119_v1  ;;  %v693_v28 = vld [vmem:[%s10238_s6 + $0x2b8] sm:$0xff]  ;;  %v1028_v52 = vunpack.c.l.s8.bf16 %v689_v41  ;;  %v759_v12 = vld [vmem:[%s10238_s6 + $0x4c8] sm:$0xff] }
 0x268   : > { %6565 = vmatmul.mubr.bf16.gmra.mrb[16].mxu0 %v8164_v42  ;;  %5416 = vmatprep.mubr.bf16.mxu1 %v8173_v45  ;;  %v1024_v42 = vunpack.c.l.s8.bf16 %v687_v40  ;;  %v1032_v45 = vunpack.c.l.s8.bf16 %v691_v30  ;;  %v8317_v30 = vcombine.high %v1088_v31, %v1096_v22  ;;  %v763_v15 = vld [vmem:[%s10238_s6 + $0x4e8] sm:$0xff] }
 0x269   : > { %6572 = vmatprep.mubr.bf16.mxu0 %v8181_v48  ;;  %5650 = vmatpush1.bf16.msra.mxu1 %v9861_v46  ;;  %v9869_v48 = vld [vmem:[%s11541_s1 + $0x1e0] sm:$0xff]   ;;  %v1036_v46 = vunpack.c.l.s8.bf16 %v693_v28  ;;  %v727_v28 = vld [vmem:[%s10238_s6 + $0x3c8] sm:$0xff] }
 0x26a   : > { %6806 = vmatpush1.bf16.msra.mxu0 %v9862_v54  ;;  %5651 = vmatprep.subr.bf16.mxu1 %v10119_v1  ;;  %v8253_v54 = vcombine.high %v1024_v42, %v1032_v45 }
 0x26b   : > { %6807 = vmatprep.subr.bf16.mxu0 %v10119_v1  ;;  %v8261_v43 = vcombine.high %v1028_v52, %v1036_v46  ;;  %v8260_v21 = vcombine.low %v1028_v52, %v1036_v46 }
 0x26d   : > { %5652 = vmatpush1.bf16.msra.mxu1 %v9863_v59  ;;  %v701_v59 = vld [vmem:[%s10238_s6 + $0x2f8] sm:$0xff] }
 0x26e   : > { %6808 = vmatpush1.bf16.msra.mxu0 %v9864_v2  ;;  %5653 = vmatprep.subr.bf16.mxu1 %v10119_v1  ;;  %v1040_v2 = vunpack.c.l.s8.bf16 %v695_v44  ;;  %v735_v44 = vld [vmem:[%s10238_s6 + $0x408] sm:$0xff] }
 0x26f   : > { %5417 = vmatmul.mubr.bf16.gmra.mrb[20].mxu1 %v8172_v47  ;;  %6809 = vmatprep.subr.bf16.mxu0 %v10119_v1  ;;  %v1048_v47 = vunpack.c.l.s8.bf16 %v699_v63  ;;  %v739_v63 = vld [vmem:[%s10238_s6 + $0x428] sm:$0xff] }
 0x270   : > { %6573 = vmatmul.mubr.bf16.gmra.mrb[20].mxu0 %v8180_v3  ;;  %5424 = vmatprep.mubr.bf16.mxu1 %v8189_v60  ;;  %v1044_v3 = vunpack.c.l.s8.bf16 %v697_v0  ;;  %v1052_v60 = vunpack.c.l.s8.bf16 %v701_v59  ;;  %v737_v0 = vld [vmem:[%s10238_s6 + $0x418] sm:$0xff] }
 0x271   : > { %6580 = vmatprep.mubr.bf16.mxu0 %v8197_v6  ;;  %5654 = vmatpush1.bf16.msra.mxu1 %v9865_v4  ;;  %v8252_v6 = vcombine.low %v1024_v42, %v1032_v45  ;;  %v8269_v25 = vcombine.high %v1040_v2, %v1048_v47  ;;  %v731_v42 = vld [vmem:[%s10238_s6 + $0x3e8] sm:$0xff]  ;;  %v729_v45 = vld [vmem:[%s10238_s6 + $0x3d8] sm:$0xff] }
 0x272   : > { %6810 = vmatpush1.bf16.msra.mxu0 %v9866_v29  ;;  %5655 = vmatprep.subr.bf16.mxu1 %v10119_v1  ;;  %v8277_v4 = vcombine.high %v1044_v3, %v1052_v60  ;;  %v705_v29 = vld [vmem:[%s10238_s6 + $0x318] sm:$0xff]  ;;  %v8276_v50 = vcombine.low %v1044_v3, %v1052_v60  ;;  %v1112_v52 = vunpack.c.l.s8.bf16 %v731_v42  ;;  %v1108_v46 = vunpack.c.l.s8.bf16 %v729_v45 }
 0x273   : > { %6811 = vmatprep.subr.bf16.mxu0 %v10119_v1  ;;  %v741_v59 = vld [vmem:[%s10238_s6 + $0x438] sm:$0xff] }
 0x274   : > { %v9875_v3 = vld [vmem:[%s11541_s1 + $0x1f8] sm:$0xff]  }
 0x275   : > { %5656 = vmatpush1.bf16.msra.mxu1 %v9867_v19  ;;  %v717_v19 = vld [vmem:[%s10238_s6 + $0x378] sm:$0xff] }
 0x276   : > { %6812 = vmatpush1.bf16.msra.mxu0 %v9868_v61  ;;  %5657 = vmatprep.subr.bf16.mxu1 %v10119_v1  ;;  %v1072_v61 = vunpack.c.l.s8.bf16 %v711_v57  ;;  %v9876_v60 = vld [vmem:[%s11541_s1 + $0x3f8] sm:$0xff]   ;;  %v751_v57 = vld [vmem:[%s10238_s6 + $0x488] sm:$0xff] }
 0x277   : > { %5425 = vmatmul.mubr.bf16.gmra.mrb[24].mxu1 %v8188_v62  ;;  %6813 = vmatprep.subr.bf16.mxu0 %v10119_v1  ;;  %v9872_v62 = vld [vmem:[%s11541_s1 + $0x3e8] sm:$0xff]   ;;  %v773_v42 = vld [vmem:[%s10238_s6 + $0x538] sm:$0xff] }
 0x278   : > { %6581 = vmatmul.mubr.bf16.gmra.mrb[24].mxu0 %v8196_v35  ;;  %5432 = vmatprep.mubr.bf16.mxu1 %v8205_v37  ;;  %v1060_v35 = vunpack.c.l.s8.bf16 %v705_v29  ;;  %v1068_v37 = vunpack.c.l.s8.bf16 %v709_v23  ;;  %v743_v29 = vld [vmem:[%s10238_s6 + $0x448] sm:$0xff] }
 0x279   : > { %6588 = vmatprep.mubr.bf16.mxu0 %v8213_v58  ;;  %5658 = vmatpush1.bf16.msra.mxu1 %v9869_v48  ;;  %v8268_v58 = vcombine.low %v1040_v2, %v1048_v47  ;;  %v733_v48 = vld [vmem:[%s10238_s6 + $0x3f8] sm:$0xff]  ;;  %v1120_v2 = vunpack.c.l.s8.bf16 %v735_v44  ;;  %v1128_v47 = vunpack.c.l.s8.bf16 %v739_v63  ;;  %v747_v23 = vld [vmem:[%s10238_s6 + $0x468] sm:$0xff] }
 0x27a   : > { %6814 = vmatpush1.bf16.msra.mxu0 %v9870_v51  ;;  %5659 = vmatprep.subr.bf16.mxu1 %v10119_v1  ;;  %v8293_v56 = vcombine.high %v1060_v35, %v1068_v37  ;;  %v1104_v51 = vunpack.c.l.s8.bf16 %v727_v28  ;;  %v769_v28 = vld [vmem:[%s10238_s6 + $0x518] sm:$0xff] }
 0x27b   : > { %6815 = vmatprep.subr.bf16.mxu0 %v10119_v1  ;;  %v8349_v26 = vcombine.high %v1120_v2, %v1128_v47  ;;  %v777_v44 = vld [vmem:[%s10238_s6 + $0x558] sm:$0xff] }
 0x27c   : > { %v781_v63 = vld [vmem:[%s10238_s6 + $0x578] sm:$0xff] }
 0x27d   : > { %5660 = vmatpush1.bf16.msra.mxu1 %v9871_v33  ;;  %v1136_v33 = vunpack.c.l.s8.bf16 %v743_v29 }
 0x27e   : > { %6816 = vmatpush1.bf16.msra.mxu0 %v9872_v62  ;;  %5661 = vmatprep.subr.bf16.mxu1 %v10119_v1  ;;  %v1144_v62 = vunpack.c.l.s8.bf16 %v747_v23 }
 0x27f   : > { %5433 = vmatmul.mubr.bf16.gmra.mrb[28].mxu1 %v8204_v16  ;;  %6817 = vmatprep.subr.bf16.mxu0 %v10119_v1  ;;  %v1084_v16 = vunpack.c.l.s8.bf16 %v717_v19  ;;  %v757_v19 = vld [vmem:[%s10238_s6 + $0x4b8] sm:$0xff] }
 0x280   : > { %6589 = vmatmul.mubr.bf16.gmra.mrb[28].mxu0 %v8212_v36  ;;  %5440 = vmatprep.mubr.bf16.mxu1 %v8221_v9  ;;  %v8284_v36 = vcombine.low %v1056_v14, %v1064_v32  ;;  %v8292_v9 = vcombine.low %v1060_v35, %v1068_v37  ;;  %v745_v14 = vld [vmem:[%s10238_s6 + $0x458] sm:$0xff] }
 0x281   : > { %6596 = vmatprep.mubr.bf16.mxu0 %v8229_v10  ;;  %v8301_v10 = vcombine.high %v1072_v61, %v1080_v8  ;;  %v8309_v11 = vcombine.high %v1076_v7, %v1084_v16  ;;  %5662 = vmatpush1.bf16.msra.mxu1 %v9873_v13  ;;  %v8308_v40 = vcombine.low %v1076_v7, %v1084_v16  ;;  %v749_v32 = vld [vmem:[%s10238_s6 + $0x478] sm:$0xff]  ;;  %v1140_v35 = vunpack.c.l.s8.bf16 %v745_v14 }
 0x282   : > { %5663 = vmatprep.subr.bf16.mxu1 %v10119_v1  ;;  %v1148_v37 = vunpack.c.l.s8.bf16 %v749_v32  ;;  %v1156_v7 = vunpack.c.l.s8.bf16 %v753_v20  ;;  %v1164_v16 = vunpack.c.l.s8.bf16 %v757_v19 }
 0x285   : > { %5664 = vmatpush1.bf16.msra.mxu1 %v9875_v3 }
 0x287   : > { %5441 = vmatmul.mubr.bf16.gmra.mrb[32].mxu1 %v8220_v24  ;;  %v9874_v24 = vld [vmem:[%s11541_s1 + $0x3f0] sm:$0xff]  }
 0x288   : > { %6597 = vmatmul.mubr.bf16.gmra.mrb[32].mxu0 %v8228_v34  ;;  %5448 = vmatprep.mubr.bf16.mxu1 %v8237_v27  ;;  %v1092_v34 = vunpack.c.l.s8.bf16 %v721_v17  ;;  %v1100_v27 = vunpack.c.l.s8.bf16 %v725_v18  ;;  %v761_v17 = vld [vmem:[%s10238_s6 + $0x4d8] sm:$0xff] }
 0x289   : > { %6604 = vmatprep.mubr.bf16.mxu0 %v8245_v39  ;;  %6818 = vmatpush1.bf16.msra.mxu0 %v9874_v24  ;;  %v8300_v39 = vcombine.low %v1072_v61, %v1080_v8  ;;  %v1152_v61 = vunpack.c.l.s8.bf16 %v751_v57  ;;  %v1160_v8 = vunpack.c.l.s8.bf16 %v755_v5  ;;  %v765_v18 = vld [vmem:[%s10238_s6 + $0x4f8] sm:$0xff]  ;;  %v1172_v13 = vunpack.c.l.s8.bf16 %v761_v17 }
 0x28a   : > { %6819 = vmatprep.subr.bf16.mxu0 %v10119_v1  ;;  %v8325_v41 = vcombine.high %v1092_v34, %v1100_v27  ;;  %v8316_v1 = vcombine.low %v1088_v31, %v1096_v22  ;;  %v1168_v31 = vunpack.c.l.s8.bf16 %v759_v12  ;;  %v1176_v22 = vunpack.c.l.s8.bf16 %v763_v15 }
 0x28b   : > { %v1180_v24 = vunpack.c.l.s8.bf16 %v765_v18 }
 0x28d   : > { %6820 = vmatpush1.bf16.msra.mxu0 %v9876_v60 }
 0x28f   : > { %5449 = vmatmul.mubr.bf16.gmra.mrb[36].mxu1 %v8236_v53  ;;  %v1116_v53 = vunpack.c.l.s8.bf16 %v733_v48 }
 0x290   : > { %6605 = vmatmul.mubr.bf16.gmra.mrb[36].mxu0 %v8244_v38  ;;  %5456 = vmatprep.mubr.bf16.mxu1 %v8253_v54  ;;  %v8324_v38 = vcombine.low %v1092_v34, %v1100_v27  ;;  %v8333_v54 = vcombine.high %v1104_v51, %v1112_v52  ;;  %v8380_v34 = vcombine.low %v1152_v61, %v1160_v8 }
 0x291   : > { %6612 = vmatprep.mubr.bf16.mxu0 %v8261_v43  ;;  %v8341_v43 = vcombine.high %v1108_v46, %v1116_v53  ;;  %v8388_v27 = vcombine.low %v1156_v7, %v1164_v16 }
 0x297   : > { %5457 = vmatmul.mubr.bf16.gmra.mrb[40].mxu1 %v8252_v6  ;;  %v1124_v6 = vunpack.c.l.s8.bf16 %v737_v0 }
 0x298   : > { %6613 = vmatmul.mubr.bf16.gmra.mrb[40].mxu0 %v8260_v21  ;;  %5464 = vmatprep.mubr.bf16.mxu1 %v8269_v25  ;;  %v1132_v21 = vunpack.c.l.s8.bf16 %v741_v59  ;;  %v8332_v25 = vcombine.low %v1104_v51, %v1112_v52  ;;  %v1188_v51 = vunpack.c.l.s8.bf16 %v769_v28  ;;  %v1196_v52 = vunpack.c.l.s8.bf16 %v773_v42 }
 0x299   : > { %6620 = vmatprep.mubr.bf16.mxu0 %v8277_v4  ;;  %v8340_v4 = vcombine.low %v1108_v46, %v1116_v53  ;;  %v8396_v46 = vcombine.low %v1168_v31, %v1176_v22  ;;  %v8404_v53 = vcombine.low %v1172_v13, %v1180_v24 }
 0x29a   : > { %v8357_v49 = vcombine.high %v1124_v6, %v1132_v21  ;;  %v8420_v60 = vcombine.low %v1188_v51, %v1196_v52 }
 0x29f   : > { %5465 = vmatmul.mubr.bf16.gmra.mrb[44].mxu1 %v8268_v58  ;;  %v8348_v58 = vcombine.low %v1120_v2, %v1128_v47  ;;  %v1204_v2 = vunpack.c.l.s8.bf16 %v777_v44  ;;  %v1212_v47 = vunpack.c.l.s8.bf16 %v781_v63 }
 0x2a0   : > { %6621 = vmatmul.mubr.bf16.gmra.mrb[44].mxu0 %v8276_v50  ;;  %5472 = vmatprep.mubr.bf16.mxu1 %v8285_v55  ;;  %v8356_v50 = vcombine.low %v1124_v6, %v1132_v21  ;;  %v8365_v55 = vcombine.high %v1136_v33, %v1144_v62 }
 0x2a1   : > { %6628 = vmatprep.mubr.bf16.mxu0 %v8293_v56  ;;  %v8373_v56 = vcombine.high %v1140_v35, %v1148_v37  ;;  %v8437_v21 = vcombine.high %v1204_v2, %v1212_v47 }
 0x2a7   : > { %5473 = vmatmul.mubr.bf16.gmra.mrb[48].mxu1 %v8284_v36  ;;  %v8364_v36 = vcombine.low %v1136_v33, %v1144_v62  ;;  %v8436_v62 = vcombine.low %v1204_v2, %v1212_v47 }
 0x2a8   : > { %6629 = vmatmul.mubr.bf16.gmra.mrb[48].mxu0 %v8292_v9  ;;  %5480 = vmatprep.mubr.bf16.mxu1 %v8301_v10  ;;  %v8372_v9 = vcombine.low %v1140_v35, %v1148_v37  ;;  %v8381_v10 = vcombine.high %v1152_v61, %v1160_v8 }
 0x2a9   : > { %6636 = vmatprep.mubr.bf16.mxu0 %v8309_v11  ;;  %v8389_v11 = vcombine.high %v1156_v7, %v1164_v16 }
 0x2af   : > { %5481 = vmatmul.mubr.bf16.gmra.mrb[52].mxu1 %v8300_v39  ;;  %v8397_v39 = vcombine.high %v1168_v31, %v1176_v22 }
 0x2b0   : > { %6637 = vmatmul.mubr.bf16.gmra.mrb[52].mxu0 %v8308_v40  ;;  %5488 = vmatprep.mubr.bf16.mxu1 %v8317_v30  ;;  %v8405_v40 = vcombine.high %v1172_v13, %v1180_v24  ;;  %v767_v30 = vld [vmem:[%s10238_s6 + $0x508] sm:$0xff] }
 0x2b1   : > { %6644 = vmatprep.mubr.bf16.mxu0 %v8325_v41  ;;  %v771_v41 = vld [vmem:[%s10238_s6 + $0x528] sm:$0xff]  ;;  %v1184_v45 = vunpack.c.l.s8.bf16 %v767_v30 }
 0x2b2   : > { %v1192_v48 = vunpack.c.l.s8.bf16 %v771_v41 }
 0x2b4   : > { %v8412_v3 = vcombine.low %v1184_v45, %v1192_v48 }
 0x2b7   : > { %5489 = vmatmul.mubr.bf16.gmra.mrb[56].mxu1 %v8316_v1  ;;  %v8413_v1 = vcombine.high %v1184_v45, %v1192_v48 }
 0x2b8   : > { %6645 = vmatmul.mubr.bf16.gmra.mrb[56].mxu0 %v8324_v38  ;;  %5496 = vmatprep.mubr.bf16.mxu1 %v8333_v54  ;;  %v8421_v38 = vcombine.high %v1188_v51, %v1196_v52  ;;  %v775_v54 = vld [vmem:[%s10238_s6 + $0x548] sm:$0xff] }
 0x2b9   : > { %6652 = vmatprep.mubr.bf16.mxu0 %v8341_v43  ;;  %v779_v43 = vld [vmem:[%s10238_s6 + $0x568] sm:$0xff]  ;;  %v1200_v0 = vunpack.c.l.s8.bf16 %v775_v54 }
 0x2ba   : > { %v1208_v59 = vunpack.c.l.s8.bf16 %v779_v43 }
 0x2bc   : > { %v8429_v6 = vcombine.high %v1200_v0, %v1208_v59  ;;  %v8428_v33 = vcombine.low %v1200_v0, %v1208_v59 }
 0x2bf   : > { %5497 = vmatmul.mubr.bf16.gmra.mrb[60].mxu1 %v8332_v25  ;;  %v783_v25 = vld [vmem:[%s10238_s6 + $0x588] sm:$0xff] }
 0x2c0   : > { %6653 = vmatmul.mubr.bf16.gmra.mrb[60].mxu0 %v8340_v4  ;;  %5504 = vmatprep.mubr.bf16.mxu1 %v8349_v26  ;;  %v787_v4 = vld [vmem:[%s10238_s6 + $0x5a8] sm:$0xff]  ;;  %v785_v26 = vld [vmem:[%s10238_s6 + $0x598] sm:$0xff]  ;;  %v1216_v29 = vunpack.c.l.s8.bf16 %v783_v25 }
 0x2c1   : > { %6660 = vmatprep.mubr.bf16.mxu0 %v8357_v49  ;;  %v789_v49 = vld [vmem:[%s10238_s6 + $0x5b8] sm:$0xff]  ;;  %v1224_v23 = vunpack.c.l.s8.bf16 %v787_v4  ;;  %v1220_v14 = vunpack.c.l.s8.bf16 %v785_v26 }
 0x2c2   : > { %v1228_v32 = vunpack.c.l.s8.bf16 %v789_v49 }
 0x2c3   : > { %v8445_v35 = vcombine.high %v1216_v29, %v1224_v23  ;;  %v8444_v61 = vcombine.low %v1216_v29, %v1224_v23 }
 0x2c4   : > { %v8453_v37 = vcombine.high %v1220_v14, %v1228_v32  ;;  %v8452_v8 = vcombine.low %v1220_v14, %v1228_v32 }
 0x2c7   : > { %5505 = vmatmul.mubr.bf16.gmra.mrb[64].mxu1 %v8348_v58  ;;  %v791_v58 = vld [vmem:[%s10238_s6 + $0x5c8] sm:$0xff] }
 0x2c8   : > { %6661 = vmatmul.mubr.bf16.gmra.mrb[64].mxu0 %v8356_v50  ;;  %5512 = vmatprep.mubr.bf16.mxu1 %v8365_v55  ;;  %v795_v50 = vld [vmem:[%s10238_s6 + $0x5e8] sm:$0xff]  ;;  %v793_v55 = vld [vmem:[%s10238_s6 + $0x5d8] sm:$0xff]  ;;  %v1232_v57 = vunpack.c.l.s8.bf16 %v791_v58 }
 0x2c9   : > { %6668 = vmatprep.mubr.bf16.mxu0 %v8373_v56  ;;  %v797_v56 = vld [vmem:[%s10238_s6 + $0x5f8] sm:$0xff]  ;;  %v1240_v5 = vunpack.c.l.s8.bf16 %v795_v50  ;;  %v1236_v20 = vunpack.c.l.s8.bf16 %v793_v55 }
 0x2ca   : > { %v1244_v19 = vunpack.c.l.s8.bf16 %v797_v56 }
 0x2cb   : > { %v8461_v7 = vcombine.high %v1232_v57, %v1240_v5  ;;  %v8460_v31 = vcombine.low %v1232_v57, %v1240_v5  ;;  %v7273_v57 = vld [vmem:[%s11216_s28] sm:$0xff] }
 0x2cc   : > { %v8469_v16 = vcombine.high %v1236_v20, %v1244_v19  ;;  %v8468_v22 = vcombine.low %v1236_v20, %v1244_v19  ;;  %7339 = vperm.xlu0 %9747, %v7273_v57   ;;  %v7287_v57 = vld [vmem:[%s11216_s28 + $0x70] sm:$0xff] }
 0x2cf   : > { %5513 = vmatmul.mubr.bf16.gmra.mrb[68].mxu1 %v8364_v36  ;;  %v799_v36 = vld [vmem:[%s10238_s6 + $0x608] sm:$0xff] }
 0x2d0   : > { %6669 = vmatmul.mubr.bf16.gmra.mrb[68].mxu0 %v8372_v9  ;;  %5520 = vmatprep.mubr.bf16.mxu1 %v8381_v10  ;;  %v803_v9 = vld [vmem:[%s10238_s6 + $0x628] sm:$0xff]  ;;  %v801_v10 = vld [vmem:[%s10238_s6 + $0x618] sm:$0xff]  ;;  %v1248_v12 = vunpack.c.l.s8.bf16 %v799_v36 }
 0x2d1   : > { %6676 = vmatprep.mubr.bf16.mxu0 %v8389_v11  ;;  %v805_v11 = vld [vmem:[%s10238_s6 + $0x638] sm:$0xff]  ;;  %v1256_v15 = vunpack.c.l.s8.bf16 %v803_v9  ;;  %v1252_v17 = vunpack.c.l.s8.bf16 %v801_v10  ;;  %v7275_v10 = vld [vmem:[%s11216_s28 + $0x10] sm:$0xff] }
 0x2d2   : > { %v1260_v18 = vunpack.c.l.s8.bf16 %v805_v11  ;;  %v841_v36 = vld [vmem:[%s10238_s6 + $0x758] sm:$0xff]  ;;  %7349 = vperm.xlu1 %9748, %v7275_v10  }
 0x2d3   : > { %v8477_v13 = vcombine.high %v1248_v12, %v1256_v15  ;;  %v8476_v45 = vcombine.low %v1248_v12, %v1256_v15  ;;  %v845_v9 = vld [vmem:[%s10238_s6 + $0x778] sm:$0xff]  ;;  %v1332_v15 = vunpack.c.l.s8.bf16 %v841_v36  ;;  %v9972_v36 = vld [vmem:[%s10238_s6 + $0x68] sm:$0xff] }
 0x2d4   : > { %v8485_v24 = vcombine.high %v1252_v17, %v1260_v18  ;;  %v8484_v48 = vcombine.low %v1252_v17, %v1260_v18  ;;  %v1340_v17 = vunpack.c.l.s8.bf16 %v845_v9  ;;  %v7276_v18 = vld [vmem:[%s11216_s28 + $0x18] sm:$0xff]  ;;  %v889_v9 = vunpack.c.h.s8.bf16 %v9972_v36  ;;  %v9988_v36 = vld [vmem:[%s10238_s6 + $0x168] sm:$0xff] }
 0x2d5   : > { %v9973_v10 = vld [vmem:[%s10238_s6 + $0x58] sm:$0xff] }
 0x2d6   : > { %7354 = vperm.xlu1 %9748, %v7276_v18  }
 0x2d7   : > { %5521 = vmatmul.mubr.bf16.gmra.mrb[72].mxu1 %v8380_v34  ;;  %v807_v34 = vld [vmem:[%s10238_s6 + $0x648] sm:$0xff] }
 0x2d8   : > { %6677 = vmatmul.mubr.bf16.gmra.mrb[72].mxu0 %v8388_v27  ;;  %5528 = vmatprep.mubr.bf16.mxu1 %v8397_v39  ;;  %v811_v27 = vld [vmem:[%s10238_s6 + $0x668] sm:$0xff]  ;;  %v809_v39 = vld [vmem:[%s10238_s6 + $0x658] sm:$0xff]  ;;  %v1264_v30 = vunpack.c.l.s8.bf16 %v807_v34 }
 0x2d9   : > { %6684 = vmatprep.mubr.bf16.mxu0 %v8405_v40  ;;  %v813_v40 = vld [vmem:[%s10238_s6 + $0x678] sm:$0xff]  ;;  %v1272_v41 = vunpack.c.l.s8.bf16 %v811_v27  ;;  %v1268_v28 = vunpack.c.l.s8.bf16 %v809_v39  ;;  %v847_v34 = vld [vmem:[%s10238_s6 + $0x788] sm:$0xff] }
 0x2da   : > { %v1276_v42 = vunpack.c.l.s8.bf16 %v813_v40  ;;  %v851_v27 = vld [vmem:[%s10238_s6 + $0x7a8] sm:$0xff]  ;;  %v849_v39 = vld [vmem:[%s10238_s6 + $0x798] sm:$0xff] }
 0x2db   : > { %v8493_v51 = vcombine.high %v1264_v30, %v1272_v41  ;;  %v8492_v0 = vcombine.low %v1264_v30, %v1272_v41  ;;  %v853_v40 = vld [vmem:[%s10238_s6 + $0x7b8] sm:$0xff]  ;;  %v7278_v30 = vld [vmem:[%s11216_s28 + $0x28] sm:$0xff]  ;;  %v7277_v41 = vld [vmem:[%s11216_s28 + $0x20] sm:$0xff] }
 0x2dc   : > { %v8501_v52 = vcombine.high %v1268_v28, %v1276_v42  ;;  %v8500_v59 = vcombine.low %v1268_v28, %v1276_v42  ;;  %v1344_v28 = vunpack.c.l.s8.bf16 %v847_v34  ;;  %v1352_v42 = vunpack.c.l.s8.bf16 %v851_v27  ;;  %7364 = vperm.xlu1 %9748, %v7278_v30   ;;  %v7294_v34 = vld [vmem:[%s11216_s28 + $0xa8] sm:$0xff]  ;;  %v7293_v27 = vld [vmem:[%s11216_s28 + $0xa0] sm:$0xff] }
 0x2dd   : > { %v9976_v30 = vld [vmem:[%s10238_s6 + $0xa8] sm:$0xff] }
 0x2df   : > { %5529 = vmatmul.mubr.bf16.gmra.mrb[76].mxu1 %v8396_v46  ;;  %v815_v46 = vld [vmem:[%s10238_s6 + $0x688] sm:$0xff] }
 0x2e0   : > { %6685 = vmatmul.mubr.bf16.gmra.mrb[76].mxu0 %v8404_v53  ;;  %5536 = vmatprep.mubr.bf16.mxu1 %v8413_v1  ;;  %v819_v53 = vld [vmem:[%s10238_s6 + $0x6a8] sm:$0xff]  ;;  %v817_v1 = vld [vmem:[%s10238_s6 + $0x698] sm:$0xff]  ;;  %v1280_v54 = vunpack.c.l.s8.bf16 %v815_v46  ;;  %v7279_v46 = vld [vmem:[%s11216_s28 + $0x30] sm:$0xff] }
 0x2e1   : > { %6692 = vmatprep.mubr.bf16.mxu0 %v8421_v38  ;;  %v821_v38 = vld [vmem:[%s10238_s6 + $0x6b8] sm:$0xff]  ;;  %v1288_v43 = vunpack.c.l.s8.bf16 %v819_v53  ;;  %v1284_v44 = vunpack.c.l.s8.bf16 %v817_v1  ;;  %v8564_v53 = vcombine.low %v1332_v15, %v1340_v17  ;;  %v8573_v1 = vcombine.high %v1344_v28, %v1352_v42 }
 0x2e2   : > { %v1292_v63 = vunpack.c.l.s8.bf16 %v821_v38 }
 0x2e3   : > { %v8509_v2 = vcombine.high %v1280_v54, %v1288_v43  ;;  %v8508_v29 = vcombine.low %v1280_v54, %v1288_v43  ;;  %v855_v54 = vld [vmem:[%s10238_s6 + $0x7c8] sm:$0xff] }
 0x2e4   : > { %v8517_v47 = vcombine.high %v1284_v44, %v1292_v63  ;;  %v8516_v23 = vcombine.low %v1284_v44, %v1292_v63  ;;  %v859_v43 = vld [vmem:[%s10238_s6 + $0x7e8] sm:$0xff]  ;;  %v857_v44 = vld [vmem:[%s10238_s6 + $0x7d8] sm:$0xff] }
 0x2e5   : > { %v861_v63 = vld [vmem:[%s10238_s6 + $0x7f8] sm:$0xff] }
 0x2e7   : > { %5537 = vmatmul.mubr.bf16.gmra.mrb[80].mxu1 %v8412_v3  ;;  %v823_v3 = vld [vmem:[%s10238_s6 + $0x6c8] sm:$0xff] }
 0x2e8   : > { %6693 = vmatmul.mubr.bf16.gmra.mrb[80].mxu0 %v8420_v60  ;;  %5544 = vmatprep.mubr.bf16.mxu1 %v8429_v6  ;;  %v827_v60 = vld [vmem:[%s10238_s6 + $0x6e8] sm:$0xff]  ;;  %v825_v6 = vld [vmem:[%s10238_s6 + $0x6d8] sm:$0xff]  ;;  %v1296_v25 = vunpack.c.l.s8.bf16 %v823_v3  ;;  %v1364_v3 = vunpack.c.l.s8.bf16 %v857_v44 }
 0x2e9   : > { %6700 = vmatprep.mubr.bf16.mxu0 %v8437_v21  ;;  %v829_v21 = vld [vmem:[%s10238_s6 + $0x6f8] sm:$0xff]  ;;  %v1304_v4 = vunpack.c.l.s8.bf16 %v827_v60  ;;  %v1300_v26 = vunpack.c.l.s8.bf16 %v825_v6  ;;  %v1372_v60 = vunpack.c.l.s8.bf16 %v861_v63  ;;  %v9979_v44 = vld [vmem:[%s10238_s6 + $0xc8] sm:$0xff] }
 0x2ea   : > { %v1308_v49 = vunpack.c.l.s8.bf16 %v829_v21  ;;  %v7284_v6 = vld [vmem:[%s11216_s28 + $0x58] sm:$0xff]  ;;  %v8572_v21 = vcombine.low %v1344_v28, %v1352_v42  ;;  %v913_v63 = vunpack.c.h.s8.bf16 %v9979_v44  ;;  %v9995_v44 = vld [vmem:[%s10238_s6 + $0x1c8] sm:$0xff] }
 0x2eb   : > { %v8525_v14 = vcombine.high %v1296_v25, %v1304_v4  ;;  %v8524_v5 = vcombine.low %v1296_v25, %v1304_v4  ;;  %v7283_v25 = vld [vmem:[%s11216_s28 + $0x50] sm:$0xff]  ;;  %v9977_v28 = vld [vmem:[%s10238_s6 + $0x98] sm:$0xff] }
 0x2ec   : > { %v8533_v32 = vcombine.high %v1300_v26, %v1308_v49  ;;  %v8532_v20 = vcombine.low %v1300_v26, %v1308_v49  ;;  %v8597_v49 = vcombine.high %v1364_v3, %v1372_v60  ;;  %v901_v42 = vunpack.c.h.s8.bf16 %v9977_v28  ;;  %v9993_v28 = vld [vmem:[%s10238_s6 + $0x198] sm:$0xff] }
 0x2ef   : > { %5545 = vmatmul.mubr.bf16.gmra.mrb[84].mxu1 %v8428_v33  ;;  %v831_v33 = vld [vmem:[%s10238_s6 + $0x708] sm:$0xff] }
 0x2f0   : > { %6701 = vmatmul.mubr.bf16.gmra.mrb[84].mxu0 %v8436_v62  ;;  %5552 = vmatprep.mubr.bf16.mxu1 %v8445_v35  ;;  %v835_v62 = vld [vmem:[%s10238_s6 + $0x728] sm:$0xff]  ;;  %v833_v35 = vld [vmem:[%s10238_s6 + $0x718] sm:$0xff]  ;;  %v1312_v58 = vunpack.c.l.s8.bf16 %v831_v33 }
 0x2f1   : > { %6708 = vmatprep.mubr.bf16.mxu0 %v8453_v37  ;;  %v837_v37 = vld [vmem:[%s10238_s6 + $0x738] sm:$0xff]  ;;  %v1320_v50 = vunpack.c.l.s8.bf16 %v835_v62  ;;  %v1316_v55 = vunpack.c.l.s8.bf16 %v833_v35  ;;  %v9968_v33 = vld [vmem:[%s10238_s6 + $0x28] sm:$0xff] }
 0x2f2   : > { %v1324_v56 = vunpack.c.l.s8.bf16 %v837_v37  ;;  %v873_v62 = vunpack.c.h.s8.bf16 %v9968_v33  ;;  %v9969_v35 = vld [vmem:[%s10238_s6 + $0x18] sm:$0xff]  ;;  %v9984_v33 = vld [vmem:[%s10238_s6 + $0x128] sm:$0xff] }
 0x2f3   : > { %v8541_v19 = vcombine.high %v1312_v58, %v1320_v50  ;;  %v869_v37 = vunpack.c.h.s8.bf16 %v9969_v35  ;;  %v9985_v35 = vld [vmem:[%s10238_s6 + $0x118] sm:$0xff] }
 0x2f7   : > { %5553 = vmatmul.mubr.bf16.gmra.mrb[88].mxu1 %v8444_v61  ;;  %v7274_v61 = vld [vmem:[%s11216_s28 + $0x8] sm:$0xff] }
 0x2f8   : > { %6709 = vmatmul.mubr.bf16.gmra.mrb[88].mxu0 %v8452_v8  ;;  %5560 = vmatprep.mubr.bf16.mxu1 %v8461_v7  ;;  %v8549_v8 = vcombine.high %v1316_v55, %v1324_v56  ;;  %v839_v7 = vld [vmem:[%s10238_s6 + $0x748] sm:$0xff] }
 0x2f9   : > { %6716 = vmatprep.mubr.bf16.mxu0 %v8469_v16  ;;  %v843_v16 = vld [vmem:[%s10238_s6 + $0x768] sm:$0xff]  ;;  %7344 = vperm.xlu0 %9747, %v7274_v61   ;;  %v1328_v11 = vunpack.c.l.s8.bf16 %v839_v7 }
 0x2fa   : > { %v1336_v12 = vunpack.c.l.s8.bf16 %v843_v16  ;;  %v7290_v61 = vld [vmem:[%s11216_s28 + $0x88] sm:$0xff] }
 0x2fb   : > { %v9971_v7 = vld [vmem:[%s10238_s6 + $0x48] sm:$0xff] }
 0x2fc   : > { %v881_v16 = vunpack.c.h.s8.bf16 %v9971_v7  ;;  %v9987_v7 = vld [vmem:[%s10238_s6 + $0x148] sm:$0xff] }
 0x2fd   : > { %7359 = vperm.xlu0 %9747, %v7277_v41   ;;  %v905_v41 = vunpack.c.h.s8.bf16 %v9976_v30  ;;  %v9992_v30 = vld [vmem:[%s10238_s6 + $0x1a8] sm:$0xff] }
 0x2ff   : > { %5561 = vmatmul.mubr.bf16.gmra.mrb[92].mxu1 %v8460_v31  ;;  %v8540_v31 = vcombine.low %v1312_v58, %v1320_v50  ;;  %v9970_v58 = vld [vmem:[%s10238_s6 + $0x38] sm:$0xff] }
 0x300   : > { %6717 = vmatmul.mubr.bf16.gmra.mrb[92].mxu0 %v8468_v22  ;;  %5568 = vmatprep.mubr.bf16.mxu1 %v8477_v13  ;;  %v8548_v22 = vcombine.low %v1316_v55, %v1324_v56  ;;  %v8557_v13 = vcombine.high %v1328_v11, %v1336_v12  ;;  %v877_v50 = vunpack.c.h.s8.bf16 %v9970_v58  ;;  %v7288_v55 = vld [vmem:[%s11216_s28 + $0x78] sm:$0xff] }
 0x301   : > { %6724 = vmatprep.mubr.bf16.mxu0 %v8485_v24  ;;  %v8565_v24 = vcombine.high %v1332_v15, %v1340_v17  ;;  %7369 = vperm.xlu0 %9747, %v7279_v46   ;;  %v7292_v17 = vld [vmem:[%s11216_s28 + $0x98] sm:$0xff]  ;;  %v7295_v46 = vld [vmem:[%s11216_s28 + $0xb0] sm:$0xff] }
 0x302   : > { %v9986_v58 = vld [vmem:[%s10238_s6 + $0x138] sm:$0xff] }
 0x307   : > { %5569 = vmatmul.mubr.bf16.gmra.mrb[96].mxu1 %v8476_v45  ;;  %v1348_v45 = vunpack.c.l.s8.bf16 %v849_v39  ;;  %v9975_v39 = vld [vmem:[%s10238_s6 + $0x88] sm:$0xff] }
 0x308   : > { %6725 = vmatmul.mubr.bf16.gmra.mrb[96].mxu0 %v8484_v48  ;;  %5576 = vmatprep.mubr.bf16.mxu1 %v8493_v51  ;;  %v1356_v48 = vunpack.c.l.s8.bf16 %v853_v40  ;;  %v7280_v51 = vld [vmem:[%s11216_s28 + $0x38] sm:$0xff]  ;;  %v897_v40 = vunpack.c.h.s8.bf16 %v9975_v39  ;;  %v9991_v39 = vld [vmem:[%s10238_s6 + $0x188] sm:$0xff] }
 0x309   : > { %6732 = vmatprep.mubr.bf16.mxu0 %v8501_v52  ;;  %v8556_v52 = vcombine.low %v1328_v11, %v1336_v12  ;;  %7374 = vperm.xlu1 %9748, %v7280_v51   ;;  %v885_v11 = vunpack.c.h.s8.bf16 %v9973_v10  ;;  %v9974_v12 = vld [vmem:[%s10238_s6 + $0x78] sm:$0xff] }
 0x30a   : > { %v8581_v38 = vcombine.high %v1348_v45, %v1356_v48  ;;  %v8580_v4 = vcombine.low %v1348_v45, %v1356_v48  ;;  %v893_v15 = vunpack.c.h.s8.bf16 %v9974_v12  ;;  %v9978_v45 = vld [vmem:[%s10238_s6 + $0xb8] sm:$0xff] }
 0x30b   : > { %v909_v48 = vunpack.c.h.s8.bf16 %v9978_v45  ;;  %v7296_v51 = vld [vmem:[%s11216_s28 + $0xb8] sm:$0xff] }
 0x30c   : > { %v9989_v10 = vld [vmem:[%s10238_s6 + $0x158] sm:$0xff] }
 0x30d   : > { %v9990_v12 = vld [vmem:[%s10238_s6 + $0x178] sm:$0xff] }
 0x30e   : > { %v9994_v45 = vld [vmem:[%s10238_s6 + $0x1b8] sm:$0xff] }
 0x30f   : > { %5577 = vmatmul.mubr.bf16.gmra.mrb[100].mxu1 %v8492_v0  ;;  %v7282_v0 = vld [vmem:[%s11216_s28 + $0x48] sm:$0xff] }
 0x310   : > { %6733 = vmatmul.mubr.bf16.gmra.mrb[100].mxu0 %v8500_v59  ;;  %5584 = vmatprep.mubr.bf16.mxu1 %v8509_v2  ;;  %v7281_v59 = vld [vmem:[%s11216_s28 + $0x40] sm:$0xff]  ;;  %v1360_v2 = vunpack.c.l.s8.bf16 %v855_v54  ;;  %v7298_v54 = vld [vmem:[%s11216_s28 + $0xc8] sm:$0xff] }
 0x311   : > { %6740 = vmatprep.mubr.bf16.mxu0 %v8517_v47  ;;  %v1368_v47 = vunpack.c.l.s8.bf16 %v859_v43  ;;  %7384 = vperm.xlu1 %9748, %v7282_v0   ;;  %v7297_v43 = vld [vmem:[%s11216_s28 + $0xc0] sm:$0xff]  ;;  %v9980_v0 = vld [vmem:[%s10238_s6 + $0xe8] sm:$0xff] }
 0x312   : > { %7379 = vperm.xlu0 %9747, %v7281_v59   ;;  %v921_v59 = vunpack.c.h.s8.bf16 %v9980_v0  ;;  %v9996_v0 = vld [vmem:[%s10238_s6 + $0x1e8] sm:$0xff] }
 0x313   : > { %v8589_v26 = vcombine.high %v1360_v2, %v1368_v47  ;;  %v8588_v56 = vcombine.low %v1360_v2, %v1368_v47  ;;  %v9981_v2 = vld [vmem:[%s10238_s6 + $0xd8] sm:$0xff] }
 0x314   : > { %v917_v47 = vunpack.c.h.s8.bf16 %v9981_v2  ;;  %v9997_v2 = vld [vmem:[%s10238_s6 + $0x1d8] sm:$0xff] }
 0x315   : > { %7394 = vperm.xlu1 %9748, %v7284_v6   ;;  %v7300_v6 = vld [vmem:[%s11216_s28 + $0xd8] sm:$0xff] }
 0x316   : > { %7389 = vperm.xlu0 %9747, %v7283_v25   ;;  %v7299_v25 = vld [vmem:[%s11216_s28 + $0xd0] sm:$0xff] }
 0x317   : > { %5585 = vmatmul.mubr.bf16.gmra.mrb[104].mxu1 %v8508_v29  ;;  %v7286_v29 = vld [vmem:[%s11216_s28 + $0x68] sm:$0xff] }
 0x318   : > { %6741 = vmatmul.mubr.bf16.gmra.mrb[104].mxu0 %v8516_v23  ;;  %5592 = vmatprep.mubr.bf16.mxu1 %v8525_v14  ;;  %v7285_v23 = vld [vmem:[%s11216_s28 + $0x60] sm:$0xff]  ;;  %v9967_v14 = vld [vmem:[%s10238_s6 + $0x8] sm:$0xff] }
 0x319   : > { %6748 = vmatprep.mubr.bf16.mxu0 %v8533_v32  ;;  %v865_v32 = vunpack.c.h.s8.bf16 %v9967_v14  ;;  %7404 = vperm.xlu1 %9748, %v7286_v29   ;;  %v7302_v29 = vld [vmem:[%s11216_s28 + $0xe8] sm:$0xff] }
 0x31a   : > { %7399 = vperm.xlu0 %9747, %v7285_v23   ;;  %v7301_v23 = vld [vmem:[%s11216_s28 + $0xe0] sm:$0xff]  ;;  %v9983_v14 = vld [vmem:[%s10238_s6 + $0x108] sm:$0xff] }
 0x31b   : > { %v8094_v18 = vcombine.low %v865_v32, %v873_v62 }
 0x31d   : > { %7414 = vperm.xlu1 %9748, %v7288_v55   ;;  %v7304_v55 = vld [vmem:[%s11216_s28 + $0xf8] sm:$0xff] }
 0x31e   : > { %7409 = vperm.xlu0 %9747, %v7287_v57   ;;  %v7303_v57 = vld [vmem:[%s11216_s28 + $0xf0] sm:$0xff] }
 0x31f   : > { %5593 = vmatmul.mubr.bf16.gmra.mrb[108].mxu1 %v8524_v5  ;;  %v8596_v5 = vcombine.low %v1364_v3, %v1372_v60  ;;  %v9982_v3 = vld [vmem:[%s10238_s6 + $0xf8] sm:$0xff] }
 0x320   : > { %6749 = vmatmul.mubr.bf16.gmra.mrb[108].mxu0 %v8532_v20  ;;  %5600 = vmatprep.mubr.bf16.mxu1 %v8541_v19  ;;  %v8095_v20 = vcombine.high %v865_v32, %v873_v62  ;;  %v8103_v19 = vcombine.high %v869_v37, %v877_v50  ;;  %v925_v60 = vunpack.c.h.s8.bf16 %v9982_v3  ;;  %v929_v32 = vunpack.c.h.s8.bf16 %v9983_v14  ;;  %v9998_v3 = vld [vmem:[%s10238_s6 + $0x1f8] sm:$0xff]  ;;  %v9999_v14 = vld [vmem:[%s10238_s6 + $0x208] sm:$0xff] }
 0x321   : > { %6756 = vmatprep.mubr.bf16.mxu0 %v8549_v8  ;;  %v7289_v8 = vld [vmem:[%s11216_s28 + $0x80] sm:$0xff]  ;;  %7424 = vperm.xlu1 %9748, %v7290_v61   ;;  %v937_v62 = vunpack.c.h.s8.bf16 %v9984_v33  ;;  %v7306_v61 = vld [vmem:[%s11216_s28 + $0x108] sm:$0xff] }
 0x322   : > { %7419 = vperm.xlu0 %9747, %v7289_v8   ;;  %v7305_v8 = vld [vmem:[%s11216_s28 + $0x100] sm:$0xff]  ;;  %v10000_v33 = vld [vmem:[%s10238_s6 + $0x228] sm:$0xff] }
 0x325   : > { %7434 = vperm.xlu1 %9748, %v7292_v17   ;;  %v7308_v17 = vld [vmem:[%s11216_s28 + $0x118] sm:$0xff] }
 0x327   : > { %5601 = vmatmul.mubr.bf16.gmra.mrb[112].mxu1 %v8540_v31  ;;  %v7291_v31 = vld [vmem:[%s11216_s28 + $0x90] sm:$0xff] }
 0x328   : > { %6757 = vmatmul.mubr.bf16.gmra.mrb[112].mxu0 %v8548_v22  ;;  %5608 = vmatprep.mubr.bf16.mxu1 %v8557_v13  ;;  %v8102_v22 = vcombine.low %v869_v37, %v877_v50  ;;  %v8111_v13 = vcombine.high %v881_v16, %v889_v9  ;;  %v933_v37 = vunpack.c.h.s8.bf16 %v9985_v35  ;;  %v941_v50 = vunpack.c.h.s8.bf16 %v9986_v58  ;;  %v10001_v35 = vld [vmem:[%s10238_s6 + $0x218] sm:$0xff] }
 0x329   : > { %6764 = vmatprep.mubr.bf16.mxu0 %v8565_v24  ;;  %v8119_v24 = vcombine.high %v885_v11, %v893_v15  ;;  %7429 = vperm.xlu0 %9747, %v7291_v31   ;;  %v7307_v31 = vld [vmem:[%s11216_s28 + $0x110] sm:$0xff]  ;;  %v10002_v58 = vld [vmem:[%s10238_s6 + $0x238] sm:$0xff] }
 0x32a   : > { %7444 = vperm.xlu1 %9748, %v7294_v34   ;;  %v7310_v34 = vld [vmem:[%s11216_s28 + $0x128] sm:$0xff] }
 0x32d   : > { %7439 = vperm.xlu0 %9747, %v7293_v27   ;;  %v7309_v27 = vld [vmem:[%s11216_s28 + $0x120] sm:$0xff] }
 0x32e   : > { %7454 = vperm.xlu1 %9748, %v7296_v51   ;;  %v7312_v51 = vld [vmem:[%s11216_s28 + $0x138] sm:$0xff] }
 0x32f   : > { %5609 = vmatmul.mubr.bf16.gmra.mrb[116].mxu1 %v8556_v52  ;;  %v8110_v52 = vcombine.low %v881_v16, %v889_v9  ;;  %v945_v16 = vunpack.c.h.s8.bf16 %v9987_v7  ;;  %v953_v9 = vunpack.c.h.s8.bf16 %v9988_v36  ;;  %v10003_v7 = vld [vmem:[%s10238_s6 + $0x248] sm:$0xff] }
 0x330   : > { %6765 = vmatmul.mubr.bf16.gmra.mrb[116].mxu0 %v8564_v53  ;;  %5616 = vmatprep.mubr.bf16.mxu1 %v8573_v1  ;;  %v8118_v53 = vcombine.low %v885_v11, %v893_v15  ;;  %v8127_v1 = vcombine.high %v897_v40, %v905_v41  ;;  %v949_v11 = vunpack.c.h.s8.bf16 %v9989_v10  ;;  %v957_v15 = vunpack.c.h.s8.bf16 %v9990_v12  ;;  %v10004_v36 = vld [vmem:[%s10238_s6 + $0x268] sm:$0xff]  ;;  %v10005_v10 = vld [vmem:[%s10238_s6 + $0x258] sm:$0xff] }
 0x331   : > { %6772 = vmatprep.mubr.bf16.mxu0 %v8581_v38  ;;  %v8135_v38 = vcombine.high %v901_v42, %v909_v48  ;;  %7449 = vperm.xlu0 %9747, %v7295_v46   ;;  %v7311_v46 = vld [vmem:[%s11216_s28 + $0x130] sm:$0xff]  ;;  %v10006_v12 = vld [vmem:[%s10238_s6 + $0x278] sm:$0xff] }
 0x332   : > { %7464 = vperm.xlu1 %9748, %v7298_v54   ;;  %v7314_v54 = vld [vmem:[%s11216_s28 + $0x148] sm:$0xff] }
 0x335   : > { %7459 = vperm.xlu0 %9747, %v7297_v43   ;;  %v7313_v43 = vld [vmem:[%s11216_s28 + $0x140] sm:$0xff] }
 0x336   : > { %7474 = vperm.xlu1 %9748, %v7300_v6   ;;  %v7316_v6 = vld [vmem:[%s11216_s28 + $0x158] sm:$0xff] }
 0x337   : > { %5617 = vmatmul.mubr.bf16.gmra.mrb[120].mxu1 %v8572_v21  ;;  %v8126_v21 = vcombine.low %v897_v40, %v905_v41  ;;  %v961_v40 = vunpack.c.h.s8.bf16 %v9991_v39  ;;  %v969_v41 = vunpack.c.h.s8.bf16 %v9992_v30  ;;  %v10007_v39 = vld [vmem:[%s10238_s6 + $0x288] sm:$0xff] }
 0x338   : > { %6773 = vmatmul.mubr.bf16.gmra.mrb[120].mxu0 %v8580_v4  ;;  %5624 = vmatprep.mubr.bf16.mxu1 %v8589_v26  ;;  %v8134_v4 = vcombine.low %v901_v42, %v909_v48  ;;  %v8143_v26 = vcombine.high %v913_v63, %v921_v59  ;;  %v965_v42 = vunpack.c.h.s8.bf16 %v9993_v28  ;;  %v973_v48 = vunpack.c.h.s8.bf16 %v9994_v45  ;;  %v10008_v30 = vld [vmem:[%s10238_s6 + $0x2a8] sm:$0xff]  ;;  %v10009_v28 = vld [vmem:[%s10238_s6 + $0x298] sm:$0xff] }
 0x339   : > { %6780 = vmatprep.mubr.bf16.mxu0 %v8597_v49  ;;  %v8151_v49 = vcombine.high %v917_v47, %v925_v60  ;;  %7469 = vperm.xlu0 %9747, %v7299_v25   ;;  %v7315_v25 = vld [vmem:[%s11216_s28 + $0x150] sm:$0xff]  ;;  %v10010_v45 = vld [vmem:[%s10238_s6 + $0x2b8] sm:$0xff] }
 0x33a   : > { %7484 = vperm.xlu1 %9748, %v7302_v29   ;;  %v7318_v29 = vld [vmem:[%s11216_s28 + $0x168] sm:$0xff] }
 0x33d   : > { %7479 = vperm.xlu0 %9747, %v7301_v23   ;;  %v7317_v23 = vld [vmem:[%s11216_s28 + $0x160] sm:$0xff] }
 0x33e   : > { %7494 = vperm.xlu1 %9748, %v7304_v55   ;;  %v7320_v55 = vld [vmem:[%s11216_s28 + $0x178] sm:$0xff] }
 0x33f   : > { %5625 = vmatmul.mubr.bf16.gmra.mrb[124].mxu1 %v8588_v56  ;;  %v8142_v56 = vcombine.low %v913_v63, %v921_v59  ;;  %v977_v63 = vunpack.c.h.s8.bf16 %v9995_v44  ;;  %v985_v59 = vunpack.c.h.s8.bf16 %v9996_v0  ;;  %v10011_v44 = vld [vmem:[%s10238_s6 + $0x2c8] sm:$0xff] }
 0x340   : > { %6781 = vmatmul.mubr.bf16.gmra.mrb[124].mxu0 %v8596_v5  ;;  %5665 = vmatprep.mubr.bf16.mxu1 %v8095_v20  ;;  %v8150_v5 = vcombine.low %v917_v47, %v925_v60  ;;  %v8159_v20 = vcombine.high %v929_v32, %v937_v62  ;;  %v981_v47 = vunpack.c.h.s8.bf16 %v9997_v2  ;;  %v989_v60 = vunpack.c.h.s8.bf16 %v9998_v3  ;;  %v10012_v0 = vld [vmem:[%s10238_s6 + $0x2e8] sm:$0xff]  ;;  %v10013_v2 = vld [vmem:[%s10238_s6 + $0x2d8] sm:$0xff] }
 0x341   : > { %6821 = vmatprep.mubr.bf16.mxu0 %v8103_v19  ;;  %v8167_v19 = vcombine.high %v933_v37, %v941_v50  ;;  %7489 = vperm.xlu0 %9747, %v7303_v57   ;;  %v7319_v57 = vld [vmem:[%s11216_s28 + $0x170] sm:$0xff]  ;;  %v10014_v3 = vld [vmem:[%s10238_s6 + $0x2f8] sm:$0xff] }
 0x342   : > { %7504 = vperm.xlu1 %9748, %v7306_v61   ;;  %v7322_v61 = vld [vmem:[%s11216_s28 + $0x188] sm:$0xff] }
 0x345   : > { %7499 = vperm.xlu0 %9747, %v7305_v8   ;;  %v7321_v8 = vld [vmem:[%s11216_s28 + $0x180] sm:$0xff] }
 0x346   : > { %7514 = vperm.xlu1 %9748, %v7308_v17   ;;  %v7324_v17 = vld [vmem:[%s11216_s28 + $0x198] sm:$0xff] }
 0x347   : > { %5666 = vmatmul.mubr.bf16.vlgmr.msra.gmra.mrb[0].mxu1 %v8094_v18  ;;  %v8158_v18 = vcombine.low %v929_v32, %v937_v62  ;;  %v993_v32 = vunpack.c.h.s8.bf16 %v9999_v14  ;;  %v1001_v62 = vunpack.c.h.s8.bf16 %v10000_v33  ;;  %v10015_v14 = vld [vmem:[%s10238_s6 + $0x308] sm:$0xff] }
 0x348   : > { %6822 = vmatmul.mubr.bf16.vlgmr.msra.gmra.mrb[0].mxu0 %v8102_v22  ;;  %5673 = vmatprep.mubr.bf16.mxu1 %v8111_v13  ;;  %v8166_v22 = vcombine.low %v933_v37, %v941_v50  ;;  %v8175_v13 = vcombine.high %v945_v16, %v953_v9  ;;  %v997_v37 = vunpack.c.h.s8.bf16 %v10001_v35  ;;  %v1005_v50 = vunpack.c.h.s8.bf16 %v10002_v58  ;;  %v10016_v33 = vld [vmem:[%s10238_s6 + $0x328] sm:$0xff]  ;;  %v10017_v35 = vld [vmem:[%s10238_s6 + $0x318] sm:$0xff] }
 0x349   : > { %6829 = vmatprep.mubr.bf16.mxu0 %v8119_v24  ;;  %v8183_v24 = vcombine.high %v949_v11, %v957_v15  ;;  %7509 = vperm.xlu0 %9747, %v7307_v31   ;;  %v7323_v31 = vld [vmem:[%s11216_s28 + $0x190] sm:$0xff]  ;;  %v10018_v58 = vld [vmem:[%s10238_s6 + $0x338] sm:$0xff] }
 0x34a   : > { %7524 = vperm.xlu1 %9748, %v7310_v34   ;;  %v7326_v34 = vld [vmem:[%s11216_s28 + $0x1a8] sm:$0xff] }
 0x34d   : > { %7519 = vperm.xlu0 %9747, %v7309_v27   ;;  %v7325_v27 = vld [vmem:[%s11216_s28 + $0x1a0] sm:$0xff] }
 0x34e   : > { %7534 = vperm.xlu1 %9748, %v7312_v51   ;;  %v7328_v51 = vld [vmem:[%s11216_s28 + $0x1b8] sm:$0xff] }
 0x34f   : > { %5674 = vmatmul.mubr.bf16.gmra.mrb[4].mxu1 %v8110_v52  ;;  %v8174_v52 = vcombine.low %v945_v16, %v953_v9  ;;  %v1009_v16 = vunpack.c.h.s8.bf16 %v10003_v7  ;;  %v1017_v9 = vunpack.c.h.s8.bf16 %v10004_v36  ;;  %v10020_v7 = vld [vmem:[%s10238_s6 + $0x368] sm:$0xff]  ;;  %v10021_v36 = vld [vmem:[%s10238_s6 + $0x358] sm:$0xff] }
 0x350   : > { %6830 = vmatmul.mubr.bf16.gmra.mrb[4].mxu0 %v8118_v53  ;;  %5681 = vmatprep.mubr.bf16.mxu1 %v8127_v1  ;;  %v8182_v53 = vcombine.low %v949_v11, %v957_v15  ;;  %v8191_v1 = vcombine.high %v961_v40, %v969_v41  ;;  %v1013_v11 = vunpack.c.h.s8.bf16 %v10005_v10  ;;  %v1021_v15 = vunpack.c.h.s8.bf16 %v10006_v12  ;;  %v10022_v10 = vld [vmem:[%s10238_s6 + $0x378] sm:$0xff] }
 0x351   : > { %6837 = vmatprep.mubr.bf16.mxu0 %v8135_v38  ;;  %v8199_v38 = vcombine.high %v965_v42, %v973_v48  ;;  %7529 = vperm.xlu0 %9747, %v7311_v46   ;;  %v7327_v46 = vld [vmem:[%s11216_s28 + $0x1b0] sm:$0xff] }
 0x352   : > { %7544 = vperm.xlu1 %9748, %v7314_v54   ;;  %v7330_v54 = vld [vmem:[%s11216_s28 + $0x1c8] sm:$0xff] }
 0x355   : > { %7539 = vperm.xlu0 %9747, %v7313_v43   ;;  %v7329_v43 = vld [vmem:[%s11216_s28 + $0x1c0] sm:$0xff] }
 0x356   : > { %7554 = vperm.xlu1 %9748, %v7316_v6   ;;  %v7332_v6 = vld [vmem:[%s11216_s28 + $0x1d8] sm:$0xff] }
 0x357   : > { %5682 = vmatmul.mubr.bf16.gmra.mrb[8].mxu1 %v8126_v21  ;;  %v8190_v21 = vcombine.low %v961_v40, %v969_v41  ;;  %v1025_v40 = vunpack.c.h.s8.bf16 %v10007_v39  ;;  %v1033_v41 = vunpack.c.h.s8.bf16 %v10008_v30  ;;  %v10026_v39 = vld [vmem:[%s10238_s6 + $0x3b8] sm:$0xff] }
 0x358   : > { %6838 = vmatmul.mubr.bf16.gmra.mrb[8].mxu0 %v8134_v4  ;;  %5689 = vmatprep.mubr.bf16.mxu1 %v8143_v26  ;;  %v8198_v4 = vcombine.low %v965_v42, %v973_v48  ;;  %v8207_v26 = vcombine.high %v977_v63, %v985_v59  ;;  %v1029_v42 = vunpack.c.h.s8.bf16 %v10009_v28  ;;  %v1037_v48 = vunpack.c.h.s8.bf16 %v10010_v45  ;;  %v10027_v45 = vld [vmem:[%s10238_s6 + $0x3c8] sm:$0xff] }
 0x359   : > { %6845 = vmatprep.mubr.bf16.mxu0 %v8151_v49  ;;  %v8215_v49 = vcombine.high %v981_v47, %v989_v60  ;;  %7549 = vperm.xlu0 %9747, %v7315_v25   ;;  %v7331_v25 = vld [vmem:[%s11216_s28 + $0x1d0] sm:$0xff] }
 0x35a   : > { %7564 = vperm.xlu1 %9748, %v7318_v29   ;;  %v7334_v29 = vld [vmem:[%s11216_s28 + $0x1e8] sm:$0xff] }
 0x35d   : > { %7559 = vperm.xlu0 %9747, %v7317_v23   ;;  %v7333_v23 = vld [vmem:[%s11216_s28 + $0x1e0] sm:$0xff] }
 0x35e   : > { %7574 = vperm.xlu1 %9748, %v7320_v55  }
 0x35f   : > { %5690 = vmatmul.mubr.bf16.gmra.mrb[12].mxu1 %v8142_v56  ;;  %v8206_v56 = vcombine.low %v977_v63, %v985_v59  ;;  %v1041_v63 = vunpack.c.h.s8.bf16 %v10011_v44  ;;  %v1049_v59 = vunpack.c.h.s8.bf16 %v10012_v0  ;;  %v10031_v0 = vld [vmem:[%s10238_s6 + $0x408] sm:$0xff] }
 0x360   : > { %6846 = vmatmul.mubr.bf16.gmra.mrb[12].mxu0 %v8150_v5  ;;  %5697 = vmatprep.mubr.bf16.mxu1 %v8159_v20  ;;  %v8214_v5 = vcombine.low %v981_v47, %v989_v60  ;;  %v8223_v20 = vcombine.high %v993_v32, %v1001_v62  ;;  %v1045_v47 = vunpack.c.h.s8.bf16 %v10013_v2  ;;  %v1053_v60 = vunpack.c.h.s8.bf16 %v10014_v3  ;;  %v10032_v2 = vld [vmem:[%s10238_s6 + $0x428] sm:$0xff]  ;;  %v10033_v3 = vld [vmem:[%s10238_s6 + $0x418] sm:$0xff] }
 0x361   : > { %6853 = vmatprep.mubr.bf16.mxu0 %v8167_v19  ;;  %v8231_v19 = vcombine.high %v997_v37, %v1005_v50  ;;  %7569 = vperm.xlu0 %9747, %v7319_v57   ;;  %v8270_v55 = vcombine.low %v1041_v63, %v1049_v59  ;;  %v7335_v57 = vld [vmem:[%s11216_s28 + $0x1f0] sm:$0xff] }
 0x362   : > { %7584 = vperm.xlu1 %9748, %v7322_v61   ;;  %v10019_v61 = vld [vmem:[%s10238_s6 + $0x348] sm:$0xff] }
 0x365   : > { %7579 = vperm.xlu0 %9747, %v7321_v8   ;;  %v1073_v8 = vunpack.c.h.s8.bf16 %v10019_v61  ;;  %v10041_v61 = vld [vmem:[%s10238_s6 + $0x498] sm:$0xff] }
 0x366   : > { %7594 = vperm.xlu1 %9748, %v7324_v17  }
 0x367   : > { %5698 = vmatmul.mubr.bf16.gmra.mrb[16].mxu1 %v8158_v18  ;;  %v8222_v18 = vcombine.low %v993_v32, %v1001_v62  ;;  %v1057_v32 = vunpack.c.h.s8.bf16 %v10015_v14  ;;  %v1065_v62 = vunpack.c.h.s8.bf16 %v10016_v33  ;;  %v10036_v14 = vld [vmem:[%s10238_s6 + $0x468] sm:$0xff]  ;;  %v10037_v33 = vld [vmem:[%s10238_s6 + $0x458] sm:$0xff] }
 0x368   : > { %6854 = vmatmul.mubr.bf16.gmra.mrb[16].mxu0 %v8166_v22  ;;  %5705 = vmatprep.mubr.bf16.mxu1 %v8175_v13  ;;  %v8230_v22 = vcombine.low %v997_v37, %v1005_v50  ;;  %v8239_v13 = vcombine.high %v1009_v16, %v1017_v9  ;;  %v1061_v37 = vunpack.c.h.s8.bf16 %v10017_v35  ;;  %v1069_v50 = vunpack.c.h.s8.bf16 %v10018_v58  ;;  %v10038_v35 = vld [vmem:[%s10238_s6 + $0x478] sm:$0xff] }
 0x369   : > { %6861 = vmatprep.mubr.bf16.mxu0 %v8183_v24  ;;  %v8247_v24 = vcombine.high %v1013_v11, %v1021_v15  ;;  %7589 = vperm.xlu0 %9747, %v7323_v31   ;;  %v8286_v12 = vcombine.low %v1057_v32, %v1065_v62  ;;  %v10023_v31 = vld [vmem:[%s10238_s6 + $0x388] sm:$0xff] }
 0x36a   : > { %7604 = vperm.xlu1 %9748, %v7326_v34   ;;  %v10025_v34 = vld [vmem:[%s10238_s6 + $0x398] sm:$0xff] }
 0x36d   : > { %7599 = vperm.xlu0 %9747, %v7325_v27   ;;  %v1093_v27 = vunpack.c.h.s8.bf16 %v10025_v34 }
 0x36e   : > { %7614 = vperm.xlu1 %9748, %v7328_v51   ;;  %v10028_v51 = vld [vmem:[%s10238_s6 + $0x3e8] sm:$0xff] }
 0x36f   : > { %5706 = vmatmul.mubr.bf16.gmra.mrb[20].mxu1 %v8174_v52  ;;  %v8238_v52 = vcombine.low %v1009_v16, %v1017_v9  ;;  %v1081_v16 = vunpack.c.h.s8.bf16 %v10020_v7  ;;  %v1077_v9 = vunpack.c.h.s8.bf16 %v10021_v36  ;;  %v10042_v7 = vld [vmem:[%s10238_s6 + $0x4b8] sm:$0xff] }
 0x370   : > { %6862 = vmatmul.mubr.bf16.gmra.mrb[20].mxu0 %v8182_v53  ;;  %5713 = vmatprep.mubr.bf16.mxu1 %v8191_v1  ;;  %v8246_v53 = vcombine.low %v1013_v11, %v1021_v15  ;;  %v8255_v1 = vcombine.high %v1025_v40, %v1033_v41  ;;  %v1085_v11 = vunpack.c.h.s8.bf16 %v10022_v10  ;;  %v8294_v15 = vcombine.low %v1061_v37, %v1069_v50 }
 0x371   : > { %6869 = vmatprep.mubr.bf16.mxu0 %v8199_v38  ;;  %v8263_v38 = vcombine.high %v1029_v42, %v1037_v48  ;;  %7609 = vperm.xlu0 %9747, %v7327_v46   ;;  %v8303_v17 = vcombine.high %v1073_v8, %v1081_v16  ;;  %v8302_v30 = vcombine.low %v1073_v8, %v1081_v16  ;;  %v10029_v46 = vld [vmem:[%s10238_s6 + $0x3d8] sm:$0xff]  ;;  %v1157_v8 = vunpack.c.h.s8.bf16 %v10041_v61 }
 0x372   : > { %7624 = vperm.xlu1 %9748, %v7330_v54   ;;  %v1165_v16 = vunpack.c.h.s8.bf16 %v10042_v7 }
 0x375   : > { %7619 = vperm.xlu0 %9747, %v7329_v43  }
 0x376   : > { %7634 = vperm.xlu1 %9748, %v7332_v6   ;;  %v10034_v6 = vld [vmem:[%s10238_s6 + $0x438] sm:$0xff] }
 0x377   : > { %5714 = vmatmul.mubr.bf16.gmra.mrb[24].mxu1 %v8190_v21  ;;  %v8254_v21 = vcombine.low %v1025_v40, %v1033_v41  ;;  %v1101_v40 = vunpack.c.h.s8.bf16 %v10026_v39  ;;  %v8310_v41 = vcombine.low %v1077_v9, %v1085_v11 }
 0x378   : > { %6870 = vmatmul.mubr.bf16.gmra.mrb[24].mxu0 %v8198_v4  ;;  %5721 = vmatprep.mubr.bf16.mxu1 %v8207_v26  ;;  %v8262_v4 = vcombine.low %v1029_v42, %v1037_v48  ;;  %v8271_v26 = vcombine.high %v1041_v63, %v1049_v59  ;;  %v1105_v48 = vunpack.c.h.s8.bf16 %v10027_v45  ;;  %v1121_v59 = vunpack.c.h.s8.bf16 %v10031_v0  ;;  %v10049_v45 = vld [vmem:[%s10238_s6 + $0x518] sm:$0xff] }
 0x379   : > { %6877 = vmatprep.mubr.bf16.mxu0 %v8215_v49  ;;  %v8279_v49 = vcombine.high %v1045_v47, %v1053_v60  ;;  %7629 = vperm.xlu0 %9747, %v7331_v25   ;;  %v8327_v42 = vcombine.high %v1093_v27, %v1101_v40  ;;  %v8326_v43 = vcombine.low %v1093_v27, %v1101_v40  ;;  %v10053_v0 = vld [vmem:[%s10238_s6 + $0x558] sm:$0xff] }
 0x37a   : > { %7644 = vperm.xlu1 %9748, %v7334_v29   ;;  %v10035_v29 = vld [vmem:[%s10238_s6 + $0x448] sm:$0xff]  ;;  %v8390_v27 = vcombine.low %v1157_v8, %v1165_v16 }
 0x37d   : > { %7639 = vperm.xlu0 %9747, %v7333_v23   ;;  %v1137_v23 = vunpack.c.h.s8.bf16 %v10035_v29  ;;  %v10057_v29 = vld [vmem:[%s10238_s6 + $0x598] sm:$0xff] }
 0x37f   : > { %5722 = vmatmul.mubr.bf16.gmra.mrb[28].mxu1 %v8206_v56  ;;  %v7336_v56 = vld [vmem:[%s11216_s28 + $0x1f8] sm:$0xff] }
 0x380   : > { %6878 = vmatmul.mubr.bf16.gmra.mrb[28].mxu0 %v8214_v5  ;;  %5729 = vmatprep.mubr.bf16.mxu1 %v8223_v20  ;;  %v8278_v5 = vcombine.low %v1045_v47, %v1053_v60  ;;  %v8287_v20 = vcombine.high %v1057_v32, %v1065_v62  ;;  %v1129_v47 = vunpack.c.h.s8.bf16 %v10032_v2  ;;  %v1125_v60 = vunpack.c.h.s8.bf16 %v10033_v3  ;;  %v10054_v2 = vld [vmem:[%s10238_s6 + $0x578] sm:$0xff] }
 0x381   : > { %6885 = vmatprep.mubr.bf16.mxu0 %v8231_v19  ;;  %v8295_v19 = vcombine.high %v1061_v37, %v1069_v50  ;;  %7654 = vperm.xlu1 %9748, %v7336_v56   ;;  %v1145_v32 = vunpack.c.h.s8.bf16 %v10036_v14  ;;  %v1141_v62 = vunpack.c.h.s8.bf16 %v10037_v33  ;;  %v1149_v37 = vunpack.c.h.s8.bf16 %v10038_v35  ;;  %v10058_v14 = vld [vmem:[%s10238_s6 + $0x5b8] sm:$0xff] }
 0x382   : > { %7649 = vperm.xlu0 %9747, %v7335_v57   ;;  %v8350_v58 = vcombine.low %v1121_v59, %v1129_v47  ;;  %v10039_v57 = vld [vmem:[%s10238_s6 + $0x488] sm:$0xff] }
 0x383   : > { %v8375_v56 = vcombine.high %v1141_v62, %v1149_v37  ;;  %v8366_v36 = vcombine.low %v1137_v23, %v1145_v32 }
 0x387   : > { %5730 = vmatmul.mubr.bf16.gmra.mrb[32].mxu1 %v8222_v18  ;;  %v8311_v18 = vcombine.high %v1077_v9, %v1085_v11  ;;  %v8374_v9 = vcombine.low %v1141_v62, %v1149_v37  ;;  %v8391_v11 = vcombine.high %v1157_v8, %v1165_v16 }
 0x388   : > { %6886 = vmatmul.mubr.bf16.gmra.mrb[32].mxu0 %v8230_v22  ;;  %5737 = vmatprep.mubr.bf16.mxu1 %v8239_v13  ;;  %v1089_v22 = vunpack.c.h.s8.bf16 %v10023_v31  ;;  %v10024_v13 = vld [vmem:[%s10238_s6 + $0x3a8] sm:$0xff]  ;;  %v10045_v31 = vld [vmem:[%s10238_s6 + $0x4d8] sm:$0xff] }
 0x389   : > { %6893 = vmatprep.mubr.bf16.mxu0 %v8247_v24  ;;  %v1097_v24 = vunpack.c.h.s8.bf16 %v10024_v13  ;;  %v10046_v13 = vld [vmem:[%s10238_s6 + $0x4f8] sm:$0xff] }
 0x38b   : > { %v8319_v28 = vcombine.high %v1089_v22, %v1097_v24  ;;  %v8318_v54 = vcombine.low %v1089_v22, %v1097_v24  ;;  %v1173_v22 = vunpack.c.h.s8.bf16 %v10045_v31  ;;  %v1181_v24 = vunpack.c.h.s8.bf16 %v10046_v13 }
 0x38d   : > { %v8407_v40 = vcombine.high %v1173_v22, %v1181_v24 }
 0x38f   : > { %5738 = vmatmul.mubr.bf16.gmra.mrb[36].mxu1 %v8238_v52  ;;  %v1113_v52 = vunpack.c.h.s8.bf16 %v10028_v51  ;;  %v10050_v51 = vld [vmem:[%s10238_s6 + $0x538] sm:$0xff] }
 0x390   : > { %6894 = vmatmul.mubr.bf16.gmra.mrb[36].mxu0 %v8246_v53  ;;  %5745 = vmatprep.mubr.bf16.mxu1 %v8255_v1  ;;  %v1109_v53 = vunpack.c.h.s8.bf16 %v10029_v46  ;;  %v10030_v1 = vld [vmem:[%s10238_s6 + $0x3f8] sm:$0xff] }
 0x391   : > { %6901 = vmatprep.mubr.bf16.mxu0 %v8263_v38  ;;  %v1117_v38 = vunpack.c.h.s8.bf16 %v10030_v1  ;;  %v8335_v44 = vcombine.high %v1105_v48, %v1113_v52  ;;  %v8334_v25 = vcombine.low %v1105_v48, %v1113_v52  ;;  %v1189_v48 = vunpack.c.h.s8.bf16 %v10049_v45 }
 0x392   : > { %v1197_v52 = vunpack.c.h.s8.bf16 %v10050_v51 }
 0x393   : > { %v8343_v63 = vcombine.high %v1109_v53, %v1117_v38 }
 0x397   : > { %5746 = vmatmul.mubr.bf16.gmra.mrb[40].mxu1 %v8254_v21  ;;  %v1133_v21 = vunpack.c.h.s8.bf16 %v10034_v6 }
 0x398   : > { %6902 = vmatmul.mubr.bf16.gmra.mrb[40].mxu0 %v8262_v4  ;;  %5753 = vmatprep.mubr.bf16.mxu1 %v8271_v26  ;;  %v8342_v4 = vcombine.low %v1109_v53, %v1117_v38  ;;  %v8351_v26 = vcombine.high %v1121_v59, %v1129_v47  ;;  %v8406_v53 = vcombine.low %v1173_v22, %v1181_v24  ;;  %v1205_v59 = vunpack.c.h.s8.bf16 %v10053_v0 }
 0x399   : > { %6909 = vmatprep.mubr.bf16.mxu0 %v8279_v49  ;;  %v8359_v49 = vcombine.high %v1125_v60, %v1133_v21  ;;  %v8358_v50 = vcombine.low %v1125_v60, %v1133_v21  ;;  %v8423_v38 = vcombine.high %v1189_v48, %v1197_v52  ;;  %v1213_v47 = vunpack.c.h.s8.bf16 %v10054_v2 }
 0x39a   : > { %v8422_v60 = vcombine.low %v1189_v48, %v1197_v52 }
 0x39b   : > { %v8439_v21 = vcombine.high %v1205_v59, %v1213_v47  ;;  %v8438_v62 = vcombine.low %v1205_v59, %v1213_v47 }
 0x39f   : > { %5754 = vmatmul.mubr.bf16.gmra.mrb[44].mxu1 %v8270_v55  ;;  %v8367_v55 = vcombine.high %v1137_v23, %v1145_v32  ;;  %v1221_v23 = vunpack.c.h.s8.bf16 %v10057_v29  ;;  %v1229_v32 = vunpack.c.h.s8.bf16 %v10058_v14  ;;  %v7340_v14 = vpop.permute.xlu0 %7339 }
 0x3a0   : > { %6910 = vmatmul.mubr.bf16.gmra.mrb[44].mxu0 %v8278_v5  ;;  %5761 = vmatprep.mubr.bf16.mxu1 %v8287_v20  ;;  %v1153_v5 = vunpack.c.h.s8.bf16 %v10039_v57  ;;  %v10040_v20 = vld [vmem:[%s10238_s6 + $0x4a8] sm:$0xff]  ;;  %v10061_v57 = vld [vmem:[%s10238_s6 + $0x5d8] sm:$0xff] }
 0x3a1   : > { %6917 = vmatprep.mubr.bf16.mxu0 %v8295_v19  ;;  %v1161_v19 = vunpack.c.h.s8.bf16 %v10040_v20  ;;  %v8455_v37 = vcombine.high %v1221_v23, %v1229_v32  ;;  %v10062_v20 = vld [vmem:[%s10238_s6 + $0x5f8] sm:$0xff]  ;;  %v8454_v8 = vcombine.low %v1221_v23, %v1229_v32 }
 0x3a3   : > { %v8383_v10 = vcombine.high %v1153_v5, %v1161_v19  ;;  %v8382_v34 = vcombine.low %v1153_v5, %v1161_v19  ;;  %v1237_v5 = vunpack.c.h.s8.bf16 %v10061_v57  ;;  %v1245_v19 = vunpack.c.h.s8.bf16 %v10062_v20  ;;  %v10082_v57 = vld [vmem:[%s10238_s6 + $0x738] sm:$0xff] }
 0x3a5   : > { %v8471_v16 = vcombine.high %v1237_v5, %v1245_v19  ;;  %v8470_v22 = vcombine.low %v1237_v5, %v1245_v19  ;;  %v1325_v5 = vunpack.c.h.s8.bf16 %v10082_v57  ;;  %v7345_v19 = vpop.permute.xlu0 %7344 }
 0x3a7   : > { %5762 = vmatmul.mubr.bf16.gmra.mrb[48].mxu1 %v8286_v12  ;;  %v10043_v12 = vld [vmem:[%s10238_s6 + $0x4c8] sm:$0xff] }
 0x3a8   : > { %6918 = vmatmul.mubr.bf16.gmra.mrb[48].mxu0 %v8294_v15  ;;  %5769 = vmatprep.mubr.bf16.mxu1 %v8303_v17  ;;  %v1169_v15 = vunpack.c.h.s8.bf16 %v10043_v12  ;;  %v10044_v17 = vld [vmem:[%s10238_s6 + $0x4e8] sm:$0xff]  ;;  %v10065_v12 = vld [vmem:[%s10238_s6 + $0x618] sm:$0xff] }
 0x3a9   : > { %6925 = vmatprep.mubr.bf16.mxu0 %v8311_v18  ;;  %v1177_v18 = vunpack.c.h.s8.bf16 %v10044_v17  ;;  %v10066_v17 = vld [vmem:[%s10238_s6 + $0x638] sm:$0xff] }
 0x3ab   : > { %v8399_v39 = vcombine.high %v1169_v15, %v1177_v18  ;;  %v8398_v46 = vcombine.low %v1169_v15, %v1177_v18  ;;  %v1253_v15 = vunpack.c.h.s8.bf16 %v10065_v12  ;;  %v1261_v18 = vunpack.c.h.s8.bf16 %v10066_v17 }
 0x3ad   : > { %v8487_v24 = vcombine.high %v1253_v15, %v1261_v18  ;;  %v8486_v48 = vcombine.low %v1253_v15, %v1261_v18 }
 0x3af   : > { %5770 = vmatmul.mubr.bf16.gmra.mrb[52].mxu1 %v8302_v30  ;;  %v10047_v30 = vld [vmem:[%s10238_s6 + $0x508] sm:$0xff] }
 0x3b0   : > { %6926 = vmatmul.mubr.bf16.gmra.mrb[52].mxu0 %v8310_v41  ;;  %5777 = vmatprep.mubr.bf16.mxu1 %v8319_v28  ;;  %v1185_v41 = vunpack.c.h.s8.bf16 %v10047_v30  ;;  %v10048_v28 = vld [vmem:[%s10238_s6 + $0x528] sm:$0xff]  ;;  %v10069_v30 = vld [vmem:[%s10238_s6 + $0x658] sm:$0xff] }
 0x3b1   : > { %6933 = vmatprep.mubr.bf16.mxu0 %v8327_v42  ;;  %v1193_v42 = vunpack.c.h.s8.bf16 %v10048_v28  ;;  %v10070_v28 = vld [vmem:[%s10238_s6 + $0x678] sm:$0xff] }
 0x3b3   : > { %v8415_v1 = vcombine.high %v1185_v41, %v1193_v42  ;;  %v8414_v3 = vcombine.low %v1185_v41, %v1193_v42  ;;  %v1269_v41 = vunpack.c.h.s8.bf16 %v10069_v30  ;;  %v1277_v42 = vunpack.c.h.s8.bf16 %v10070_v28  ;;  %v10084_v30 = vld [vmem:[%s10238_s6 + $0x768] sm:$0xff]  ;;  %v7350_v28 = vpop.permute.xlu1 %7349 }
 0x3b5   : > { %v8503_v52 = vcombine.high %v1269_v41, %v1277_v42  ;;  %v8502_v59 = vcombine.low %v1269_v41, %v1277_v42  ;;  %v1337_v41 = vunpack.c.h.s8.bf16 %v10084_v30  ;;  %v8859_v42 = vld [vmem:[%s11410_s7 + $0x8] sm:$0xff]   ;;  %v8861_v30 = vld [vmem:[%s11410_s7 + $0x18] sm:$0xff]  }
 0x3b7   : > { %5778 = vmatmul.mubr.bf16.gmra.mrb[56].mxu1 %v8318_v54  ;;  %v10051_v54 = vld [vmem:[%s10238_s6 + $0x548] sm:$0xff] }
 0x3b8   : > { %6934 = vmatmul.mubr.bf16.gmra.mrb[56].mxu0 %v8326_v43  ;;  %5785 = vmatprep.mubr.bf16.mxu1 %v8335_v44  ;;  %v1201_v43 = vunpack.c.h.s8.bf16 %v10051_v54  ;;  %v10052_v44 = vld [vmem:[%s10238_s6 + $0x568] sm:$0xff]  ;;  %v10073_v54 = vld [vmem:[%s10238_s6 + $0x698] sm:$0xff] }
 0x3b9   : > { %6941 = vmatprep.mubr.bf16.mxu0 %v8343_v63  ;;  %v1209_v63 = vunpack.c.h.s8.bf16 %v10052_v44  ;;  %v10074_v44 = vld [vmem:[%s10238_s6 + $0x6b8] sm:$0xff] }
 0x3bb   : > { %v8431_v6 = vcombine.high %v1201_v43, %v1209_v63  ;;  %v8430_v33 = vcombine.low %v1201_v43, %v1209_v63  ;;  %v1285_v43 = vunpack.c.h.s8.bf16 %v10073_v54  ;;  %v1293_v63 = vunpack.c.h.s8.bf16 %v10074_v44 }
 0x3bc   : > { %v8737_v44 = vunpack.c.l.bf16 %v8859_v42 }
 0x3bd   : > { %v8519_v47 = vcombine.high %v1285_v43, %v1293_v63  ;;  %v8518_v23 = vcombine.low %v1285_v43, %v1293_v63 }
 0x3bf   : > { %5786 = vmatmul.mubr.bf16.gmra.mrb[60].mxu1 %v8334_v25  ;;  %v10055_v25 = vld [vmem:[%s10238_s6 + $0x588] sm:$0xff] }
 0x3c0   : > { %6942 = vmatmul.mubr.bf16.gmra.mrb[60].mxu0 %v8342_v4  ;;  %5793 = vmatprep.mubr.bf16.mxu1 %v8351_v26  ;;  %v1217_v4 = vunpack.c.h.s8.bf16 %v10055_v25  ;;  %v10056_v26 = vld [vmem:[%s10238_s6 + $0x5a8] sm:$0xff]  ;;  %v10077_v25 = vld [vmem:[%s10238_s6 + $0x6d8] sm:$0xff] }
 0x3c1   : > { %6949 = vmatprep.mubr.bf16.mxu0 %v8359_v49  ;;  %v1225_v49 = vunpack.c.h.s8.bf16 %v10056_v26  ;;  %v10078_v26 = vld [vmem:[%s10238_s6 + $0x6f8] sm:$0xff] }
 0x3c3   : > { %v8447_v35 = vcombine.high %v1217_v4, %v1225_v49  ;;  %v8446_v61 = vcombine.low %v1217_v4, %v1225_v49  ;;  %v1301_v4 = vunpack.c.h.s8.bf16 %v10077_v25  ;;  %v1309_v49 = vunpack.c.h.s8.bf16 %v10078_v26  ;;  %v7355_v26 = vpop.permute.xlu1 %7354 }
 0x3c4   : > { %v8738_v25 = vunpack.c.h.bf16 %v8859_v42  ;;  %v10094_v42 = vld [vmem:[%s10238_s6 + $0x7f8] sm:$0xff] }
 0x3c7   : > { %5794 = vmatmul.mubr.bf16.gmra.mrb[64].mxu1 %v8350_v58  ;;  %v10059_v58 = vld [vmem:[%s10238_s6 + $0x5c8] sm:$0xff] }
 0x3c8   : > { %6950 = vmatmul.mubr.bf16.gmra.mrb[64].mxu0 %v8358_v50  ;;  %5801 = vmatprep.mubr.bf16.mxu1 %v8367_v55  ;;  %v1233_v50 = vunpack.c.h.s8.bf16 %v10059_v58  ;;  %v10060_v55 = vld [vmem:[%s10238_s6 + $0x5e8] sm:$0xff] }
 0x3c9   : > { %6957 = vmatprep.mubr.bf16.mxu0 %v8375_v56  ;;  %v1241_v56 = vunpack.c.h.s8.bf16 %v10060_v55  ;;  %v10081_v55 = vld [vmem:[%s10238_s6 + $0x718] sm:$0xff] }
 0x3cb   : > { %v8463_v7 = vcombine.high %v1233_v50, %v1241_v56  ;;  %v8462_v31 = vcombine.low %v1233_v50, %v1241_v56  ;;  %v8732_v50 = vld [vmem:[%s11410_s7] sm:$0xff]   ;;  %v1317_v56 = vunpack.c.h.s8.bf16 %v10081_v55 }
 0x3cd   : > { %v8551_v18 = vcombine.high %v1317_v56, %v1325_v5 }
 0x3cf   : > { %5802 = vmatmul.mubr.bf16.gmra.mrb[68].mxu1 %v8366_v36  ;;  %v10063_v36 = vld [vmem:[%s10238_s6 + $0x608] sm:$0xff] }
 0x3d0   : > { %6958 = vmatmul.mubr.bf16.gmra.mrb[68].mxu0 %v8374_v9  ;;  %5809 = vmatprep.mubr.bf16.mxu1 %v8383_v10  ;;  %v1249_v9 = vunpack.c.h.s8.bf16 %v10063_v36  ;;  %v10064_v10 = vld [vmem:[%s10238_s6 + $0x628] sm:$0xff]  ;;  %v8733_v36 = vunpack.c.l.bf16 %v8732_v50 }
 0x3d1   : > { %6965 = vmatprep.mubr.bf16.mxu0 %v8391_v11  ;;  %v1257_v11 = vunpack.c.h.s8.bf16 %v10064_v10 }
 0x3d3   : > { %v8479_v13 = vcombine.high %v1249_v9, %v1257_v11  ;;  %v8478_v45 = vcombine.low %v1249_v9, %v1257_v11  ;;  %v8534_v11 = vcombine.low %v1301_v4, %v1309_v49 }
 0x3d7   : > { %5810 = vmatmul.mubr.bf16.gmra.mrb[72].mxu1 %v8382_v34  ;;  %v10067_v34 = vld [vmem:[%s10238_s6 + $0x648] sm:$0xff] }
 0x3d8   : > { %6966 = vmatmul.mubr.bf16.gmra.mrb[72].mxu0 %v8390_v27  ;;  %5817 = vmatprep.mubr.bf16.mxu1 %v8399_v39  ;;  %v1265_v27 = vunpack.c.h.s8.bf16 %v10067_v34  ;;  %v10068_v39 = vld [vmem:[%s10238_s6 + $0x668] sm:$0xff] }
 0x3d9   : > { %6973 = vmatprep.mubr.bf16.mxu0 %v8407_v40  ;;  %v1273_v40 = vunpack.c.h.s8.bf16 %v10068_v39  ;;  %v10083_v39 = vld [vmem:[%s10238_s6 + $0x748] sm:$0xff] }
 0x3db   : > { %v8495_v51 = vcombine.high %v1265_v27, %v1273_v40  ;;  %v8494_v0 = vcombine.low %v1265_v27, %v1273_v40  ;;  %v1329_v40 = vunpack.c.h.s8.bf16 %v10083_v39  ;;  %v10092_v39 = vld [vmem:[%s10238_s6 + $0x7e8] sm:$0xff] }
 0x3df   : > { %5818 = vmatmul.mubr.bf16.gmra.mrb[76].mxu1 %v8398_v46  ;;  %v10071_v46 = vld [vmem:[%s10238_s6 + $0x688] sm:$0xff] }
 0x3e0   : > { %6974 = vmatmul.mubr.bf16.gmra.mrb[76].mxu0 %v8406_v53  ;;  %5825 = vmatprep.mubr.bf16.mxu1 %v8415_v1  ;;  %v1281_v53 = vunpack.c.h.s8.bf16 %v10071_v46  ;;  %v10072_v1 = vld [vmem:[%s10238_s6 + $0x6a8] sm:$0xff] }
 0x3e1   : > { %6981 = vmatprep.mubr.bf16.mxu0 %v8423_v38  ;;  %v1289_v38 = vunpack.c.h.s8.bf16 %v10072_v1 }
 0x3e3   : > { %v8511_v2 = vcombine.high %v1281_v53, %v1289_v38  ;;  %v8510_v29 = vcombine.low %v1281_v53, %v1289_v38 }
 0x3e7   : > { %5826 = vmatmul.mubr.bf16.gmra.mrb[80].mxu1 %v8414_v3  ;;  %v10075_v3 = vld [vmem:[%s10238_s6 + $0x6c8] sm:$0xff] }
 0x3e8   : > { %6982 = vmatmul.mubr.bf16.gmra.mrb[80].mxu0 %v8422_v60  ;;  %5833 = vmatprep.mubr.bf16.mxu1 %v8431_v6  ;;  %v1297_v60 = vunpack.c.h.s8.bf16 %v10075_v3  ;;  %v10076_v6 = vld [vmem:[%s10238_s6 + $0x6e8] sm:$0xff] }
 0x3e9   : > { %6989 = vmatprep.mubr.bf16.mxu0 %v8439_v21  ;;  %v1305_v21 = vunpack.c.h.s8.bf16 %v10076_v6 }
 0x3eb   : > { %v8527_v32 = vcombine.high %v1297_v60, %v1305_v21 }
 0x3ef   : > { %5834 = vmatmul.mubr.bf16.gmra.mrb[84].mxu1 %v8430_v33  ;;  %v8535_v33 = vcombine.high %v1301_v4, %v1309_v49 }
 0x3f0   : > { %6990 = vmatmul.mubr.bf16.gmra.mrb[84].mxu0 %v8438_v62  ;;  %5841 = vmatprep.mubr.bf16.mxu1 %v8447_v35  ;;  %v10079_v62 = vld [vmem:[%s10238_s6 + $0x708] sm:$0xff] }
 0x3f1   : > { %6997 = vmatprep.mubr.bf16.mxu0 %v8455_v37  ;;  %v1313_v35 = vunpack.c.h.s8.bf16 %v10079_v62  ;;  %v10080_v37 = vld [vmem:[%s10238_s6 + $0x728] sm:$0xff]  ;;  %v8860_v62 = vld [vmem:[%s11410_s7 + $0x10] sm:$0xff]  }
 0x3f2   : > { %v1321_v58 = vunpack.c.h.s8.bf16 %v10080_v37 }
 0x3f4   : > { %v8543_v12 = vcombine.high %v1313_v35, %v1321_v58  ;;  %v8542_v54 = vcombine.low %v1313_v35, %v1321_v58  ;;  %v10089_v35 = vld [vmem:[%s10238_s6 + $0x798] sm:$0xff] }
 0x3f5   : > { %v1349_v37 = vunpack.c.h.s8.bf16 %v10089_v35  ;;  %v10090_v58 = vld [vmem:[%s10238_s6 + $0x7b8] sm:$0xff] }
 0x3f7   : > { %5842 = vmatmul.mubr.bf16.gmra.mrb[88].mxu1 %v8446_v61 }
 0x3f8   : > { %6998 = vmatmul.mubr.bf16.gmra.mrb[88].mxu0 %v8454_v8  ;;  %5849 = vmatprep.mubr.bf16.mxu1 %v8463_v7  ;;  %v8526_v7 = vcombine.low %v1297_v60, %v1305_v21 }
 0x3f9   : > { %7005 = vmatprep.mubr.bf16.mxu0 %v8471_v16 }
 0x3ff   : > { %5850 = vmatmul.mubr.bf16.gmra.mrb[92].mxu1 %v8462_v31 }
 0x400   : > { %7006 = vmatmul.mubr.bf16.gmra.mrb[92].mxu0 %v8470_v22  ;;  %5857 = vmatprep.mubr.bf16.mxu1 %v8479_v13 }
 0x401   : > { %7013 = vmatprep.mubr.bf16.mxu0 %v8487_v24  ;;  %v8734_v24 = vunpack.c.h.bf16 %v8732_v50  ;;  %v1357_v50 = vunpack.c.h.s8.bf16 %v10090_v58 }
 0x407   : > { %5858 = vmatmul.mubr.bf16.gmra.mrb[96].mxu1 %v8478_v45  ;;  %v10085_v45 = vld [vmem:[%s10238_s6 + $0x758] sm:$0xff] }
 0x408   : > { %7014 = vmatmul.mubr.bf16.gmra.mrb[96].mxu0 %v8486_v48  ;;  %5865 = vmatprep.mubr.bf16.mxu1 %v8495_v51  ;;  %v1333_v48 = vunpack.c.h.s8.bf16 %v10085_v45  ;;  %v10086_v51 = vld [vmem:[%s10238_s6 + $0x778] sm:$0xff]  ;;  %v1373_v45 = vunpack.c.h.s8.bf16 %v10094_v42  ;;  %v8864_v42 = vld [vmem:[%s11410_s7 + $0x30] sm:$0xff]  }
 0x409   : > { %7021 = vmatprep.mubr.bf16.mxu0 %v8503_v52  ;;  %v1341_v52 = vunpack.c.h.s8.bf16 %v10086_v51 }
 0x40b   : > { %v8567_v60 = vcombine.high %v1333_v48, %v1341_v52 }
 0x40f   : > { %5866 = vmatmul.mubr.bf16.gmra.mrb[100].mxu1 %v8494_v0 }
 0x410   : > { %7022 = vmatmul.mubr.bf16.gmra.mrb[100].mxu0 %v8502_v59  ;;  %5873 = vmatprep.mubr.bf16.mxu1 %v8511_v2  ;;  %v8550_v59 = vcombine.low %v1317_v56, %v1325_v5  ;;  %v8559_v2 = vcombine.high %v1329_v40, %v1337_v41  ;;  %v7360_v56 = vpop.permute.xlu0 %7359 }
 0x411   : > { %7029 = vmatprep.mubr.bf16.mxu0 %v8519_v47 }
 0x417   : > { %5874 = vmatmul.mubr.bf16.gmra.mrb[104].mxu1 %v8510_v29 }
 0x418   : > { %7030 = vmatmul.mubr.bf16.gmra.mrb[104].mxu0 %v8518_v23  ;;  %5881 = vmatprep.mubr.bf16.mxu1 %v8527_v32  ;;  %v10087_v23 = vld [vmem:[%s10238_s6 + $0x788] sm:$0xff] }
 0x419   : > { %7037 = vmatprep.mubr.bf16.mxu0 %v8535_v33  ;;  %v10088_v32 = vld [vmem:[%s10238_s6 + $0x7a8] sm:$0xff] }
 0x41a   : > { %v5667_v20 = vpop.f32.mrb[0].mxu1  ;;  %v1353_v33 = vunpack.c.h.s8.bf16 %v10088_v32 }
 0x41b   : > { %v6823_v61 = vpop.f32.mrb[0].mxu0  ;;  %v5669_v8 = vpop.f32.mrb[1].mxu1 }
 0x41c   : > { %v8890_v16 = vadd.f32 %v6823_v61, %v5667_v20  ;;  %v6825_v9 = vpop.f32.mrb[1].mxu0  ;;  %v5670_v10 = vpop.f32.mrb[2].mxu1  ;;  %v8741_v8 = vunpack.c.l.bf16 %v8860_v62 }
 0x41d   : > { %v6826_v15 = vpop.f32.mrb[2].mxu0  ;;  %v5672_v17 = vpop.f32.mrb[3].mxu1 }
 0x41e   : > { %v7657_v31 = vmul.f32 %v8890_v16, %v7340_v14  ;;  %v8891_v22 = vadd.f32 %v6826_v15, %v5670_v10  ;;  %v6828_v13 = vpop.f32.mrb[3].mxu0  ;;  %v1345_v14 = vunpack.c.h.s8.bf16 %v10087_v23 }
 0x41f   : > { %5882 = vmatmul.mubr.bf16.gmra.mrb[108].mxu1 %v8526_v7 }
 0x420   : > { %v7849_v34 = vadd.f32 %v8733_v36, %v7657_v31  ;;  %v7658_v27 = vmul.f32 %v8891_v22, %v7345_v19  ;;  %7038 = vmatmul.mubr.bf16.gmra.mrb[108].mxu0 %v8534_v11  ;;  %5889 = vmatprep.mubr.bf16.mxu1 %v8543_v12  ;;  %v8558_v19 = vcombine.low %v1329_v40, %v1337_v41  ;;  %v7365_v22 = vpop.permute.xlu1 %7364  ;;  %v1369_v40 = vunpack.c.h.s8.bf16 %v10092_v39  ;;  %v10093_v41 = vld [vmem:[%s10238_s6 + $0x7d8] sm:$0xff] }
 0x421   : > { %7045 = vmatprep.mubr.bf16.mxu0 %v8551_v18  ;;  %v8566_v36 = vcombine.low %v1333_v48, %v1341_v52  ;;  %v8575_v9 = vcombine.high %v1345_v14, %v1353_v33  ;;  %v8583_v12 = vcombine.high %v1349_v37, %v1357_v50  ;;  %v8742_v18 = vunpack.c.h.bf16 %v8860_v62  ;;  %v7370_v48 = vpop.permute.xlu0 %7369 }
 0x422   : > { %7913 = vst [vmem:[%s11422_s10] sm:$0xff] %v7849_v34  ;;  %v7850_v46 = vadd.f32 %v8734_v24, %v7658_v27  ;;  %v5675_v53 = vpop.f32.mrb[4].mxu1  ;;  %v10091_v34 = vld [vmem:[%s10238_s6 + $0x7c8] sm:$0xff] }
 0x423   : > { %v6831_v1 = vpop.f32.mrb[4].mxu0  ;;  %v5677_v38 = vpop.f32.mrb[5].mxu1  ;;  %v1361_v27 = vunpack.c.h.s8.bf16 %v10091_v34 }
 0x424   : > { %7914 = vst [vmem:[%s11422_s10 + $0x8] sm:$0xff] %v7850_v46  ;;  %v8892_v43 = vadd.f32 %v6831_v1, %v5675_v53  ;;  %v6833_v63 = vpop.f32.mrb[5].mxu0  ;;  %v5678_v0 = vpop.f32.mrb[6].mxu1  ;;  %v8574_v1 = vcombine.low %v1345_v14, %v1353_v33 }
 0x425   : > { %v6834_v47 = vpop.f32.mrb[6].mxu0  ;;  %v5680_v3 = vpop.f32.mrb[7].mxu1  ;;  %v8582_v63 = vcombine.low %v1349_v37, %v1357_v50  ;;  %v8590_v62 = vcombine.low %v1361_v27, %v1369_v40 }
 0x426   : > { %v7659_v6 = vmul.f32 %v8892_v43, %v7350_v28  ;;  %v8893_v21 = vadd.f32 %v6834_v47, %v5678_v0  ;;  %v6836_v4 = vpop.f32.mrb[7].mxu0  ;;  %v1365_v28 = vunpack.c.h.s8.bf16 %v10093_v41  ;;  %v8591_v0 = vcombine.high %v1361_v27, %v1369_v40 }
 0x427   : > { %5890 = vmatmul.mubr.bf16.gmra.mrb[112].mxu1 %v8542_v54  ;;  %v8745_v54 = vunpack.c.l.bf16 %v8861_v30 }
 0x428   : > { %v7851_v49 = vadd.f32 %v8737_v44, %v7659_v6  ;;  %v7660_v29 = vmul.f32 %v8893_v21, %v7355_v26  ;;  %7046 = vmatmul.mubr.bf16.gmra.mrb[112].mxu0 %v8550_v59  ;;  %5897 = vmatprep.mubr.bf16.mxu1 %v8559_v2  ;;  %v8599_v47 = vcombine.high %v1365_v28, %v1373_v45  ;;  %v8746_v6 = vunpack.c.h.bf16 %v8861_v30 }
 0x429   : > { %7053 = vmatprep.mubr.bf16.mxu0 %v8567_v60 }
 0x42a   : > { %7915 = vst [vmem:[%s11422_s10 + $0x10] sm:$0xff] %v7851_v49  ;;  %v7852_v55 = vadd.f32 %v8738_v25, %v7660_v29  ;;  %v5683_v57 = vpop.f32.mrb[8].mxu1  ;;  %v7375_v25 = vpop.permute.xlu1 %7374  ;;  %v8862_v49 = vld [vmem:[%s11410_s7 + $0x20] sm:$0xff]  }
 0x42b   : > { %v6839_v5 = vpop.f32.mrb[8].mxu0  ;;  %v5685_v20 = vpop.f32.mrb[9].mxu1  ;;  %v8749_v37 = vunpack.c.l.bf16 %v8862_v49 }
 0x42c   : > { %7916 = vst [vmem:[%s11422_s10 + $0x18] sm:$0xff] %v7852_v55  ;;  %v8894_v61 = vadd.f32 %v6839_v5, %v5683_v57  ;;  %v6841_v7 = vpop.f32.mrb[9].mxu0  ;;  %v5686_v16 = vpop.f32.mrb[10].mxu1  ;;  %v8598_v55 = vcombine.low %v1365_v28, %v1373_v45 }
 0x42d   : > { %v6842_v10 = vpop.f32.mrb[10].mxu0  ;;  %v5688_v11 = vpop.f32.mrb[11].mxu1 }
 0x42e   : > { %v7661_v15 = vmul.f32 %v8894_v61, %v7360_v56  ;;  %v8895_v17 = vadd.f32 %v6842_v10, %v5686_v16  ;;  %v6844_v31 = vpop.f32.mrb[11].mxu0  ;;  %v7380_v29 = vpop.permute.xlu0 %7379 }
 0x42f   : > { %5898 = vmatmul.mubr.bf16.gmra.mrb[116].mxu1 %v8558_v19  ;;  %v8750_v19 = vunpack.c.h.bf16 %v8862_v49 }
 0x430   : > { %v7853_v13 = vadd.f32 %v8741_v8, %v7661_v15  ;;  %v7662_v24 = vmul.f32 %v8895_v17, %v7365_v22  ;;  %7054 = vmatmul.mubr.bf16.gmra.mrb[116].mxu0 %v8566_v36  ;;  %5905 = vmatprep.mubr.bf16.mxu1 %v8575_v9  ;;  %v7385_v8 = vpop.permute.xlu1 %7384  ;;  %v8863_v36 = vld [vmem:[%s11410_s7 + $0x28] sm:$0xff]  }
 0x431   : > { %7061 = vmatprep.mubr.bf16.mxu0 %v8583_v12  ;;  %v8754_v39 = vunpack.c.h.bf16 %v8863_v36 }
 0x432   : > { %7917 = vst [vmem:[%s11422_s10 + $0x20] sm:$0xff] %v7853_v13  ;;  %v7854_v51 = vadd.f32 %v8742_v18, %v7662_v24  ;;  %v5691_v52 = vpop.f32.mrb[12].mxu1  ;;  %v7390_v9 = vpop.permute.xlu0 %7389  ;;  %v8753_v18 = vunpack.c.l.bf16 %v8863_v36 }
 0x433   : > { %v6847_v46 = vpop.f32.mrb[12].mxu0  ;;  %v5693_v53 = vpop.f32.mrb[13].mxu1 }
 0x434   : > { %7918 = vst [vmem:[%s11422_s10 + $0x28] sm:$0xff] %v7854_v51  ;;  %v8896_v38 = vadd.f32 %v6847_v46, %v5691_v52  ;;  %v6849_v43 = vpop.f32.mrb[13].mxu0  ;;  %v5694_v44 = vpop.f32.mrb[14].mxu1 }
 0x435   : > { %v6850_v59 = vpop.f32.mrb[14].mxu0  ;;  %v5696_v2 = vpop.f32.mrb[15].mxu1 }
 0x436   : > { %v7663_v3 = vmul.f32 %v8896_v38, %v7370_v48  ;;  %v8897_v60 = vadd.f32 %v6850_v59, %v5694_v44  ;;  %v6852_v21 = vpop.f32.mrb[15].mxu0  ;;  %v7395_v30 = vpop.permute.xlu1 %7394  ;;  %v8758_v59 = vunpack.c.h.bf16 %v8864_v42 }
 0x437   : > { %5906 = vmatmul.mubr.bf16.gmra.mrb[120].mxu1 %v8574_v1  ;;  %v7400_v45 = vpop.permute.xlu0 %7399  ;;  %v8757_v1 = vunpack.c.l.bf16 %v8864_v42 }
 0x438   : > { %v7855_v4 = vadd.f32 %v8745_v54, %v7663_v3  ;;  %v7664_v26 = vmul.f32 %v8897_v60, %v7375_v25  ;;  %7062 = vmatmul.mubr.bf16.gmra.mrb[120].mxu0 %v8582_v63  ;;  %5913 = vmatprep.mubr.bf16.mxu1 %v8591_v0 }
 0x439   : > { %7069 = vmatprep.mubr.bf16.mxu0 %v8599_v47 }
 0x43a   : > { %7919 = vst [vmem:[%s11422_s10 + $0x30] sm:$0xff] %v7855_v4  ;;  %v7856_v23 = vadd.f32 %v8746_v6, %v7664_v26  ;;  %v5699_v14 = vpop.f32.mrb[16].mxu1  ;;  %v7405_v47 = vpop.permute.xlu1 %7404  ;;  %v8865_v6 = vld [vmem:[%s11410_s7 + $0x38] sm:$0xff]  }
 0x43b   : > { %v6855_v32 = vpop.f32.mrb[16].mxu0  ;;  %v5701_v33 = vpop.f32.mrb[17].mxu1 }
 0x43c   : > { %7920 = vst [vmem:[%s11422_s10 + $0x38] sm:$0xff] %v7856_v23  ;;  %v8898_v35 = vadd.f32 %v6855_v32, %v5699_v14  ;;  %v6857_v58 = vpop.f32.mrb[17].mxu0  ;;  %v5702_v50 = vpop.f32.mrb[18].mxu1  ;;  %v8761_v23 = vunpack.c.l.bf16 %v8865_v6 }
 0x43d   : > { %v6858_v56 = vpop.f32.mrb[18].mxu0  ;;  %v5704_v57 = vpop.f32.mrb[19].mxu1  ;;  %v8762_v58 = vunpack.c.h.bf16 %v8865_v6 }
 0x43e   : > { %v7665_v5 = vmul.f32 %v8898_v35, %v7380_v29  ;;  %v8899_v20 = vadd.f32 %v6858_v56, %v5702_v50  ;;  %v6860_v61 = vpop.f32.mrb[19].mxu0  ;;  %v7410_v21 = vpop.permute.xlu0 %7409 }
 0x43f   : > { %5914 = vmatmul.mubr.bf16.gmra.mrb[124].mxu1 %v8590_v62 }
 0x440   : > { %v7857_v7 = vadd.f32 %v8749_v37, %v7665_v5  ;;  %v7666_v16 = vmul.f32 %v8899_v20, %v7385_v8  ;;  %7070 = vmatmul.mubr.bf16.gmra.mrb[124].mxu0 %v8598_v55  ;;  %v7415_v55 = vpop.permute.xlu1 %7414  ;;  %v8866_v5 = vld [vmem:[%s11410_s7 + $0x40] sm:$0xff]  }
 0x441   : > { %v8765_v36 = vunpack.c.l.bf16 %v8866_v5 }
 0x442   : > { %7921 = vst [vmem:[%s11422_s10 + $0x40] sm:$0xff] %v7857_v7  ;;  %v7858_v10 = vadd.f32 %v8750_v19, %v7666_v16  ;;  %v5707_v11 = vpop.f32.mrb[20].mxu1  ;;  %v7420_v20 = vpop.permute.xlu0 %7419 }
 0x443   : > { %v6863_v12 = vpop.f32.mrb[20].mxu0  ;;  %v5709_v15 = vpop.f32.mrb[21].mxu1 }
 0x444   : > { %7922 = vst [vmem:[%s11422_s10 + $0x48] sm:$0xff] %v7858_v10  ;;  %v8900_v17 = vadd.f32 %v6863_v12, %v5707_v11  ;;  %v6865_v31 = vpop.f32.mrb[21].mxu0  ;;  %v5710_v22 = vpop.f32.mrb[22].mxu1 }
 0x445   : > { %v6866_v13 = vpop.f32.mrb[22].mxu0  ;;  %v5712_v24 = vpop.f32.mrb[23].mxu1 }
 0x446   : > { %v7667_v34 = vmul.f32 %v8900_v17, %v7390_v9  ;;  %v8901_v27 = vadd.f32 %v6866_v13, %v5710_v22  ;;  %v6868_v40 = vpop.f32.mrb[23].mxu0  ;;  %v7425_v22 = vpop.permute.xlu1 %7424 }
 0x448   : > { %v7859_v41 = vadd.f32 %v8753_v18, %v7667_v34  ;;  %v7668_v28 = vmul.f32 %v8901_v27, %v7395_v30  ;;  %v8766_v18 = vunpack.c.h.bf16 %v8866_v5  ;;  %v8867_v34 = vld [vmem:[%s11410_s7 + $0x48] sm:$0xff]   ;;  %v7430_v27 = vpop.permute.xlu0 %7429 }
 0x449   : > { %v8769_v42 = vunpack.c.l.bf16 %v8867_v34 }
 0x44a   : > { %7923 = vst [vmem:[%s11422_s10 + $0x50] sm:$0xff] %v7859_v41  ;;  %v7860_v48 = vadd.f32 %v8754_v39, %v7668_v28  ;;  %v5715_v51 = vpop.f32.mrb[24].mxu1 }
 0x44b   : > { %v6871_v52 = vpop.f32.mrb[24].mxu0  ;;  %v5717_v46 = vpop.f32.mrb[25].mxu1 }
 0x44c   : > { %7924 = vst [vmem:[%s11422_s10 + $0x58] sm:$0xff] %v7860_v48  ;;  %v8902_v53 = vadd.f32 %v6871_v52, %v5715_v51  ;;  %v6873_v38 = vpop.f32.mrb[25].mxu0  ;;  %v5718_v54 = vpop.f32.mrb[26].mxu1 }
 0x44d   : > { %v6874_v43 = vpop.f32.mrb[26].mxu0  ;;  %v5720_v44 = vpop.f32.mrb[27].mxu1 }
 0x44e   : > { %v7669_v63 = vmul.f32 %v8902_v53, %v7400_v45  ;;  %v8903_v0 = vadd.f32 %v6874_v43, %v5718_v54  ;;  %v6876_v2 = vpop.f32.mrb[27].mxu0  ;;  %v7435_v54 = vpop.permute.xlu1 %7434 }
 0x450   : > { %v7861_v3 = vadd.f32 %v8757_v1, %v7669_v63  ;;  %v7670_v60 = vmul.f32 %v8903_v0, %v7405_v47  ;;  %v8770_v1 = vunpack.c.h.bf16 %v8867_v34  ;;  %v8868_v63 = vld [vmem:[%s11410_s7 + $0x50] sm:$0xff]   ;;  %v7440_v0 = vpop.permute.xlu0 %7439 }
 0x451   : > { %v8773_v6 = vunpack.c.l.bf16 %v8868_v63 }
 0x452   : > { %7925 = vst [vmem:[%s11422_s10 + $0x60] sm:$0xff] %v7861_v3  ;;  %v7862_v25 = vadd.f32 %v8758_v59, %v7670_v60  ;;  %v5723_v4 = vpop.f32.mrb[28].mxu1 }
 0x453   : > { %v6879_v26 = vpop.f32.mrb[28].mxu0  ;;  %v5725_v49 = vpop.f32.mrb[29].mxu1 }
 0x454   : > { %7926 = vst [vmem:[%s11422_s10 + $0x68] sm:$0xff] %v7862_v25  ;;  %v8904_v29 = vadd.f32 %v6879_v26, %v5723_v4  ;;  %v6881_v14 = vpop.f32.mrb[29].mxu0  ;;  %v5726_v32 = vpop.f32.mrb[30].mxu1 }
 0x455   : > { %v6882_v33 = vpop.f32.mrb[30].mxu0  ;;  %v5728_v62 = vpop.f32.mrb[31].mxu1 }
 0x456   : > { %v7671_v35 = vmul.f32 %v8904_v29, %v7410_v21  ;;  %v8905_v37 = vadd.f32 %v6882_v33, %v5726_v32  ;;  %v6884_v50 = vpop.f32.mrb[31].mxu0  ;;  %v7445_v32 = vpop.permute.xlu1 %7444 }
 0x458   : > { %v7863_v56 = vadd.f32 %v8761_v23, %v7671_v35  ;;  %v7672_v57 = vmul.f32 %v8905_v37, %v7415_v55  ;;  %v8774_v23 = vunpack.c.h.bf16 %v8868_v63  ;;  %v8869_v35 = vld [vmem:[%s11410_s7 + $0x58] sm:$0xff]   ;;  %v7450_v37 = vpop.permute.xlu0 %7449 }
 0x459   : > { %v8777_v5 = vunpack.c.l.bf16 %v8869_v35 }
 0x45a   : > { %7927 = vst [vmem:[%s11422_s10 + $0x70] sm:$0xff] %v7863_v56  ;;  %v7864_v19 = vadd.f32 %v8762_v58, %v7672_v57  ;;  %v5731_v61 = vpop.f32.mrb[32].mxu1 }
 0x45b   : > { %v6887_v8 = vpop.f32.mrb[32].mxu0  ;;  %v5733_v7 = vpop.f32.mrb[33].mxu1 }
 0x45c   : > { %7928 = vst [vmem:[%s11422_s10 + $0x78] sm:$0xff] %v7864_v19  ;;  %v8906_v16 = vadd.f32 %v6887_v8, %v5731_v61  ;;  %v6889_v9 = vpop.f32.mrb[33].mxu0  ;;  %v5734_v10 = vpop.f32.mrb[34].mxu1 }
 0x45d   : > { %v6890_v11 = vpop.f32.mrb[34].mxu0  ;;  %v5736_v12 = vpop.f32.mrb[35].mxu1 }
 0x45e   : > { %v7673_v15 = vmul.f32 %v8906_v16, %v7420_v20  ;;  %v8907_v17 = vadd.f32 %v6890_v11, %v5734_v10  ;;  %v6892_v31 = vpop.f32.mrb[35].mxu0  ;;  %v7455_v10 = vpop.permute.xlu1 %7454 }
 0x460   : > { %v7865_v13 = vadd.f32 %v8765_v36, %v7673_v15  ;;  %v7674_v24 = vmul.f32 %v8907_v17, %v7425_v22  ;;  %v8778_v36 = vunpack.c.h.bf16 %v8869_v35  ;;  %v8870_v15 = vld [vmem:[%s11410_s7 + $0x60] sm:$0xff]   ;;  %v7460_v17 = vpop.permute.xlu0 %7459 }
 0x461   : > { %v8781_v34 = vunpack.c.l.bf16 %v8870_v15 }
 0x462   : > { %7929 = vst [vmem:[%s11422_s10 + $0x80] sm:$0xff] %v7865_v13  ;;  %v7866_v39 = vadd.f32 %v8766_v18, %v7674_v24  ;;  %v5739_v40 = vpop.f32.mrb[36].mxu1 }
 0x463   : > { %v6895_v30 = vpop.f32.mrb[36].mxu0  ;;  %v5741_v41 = vpop.f32.mrb[37].mxu1 }
 0x464   : > { %7930 = vst [vmem:[%s11422_s10 + $0x88] sm:$0xff] %v7866_v39  ;;  %v8908_v28 = vadd.f32 %v6895_v30, %v5739_v40  ;;  %v6897_v45 = vpop.f32.mrb[37].mxu0  ;;  %v5742_v48 = vpop.f32.mrb[38].mxu1 }
 0x465   : > { %v6898_v51 = vpop.f32.mrb[38].mxu0  ;;  %v5744_v52 = vpop.f32.mrb[39].mxu1 }
 0x466   : > { %v7675_v46 = vmul.f32 %v8908_v28, %v7430_v27  ;;  %v8909_v53 = vadd.f32 %v6898_v51, %v5742_v48  ;;  %v6900_v38 = vpop.f32.mrb[39].mxu0  ;;  %v7465_v48 = vpop.permute.xlu1 %7464 }
 0x468   : > { %v7867_v43 = vadd.f32 %v8769_v42, %v7675_v46  ;;  %v7676_v44 = vmul.f32 %v8909_v53, %v7435_v54  ;;  %v8782_v42 = vunpack.c.h.bf16 %v8870_v15  ;;  %v8871_v46 = vld [vmem:[%s11410_s7 + $0x68] sm:$0xff]   ;;  %v7470_v53 = vpop.permute.xlu0 %7469 }
 0x469   : > { %v8785_v63 = vunpack.c.l.bf16 %v8871_v46 }
 0x46a   : > { %7931 = vst [vmem:[%s11422_s10 + $0x90] sm:$0xff] %v7867_v43  ;;  %v7868_v59 = vadd.f32 %v8770_v1, %v7676_v44  ;;  %v5747_v2 = vpop.f32.mrb[40].mxu1 }
 0x46b   : > { %v6903_v47 = vpop.f32.mrb[40].mxu0  ;;  %v5749_v3 = vpop.f32.mrb[41].mxu1 }
 0x46c   : > { %7932 = vst [vmem:[%s11422_s10 + $0x98] sm:$0xff] %v7868_v59  ;;  %v8910_v60 = vadd.f32 %v6903_v47, %v5747_v2  ;;  %v6905_v21 = vpop.f32.mrb[41].mxu0  ;;  %v5750_v25 = vpop.f32.mrb[42].mxu1 }
 0x46d   : > { %v6906_v4 = vpop.f32.mrb[42].mxu0  ;;  %v5752_v26 = vpop.f32.mrb[43].mxu1 }
 0x46e   : > { %v7677_v49 = vmul.f32 %v8910_v60, %v7440_v0  ;;  %v8911_v29 = vadd.f32 %v6906_v4, %v5750_v25  ;;  %v6908_v14 = vpop.f32.mrb[43].mxu0  ;;  %v7475_v25 = vpop.permute.xlu1 %7474 }
 0x470   : > { %v7869_v33 = vadd.f32 %v8773_v6, %v7677_v49  ;;  %v7678_v62 = vmul.f32 %v8911_v29, %v7445_v32  ;;  %v8786_v6 = vunpack.c.h.bf16 %v8871_v46  ;;  %v8872_v49 = vld [vmem:[%s11410_s7 + $0x70] sm:$0xff]   ;;  %v7480_v29 = vpop.permute.xlu0 %7479 }
 0x471   : > { %v8789_v35 = vunpack.c.l.bf16 %v8872_v49 }
 0x472   : > { %7933 = vst [vmem:[%s11422_s10 + $0xa0] sm:$0xff] %v7869_v33  ;;  %v7870_v58 = vadd.f32 %v8774_v23, %v7678_v62  ;;  %v5755_v50 = vpop.f32.mrb[44].mxu1 }
 0x473   : > { %v6911_v55 = vpop.f32.mrb[44].mxu0  ;;  %v5757_v56 = vpop.f32.mrb[45].mxu1 }
 0x474   : > { %7934 = vst [vmem:[%s11422_s10 + $0xa8] sm:$0xff] %v7870_v58  ;;  %v8912_v57 = vadd.f32 %v6911_v55, %v5755_v50  ;;  %v6913_v20 = vpop.f32.mrb[45].mxu0  ;;  %v5758_v19 = vpop.f32.mrb[46].mxu1 }
 0x475   : > { %v6914_v61 = vpop.f32.mrb[46].mxu0  ;;  %v5760_v8 = vpop.f32.mrb[47].mxu1 }
 0x476   : > { %v7679_v7 = vmul.f32 %v8912_v57, %v7450_v37  ;;  %v8913_v16 = vadd.f32 %v6914_v61, %v5758_v19  ;;  %v6916_v9 = vpop.f32.mrb[47].mxu0  ;;  %v7485_v19 = vpop.permute.xlu1 %7484 }
 0x478   : > { %v7871_v11 = vadd.f32 %v8777_v5, %v7679_v7  ;;  %v7680_v12 = vmul.f32 %v8913_v16, %v7455_v10  ;;  %v8790_v5 = vunpack.c.h.bf16 %v8872_v49  ;;  %v8873_v7 = vld [vmem:[%s11410_s7 + $0x78] sm:$0xff]   ;;  %v7490_v16 = vpop.permute.xlu0 %7489 }
 0x479   : > { %v8793_v15 = vunpack.c.l.bf16 %v8873_v7 }
 0x47a   : > { %7935 = vst [vmem:[%s11422_s10 + $0xb0] sm:$0xff] %v7871_v11  ;;  %v7872_v18 = vadd.f32 %v8778_v36, %v7680_v12  ;;  %v5763_v31 = vpop.f32.mrb[48].mxu1 }
 0x47b   : > { %v6919_v22 = vpop.f32.mrb[48].mxu0  ;;  %v5765_v13 = vpop.f32.mrb[49].mxu1 }
 0x47c   : > { %7936 = vst [vmem:[%s11422_s10 + $0xb8] sm:$0xff] %v7872_v18  ;;  %v8914_v24 = vadd.f32 %v6919_v22, %v5763_v31  ;;  %v6921_v27 = vpop.f32.mrb[49].mxu0  ;;  %v5766_v39 = vpop.f32.mrb[50].mxu1 }
 0x47d   : > { %v6922_v40 = vpop.f32.mrb[50].mxu0  ;;  %v5768_v30 = vpop.f32.mrb[51].mxu1 }
 0x47e   : > { %v7681_v41 = vmul.f32 %v8914_v24, %v7460_v17  ;;  %v8915_v28 = vadd.f32 %v6922_v40, %v5766_v39  ;;  %v6924_v45 = vpop.f32.mrb[51].mxu0  ;;  %v7495_v39 = vpop.permute.xlu1 %7494 }
 0x480   : > { %v7873_v51 = vadd.f32 %v8781_v34, %v7681_v41  ;;  %v7682_v52 = vmul.f32 %v8915_v28, %v7465_v48  ;;  %v8794_v34 = vunpack.c.h.bf16 %v8873_v7  ;;  %v8874_v41 = vld [vmem:[%s11410_s7 + $0x80] sm:$0xff]   ;;  %v7500_v28 = vpop.permute.xlu0 %7499 }
 0x481   : > { %v8797_v46 = vunpack.c.l.bf16 %v8874_v41 }
 0x482   : > { %7937 = vst [vmem:[%s11422_s10 + $0xc0] sm:$0xff] %v7873_v51  ;;  %v7874_v1 = vadd.f32 %v8782_v42, %v7682_v52  ;;  %v5771_v38 = vpop.f32.mrb[52].mxu1 }
 0x483   : > { %v6927_v54 = vpop.f32.mrb[52].mxu0  ;;  %v5773_v43 = vpop.f32.mrb[53].mxu1 }
 0x484   : > { %7938 = vst [vmem:[%s11422_s10 + $0xc8] sm:$0xff] %v7874_v1  ;;  %v8916_v44 = vadd.f32 %v6927_v54, %v5771_v38  ;;  %v6929_v0 = vpop.f32.mrb[53].mxu0  ;;  %v5774_v59 = vpop.f32.mrb[54].mxu1 }
 0x485   : > { %v6930_v2 = vpop.f32.mrb[54].mxu0  ;;  %v5776_v47 = vpop.f32.mrb[55].mxu1 }
 0x486   : > { %v7683_v3 = vmul.f32 %v8916_v44, %v7470_v53  ;;  %v8917_v60 = vadd.f32 %v6930_v2, %v5774_v59  ;;  %v6932_v21 = vpop.f32.mrb[55].mxu0  ;;  %v7505_v59 = vpop.permute.xlu1 %7504 }
 0x488   : > { %v7875_v4 = vadd.f32 %v8785_v63, %v7683_v3  ;;  %v7684_v26 = vmul.f32 %v8917_v60, %v7475_v25  ;;  %v8798_v63 = vunpack.c.h.bf16 %v8874_v41  ;;  %v8875_v3 = vld [vmem:[%s11410_s7 + $0x88] sm:$0xff]   ;;  %v7510_v60 = vpop.permute.xlu0 %7509 }
 0x489   : > { %v8801_v49 = vunpack.c.l.bf16 %v8875_v3 }
 0x48a   : > { %7939 = vst [vmem:[%s11422_s10 + $0xd0] sm:$0xff] %v7875_v4  ;;  %v7876_v23 = vadd.f32 %v8786_v6, %v7684_v26  ;;  %v5779_v14 = vpop.f32.mrb[56].mxu1 }
 0x48b   : > { %v6935_v32 = vpop.f32.mrb[56].mxu0  ;;  %v5781_v33 = vpop.f32.mrb[57].mxu1 }
 0x48c   : > { %7940 = vst [vmem:[%s11422_s10 + $0xd8] sm:$0xff] %v7876_v23  ;;  %v8918_v62 = vadd.f32 %v6935_v32, %v5779_v14  ;;  %v6937_v37 = vpop.f32.mrb[57].mxu0  ;;  %v5782_v58 = vpop.f32.mrb[58].mxu1 }
 0x48d   : > { %v6938_v50 = vpop.f32.mrb[58].mxu0  ;;  %v5784_v55 = vpop.f32.mrb[59].mxu1 }
 0x48e   : > { %v7685_v56 = vmul.f32 %v8918_v62, %v7480_v29  ;;  %v8919_v57 = vadd.f32 %v6938_v50, %v5782_v58  ;;  %v6940_v20 = vpop.f32.mrb[59].mxu0  ;;  %v7515_v58 = vpop.permute.xlu1 %7514 }
 0x490   : > { %v7877_v61 = vadd.f32 %v8789_v35, %v7685_v56  ;;  %v7686_v8 = vmul.f32 %v8919_v57, %v7485_v19  ;;  %v8802_v35 = vunpack.c.h.bf16 %v8875_v3  ;;  %v8876_v56 = vld [vmem:[%s11410_s7 + $0x90] sm:$0xff]   ;;  %v7520_v57 = vpop.permute.xlu0 %7519 }
 0x491   : > { %v8805_v7 = vunpack.c.l.bf16 %v8876_v56 }
 0x492   : > { %7941 = vst [vmem:[%s11422_s10 + $0xe0] sm:$0xff] %v7877_v61  ;;  %v7878_v36 = vadd.f32 %v8790_v5, %v7686_v8  ;;  %v5787_v9 = vpop.f32.mrb[60].mxu1 }
 0x493   : > { %v6943_v10 = vpop.f32.mrb[60].mxu0  ;;  %v5789_v11 = vpop.f32.mrb[61].mxu1 }
 0x494   : > { %7942 = vst [vmem:[%s11422_s10 + $0xe8] sm:$0xff] %v7878_v36  ;;  %v8920_v12 = vadd.f32 %v6943_v10, %v5787_v9  ;;  %v6945_v17 = vpop.f32.mrb[61].mxu0  ;;  %v5790_v18 = vpop.f32.mrb[62].mxu1 }
 0x495   : > { %v6946_v31 = vpop.f32.mrb[62].mxu0  ;;  %v5792_v22 = vpop.f32.mrb[63].mxu1 }
 0x496   : > { %v7687_v13 = vmul.f32 %v8920_v12, %v7490_v16  ;;  %v8921_v24 = vadd.f32 %v6946_v31, %v5790_v18  ;;  %v6948_v27 = vpop.f32.mrb[63].mxu0  ;;  %v7525_v18 = vpop.permute.xlu1 %7524 }
 0x498   : > { %v7879_v40 = vadd.f32 %v8793_v15, %v7687_v13  ;;  %v7688_v30 = vmul.f32 %v8921_v24, %v7495_v39  ;;  %v8806_v15 = vunpack.c.h.bf16 %v8876_v56  ;;  %v8877_v13 = vld [vmem:[%s11410_s7 + $0x98] sm:$0xff]   ;;  %v7530_v24 = vpop.permute.xlu0 %7529 }
 0x499   : > { %v8809_v41 = vunpack.c.l.bf16 %v8877_v13 }
 0x49a   : > { %7943 = vst [vmem:[%s11422_s10 + $0xf0] sm:$0xff] %v7879_v40  ;;  %v7880_v42 = vadd.f32 %v8794_v34, %v7688_v30  ;;  %v5795_v45 = vpop.f32.mrb[64].mxu1 }
 0x49b   : > { %v6951_v48 = vpop.f32.mrb[64].mxu0  ;;  %v5797_v51 = vpop.f32.mrb[65].mxu1 }
 0x49c   : > { %7944 = vst [vmem:[%s11422_s10 + $0xf8] sm:$0xff] %v7880_v42  ;;  %v8922_v52 = vadd.f32 %v6951_v48, %v5795_v45  ;;  %v6953_v53 = vpop.f32.mrb[65].mxu0  ;;  %v5798_v1 = vpop.f32.mrb[66].mxu1 }
 0x49d   : > { %v6954_v38 = vpop.f32.mrb[66].mxu0  ;;  %v5800_v54 = vpop.f32.mrb[67].mxu1 }
 0x49e   : > { %v7689_v43 = vmul.f32 %v8922_v52, %v7500_v28  ;;  %v8923_v44 = vadd.f32 %v6954_v38, %v5798_v1  ;;  %v6956_v0 = vpop.f32.mrb[67].mxu0  ;;  %v7535_v1 = vpop.permute.xlu1 %7534 }
 0x4a0   : > { %v7881_v2 = vadd.f32 %v8797_v46, %v7689_v43  ;;  %v7690_v47 = vmul.f32 %v8923_v44, %v7505_v59  ;;  %v8810_v46 = vunpack.c.h.bf16 %v8877_v13  ;;  %v8878_v43 = vld [vmem:[%s11410_s7 + $0xa0] sm:$0xff]   ;;  %v7540_v44 = vpop.permute.xlu0 %7539 }
 0x4a1   : > { %v8813_v3 = vunpack.c.l.bf16 %v8878_v43 }
 0x4a2   : > { %7945 = vst [vmem:[%s11422_s10 + $0x100] sm:$0xff] %v7881_v2  ;;  %v7882_v6 = vadd.f32 %v8798_v63, %v7690_v47  ;;  %v5803_v21 = vpop.f32.mrb[68].mxu1 }
 0x4a3   : > { %v6959_v25 = vpop.f32.mrb[68].mxu0  ;;  %v5805_v4 = vpop.f32.mrb[69].mxu1 }
 0x4a4   : > { %7946 = vst [vmem:[%s11422_s10 + $0x108] sm:$0xff] %v7882_v6  ;;  %v8924_v26 = vadd.f32 %v6959_v25, %v5803_v21  ;;  %v6961_v29 = vpop.f32.mrb[69].mxu0  ;;  %v5806_v23 = vpop.f32.mrb[70].mxu1 }
 0x4a5   : > { %v6962_v14 = vpop.f32.mrb[70].mxu0  ;;  %v5808_v32 = vpop.f32.mrb[71].mxu1 }
 0x4a6   : > { %v7691_v33 = vmul.f32 %v8924_v26, %v7510_v60  ;;  %v8925_v62 = vadd.f32 %v6962_v14, %v5806_v23  ;;  %v6964_v37 = vpop.f32.mrb[71].mxu0  ;;  %v7545_v23 = vpop.permute.xlu1 %7544 }
 0x4a8   : > { %v7883_v50 = vadd.f32 %v8801_v49, %v7691_v33  ;;  %v7692_v55 = vmul.f32 %v8925_v62, %v7515_v58  ;;  %v8814_v49 = vunpack.c.h.bf16 %v8878_v43  ;;  %v8879_v33 = vld [vmem:[%s11410_s7 + $0xa8] sm:$0xff]   ;;  %v7550_v62 = vpop.permute.xlu0 %7549 }
 0x4a9   : > { %v8817_v56 = vunpack.c.l.bf16 %v8879_v33 }
 0x4aa   : > { %7947 = vst [vmem:[%s11422_s10 + $0x110] sm:$0xff] %v7883_v50  ;;  %v7884_v5 = vadd.f32 %v8802_v35, %v7692_v55  ;;  %v5811_v20 = vpop.f32.mrb[72].mxu1 }
 0x4ab   : > { %v6967_v19 = vpop.f32.mrb[72].mxu0  ;;  %v5813_v61 = vpop.f32.mrb[73].mxu1 }
 0x4ac   : > { %7948 = vst [vmem:[%s11422_s10 + $0x118] sm:$0xff] %v7884_v5  ;;  %v8926_v8 = vadd.f32 %v6967_v19, %v5811_v20  ;;  %v6969_v16 = vpop.f32.mrb[73].mxu0  ;;  %v5814_v36 = vpop.f32.mrb[74].mxu1 }
 0x4ad   : > { %v6970_v9 = vpop.f32.mrb[74].mxu0  ;;  %v5816_v10 = vpop.f32.mrb[75].mxu1 }
 0x4ae   : > { %v7693_v11 = vmul.f32 %v8926_v8, %v7520_v57  ;;  %v8927_v12 = vadd.f32 %v6970_v9, %v5814_v36  ;;  %v6972_v17 = vpop.f32.mrb[75].mxu0  ;;  %v7555_v36 = vpop.permute.xlu1 %7554 }
 0x4b0   : > { %v7885_v31 = vadd.f32 %v8805_v7, %v7693_v11  ;;  %v7694_v22 = vmul.f32 %v8927_v12, %v7525_v18  ;;  %v8818_v7 = vunpack.c.h.bf16 %v8879_v33  ;;  %v8880_v11 = vld [vmem:[%s11410_s7 + $0xb0] sm:$0xff]   ;;  %v7560_v12 = vpop.permute.xlu0 %7559 }
 0x4b1   : > { %v8821_v13 = vunpack.c.l.bf16 %v8880_v11 }
 0x4b2   : > { %7949 = vst [vmem:[%s11422_s10 + $0x120] sm:$0xff] %v7885_v31  ;;  %v7886_v34 = vadd.f32 %v8806_v15, %v7694_v22  ;;  %v5819_v27 = vpop.f32.mrb[76].mxu1 }
 0x4b3   : > { %v6975_v39 = vpop.f32.mrb[76].mxu0  ;;  %v5821_v40 = vpop.f32.mrb[77].mxu1 }
 0x4b4   : > { %7950 = vst [vmem:[%s11422_s10 + $0x128] sm:$0xff] %v7886_v34  ;;  %v8928_v30 = vadd.f32 %v6975_v39, %v5819_v27  ;;  %v6977_v28 = vpop.f32.mrb[77].mxu0  ;;  %v5822_v42 = vpop.f32.mrb[78].mxu1 }
 0x4b5   : > { %v6978_v45 = vpop.f32.mrb[78].mxu0  ;;  %v5824_v48 = vpop.f32.mrb[79].mxu1 }
 0x4b6   : > { %v7695_v51 = vmul.f32 %v8928_v30, %v7530_v24  ;;  %v8929_v52 = vadd.f32 %v6978_v45, %v5822_v42  ;;  %v6980_v53 = vpop.f32.mrb[79].mxu0  ;;  %v7565_v42 = vpop.permute.xlu1 %7564 }
 0x4b8   : > { %v7887_v38 = vadd.f32 %v8809_v41, %v7695_v51  ;;  %v7696_v54 = vmul.f32 %v8929_v52, %v7535_v1  ;;  %v8822_v41 = vunpack.c.h.bf16 %v8880_v11  ;;  %v8881_v51 = vld [vmem:[%s11410_s7 + $0xb8] sm:$0xff]   ;;  %v7570_v52 = vpop.permute.xlu0 %7569 }
 0x4b9   : > { %v8825_v43 = vunpack.c.l.bf16 %v8881_v51 }
 0x4ba   : > { %7951 = vst [vmem:[%s11422_s10 + $0x130] sm:$0xff] %v7887_v38  ;;  %v7888_v63 = vadd.f32 %v8810_v46, %v7696_v54  ;;  %v5827_v0 = vpop.f32.mrb[80].mxu1 }
 0x4bb   : > { %v6983_v59 = vpop.f32.mrb[80].mxu0  ;;  %v5829_v2 = vpop.f32.mrb[81].mxu1 }
 0x4bc   : > { %7952 = vst [vmem:[%s11422_s10 + $0x138] sm:$0xff] %v7888_v63  ;;  %v8930_v47 = vadd.f32 %v6983_v59, %v5827_v0  ;;  %v6985_v60 = vpop.f32.mrb[81].mxu0  ;;  %v5830_v6 = vpop.f32.mrb[82].mxu1 }
 0x4bd   : > { %v6986_v21 = vpop.f32.mrb[82].mxu0  ;;  %v5832_v25 = vpop.f32.mrb[83].mxu1 }
 0x4be   : > { %v7697_v4 = vmul.f32 %v8930_v47, %v7540_v44  ;;  %v8931_v26 = vadd.f32 %v6986_v21, %v5830_v6  ;;  %v6988_v29 = vpop.f32.mrb[83].mxu0  ;;  %v7575_v6 = vpop.permute.xlu1 %7574 }
 0x4c0   : > { %v7889_v14 = vadd.f32 %v8813_v3, %v7697_v4  ;;  %v7698_v32 = vmul.f32 %v8931_v26, %v7545_v23  ;;  %v8826_v3 = vunpack.c.h.bf16 %v8881_v51  ;;  %v8882_v4 = vld [vmem:[%s11410_s7 + $0xc0] sm:$0xff]   ;;  %v7580_v26 = vpop.permute.xlu0 %7579 }
 0x4c1   : > { %v8829_v33 = vunpack.c.l.bf16 %v8882_v4 }
 0x4c2   : > { %7953 = vst [vmem:[%s11422_s10 + $0x140] sm:$0xff] %v7889_v14  ;;  %v7890_v35 = vadd.f32 %v8814_v49, %v7698_v32  ;;  %v5835_v37 = vpop.f32.mrb[84].mxu1 }
 0x4c3   : > { %v6991_v58 = vpop.f32.mrb[84].mxu0  ;;  %v5837_v50 = vpop.f32.mrb[85].mxu1 }
 0x4c4   : > { %7954 = vst [vmem:[%s11422_s10 + $0x148] sm:$0xff] %v7890_v35  ;;  %v8932_v55 = vadd.f32 %v6991_v58, %v5835_v37  ;;  %v6993_v57 = vpop.f32.mrb[85].mxu0  ;;  %v5838_v5 = vpop.f32.mrb[86].mxu1 }
 0x4c5   : > { %v6994_v20 = vpop.f32.mrb[86].mxu0  ;;  %v5840_v19 = vpop.f32.mrb[87].mxu1 }
 0x4c6   : > { %v7699_v61 = vmul.f32 %v8932_v55, %v7550_v62  ;;  %v8933_v8 = vadd.f32 %v6994_v20, %v5838_v5  ;;  %v6996_v16 = vpop.f32.mrb[87].mxu0  ;;  %v7585_v5 = vpop.permute.xlu1 %7584 }
 0x4c8   : > { %v7891_v9 = vadd.f32 %v8817_v56, %v7699_v61  ;;  %v7700_v10 = vmul.f32 %v8933_v8, %v7555_v36  ;;  %v8830_v56 = vunpack.c.h.bf16 %v8882_v4  ;;  %v8883_v61 = vld [vmem:[%s11410_s7 + $0xc8] sm:$0xff]   ;;  %v7590_v8 = vpop.permute.xlu0 %7589 }
 0x4c9   : > { %v8833_v11 = vunpack.c.l.bf16 %v8883_v61 }
 0x4ca   : > { %7955 = vst [vmem:[%s11422_s10 + $0x150] sm:$0xff] %v7891_v9  ;;  %v7892_v15 = vadd.f32 %v8818_v7, %v7700_v10  ;;  %v5843_v17 = vpop.f32.mrb[88].mxu1 }
 0x4cb   : > { %v6999_v18 = vpop.f32.mrb[88].mxu0  ;;  %v5845_v31 = vpop.f32.mrb[89].mxu1 }
 0x4cc   : > { %7956 = vst [vmem:[%s11422_s10 + $0x158] sm:$0xff] %v7892_v15  ;;  %v8934_v22 = vadd.f32 %v6999_v18, %v5843_v17  ;;  %v7001_v24 = vpop.f32.mrb[89].mxu0  ;;  %v5846_v34 = vpop.f32.mrb[90].mxu1 }
 0x4cd   : > { %v7002_v27 = vpop.f32.mrb[90].mxu0  ;;  %v5848_v39 = vpop.f32.mrb[91].mxu1 }
 0x4ce   : > { %v7701_v40 = vmul.f32 %v8934_v22, %v7560_v12  ;;  %v8935_v30 = vadd.f32 %v7002_v27, %v5846_v34  ;;  %v7004_v28 = vpop.f32.mrb[91].mxu0  ;;  %v7595_v34 = vpop.permute.xlu1 %7594 }
 0x4d0   : > { %v7893_v45 = vadd.f32 %v8821_v13, %v7701_v40  ;;  %v7702_v48 = vmul.f32 %v8935_v30, %v7565_v42  ;;  %v8834_v13 = vunpack.c.h.bf16 %v8883_v61  ;;  %v8884_v40 = vld [vmem:[%s11410_s7 + $0xd0] sm:$0xff]   ;;  %v7600_v30 = vpop.permute.xlu0 %7599 }
 0x4d1   : > { %v8837_v51 = vunpack.c.l.bf16 %v8884_v40 }
 0x4d2   : > { %7957 = vst [vmem:[%s11422_s10 + $0x160] sm:$0xff] %v7893_v45  ;;  %v7894_v46 = vadd.f32 %v8822_v41, %v7702_v48  ;;  %v5851_v53 = vpop.f32.mrb[92].mxu1 }
 0x4d3   : > { %v7007_v1 = vpop.f32.mrb[92].mxu0  ;;  %v5853_v38 = vpop.f32.mrb[93].mxu1 }
 0x4d4   : > { %7958 = vst [vmem:[%s11422_s10 + $0x168] sm:$0xff] %v7894_v46  ;;  %v8936_v54 = vadd.f32 %v7007_v1, %v5851_v53  ;;  %v7009_v44 = vpop.f32.mrb[93].mxu0  ;;  %v5854_v63 = vpop.f32.mrb[94].mxu1 }
 0x4d5   : > { %v7010_v0 = vpop.f32.mrb[94].mxu0  ;;  %v5856_v59 = vpop.f32.mrb[95].mxu1 }
 0x4d6   : > { %v7703_v2 = vmul.f32 %v8936_v54, %v7570_v52  ;;  %v8937_v47 = vadd.f32 %v7010_v0, %v5854_v63  ;;  %v7012_v60 = vpop.f32.mrb[95].mxu0  ;;  %v7605_v63 = vpop.permute.xlu1 %7604 }
 0x4d8   : > { %v7895_v21 = vadd.f32 %v8825_v43, %v7703_v2  ;;  %v7704_v25 = vmul.f32 %v8937_v47, %v7575_v6  ;;  %v8838_v43 = vunpack.c.h.bf16 %v8884_v40  ;;  %v8885_v2 = vld [vmem:[%s11410_s7 + $0xd8] sm:$0xff]   ;;  %v7610_v47 = vpop.permute.xlu0 %7609 }
 0x4d9   : > { %v8841_v4 = vunpack.c.l.bf16 %v8885_v2 }
 0x4da   : > { %7959 = vst [vmem:[%s11422_s10 + $0x170] sm:$0xff] %v7895_v21  ;;  %v7896_v49 = vadd.f32 %v8826_v3, %v7704_v25  ;;  %v5859_v29 = vpop.f32.mrb[96].mxu1 }
 0x4db   : > { %v7015_v23 = vpop.f32.mrb[96].mxu0  ;;  %v5861_v14 = vpop.f32.mrb[97].mxu1 }
 0x4dc   : > { %7960 = vst [vmem:[%s11422_s10 + $0x178] sm:$0xff] %v7896_v49  ;;  %v8938_v32 = vadd.f32 %v7015_v23, %v5859_v29  ;;  %v7017_v62 = vpop.f32.mrb[97].mxu0  ;;  %v5862_v35 = vpop.f32.mrb[98].mxu1 }
 0x4dd   : > { %v7018_v37 = vpop.f32.mrb[98].mxu0  ;;  %v5864_v58 = vpop.f32.mrb[99].mxu1 }
 0x4de   : > { %v7705_v50 = vmul.f32 %v8938_v32, %v7580_v26  ;;  %v8939_v55 = vadd.f32 %v7018_v37, %v5862_v35  ;;  %v7020_v57 = vpop.f32.mrb[99].mxu0  ;;  %v7615_v35 = vpop.permute.xlu1 %7614 }
 0x4e0   : > { %v7897_v20 = vadd.f32 %v8829_v33, %v7705_v50  ;;  %v7706_v19 = vmul.f32 %v8939_v55, %v7585_v5  ;;  %v8842_v33 = vunpack.c.h.bf16 %v8885_v2  ;;  %v8886_v50 = vld [vmem:[%s11410_s7 + $0xe0] sm:$0xff]   ;;  %v7620_v55 = vpop.permute.xlu0 %7619 }
 0x4e1   : > { %v8845_v61 = vunpack.c.l.bf16 %v8886_v50 }
 0x4e2   : > { %7961 = vst [vmem:[%s11422_s10 + $0x180] sm:$0xff] %v7897_v20  ;;  %v7898_v7 = vadd.f32 %v8830_v56, %v7706_v19  ;;  %v5867_v16 = vpop.f32.mrb[100].mxu1 }
 0x4e3   : > { %v7023_v36 = vpop.f32.mrb[100].mxu0  ;;  %v5869_v9 = vpop.f32.mrb[101].mxu1 }
 0x4e4   : > { %7962 = vst [vmem:[%s11422_s10 + $0x188] sm:$0xff] %v7898_v7  ;;  %v8940_v10 = vadd.f32 %v7023_v36, %v5867_v16  ;;  %v7025_v12 = vpop.f32.mrb[101].mxu0  ;;  %v5870_v15 = vpop.f32.mrb[102].mxu1 }
 0x4e5   : > { %v7026_v17 = vpop.f32.mrb[102].mxu0  ;;  %v5872_v18 = vpop.f32.mrb[103].mxu1 }
 0x4e6   : > { %v7707_v31 = vmul.f32 %v8940_v10, %v7590_v8  ;;  %v8941_v22 = vadd.f32 %v7026_v17, %v5870_v15  ;;  %v7028_v24 = vpop.f32.mrb[103].mxu0  ;;  %v7625_v15 = vpop.permute.xlu1 %7624 }
 0x4e8   : > { %v7899_v27 = vadd.f32 %v8833_v11, %v7707_v31  ;;  %v7708_v39 = vmul.f32 %v8941_v22, %v7595_v34  ;;  %v8846_v11 = vunpack.c.h.bf16 %v8886_v50  ;;  %v8887_v31 = vld [vmem:[%s11410_s7 + $0xe8] sm:$0xff]   ;;  %v7630_v22 = vpop.permute.xlu0 %7629 }
 0x4e9   : > { %v8849_v40 = vunpack.c.l.bf16 %v8887_v31 }
 0x4ea   : > { %7963 = vst [vmem:[%s11422_s10 + $0x190] sm:$0xff] %v7899_v27  ;;  %v7900_v41 = vadd.f32 %v8834_v13, %v7708_v39  ;;  %v5875_v28 = vpop.f32.mrb[104].mxu1 }
 0x4eb   : > { %v7031_v42 = vpop.f32.mrb[104].mxu0  ;;  %v5877_v45 = vpop.f32.mrb[105].mxu1 }
 0x4ec   : > { %7964 = vst [vmem:[%s11422_s10 + $0x198] sm:$0xff] %v7900_v41  ;;  %v8942_v48 = vadd.f32 %v7031_v42, %v5875_v28  ;;  %v7033_v52 = vpop.f32.mrb[105].mxu0  ;;  %v5878_v46 = vpop.f32.mrb[106].mxu1 }
 0x4ed   : > { %v7034_v53 = vpop.f32.mrb[106].mxu0  ;;  %v5880_v1 = vpop.f32.mrb[107].mxu1 }
 0x4ee   : > { %v7709_v38 = vmul.f32 %v8942_v48, %v7600_v30  ;;  %v8943_v54 = vadd.f32 %v7034_v53, %v5878_v46  ;;  %v7036_v44 = vpop.f32.mrb[107].mxu0  ;;  %v7635_v46 = vpop.permute.xlu1 %7634 }
 0x4f0   : > { %v7901_v0 = vadd.f32 %v8837_v51, %v7709_v38  ;;  %v7710_v59 = vmul.f32 %v8943_v54, %v7605_v63  ;;  %v8850_v51 = vunpack.c.h.bf16 %v8887_v31  ;;  %v8888_v38 = vld [vmem:[%s11410_s7 + $0xf0] sm:$0xff]   ;;  %v7640_v54 = vpop.permute.xlu0 %7639 }
 0x4f1   : > { %v8853_v2 = vunpack.c.l.bf16 %v8888_v38 }
 0x4f2   : > { %7965 = vst [vmem:[%s11422_s10 + $0x1a0] sm:$0xff] %v7901_v0  ;;  %v7902_v3 = vadd.f32 %v8838_v43, %v7710_v59  ;;  %v5883_v60 = vpop.f32.mrb[108].mxu1 }
 0x4f3   : > { %v7039_v6 = vpop.f32.mrb[108].mxu0  ;;  %v5885_v21 = vpop.f32.mrb[109].mxu1 }
 0x4f4   : > { %7966 = vst [vmem:[%s11422_s10 + $0x1a8] sm:$0xff] %v7902_v3  ;;  %v8944_v25 = vadd.f32 %v7039_v6, %v5883_v60  ;;  %v7041_v26 = vpop.f32.mrb[109].mxu0  ;;  %v5886_v49 = vpop.f32.mrb[110].mxu1 }
 0x4f5   : > { %v7042_v29 = vpop.f32.mrb[110].mxu0  ;;  %v5888_v23 = vpop.f32.mrb[111].mxu1 }
 0x4f6   : > { %v7711_v14 = vmul.f32 %v8944_v25, %v7610_v47  ;;  %v8945_v32 = vadd.f32 %v7042_v29, %v5886_v49  ;;  %v7044_v62 = vpop.f32.mrb[111].mxu0  ;;  %v7645_v49 = vpop.permute.xlu1 %7644 }
 0x4f8   : > { %v7903_v37 = vadd.f32 %v8841_v4, %v7711_v14  ;;  %v7712_v58 = vmul.f32 %v8945_v32, %v7615_v35  ;;  %v8854_v4 = vunpack.c.h.bf16 %v8888_v38  ;;  %v8889_v14 = vld [vmem:[%s11410_s7 + $0xf8] sm:$0xff]   ;;  %v7650_v32 = vpop.permute.xlu0 %7649 }
 0x4f9   : > { %v8857_v50 = vunpack.c.l.bf16 %v8889_v14 }
 0x4fa   : > { %7967 = vst [vmem:[%s11422_s10 + $0x1b0] sm:$0xff] %v7903_v37  ;;  %v7904_v56 = vadd.f32 %v8842_v33, %v7712_v58  ;;  %v5891_v57 = vpop.f32.mrb[112].mxu1 }
 0x4fb   : > { %v7047_v5 = vpop.f32.mrb[112].mxu0  ;;  %v5893_v20 = vpop.f32.mrb[113].mxu1 }
 0x4fc   : > { %7968 = vst [vmem:[%s11422_s10 + $0x1b8] sm:$0xff] %v7904_v56  ;;  %v8946_v19 = vadd.f32 %v7047_v5, %v5891_v57  ;;  %v7049_v8 = vpop.f32.mrb[113].mxu0  ;;  %v5894_v7 = vpop.f32.mrb[114].mxu1 }
 0x4fd   : > { %v7050_v16 = vpop.f32.mrb[114].mxu0  ;;  %v5896_v36 = vpop.f32.mrb[115].mxu1 }
 0x4fe   : > { %v7713_v9 = vmul.f32 %v8946_v19, %v7620_v55  ;;  %v8947_v10 = vadd.f32 %v7050_v16, %v5894_v7  ;;  %v7052_v12 = vpop.f32.mrb[115].mxu0  ;;  %v7655_v7 = vpop.permute.xlu1 %7654 }
 0x500   : > { %v7905_v17 = vadd.f32 %v8845_v61, %v7713_v9  ;;  %v7714_v18 = vmul.f32 %v8947_v10, %v7625_v15  ;;  %v8858_v61 = vunpack.c.h.bf16 %v8889_v14 }
 0x502   : > { %7969 = vst [vmem:[%s11422_s10 + $0x1c0] sm:$0xff] %v7905_v17  ;;  %v7906_v13 = vadd.f32 %v8846_v11, %v7714_v18  ;;  %v5899_v24 = vpop.f32.mrb[116].mxu1 }
 0x503   : > { %v7055_v34 = vpop.f32.mrb[116].mxu0  ;;  %v5901_v27 = vpop.f32.mrb[117].mxu1 }
 0x504   : > { %7970 = vst [vmem:[%s11422_s10 + $0x1c8] sm:$0xff] %v7906_v13  ;;  %v8948_v39 = vadd.f32 %v7055_v34, %v5899_v24  ;;  %v7057_v30 = vpop.f32.mrb[117].mxu0  ;;  %v5902_v41 = vpop.f32.mrb[118].mxu1 }
 0x505   : > { %v7058_v28 = vpop.f32.mrb[118].mxu0  ;;  %v5904_v42 = vpop.f32.mrb[119].mxu1 }
 0x506   : > { %v7715_v45 = vmul.f32 %v8948_v39, %v7630_v22  ;;  %v8949_v48 = vadd.f32 %v7058_v28, %v5902_v41  ;;  %v7060_v52 = vpop.f32.mrb[119].mxu0 }
 0x508   : > { %v7907_v53 = vadd.f32 %v8849_v40, %v7715_v45  ;;  %v7716_v1 = vmul.f32 %v8949_v48, %v7635_v46 }
 0x50a   : > { %7971 = vst [vmem:[%s11422_s10 + $0x1d0] sm:$0xff] %v7907_v53  ;;  %v7908_v43 = vadd.f32 %v8850_v51, %v7716_v1  ;;  %v5907_v44 = vpop.f32.mrb[120].mxu1 }
 0x50b   : > { %v7063_v63 = vpop.f32.mrb[120].mxu0  ;;  %v5909_v0 = vpop.f32.mrb[121].mxu1 }
 0x50c   : > { %7972 = vst [vmem:[%s11422_s10 + $0x1d8] sm:$0xff] %v7908_v43  ;;  %v8950_v59 = vadd.f32 %v7063_v63, %v5907_v44  ;;  %v7065_v47 = vpop.f32.mrb[121].mxu0  ;;  %v5910_v3 = vpop.f32.mrb[122].mxu1 }
 0x50d   : > { %v7066_v60 = vpop.f32.mrb[122].mxu0  ;;  %v5912_v6 = vpop.f32.mrb[123].mxu1 }
 0x50e   : > { %v7717_v21 = vmul.f32 %v8950_v59, %v7640_v54  ;;  %v8951_v25 = vadd.f32 %v7066_v60, %v5910_v3  ;;  %v7068_v26 = vpop.f32.mrb[123].mxu0 }
 0x510   : > { %v7909_v29 = vadd.f32 %v8853_v2, %v7717_v21  ;;  %v7718_v23 = vmul.f32 %v8951_v25, %v7645_v49 }
 0x512   : > { %7973 = vst [vmem:[%s11422_s10 + $0x1e0] sm:$0xff] %v7909_v29  ;;  %v7910_v33 = vadd.f32 %v8854_v4, %v7718_v23  ;;  %v5915_v62 = vpop.f32.mrb[124].mxu1 }
 0x513   : > { %v7071_v35 = vpop.f32.mrb[124].mxu0  ;;  %v5917_v37 = vpop.f32.mrb[125].mxu1 }
 0x514   : > { %7974 = vst [vmem:[%s11422_s10 + $0x1e8] sm:$0xff] %v7910_v33  ;;  %v8952_v58 = vadd.f32 %v7071_v35, %v5915_v62  ;;  %v7073_v55 = vpop.f32.mrb[125].mxu0  ;;  %v5918_v56 = vpop.f32.mrb[126].mxu1 }
 0x515   : > { %v7074_v57 = vpop.f32.mrb[126].mxu0  ;;  %v5920_v5 = vpop.f32.mrb[127].mxu1 }
 0x516   : > { %v7719_v20 = vmul.f32 %v8952_v58, %v7650_v32  ;;  %v8953_v19 = vadd.f32 %v7074_v57, %v5918_v56  ;;  %v7076_v8 = vpop.f32.mrb[127].mxu0 }
 0x518   : > { %v7911_v16 = vadd.f32 %v8857_v50, %v7719_v20  ;;  %v7720_v36 = vmul.f32 %v8953_v19, %v7655_v7 }
 0x51a   : > { %7975 = vst [vmem:[%s11422_s10 + $0x1f0] sm:$0xff] %v7911_v16  ;;  %v7912_v9 = vadd.f32 %v8858_v61, %v7720_v36 }
 0x51c   : > { %7976 = vst [vmem:[%s11422_s10 + $0x1f8] sm:$0xff] %v7912_v9 }
 0x51d PF: > { %s14_s17 = sadd.s32 1, %s10117_s17   ;;  %s11545_s15 = smov %s10113_s16 }
 0x51e   : > { %p11_p5 = scmp.ge.s32.totalorder %s14_s17, 6   ;;  %s11546_s16 = smov %s11548_s18 }
 0x520   :  { %13 = sbr.rel (!%p11_p5) target bundleno = 2 (0x2), region = 81 }

</bundles_post_ra>
